<compile_context>
chip_gen: v5e
topology: v5e:2x2
jax: 0.10.0
libtpu: 0.0.40
codegen_flags: <defaults>
</compile_context>

<pallas_src>
import functools
import math

import jax
import jax.numpy as jnp
from jax.experimental import pallas as pl
from jax.experimental.pallas import tpu as pltpu


# ----------------------------------------------------------------------------
# Math helpers shared by the kernels and the pure-JAX reference.
# ----------------------------------------------------------------------------
def _erf_approx(x, recip):
    """f32 rational erf approximation (same coefficients XLA uses)."""
    alpha = (-2.72614225801306e-10, 2.77068142495902e-08, -2.10102402082508e-06,
             -5.69250639462346e-05, -7.34990630326855e-04, -2.954600054904e-03,
             -1.60960333262415e-02)
    beta = (-1.45660718464996e-05, -2.13374055278905e-04, -1.68282697438203e-03,
            -7.37332916720468e-03, -1.42647390514189e-02)
    x = jnp.clip(x, -4.0, 4.0)
    x2 = x * x
    p = jnp.full_like(x, alpha[0])
    for a in alpha[1:]:
        p = p * x2 + a
    q = jnp.full_like(x, beta[0])
    for b in beta[1:]:
        q = q * x2 + b
    return x * p * recip(q)


def _gelu(x, recip):
    # nn.GELU() default (approximate='none'): 0.5*x*(1+erf(x/sqrt(2)))
    return 0.5 * x * (1.0 + _erf_approx(x * (1.0 / math.sqrt(2.0)), recip))


def _layernorm(x, g, b, eps=1e-5):
    mu = jnp.mean(x, axis=-1, keepdims=True)
    var = jnp.mean((x - mu) ** 2, axis=-1, keepdims=True)
    return (x - mu) * jax.lax.rsqrt(var + eps) * g + b


def _kernel_recip(x):
    # EUP-slot approximate reciprocal: essentially free next to MXU/VPU work.
    return pl.reciprocal(x, approx=True)


# ----------------------------------------------------------------------------
# In-kernel multi-head attention over a block of independent sequences.
# ----------------------------------------------------------------------------
def _mha_block(xq, xk, xv, wq, bq_, wk, bk_, wv, bv_, wo_h, bo_, *, n_heads, nb, lq, s):
    """Multi-head attention on `nb` independent sequences packed into 2-D slabs.

    xq: (nb*lq, dm) f32 rows ordered (seq, pos); xk/xv: (nb*s, dm) f32.
    Weights are bf16, biases f32; 1/sqrt(E) is pre-folded into wq/bq_.
    wo_h is the output projection reshaped to (H, E, dm) so it can be indexed per
    head (no lane concat).  Returns (nb*lq, dm) f32.
    """
    dm = xq.shape[-1]
    H = n_heads
    E = dm // H

    Q = jnp.dot(xq.astype(jnp.bfloat16), wq, preferred_element_type=jnp.float32) + bq_
    K = jnp.dot(xk.astype(jnp.bfloat16), wk, preferred_element_type=jnp.float32) + bk_
    V = jnp.dot(xv.astype(jnp.bfloat16), wv, preferred_element_type=jnp.float32) + bv_

    def heads(M, rows):
        # (nb*rows, dm) -> head-major batched layout (H*nb, rows, E).
        stk = jnp.stack([M[:, h * E:(h + 1) * E] for h in range(H)], axis=0)
        return stk.reshape(H * nb, rows, E).astype(jnp.bfloat16)

    Qs = heads(Q, lq)        # (H*nb, lq, E)
    Ks = heads(K, s)         # (H*nb, s,  E)
    Vs = heads(V, s)         # (H*nb, s,  E)

    # Single batched dot_general for all heads & sequences (scale already in wq).
    sc = jax.lax.dot_general(Qs, Ks, (((2,), (2,)), ((0,), (0,))),
                             preferred_element_type=jnp.float32)          # (H*nb, lq, s)
    sc = sc - jnp.max(sc, axis=-1, keepdims=True)
    pr = jnp.exp(sc)
    pr = pr * _kernel_recip(jnp.sum(pr, axis=-1, keepdims=True))
    O = jax.lax.dot_general(pr.astype(jnp.bfloat16), Vs, (((2,), (1,)), ((0,), (0,))),
                            preferred_element_type=jnp.float32)           # (H*nb, lq, E)
    O = O.reshape(H, nb * lq, E).astype(jnp.bfloat16)

    out = bo_                                            # (1, dm), broadcasts over rows
    for h in range(H):   # output projection accumulated per head: sum_h O_h @ Wo_h
        out = out + jnp.dot(O[h], wo_h[h], preferred_element_type=jnp.float32)
    return out


# ----------------------------------------------------------------------------
# Stage 1: time attention + norm1 + MLP1 + norm2 (fused).
# ----------------------------------------------------------------------------
def _stage1_kernel(x_ref,
                   wq_ref, bq_ref, wk_ref, bk_ref, wv_ref, bv_ref, wo_ref, bo_ref,
                   g1_ref, c1_ref, w1_ref, d1_ref, w2_ref, d2_ref, g2_ref, c2_ref,
                   out_ref, *, n_heads):
    tb, L, dm = x_ref.shape
    x = x_ref[...].astype(jnp.float32).reshape(tb * L, dm)
    attn = _mha_block(x, x, x,
                      wq_ref[...], bq_ref[...], wk_ref[...], bk_ref[...],
                      wv_ref[...], bv_ref[...], wo_ref[...], bo_ref[...],
                      n_heads=n_heads, nb=tb, lq=L, s=L)
    y = _layernorm(x + attn, g1_ref[...], c1_ref[...])
    h = jnp.dot(y.astype(jnp.bfloat16), w1_ref[...],
                preferred_element_type=jnp.float32) + d1_ref[...]
    h = _gelu(h, _kernel_recip)
    m = jnp.dot(h.astype(jnp.bfloat16), w2_ref[...],
                preferred_element_type=jnp.float32) + d2_ref[...]
    z = _layernorm(y + m, g2_ref[...], c2_ref[...])
    out_ref[...] = z.reshape(tb, L, dm).astype(out_ref.dtype)


# ----------------------------------------------------------------------------
# Stage 2: sender attention (router queries) + receiver attention + norm3 +
#          MLP2 + norm4 (fully fused; one batch of seg_num rows per grid step).
# ----------------------------------------------------------------------------
def _stage2_kernel(send_ref, router_ref,
                   swq, sbq, swk, sbk, swv, sbv, swo, sbo,
                   rwq, rbq, rwk, rbk, rwv, rbv, rwo, rbo,
                   g3_ref, c3_ref, w1_ref, d1_ref, w2_ref, d2_ref, g4_ref, c4_ref,
                   out_ref, *, n_heads):
    L, D, dm = send_ref.shape
    F = router_ref.shape[1]
    send = send_ref[...].astype(jnp.float32).reshape(L * D, dm)      # rows ordered (l, d)
    router = router_ref[...].astype(jnp.float32).reshape(L * F, dm)  # rows ordered (l, f)

    # sender: queries = router[l], keys/values = dim_send rows of segment l
    buf = _mha_block(router, send, send,
                     swq[...], sbq[...], swk[...], sbk[...], swv[...], sbv[...],
                     swo[...], sbo[...], n_heads=n_heads, nb=L, lq=F, s=D)   # (L*F, dm)
    # receiver: queries = dim_send, keys/values = buffer
    recv = _mha_block(send, buf, buf,
                      rwq[...], rbq[...], rwk[...], rbk[...], rwv[...], rbv[...],
                      rwo[...], rbo[...], n_heads=n_heads, nb=L, lq=D, s=F)  # (L*D, dm)

    y = _layernorm(send + recv, g3_ref[...], c3_ref[...])
    h = jnp.dot(y.astype(jnp.bfloat16), w1_ref[...],
                preferred_element_type=jnp.float32) + d1_ref[...]
    h = _gelu(h, _kernel_recip)
    m = jnp.dot(h.astype(jnp.bfloat16), w2_ref[...],
                preferred_element_type=jnp.float32) + d2_ref[...]
    z = _layernorm(y + m, g4_ref[...], c4_ref[...])
    out_ref[...] = z.reshape(L, D, dm).astype(out_ref.dtype)


# ----------------------------------------------------------------------------
# pallas_call wrappers.
# ----------------------------------------------------------------------------
_VMEM_LIMIT = 32 * 1024 * 1024  # <= scoped default on v6e/v7x, raises v5e's default


def _invariant_spec(arr):
    shape = arr.shape
    return pl.BlockSpec(shape, lambda i, _nd=len(shape): (0,) * _nd)


def _pick_row_block(n_rows, bytes_per_row, budget_bytes=6 * 1024 * 1024):
    """Largest divisor of n_rows within the VMEM budget, keeping >=2 grid steps
    (so v7x's two TensorCores both get work) whenever n_rows allows it."""
    best = 1
    for cand in range(1, n_rows + 1):
        if n_rows % cand:
            continue
        if cand * bytes_per_row > budget_bytes:
            continue
        if n_rows >= 2 and n_rows // cand < 2:
            continue
        best = cand
    return best


def _stage1_call(time_in, pp, n_heads):
    bq, L, dm = time_in.shape
    a, m = pp["time_attn"], pp["mlp1"]
    n1, n2 = pp["norm1"], pp["norm2"]
    dff = m["w1"].shape[1]
    bytes_per_row = 4 * (L * dm * 12 + L * dff * 4 + n_heads * L * L * 3) + 4096
    tb = _pick_row_block(bq, bytes_per_row)
    weights = [a["wq"], a["bq"], a["wk"], a["bk"], a["wv"], a["bv"], a["wo"], a["bo"],
               n1["g"], n1["b"], m["w1"], m["b1"], m["w2"], m["b2"], n2["g"], n2["b"]]
    return pl.pallas_call(
        functools.partial(_stage1_kernel, n_heads=n_heads),
        out_shape=jax.ShapeDtypeStruct((bq, L, dm), time_in.dtype),
        grid=(bq // tb,),
        in_specs=[pl.BlockSpec((tb, L, dm), lambda i: (i, 0, 0))]
                 + [_invariant_spec(w) for w in weights],
        out_specs=pl.BlockSpec((tb, L, dm), lambda i: (i, 0, 0)),
        compiler_params=pltpu.CompilerParams(
            dimension_semantics=("parallel",),
            vmem_limit_bytes=_VMEM_LIMIT),
    )(time_in, *weights)


def _stage2_call(dim_send, pp, n_heads, batch):
    rows, D, dm = dim_send.shape
    L = rows // batch
    s, r, m = pp["sender"], pp["receiver"], pp["mlp2"]
    n3, n4 = pp["norm3"], pp["norm4"]
    router = pp["router"]  # (seg_num, factor, dm) — grid-invariant, never tiled in HBM
    weights = [s["wq"], s["bq"], s["wk"], s["bk"], s["wv"], s["bv"], s["wo"], s["bo"],
               r["wq"], r["bq"], r["wk"], r["bk"], r["wv"], r["bv"], r["wo"], r["bo"],
               n3["g"], n3["b"], m["w1"], m["b1"], m["w2"], m["b2"], n4["g"], n4["b"]]
    return pl.pallas_call(
        functools.partial(_stage2_kernel, n_heads=n_heads),
        out_shape=jax.ShapeDtypeStruct((rows, D, dm), dim_send.dtype),
        grid=(batch,),
        in_specs=[pl.BlockSpec((L, D, dm), lambda i: (i, 0, 0)),
                  _invariant_spec(router)]
                 + [_invariant_spec(w) for w in weights],
        out_specs=pl.BlockSpec((L, D, dm), lambda i: (i, 0, 0)),
        compiler_params=pltpu.CompilerParams(
            dimension_semantics=("parallel",),
            vmem_limit_bytes=_VMEM_LIMIT),
    )(dim_send, router, *weights)


# ----------------------------------------------------------------------------
# Host-side parameter preparation: bf16 weights, scale folded into Wq/bq,
# Wo reshaped per head to (H, E, dm).
# ----------------------------------------------------------------------------
def _prepare(params, n_heads):
    bf = lambda a: a.astype(jnp.bfloat16)

    def attn(p):
        dm = p["wq"].shape[0]
        E = dm // n_heads
        sc = 1.0 / math.sqrt(E)
        return dict(wq=bf(p["wq"] * sc), bq=p["bq"] * sc,
                    wk=bf(p["wk"]), bk=p["bk"],
                    wv=bf(p["wv"]), bv=p["bv"],
                    wo=bf(p["wo"]).reshape(n_heads, E, dm), bo=p["bo"])

    def mlp(p):
        return dict(w1=bf(p["w1"]), b1=p["b1"], w2=bf(p["w2"]), b2=p["b2"])

    return dict(
        time_attn=attn(params["time_attn"]), sender=attn(params["sender"]),
        receiver=attn(params["receiver"]), router=params["router"],
        norm1=params["norm1"], norm2=params["norm2"],
        norm3=params["norm3"], norm4=params["norm4"],
        mlp1=mlp(params["mlp1"]), mlp2=mlp(params["mlp2"]),
    )


# ----------------------------------------------------------------------------
# TwoStageAttentionLayer forward (glue in plain JAX, hot paths in 2 Pallas kernels).
# ----------------------------------------------------------------------------
def two_stage_attention(x, params, n_heads):
    b, d, l, dm = x.shape
    pp = _prepare(params, n_heads)

    # ---- stage 1: attention across segments (time) + norm1/MLP1/norm2 ----
    time_in = x.reshape(b * d, l, dm)
    dim_in = _stage1_call(time_in, pp, n_heads)                          # (b*d, l, dm)

    # ---- stage 2: router attention across data dims + norm3/MLP2/norm4 ----
    dim_send = dim_in.reshape(b, d, l, dm).transpose(0, 2, 1, 3).reshape(b * l, d, dm)
    dim_enc = _stage2_call(dim_send, pp, n_heads, b)                     # (b*l, d, dm)

    return dim_enc.reshape(b, l, d, dm).transpose(0, 2, 1, 3)


# ----------------------------------------------------------------------------
# Deterministic parameter init (synthetic; matches PyTorch module shapes, f32).
# ----------------------------------------------------------------------------
def init_params(key, seg_num, factor, d_model, d_ff):
    keys = iter(jax.random.split(key, 64))

    def lin(kin, kout, wscale=0.05, bscale=0.02):
        w = jax.random.normal(next(keys), (kin, kout), jnp.float32) * wscale
        b = jax.random.normal(next(keys), (1, kout), jnp.float32) * bscale
        return w, b

    def attn_params():
        wq, bq = lin(d_model, d_model)
        wk, bk = lin(d_model, d_model)
        wv, bv = lin(d_model, d_model)
        wo, bo = lin(d_model, d_model)
        return dict(wq=wq, bq=bq, wk=wk, bk=bk, wv=wv, bv=bv, wo=wo, bo=bo)

    def norm_params():
        return dict(g=jnp.ones((1, d_model), jnp.float32),
                    b=jnp.zeros((1, d_model), jnp.float32))

    def mlp_params():
        w1, b1 = lin(d_model, d_ff)
        w2, b2 = lin(d_ff, d_model)
        return dict(w1=w1, b1=b1, w2=w2, b2=b2)

    router = jax.random.normal(next(keys), (seg_num, factor, d_model), jnp.float32)
    return dict(
        time_attn=attn_params(), sender=attn_params(), receiver=attn_params(),
        router=router,
        norm1=norm_params(), norm2=norm_params(),
        norm3=norm_params(), norm4=norm_params(),
        mlp1=mlp_params(), mlp2=mlp_params(),
    )


# ----------------------------------------------------------------------------
# Pure-JAX reference mirroring the kernel math (bf16 MXU operands, f32 stats).
# ----------------------------------------------------------------------------
def _ref_attention(q, k, v, ap, n_heads):
    N, Lq, dm = q.shape
    S = k.shape[1]
    H = n_heads
    E = dm // H

    def proj(x, w, b):
        y = jnp.dot(x.reshape(-1, dm).astype(jnp.bfloat16), w,
                    preferred_element_type=jnp.float32) + b
        return y.astype(jnp.bfloat16).astype(jnp.float32)

    Q = proj(q, ap["wq"], ap["bq"]).reshape(N, Lq, H, E)
    K = proj(k, ap["wk"], ap["bk"]).reshape(N, S, H, E)
    V = proj(v, ap["wv"], ap["bv"]).reshape(N, S, H, E)
    sc = jnp.einsum('blhe,bshe->bhls', Q, K)          # scale already folded into wq/bq
    A = jax.nn.softmax(sc, axis=-1)
    A = A.astype(jnp.bfloat16).astype(jnp.float32)
    O = jnp.einsum('bhls,bshe->blhe', A, V).reshape(N * Lq, dm)
    O = O.astype(jnp.bfloat16).astype(jnp.float32)
    wo = ap["wo"].reshape(dm, dm).astype(jnp.float32)
    out = jnp.dot(O, wo, preferred_element_type=jnp.float32) + ap["bo"]
    return out.reshape(N, Lq, dm)


def _ref_ffn(x, enc, na, mlp, nb_):
    y = _layernorm(x + enc, na["g"], na["b"])
    h = jnp.dot(y.astype(jnp.bfloat16), mlp["w1"],
                preferred_element_type=jnp.float32) + mlp["b1"]
    h = _gelu(h, lambda t: 1.0 / t)
    m = jnp.dot(h.astype(jnp.bfloat16), mlp["w2"],
                preferred_element_type=jnp.float32) + mlp["b2"]
    return _layernorm(y + m, nb_["g"], nb_["b"])


def _ref_two_stage(x, params, n_heads):
    b, d, l, dm = x.shape
    pp = _prepare(params, n_heads)
    time_in = x.reshape(b * d, l, dm)
    time_enc = _ref_attention(time_in, time_in, time_in, pp["time_attn"], n_heads)
    dim_in = _ref_ffn(time_in, time_enc, pp["norm1"], pp["mlp1"], pp["norm2"])
    dim_send = dim_in.reshape(b, d, l, dm).transpose(0, 2, 1, 3).reshape(b * l, d, dm)
    batch_router = jnp.tile(pp["router"], (b, 1, 1))
    dim_buffer = _ref_attention(batch_router, dim_send, dim_send, pp["sender"], n_heads)
    dim_receive = _ref_attention(dim_send, dim_buffer, dim_buffer, pp["receiver"], n_heads)
    dim_enc = _ref_ffn(dim_send, dim_receive, pp["norm3"], pp["mlp2"], pp["norm4"])
    return dim_enc.reshape(b, l, d, dm).transpose(0, 2, 1, 3)


# ----------------------------------------------------------------------------
if __name__ == "__main__":
    # x = [batch, ts_d(D), seg_num(L), d_model], same axis order as the PyTorch module.
    batch, ts_d, seg_num, d_model = 2, 4, 8, 32
    n_heads, factor, d_ff = 4, 5, 64

    key = jax.random.PRNGKey(0)
    k_x, k_p = jax.random.split(key)
    x = jax.random.normal(k_x, (batch, ts_d, seg_num, d_model), jnp.float32)
    params = init_params(k_p, seg_num, factor, d_model, d_ff)

    fwd = jax.jit(functools.partial(two_stage_attention, n_heads=n_heads))
    out = jax.block_until_ready(fwd(x, params))
    assert out.shape == (batch, ts_d, seg_num, d_model), out.shape

    ref = jax.block_until_ready(_ref_two_stage(x, params, n_heads))
    max_err = float(jnp.max(jnp.abs(out - ref)))
    assert jnp.allclose(out, ref, rtol=1e-2, atol=1e-2), max_err

    print("KERNEL_OK")
</pallas_src>

<mosaic_0001>
module attributes {stable_mosaic.version = 11 : i64} {
  func.func @_stage2_kernel(%arg0: i32, %arg1: memref<8x4x32xf32, #tpu.memory_space<vmem>>, %arg2: memref<8x5x32xf32, #tpu.memory_space<vmem>>, %arg3: memref<32x32xbf16, #tpu.memory_space<vmem>>, %arg4: memref<1x32xf32, #tpu.memory_space<vmem>>, %arg5: memref<32x32xbf16, #tpu.memory_space<vmem>>, %arg6: memref<1x32xf32, #tpu.memory_space<vmem>>, %arg7: memref<32x32xbf16, #tpu.memory_space<vmem>>, %arg8: memref<1x32xf32, #tpu.memory_space<vmem>>, %arg9: memref<4x8x32xbf16, #tpu.memory_space<vmem>>, %arg10: memref<1x32xf32, #tpu.memory_space<vmem>>, %arg11: memref<32x32xbf16, #tpu.memory_space<vmem>>, %arg12: memref<1x32xf32, #tpu.memory_space<vmem>>, %arg13: memref<32x32xbf16, #tpu.memory_space<vmem>>, %arg14: memref<1x32xf32, #tpu.memory_space<vmem>>, %arg15: memref<32x32xbf16, #tpu.memory_space<vmem>>, %arg16: memref<1x32xf32, #tpu.memory_space<vmem>>, %arg17: memref<4x8x32xbf16, #tpu.memory_space<vmem>>, %arg18: memref<1x32xf32, #tpu.memory_space<vmem>>, %arg19: memref<1x32xf32, #tpu.memory_space<vmem>>, %arg20: memref<1x32xf32, #tpu.memory_space<vmem>>, %arg21: memref<32x64xbf16, #tpu.memory_space<vmem>>, %arg22: memref<1x64xf32, #tpu.memory_space<vmem>>, %arg23: memref<64x32xbf16, #tpu.memory_space<vmem>>, %arg24: memref<1x32xf32, #tpu.memory_space<vmem>>, %arg25: memref<1x32xf32, #tpu.memory_space<vmem>>, %arg26: memref<1x32xf32, #tpu.memory_space<vmem>>, %arg27: memref<8x4x32xf32, #tpu.memory_space<vmem>>) attributes {dimension_semantics = [#tpu.dimension_semantics<parallel>], iteration_bounds = array<i64: 2>, scalar_prefetch = 0 : i64, scratch_operands = 0 : i64, tpu.core_type = #tpu.core_type<tc>, window_params = [{transform_indices = @transform_0, window_bounds = array<i64: 8, 4, 32>}, {pipeline_mode = #tpu.pipeline_mode<synchronous>, transform_indices = @transform_1, window_bounds = array<i64: 8, 5, 32>}, {pipeline_mode = #tpu.pipeline_mode<synchronous>, transform_indices = @transform_2, window_bounds = array<i64: 32, 32>}, {pipeline_mode = #tpu.pipeline_mode<synchronous>, transform_indices = @transform_3, window_bounds = array<i64: 1, 32>}, {pipeline_mode = #tpu.pipeline_mode<synchronous>, transform_indices = @transform_4, window_bounds = array<i64: 32, 32>}, {pipeline_mode = #tpu.pipeline_mode<synchronous>, transform_indices = @transform_5, window_bounds = array<i64: 1, 32>}, {pipeline_mode = #tpu.pipeline_mode<synchronous>, transform_indices = @transform_6, window_bounds = array<i64: 32, 32>}, {pipeline_mode = #tpu.pipeline_mode<synchronous>, transform_indices = @transform_7, window_bounds = array<i64: 1, 32>}, {pipeline_mode = #tpu.pipeline_mode<synchronous>, transform_indices = @transform_8, window_bounds = array<i64: 4, 8, 32>}, {pipeline_mode = #tpu.pipeline_mode<synchronous>, transform_indices = @transform_9, window_bounds = array<i64: 1, 32>}, {pipeline_mode = #tpu.pipeline_mode<synchronous>, transform_indices = @transform_10, window_bounds = array<i64: 32, 32>}, {pipeline_mode = #tpu.pipeline_mode<synchronous>, transform_indices = @transform_11, window_bounds = array<i64: 1, 32>}, {pipeline_mode = #tpu.pipeline_mode<synchronous>, transform_indices = @transform_12, window_bounds = array<i64: 32, 32>}, {pipeline_mode = #tpu.pipeline_mode<synchronous>, transform_indices = @transform_13, window_bounds = array<i64: 1, 32>}, {pipeline_mode = #tpu.pipeline_mode<synchronous>, transform_indices = @transform_14, window_bounds = array<i64: 32, 32>}, {pipeline_mode = #tpu.pipeline_mode<synchronous>, transform_indices = @transform_15, window_bounds = array<i64: 1, 32>}, {pipeline_mode = #tpu.pipeline_mode<synchronous>, transform_indices = @transform_16, window_bounds = array<i64: 4, 8, 32>}, {pipeline_mode = #tpu.pipeline_mode<synchronous>, transform_indices = @transform_17, window_bounds = array<i64: 1, 32>}, {pipeline_mode = #tpu.pipeline_mode<synchronous>, transform_indices = @transform_18, window_bounds = array<i64: 1, 32>}, {pipeline_mode = #tpu.pipeline_mode<synchronous>, transform_indices = @transform_19, window_bounds = array<i64: 1, 32>}, {pipeline_mode = #tpu.pipeline_mode<synchronous>, transform_indices = @transform_20, window_bounds = array<i64: 32, 64>}, {pipeline_mode = #tpu.pipeline_mode<synchronous>, transform_indices = @transform_21, window_bounds = array<i64: 1, 64>}, {pipeline_mode = #tpu.pipeline_mode<synchronous>, transform_indices = @transform_22, window_bounds = array<i64: 64, 32>}, {pipeline_mode = #tpu.pipeline_mode<synchronous>, transform_indices = @transform_23, window_bounds = array<i64: 1, 32>}, {pipeline_mode = #tpu.pipeline_mode<synchronous>, transform_indices = @transform_24, window_bounds = array<i64: 1, 32>}, {pipeline_mode = #tpu.pipeline_mode<synchronous>, transform_indices = @transform_25, window_bounds = array<i64: 1, 32>}, {transform_indices = @transform_26, window_bounds = array<i64: 8, 4, 32>}]} {
    %c0 = arith.constant 0 : index
    %c0_0 = arith.constant 0 : index
    %c0_1 = arith.constant 0 : index
    %0 = vector.load %arg1[%c0, %c0_0, %c0_1] : memref<8x4x32xf32, #tpu.memory_space<vmem>>, vector<8x4x32xf32>
    %1 = vector.shape_cast %0 : vector<8x4x32xf32> to vector<32x32xf32>
    %c0_2 = arith.constant 0 : index
    %c0_3 = arith.constant 0 : index
    %c0_4 = arith.constant 0 : index
    %2 = vector.load %arg2[%c0_2, %c0_3, %c0_4] : memref<8x5x32xf32, #tpu.memory_space<vmem>>, vector<8x5x32xf32>
    %3 = vector.shape_cast %2 : vector<8x5x32xf32> to vector<40x32xf32>
    %c0_5 = arith.constant 0 : index
    %c0_6 = arith.constant 0 : index
    %4 = vector.load %arg3[%c0_5, %c0_6] : memref<32x32xbf16, #tpu.memory_space<vmem>>, vector<32x32xbf16>
    %c0_7 = arith.constant 0 : index
    %c0_8 = arith.constant 0 : index
    %5 = vector.load %arg4[%c0_7, %c0_8] : memref<1x32xf32, #tpu.memory_space<vmem>>, vector<1x32xf32>
    %c0_9 = arith.constant 0 : index
    %c0_10 = arith.constant 0 : index
    %6 = vector.load %arg5[%c0_9, %c0_10] : memref<32x32xbf16, #tpu.memory_space<vmem>>, vector<32x32xbf16>
    %c0_11 = arith.constant 0 : index
    %c0_12 = arith.constant 0 : index
    %7 = vector.load %arg6[%c0_11, %c0_12] : memref<1x32xf32, #tpu.memory_space<vmem>>, vector<1x32xf32>
    %c0_13 = arith.constant 0 : index
    %c0_14 = arith.constant 0 : index
    %8 = vector.load %arg7[%c0_13, %c0_14] : memref<32x32xbf16, #tpu.memory_space<vmem>>, vector<32x32xbf16>
    %c0_15 = arith.constant 0 : index
    %c0_16 = arith.constant 0 : index
    %9 = vector.load %arg8[%c0_15, %c0_16] : memref<1x32xf32, #tpu.memory_space<vmem>>, vector<1x32xf32>
    %c0_17 = arith.constant 0 : index
    %c0_18 = arith.constant 0 : index
    %c0_19 = arith.constant 0 : index
    %10 = vector.load %arg9[%c0_17, %c0_18, %c0_19] : memref<4x8x32xbf16, #tpu.memory_space<vmem>>, vector<4x8x32xbf16>
    %c0_20 = arith.constant 0 : index
    %c0_21 = arith.constant 0 : index
    %11 = vector.load %arg10[%c0_20, %c0_21] : memref<1x32xf32, #tpu.memory_space<vmem>>, vector<1x32xf32>
    %12 = arith.truncf %3 : vector<40x32xf32> to vector<40x32xbf16>
    %cst = arith.constant dense<0.000000e+00> : vector<40x32xf32>
    %13 = tpu.matmul %12, %4, %cst {dimension_numbers = #tpu.dot_dimension_numbers<[1], [0], [0], [1], [0, 0, 1, 1], [], []>} : vector<40x32xbf16>, vector<32x32xbf16>, vector<40x32xf32> -> vector<40x32xf32>
    %14 = vector.broadcast %5 : vector<1x32xf32> to vector<40x32xf32>
    %15 = arith.addf %13, %14 : vector<40x32xf32>
    %16 = arith.truncf %1 : vector<32x32xf32> to vector<32x32xbf16>
    %cst_22 = arith.constant dense<0.000000e+00> : vector<32x32xf32>
    %17 = tpu.matmul %16, %6, %cst_22 {dimension_numbers = #tpu.dot_dimension_numbers<[1], [0], [0], [1], [0, 0, 1, 1], [], []>} : vector<32x32xbf16>, vector<32x32xbf16>, vector<32x32xf32> -> vector<32x32xf32>
    %18 = vector.broadcast %7 : vector<1x32xf32> to vector<32x32xf32>
    %19 = arith.addf %17, %18 : vector<32x32xf32>
    %20 = arith.truncf %1 : vector<32x32xf32> to vector<32x32xbf16>
    %cst_23 = arith.constant dense<0.000000e+00> : vector<32x32xf32>
    %21 = tpu.matmul %20, %8, %cst_23 {dimension_numbers = #tpu.dot_dimension_numbers<[1], [0], [0], [1], [0, 0, 1, 1], [], []>} : vector<32x32xbf16>, vector<32x32xbf16>, vector<32x32xf32> -> vector<32x32xf32>
    %22 = vector.broadcast %9 : vector<1x32xf32> to vector<32x32xf32>
    %23 = arith.addf %21, %22 : vector<32x32xf32>
    %24 = vector.extract_strided_slice %15 {offsets = [0, 0], sizes = [40, 8], strides = [1, 1]} : vector<40x32xf32> to vector<40x8xf32>
    %25 = vector.extract_strided_slice %15 {offsets = [0, 8], sizes = [40, 8], strides = [1, 1]} : vector<40x32xf32> to vector<40x8xf32>
    %26 = vector.extract_strided_slice %15 {offsets = [0, 16], sizes = [40, 8], strides = [1, 1]} : vector<40x32xf32> to vector<40x8xf32>
    %27 = vector.extract_strided_slice %15 {offsets = [0, 24], sizes = [40, 8], strides = [1, 1]} : vector<40x32xf32> to vector<40x8xf32>
    %28 = vector.shape_cast %24 : vector<40x8xf32> to vector<1x40x8xf32>
    %29 = vector.shape_cast %25 : vector<40x8xf32> to vector<1x40x8xf32>
    %30 = vector.shape_cast %26 : vector<40x8xf32> to vector<1x40x8xf32>
    %31 = vector.shape_cast %27 : vector<40x8xf32> to vector<1x40x8xf32>
    %32 = tpu.concatenate %28, %29, %30, %31 in 0 : vector<1x40x8xf32>, vector<1x40x8xf32>, vector<1x40x8xf32>, vector<1x40x8xf32> -> vector<4x40x8xf32>
    %33 = vector.shape_cast %32 : vector<4x40x8xf32> to vector<32x5x8xf32>
    %34 = arith.truncf %33 : vector<32x5x8xf32> to vector<32x5x8xbf16>
    %35 = vector.extract_strided_slice %19 {offsets = [0, 0], sizes = [32, 8], strides = [1, 1]} : vector<32x32xf32> to vector<32x8xf32>
    %36 = vector.extract_strided_slice %19 {offsets = [0, 8], sizes = [32, 8], strides = [1, 1]} : vector<32x32xf32> to vector<32x8xf32>
    %37 = vector.extract_strided_slice %19 {offsets = [0, 16], sizes = [32, 8], strides = [1, 1]} : vector<32x32xf32> to vector<32x8xf32>
    %38 = vector.extract_strided_slice %19 {offsets = [0, 24], sizes = [32, 8], strides = [1, 1]} : vector<32x32xf32> to vector<32x8xf32>
    %39 = vector.shape_cast %35 : vector<32x8xf32> to vector<1x32x8xf32>
    %40 = vector.shape_cast %36 : vector<32x8xf32> to vector<1x32x8xf32>
    %41 = vector.shape_cast %37 : vector<32x8xf32> to vector<1x32x8xf32>
    %42 = vector.shape_cast %38 : vector<32x8xf32> to vector<1x32x8xf32>
    %43 = tpu.concatenate %39, %40, %41, %42 in 0 : vector<1x32x8xf32>, vector<1x32x8xf32>, vector<1x32x8xf32>, vector<1x32x8xf32> -> vector<4x32x8xf32>
    %44 = vector.shape_cast %43 : vector<4x32x8xf32> to vector<32x4x8xf32>
    %45 = arith.truncf %44 : vector<32x4x8xf32> to vector<32x4x8xbf16>
    %46 = vector.extract_strided_slice %23 {offsets = [0, 0], sizes = [32, 8], strides = [1, 1]} : vector<32x32xf32> to vector<32x8xf32>
    %47 = vector.extract_strided_slice %23 {offsets = [0, 8], sizes = [32, 8], strides = [1, 1]} : vector<32x32xf32> to vector<32x8xf32>
    %48 = vector.extract_strided_slice %23 {offsets = [0, 16], sizes = [32, 8], strides = [1, 1]} : vector<32x32xf32> to vector<32x8xf32>
    %49 = vector.extract_strided_slice %23 {offsets = [0, 24], sizes = [32, 8], strides = [1, 1]} : vector<32x32xf32> to vector<32x8xf32>
    %50 = vector.shape_cast %46 : vector<32x8xf32> to vector<1x32x8xf32>
    %51 = vector.shape_cast %47 : vector<32x8xf32> to vector<1x32x8xf32>
    %52 = vector.shape_cast %48 : vector<32x8xf32> to vector<1x32x8xf32>
    %53 = vector.shape_cast %49 : vector<32x8xf32> to vector<1x32x8xf32>
    %54 = tpu.concatenate %50, %51, %52, %53 in 0 : vector<1x32x8xf32>, vector<1x32x8xf32>, vector<1x32x8xf32>, vector<1x32x8xf32> -> vector<4x32x8xf32>
    %55 = vector.shape_cast %54 : vector<4x32x8xf32> to vector<32x4x8xf32>
    %56 = arith.truncf %55 : vector<32x4x8xf32> to vector<32x4x8xbf16>
    %cst_24 = arith.constant dense<0.000000e+00> : vector<32x5x4xf32>
    %57 = tpu.matmul %34, %45, %cst_24 {dimension_numbers = #tpu.dot_dimension_numbers<[2], [2], [1], [1], [0, 0, 0, 1, 1, 1], [0], [0]>} : vector<32x5x8xbf16>, vector<32x4x8xbf16>, vector<32x5x4xf32> -> vector<32x5x4xf32>
    %cst_25 = arith.constant dense<0xFF800000> : vector<32x5xf32>
    %58 = vector.multi_reduction <maximumf>, %57, %cst_25 [2] : vector<32x5x4xf32> to vector<32x5xf32>
    %59 = vector.shape_cast %58 : vector<32x5xf32> to vector<32x5x1xf32>
    %60 = vector.broadcast %59 : vector<32x5x1xf32> to vector<32x5x4xf32>
    %61 = arith.subf %57, %60 : vector<32x5x4xf32>
    %62 = math.exp %61 : vector<32x5x4xf32>
    %cst_26 = arith.constant dense<0.000000e+00> : vector<32x5xf32>
    %63 = vector.multi_reduction <add>, %62, %cst_26 [2] : vector<32x5x4xf32> to vector<32x5xf32>
    %64 = vector.shape_cast %63 : vector<32x5xf32> to vector<32x5x1xf32>
    %65 = tpu.reciprocal %64 {approx = true} : vector<32x5x1xf32> -> vector<32x5x1xf32>
    %66 = vector.broadcast %65 : vector<32x5x1xf32> to vector<32x5x4xf32>
    %67 = arith.mulf %62, %66 : vector<32x5x4xf32>
    %68 = arith.truncf %67 : vector<32x5x4xf32> to vector<32x5x4xbf16>
    %cst_27 = arith.constant dense<0.000000e+00> : vector<32x5x8xf32>
    %69 = tpu.matmul %68, %56, %cst_27 {dimension_numbers = #tpu.dot_dimension_numbers<[2], [1], [1], [2], [0, 0, 0, 1, 1, 2], [0], [0]>} : vector<32x5x4xbf16>, vector<32x4x8xbf16>, vector<32x5x8xf32> -> vector<32x5x8xf32>
    %70 = vector.shape_cast %69 : vector<32x5x8xf32> to vector<4x40x8xf32>
    %71 = arith.truncf %70 : vector<4x40x8xf32> to vector<4x40x8xbf16>
    %72 = vector.extract_strided_slice %71 {offsets = [0, 0, 0], sizes = [1, 40, 8], strides = [1, 1, 1]} : vector<4x40x8xbf16> to vector<1x40x8xbf16>
    %73 = vector.shape_cast %72 : vector<1x40x8xbf16> to vector<40x8xbf16>
    %74 = vector.extract_strided_slice %10 {offsets = [0, 0, 0], sizes = [1, 8, 32], strides = [1, 1, 1]} : vector<4x8x32xbf16> to vector<1x8x32xbf16>
    %75 = vector.shape_cast %74 : vector<1x8x32xbf16> to vector<8x32xbf16>
    %cst_28 = arith.constant dense<0.000000e+00> : vector<40x32xf32>
    %76 = tpu.matmul %73, %75, %cst_28 {dimension_numbers = #tpu.dot_dimension_numbers<[1], [0], [0], [1], [0, 0, 1, 1], [], []>} : vector<40x8xbf16>, vector<8x32xbf16>, vector<40x32xf32> -> vector<40x32xf32>
    %77 = vector.broadcast %11 : vector<1x32xf32> to vector<40x32xf32>
    %78 = arith.addf %77, %76 : vector<40x32xf32>
    %79 = vector.extract_strided_slice %71 {offsets = [1, 0, 0], sizes = [1, 40, 8], strides = [1, 1, 1]} : vector<4x40x8xbf16> to vector<1x40x8xbf16>
    %80 = vector.shape_cast %79 : vector<1x40x8xbf16> to vector<40x8xbf16>
    %81 = vector.extract_strided_slice %10 {offsets = [1, 0, 0], sizes = [1, 8, 32], strides = [1, 1, 1]} : vector<4x8x32xbf16> to vector<1x8x32xbf16>
    %82 = vector.shape_cast %81 : vector<1x8x32xbf16> to vector<8x32xbf16>
    %cst_29 = arith.constant dense<0.000000e+00> : vector<40x32xf32>
    %83 = tpu.matmul %80, %82, %cst_29 {dimension_numbers = #tpu.dot_dimension_numbers<[1], [0], [0], [1], [0, 0, 1, 1], [], []>} : vector<40x8xbf16>, vector<8x32xbf16>, vector<40x32xf32> -> vector<40x32xf32>
    %84 = arith.addf %78, %83 : vector<40x32xf32>
    %85 = vector.extract_strided_slice %71 {offsets = [2, 0, 0], sizes = [1, 40, 8], strides = [1, 1, 1]} : vector<4x40x8xbf16> to vector<1x40x8xbf16>
    %86 = vector.shape_cast %85 : vector<1x40x8xbf16> to vector<40x8xbf16>
    %87 = vector.extract_strided_slice %10 {offsets = [2, 0, 0], sizes = [1, 8, 32], strides = [1, 1, 1]} : vector<4x8x32xbf16> to vector<1x8x32xbf16>
    %88 = vector.shape_cast %87 : vector<1x8x32xbf16> to vector<8x32xbf16>
    %cst_30 = arith.constant dense<0.000000e+00> : vector<40x32xf32>
    %89 = tpu.matmul %86, %88, %cst_30 {dimension_numbers = #tpu.dot_dimension_numbers<[1], [0], [0], [1], [0, 0, 1, 1], [], []>} : vector<40x8xbf16>, vector<8x32xbf16>, vector<40x32xf32> -> vector<40x32xf32>
    %90 = arith.addf %84, %89 : vector<40x32xf32>
    %91 = vector.extract_strided_slice %71 {offsets = [3, 0, 0], sizes = [1, 40, 8], strides = [1, 1, 1]} : vector<4x40x8xbf16> to vector<1x40x8xbf16>
    %92 = vector.shape_cast %91 : vector<1x40x8xbf16> to vector<40x8xbf16>
    %93 = vector.extract_strided_slice %10 {offsets = [3, 0, 0], sizes = [1, 8, 32], strides = [1, 1, 1]} : vector<4x8x32xbf16> to vector<1x8x32xbf16>
    %94 = vector.shape_cast %93 : vector<1x8x32xbf16> to vector<8x32xbf16>
    %cst_31 = arith.constant dense<0.000000e+00> : vector<40x32xf32>
    %95 = tpu.matmul %92, %94, %cst_31 {dimension_numbers = #tpu.dot_dimension_numbers<[1], [0], [0], [1], [0, 0, 1, 1], [], []>} : vector<40x8xbf16>, vector<8x32xbf16>, vector<40x32xf32> -> vector<40x32xf32>
    %96 = arith.addf %90, %95 : vector<40x32xf32>
    %c0_32 = arith.constant 0 : index
    %c0_33 = arith.constant 0 : index
    %97 = vector.load %arg11[%c0_32, %c0_33] : memref<32x32xbf16, #tpu.memory_space<vmem>>, vector<32x32xbf16>
    %c0_34 = arith.constant 0 : index
    %c0_35 = arith.constant 0 : index
    %98 = vector.load %arg12[%c0_34, %c0_35] : memref<1x32xf32, #tpu.memory_space<vmem>>, vector<1x32xf32>
    %c0_36 = arith.constant 0 : index
    %c0_37 = arith.constant 0 : index
    %99 = vector.load %arg13[%c0_36, %c0_37] : memref<32x32xbf16, #tpu.memory_space<vmem>>, vector<32x32xbf16>
    %c0_38 = arith.constant 0 : index
    %c0_39 = arith.constant 0 : index
    %100 = vector.load %arg14[%c0_38, %c0_39] : memref<1x32xf32, #tpu.memory_space<vmem>>, vector<1x32xf32>
    %c0_40 = arith.constant 0 : index
    %c0_41 = arith.constant 0 : index
    %101 = vector.load %arg15[%c0_40, %c0_41] : memref<32x32xbf16, #tpu.memory_space<vmem>>, vector<32x32xbf16>
    %c0_42 = arith.constant 0 : index
    %c0_43 = arith.constant 0 : index
    %102 = vector.load %arg16[%c0_42, %c0_43] : memref<1x32xf32, #tpu.memory_space<vmem>>, vector<1x32xf32>
    %c0_44 = arith.constant 0 : index
    %c0_45 = arith.constant 0 : index
    %c0_46 = arith.constant 0 : index
    %103 = vector.load %arg17[%c0_44, %c0_45, %c0_46] : memref<4x8x32xbf16, #tpu.memory_space<vmem>>, vector<4x8x32xbf16>
    %c0_47 = arith.constant 0 : index
    %c0_48 = arith.constant 0 : index
    %104 = vector.load %arg18[%c0_47, %c0_48] : memref<1x32xf32, #tpu.memory_space<vmem>>, vector<1x32xf32>
    %105 = arith.truncf %1 : vector<32x32xf32> to vector<32x32xbf16>
    %cst_49 = arith.constant dense<0.000000e+00> : vector<32x32xf32>
    %106 = tpu.matmul %105, %97, %cst_49 {dimension_numbers = #tpu.dot_dimension_numbers<[1], [0], [0], [1], [0, 0, 1, 1], [], []>} : vector<32x32xbf16>, vector<32x32xbf16>, vector<32x32xf32> -> vector<32x32xf32>
    %107 = vector.broadcast %98 : vector<1x32xf32> to vector<32x32xf32>
    %108 = arith.addf %106, %107 : vector<32x32xf32>
    %109 = arith.truncf %96 : vector<40x32xf32> to vector<40x32xbf16>
    %cst_50 = arith.constant dense<0.000000e+00> : vector<40x32xf32>
    %110 = tpu.matmul %109, %99, %cst_50 {dimension_numbers = #tpu.dot_dimension_numbers<[1], [0], [0], [1], [0, 0, 1, 1], [], []>} : vector<40x32xbf16>, vector<32x32xbf16>, vector<40x32xf32> -> vector<40x32xf32>
    %111 = vector.broadcast %100 : vector<1x32xf32> to vector<40x32xf32>
    %112 = arith.addf %110, %111 : vector<40x32xf32>
    %113 = arith.truncf %96 : vector<40x32xf32> to vector<40x32xbf16>
    %cst_51 = arith.constant dense<0.000000e+00> : vector<40x32xf32>
    %114 = tpu.matmul %113, %101, %cst_51 {dimension_numbers = #tpu.dot_dimension_numbers<[1], [0], [0], [1], [0, 0, 1, 1], [], []>} : vector<40x32xbf16>, vector<32x32xbf16>, vector<40x32xf32> -> vector<40x32xf32>
    %115 = vector.broadcast %102 : vector<1x32xf32> to vector<40x32xf32>
    %116 = arith.addf %114, %115 : vector<40x32xf32>
    %117 = vector.extract_strided_slice %108 {offsets = [0, 0], sizes = [32, 8], strides = [1, 1]} : vector<32x32xf32> to vector<32x8xf32>
    %118 = vector.extract_strided_slice %108 {offsets = [0, 8], sizes = [32, 8], strides = [1, 1]} : vector<32x32xf32> to vector<32x8xf32>
    %119 = vector.extract_strided_slice %108 {offsets = [0, 16], sizes = [32, 8], strides = [1, 1]} : vector<32x32xf32> to vector<32x8xf32>
    %120 = vector.extract_strided_slice %108 {offsets = [0, 24], sizes = [32, 8], strides = [1, 1]} : vector<32x32xf32> to vector<32x8xf32>
    %121 = vector.shape_cast %117 : vector<32x8xf32> to vector<1x32x8xf32>
    %122 = vector.shape_cast %118 : vector<32x8xf32> to vector<1x32x8xf32>
    %123 = vector.shape_cast %119 : vector<32x8xf32> to vector<1x32x8xf32>
    %124 = vector.shape_cast %120 : vector<32x8xf32> to vector<1x32x8xf32>
    %125 = tpu.concatenate %121, %122, %123, %124 in 0 : vector<1x32x8xf32>, vector<1x32x8xf32>, vector<1x32x8xf32>, vector<1x32x8xf32> -> vector<4x32x8xf32>
    %126 = vector.shape_cast %125 : vector<4x32x8xf32> to vector<32x4x8xf32>
    %127 = arith.truncf %126 : vector<32x4x8xf32> to vector<32x4x8xbf16>
    %128 = vector.extract_strided_slice %112 {offsets = [0, 0], sizes = [40, 8], strides = [1, 1]} : vector<40x32xf32> to vector<40x8xf32>
    %129 = vector.extract_strided_slice %112 {offsets = [0, 8], sizes = [40, 8], strides = [1, 1]} : vector<40x32xf32> to vector<40x8xf32>
    %130 = vector.extract_strided_slice %112 {offsets = [0, 16], sizes = [40, 8], strides = [1, 1]} : vector<40x32xf32> to vector<40x8xf32>
    %131 = vector.extract_strided_slice %112 {offsets = [0, 24], sizes = [40, 8], strides = [1, 1]} : vector<40x32xf32> to vector<40x8xf32>
    %132 = vector.shape_cast %128 : vector<40x8xf32> to vector<1x40x8xf32>
    %133 = vector.shape_cast %129 : vector<40x8xf32> to vector<1x40x8xf32>
    %134 = vector.shape_cast %130 : vector<40x8xf32> to vector<1x40x8xf32>
    %135 = vector.shape_cast %131 : vector<40x8xf32> to vector<1x40x8xf32>
    %136 = tpu.concatenate %132, %133, %134, %135 in 0 : vector<1x40x8xf32>, vector<1x40x8xf32>, vector<1x40x8xf32>, vector<1x40x8xf32> -> vector<4x40x8xf32>
    %137 = vector.shape_cast %136 : vector<4x40x8xf32> to vector<32x5x8xf32>
    %138 = arith.truncf %137 : vector<32x5x8xf32> to vector<32x5x8xbf16>
    %139 = vector.extract_strided_slice %116 {offsets = [0, 0], sizes = [40, 8], strides = [1, 1]} : vector<40x32xf32> to vector<40x8xf32>
    %140 = vector.extract_strided_slice %116 {offsets = [0, 8], sizes = [40, 8], strides = [1, 1]} : vector<40x32xf32> to vector<40x8xf32>
    %141 = vector.extract_strided_slice %116 {offsets = [0, 16], sizes = [40, 8], strides = [1, 1]} : vector<40x32xf32> to vector<40x8xf32>
    %142 = vector.extract_strided_slice %116 {offsets = [0, 24], sizes = [40, 8], strides = [1, 1]} : vector<40x32xf32> to vector<40x8xf32>
    %143 = vector.shape_cast %139 : vector<40x8xf32> to vector<1x40x8xf32>
    %144 = vector.shape_cast %140 : vector<40x8xf32> to vector<1x40x8xf32>
    %145 = vector.shape_cast %141 : vector<40x8xf32> to vector<1x40x8xf32>
    %146 = vector.shape_cast %142 : vector<40x8xf32> to vector<1x40x8xf32>
    %147 = tpu.concatenate %143, %144, %145, %146 in 0 : vector<1x40x8xf32>, vector<1x40x8xf32>, vector<1x40x8xf32>, vector<1x40x8xf32> -> vector<4x40x8xf32>
    %148 = vector.shape_cast %147 : vector<4x40x8xf32> to vector<32x5x8xf32>
    %149 = arith.truncf %148 : vector<32x5x8xf32> to vector<32x5x8xbf16>
    %cst_52 = arith.constant dense<0.000000e+00> : vector<32x4x5xf32>
    %150 = tpu.matmul %127, %138, %cst_52 {dimension_numbers = #tpu.dot_dimension_numbers<[2], [2], [1], [1], [0, 0, 0, 1, 1, 1], [0], [0]>} : vector<32x4x8xbf16>, vector<32x5x8xbf16>, vector<32x4x5xf32> -> vector<32x4x5xf32>
    %cst_53 = arith.constant dense<0xFF800000> : vector<32x4xf32>
    %151 = vector.multi_reduction <maximumf>, %150, %cst_53 [2] : vector<32x4x5xf32> to vector<32x4xf32>
    %152 = vector.shape_cast %151 : vector<32x4xf32> to vector<32x4x1xf32>
    %153 = vector.broadcast %152 : vector<32x4x1xf32> to vector<32x4x5xf32>
    %154 = arith.subf %150, %153 : vector<32x4x5xf32>
    %155 = math.exp %154 : vector<32x4x5xf32>
    %cst_54 = arith.constant dense<0.000000e+00> : vector<32x4xf32>
    %156 = vector.multi_reduction <add>, %155, %cst_54 [2] : vector<32x4x5xf32> to vector<32x4xf32>
    %157 = vector.shape_cast %156 : vector<32x4xf32> to vector<32x4x1xf32>
    %158 = tpu.reciprocal %157 {approx = true} : vector<32x4x1xf32> -> vector<32x4x1xf32>
    %159 = vector.broadcast %158 : vector<32x4x1xf32> to vector<32x4x5xf32>
    %160 = arith.mulf %155, %159 : vector<32x4x5xf32>
    %161 = arith.truncf %160 : vector<32x4x5xf32> to vector<32x4x5xbf16>
    %cst_55 = arith.constant dense<0.000000e+00> : vector<32x4x8xf32>
    %162 = tpu.matmul %161, %149, %cst_55 {dimension_numbers = #tpu.dot_dimension_numbers<[2], [1], [1], [2], [0, 0, 0, 1, 1, 2], [0], [0]>} : vector<32x4x5xbf16>, vector<32x5x8xbf16>, vector<32x4x8xf32> -> vector<32x4x8xf32>
    %163 = vector.shape_cast %162 : vector<32x4x8xf32> to vector<4x32x8xf32>
    %164 = arith.truncf %163 : vector<4x32x8xf32> to vector<4x32x8xbf16>
    %165 = vector.extract_strided_slice %164 {offsets = [0, 0, 0], sizes = [1, 32, 8], strides = [1, 1, 1]} : vector<4x32x8xbf16> to vector<1x32x8xbf16>
    %166 = vector.shape_cast %165 : vector<1x32x8xbf16> to vector<32x8xbf16>
    %167 = vector.extract_strided_slice %103 {offsets = [0, 0, 0], sizes = [1, 8, 32], strides = [1, 1, 1]} : vector<4x8x32xbf16> to vector<1x8x32xbf16>
    %168 = vector.shape_cast %167 : vector<1x8x32xbf16> to vector<8x32xbf16>
    %cst_56 = arith.constant dense<0.000000e+00> : vector<32x32xf32>
    %169 = tpu.matmul %166, %168, %cst_56 {dimension_numbers = #tpu.dot_dimension_numbers<[1], [0], [0], [1], [0, 0, 1, 1], [], []>} : vector<32x8xbf16>, vector<8x32xbf16>, vector<32x32xf32> -> vector<32x32xf32>
    %170 = vector.broadcast %104 : vector<1x32xf32> to vector<32x32xf32>
    %171 = arith.addf %170, %169 : vector<32x32xf32>
    %172 = vector.extract_strided_slice %164 {offsets = [1, 0, 0], sizes = [1, 32, 8], strides = [1, 1, 1]} : vector<4x32x8xbf16> to vector<1x32x8xbf16>
    %173 = vector.shape_cast %172 : vector<1x32x8xbf16> to vector<32x8xbf16>
    %174 = vector.extract_strided_slice %103 {offsets = [1, 0, 0], sizes = [1, 8, 32], strides = [1, 1, 1]} : vector<4x8x32xbf16> to vector<1x8x32xbf16>
    %175 = vector.shape_cast %174 : vector<1x8x32xbf16> to vector<8x32xbf16>
    %cst_57 = arith.constant dense<0.000000e+00> : vector<32x32xf32>
    %176 = tpu.matmul %173, %175, %cst_57 {dimension_numbers = #tpu.dot_dimension_numbers<[1], [0], [0], [1], [0, 0, 1, 1], [], []>} : vector<32x8xbf16>, vector<8x32xbf16>, vector<32x32xf32> -> vector<32x32xf32>
    %177 = arith.addf %171, %176 : vector<32x32xf32>
    %178 = vector.extract_strided_slice %164 {offsets = [2, 0, 0], sizes = [1, 32, 8], strides = [1, 1, 1]} : vector<4x32x8xbf16> to vector<1x32x8xbf16>
    %179 = vector.shape_cast %178 : vector<1x32x8xbf16> to vector<32x8xbf16>
    %180 = vector.extract_strided_slice %103 {offsets = [2, 0, 0], sizes = [1, 8, 32], strides = [1, 1, 1]} : vector<4x8x32xbf16> to vector<1x8x32xbf16>
    %181 = vector.shape_cast %180 : vector<1x8x32xbf16> to vector<8x32xbf16>
    %cst_58 = arith.constant dense<0.000000e+00> : vector<32x32xf32>
    %182 = tpu.matmul %179, %181, %cst_58 {dimension_numbers = #tpu.dot_dimension_numbers<[1], [0], [0], [1], [0, 0, 1, 1], [], []>} : vector<32x8xbf16>, vector<8x32xbf16>, vector<32x32xf32> -> vector<32x32xf32>
    %183 = arith.addf %177, %182 : vector<32x32xf32>
    %184 = vector.extract_strided_slice %164 {offsets = [3, 0, 0], sizes = [1, 32, 8], strides = [1, 1, 1]} : vector<4x32x8xbf16> to vector<1x32x8xbf16>
    %185 = vector.shape_cast %184 : vector<1x32x8xbf16> to vector<32x8xbf16>
    %186 = vector.extract_strided_slice %103 {offsets = [3, 0, 0], sizes = [1, 8, 32], strides = [1, 1, 1]} : vector<4x8x32xbf16> to vector<1x8x32xbf16>
    %187 = vector.shape_cast %186 : vector<1x8x32xbf16> to vector<8x32xbf16>
    %cst_59 = arith.constant dense<0.000000e+00> : vector<32x32xf32>
    %188 = tpu.matmul %185, %187, %cst_59 {dimension_numbers = #tpu.dot_dimension_numbers<[1], [0], [0], [1], [0, 0, 1, 1], [], []>} : vector<32x8xbf16>, vector<8x32xbf16>, vector<32x32xf32> -> vector<32x32xf32>
    %189 = arith.addf %183, %188 : vector<32x32xf32>
    %190 = arith.addf %1, %189 : vector<32x32xf32>
    %c0_60 = arith.constant 0 : index
    %c0_61 = arith.constant 0 : index
    %191 = vector.load %arg19[%c0_60, %c0_61] : memref<1x32xf32, #tpu.memory_space<vmem>>, vector<1x32xf32>
    %c0_62 = arith.constant 0 : index
    %c0_63 = arith.constant 0 : index
    %192 = vector.load %arg20[%c0_62, %c0_63] : memref<1x32xf32, #tpu.memory_space<vmem>>, vector<1x32xf32>
    %cst_64 = arith.constant dense<0.000000e+00> : vector<32xf32>
    %193 = vector.multi_reduction <add>, %190, %cst_64 [1] : vector<32x32xf32> to vector<32xf32>
    %194 = vector.shape_cast %193 : vector<32xf32> to vector<32x1xf32>
    %cst_65 = arith.constant 3.200000e+01 : f32
    %195 = vector.broadcast %cst_65 : f32 to vector<32x1xf32>
    %196 = arith.divf %194, %195 : vector<32x1xf32>
    %197 = vector.broadcast %196 : vector<32x1xf32> to vector<32x32xf32>
    %198 = arith.subf %190, %197 : vector<32x32xf32>
    %199 = arith.mulf %198, %198 : vector<32x32xf32>
    %cst_66 = arith.constant dense<0.000000e+00> : vector<32xf32>
    %200 = vector.multi_reduction <add>, %199, %cst_66 [1] : vector<32x32xf32> to vector<32xf32>
    %201 = vector.shape_cast %200 : vector<32xf32> to vector<32x1xf32>
    %cst_67 = arith.constant 3.200000e+01 : f32
    %202 = vector.broadcast %cst_67 : f32 to vector<32x1xf32>
    %203 = arith.divf %201, %202 : vector<32x1xf32>
    %204 = vector.broadcast %196 : vector<32x1xf32> to vector<32x32xf32>
    %205 = arith.subf %190, %204 : vector<32x32xf32>
    %cst_68 = arith.constant 9.99999974E-6 : f32
    %206 = vector.broadcast %cst_68 : f32 to vector<32x1xf32>
    %207 = arith.addf %203, %206 : vector<32x1xf32>
    %208 = math.rsqrt %207 : vector<32x1xf32>
    %209 = vector.broadcast %208 : vector<32x1xf32> to vector<32x32xf32>
    %210 = arith.mulf %205, %209 : vector<32x32xf32>
    %211 = vector.broadcast %191 : vector<1x32xf32> to vector<32x32xf32>
    %212 = arith.mulf %210, %211 : vector<32x32xf32>
    %213 = vector.broadcast %192 : vector<1x32xf32> to vector<32x32xf32>
    %214 = arith.addf %212, %213 : vector<32x32xf32>
    %215 = arith.truncf %214 : vector<32x32xf32> to vector<32x32xbf16>
    %c0_69 = arith.constant 0 : index
    %c0_70 = arith.constant 0 : index
    %216 = vector.load %arg21[%c0_69, %c0_70] : memref<32x64xbf16, #tpu.memory_space<vmem>>, vector<32x64xbf16>
    %cst_71 = arith.constant dense<0.000000e+00> : vector<32x64xf32>
    %217 = tpu.matmul %215, %216, %cst_71 {dimension_numbers = #tpu.dot_dimension_numbers<[1], [0], [0], [1], [0, 0, 1, 1], [], []>} : vector<32x32xbf16>, vector<32x64xbf16>, vector<32x64xf32> -> vector<32x64xf32>
    %c0_72 = arith.constant 0 : index
    %c0_73 = arith.constant 0 : index
    %218 = vector.load %arg22[%c0_72, %c0_73] : memref<1x64xf32, #tpu.memory_space<vmem>>, vector<1x64xf32>
    %219 = vector.broadcast %218 : vector<1x64xf32> to vector<32x64xf32>
    %220 = arith.addf %217, %219 : vector<32x64xf32>
    %cst_74 = arith.constant 5.000000e-01 : f32
    %221 = vector.broadcast %cst_74 : f32 to vector<32x64xf32>
    %222 = arith.mulf %221, %220 : vector<32x64xf32>
    %cst_75 = arith.constant 0.707106769 : f32
    %223 = vector.broadcast %cst_75 : f32 to vector<32x64xf32>
    %224 = arith.mulf %220, %223 : vector<32x64xf32>
    %cst_76 = arith.constant -4.000000e+00 : f32
    %cst_77 = arith.constant 4.000000e+00 : f32
    %225 = vector.broadcast %cst_76 : f32 to vector<32x64xf32>
    %226 = arith.maximumf %225, %224 : vector<32x64xf32>
    %227 = vector.broadcast %cst_77 : f32 to vector<32x64xf32>
    %228 = arith.minimumf %227, %226 : vector<32x64xf32>
    %229 = arith.mulf %228, %228 : vector<32x64xf32>
    %cst_78 = arith.constant -2.72614237E-10 : f32
    %230 = vector.broadcast %cst_78 : f32 to vector<32x64xf32>
    %231 = arith.mulf %230, %229 : vector<32x64xf32>
    %cst_79 = arith.constant 2.77068146E-8 : f32
    %232 = vector.broadcast %cst_79 : f32 to vector<32x64xf32>
    %233 = arith.addf %231, %232 : vector<32x64xf32>
    %234 = arith.mulf %233, %229 : vector<32x64xf32>
    %cst_80 = arith.constant -2.10102394E-6 : f32
    %235 = vector.broadcast %cst_80 : f32 to vector<32x64xf32>
    %236 = arith.addf %234, %235 : vector<32x64xf32>
    %237 = arith.mulf %236, %229 : vector<32x64xf32>
    %cst_81 = arith.constant -5.69250624E-5 : f32
    %238 = vector.broadcast %cst_81 : f32 to vector<32x64xf32>
    %239 = arith.addf %237, %238 : vector<32x64xf32>
    %240 = arith.mulf %239, %229 : vector<32x64xf32>
    %cst_82 = arith.constant -7.34990637E-4 : f32
    %241 = vector.broadcast %cst_82 : f32 to vector<32x64xf32>
    %242 = arith.addf %240, %241 : vector<32x64xf32>
    %243 = arith.mulf %242, %229 : vector<32x64xf32>
    %cst_83 = arith.constant -0.00295460015 : f32
    %244 = vector.broadcast %cst_83 : f32 to vector<32x64xf32>
    %245 = arith.addf %243, %244 : vector<32x64xf32>
    %246 = arith.mulf %245, %229 : vector<32x64xf32>
    %cst_84 = arith.constant -0.0160960332 : f32
    %247 = vector.broadcast %cst_84 : f32 to vector<32x64xf32>
    %248 = arith.addf %246, %247 : vector<32x64xf32>
    %cst_85 = arith.constant -1.45660715E-5 : f32
    %249 = vector.broadcast %cst_85 : f32 to vector<32x64xf32>
    %250 = arith.mulf %249, %229 : vector<32x64xf32>
    %cst_86 = arith.constant -2.13374049E-4 : f32
    %251 = vector.broadcast %cst_86 : f32 to vector<32x64xf32>
    %252 = arith.addf %250, %251 : vector<32x64xf32>
    %253 = arith.mulf %252, %229 : vector<32x64xf32>
    %cst_87 = arith.constant -0.00168282702 : f32
    %254 = vector.broadcast %cst_87 : f32 to vector<32x64xf32>
    %255 = arith.addf %253, %254 : vector<32x64xf32>
    %256 = arith.mulf %255, %229 : vector<32x64xf32>
    %cst_88 = arith.constant -0.00737332925 : f32
    %257 = vector.broadcast %cst_88 : f32 to vector<32x64xf32>
    %258 = arith.addf %256, %257 : vector<32x64xf32>
    %259 = arith.mulf %258, %229 : vector<32x64xf32>
    %cst_89 = arith.constant -0.0142647391 : f32
    %260 = vector.broadcast %cst_89 : f32 to vector<32x64xf32>
    %261 = arith.addf %259, %260 : vector<32x64xf32>
    %262 = arith.mulf %228, %248 : vector<32x64xf32>
    %263 = tpu.reciprocal %261 {approx = true} : vector<32x64xf32> -> vector<32x64xf32>
    %264 = arith.mulf %262, %263 : vector<32x64xf32>
    %cst_90 = arith.constant 1.000000e+00 : f32
    %265 = vector.broadcast %cst_90 : f32 to vector<32x64xf32>
    %266 = arith.addf %265, %264 : vector<32x64xf32>
    %267 = arith.mulf %222, %266 : vector<32x64xf32>
    %268 = arith.truncf %267 : vector<32x64xf32> to vector<32x64xbf16>
    %c0_91 = arith.constant 0 : index
    %c0_92 = arith.constant 0 : index
    %269 = vector.load %arg23[%c0_91, %c0_92] : memref<64x32xbf16, #tpu.memory_space<vmem>>, vector<64x32xbf16>
    %cst_93 = arith.constant dense<0.000000e+00> : vector<32x32xf32>
    %270 = tpu.matmul %268, %269, %cst_93 {dimension_numbers = #tpu.dot_dimension_numbers<[1], [0], [0], [1], [0, 0, 1, 1], [], []>} : vector<32x64xbf16>, vector<64x32xbf16>, vector<32x32xf32> -> vector<32x32xf32>
    %c0_94 = arith.constant 0 : index
    %c0_95 = arith.constant 0 : index
    %271 = vector.load %arg24[%c0_94, %c0_95] : memref<1x32xf32, #tpu.memory_space<vmem>>, vector<1x32xf32>
    %272 = vector.broadcast %271 : vector<1x32xf32> to vector<32x32xf32>
    %273 = arith.addf %270, %272 : vector<32x32xf32>
    %274 = arith.addf %214, %273 : vector<32x32xf32>
    %c0_96 = arith.constant 0 : index
    %c0_97 = arith.constant 0 : index
    %275 = vector.load %arg25[%c0_96, %c0_97] : memref<1x32xf32, #tpu.memory_space<vmem>>, vector<1x32xf32>
    %c0_98 = arith.constant 0 : index
    %c0_99 = arith.constant 0 : index
    %276 = vector.load %arg26[%c0_98, %c0_99] : memref<1x32xf32, #tpu.memory_space<vmem>>, vector<1x32xf32>
    %cst_100 = arith.constant dense<0.000000e+00> : vector<32xf32>
    %277 = vector.multi_reduction <add>, %274, %cst_100 [1] : vector<32x32xf32> to vector<32xf32>
    %278 = vector.shape_cast %277 : vector<32xf32> to vector<32x1xf32>
    %cst_101 = arith.constant 3.200000e+01 : f32
    %279 = vector.broadcast %cst_101 : f32 to vector<32x1xf32>
    %280 = arith.divf %278, %279 : vector<32x1xf32>
    %281 = vector.broadcast %280 : vector<32x1xf32> to vector<32x32xf32>
    %282 = arith.subf %274, %281 : vector<32x32xf32>
    %283 = arith.mulf %282, %282 : vector<32x32xf32>
    %cst_102 = arith.constant dense<0.000000e+00> : vector<32xf32>
    %284 = vector.multi_reduction <add>, %283, %cst_102 [1] : vector<32x32xf32> to vector<32xf32>
    %285 = vector.shape_cast %284 : vector<32xf32> to vector<32x1xf32>
    %cst_103 = arith.constant 3.200000e+01 : f32
    %286 = vector.broadcast %cst_103 : f32 to vector<32x1xf32>
    %287 = arith.divf %285, %286 : vector<32x1xf32>
    %288 = vector.broadcast %280 : vector<32x1xf32> to vector<32x32xf32>
    %289 = arith.subf %274, %288 : vector<32x32xf32>
    %cst_104 = arith.constant 9.99999974E-6 : f32
    %290 = vector.broadcast %cst_104 : f32 to vector<32x1xf32>
    %291 = arith.addf %287, %290 : vector<32x1xf32>
    %292 = math.rsqrt %291 : vector<32x1xf32>
    %293 = vector.broadcast %292 : vector<32x1xf32> to vector<32x32xf32>
    %294 = arith.mulf %289, %293 : vector<32x32xf32>
    %295 = vector.broadcast %275 : vector<1x32xf32> to vector<32x32xf32>
    %296 = arith.mulf %294, %295 : vector<32x32xf32>
    %297 = vector.broadcast %276 : vector<1x32xf32> to vector<32x32xf32>
    %298 = arith.addf %296, %297 : vector<32x32xf32>
    %299 = vector.shape_cast %298 : vector<32x32xf32> to vector<8x4x32xf32>
    %c0_105 = arith.constant 0 : index
    %c0_106 = arith.constant 0 : index
    %c0_107 = arith.constant 0 : index
    %300 = vector.load %arg27[%c0_105, %c0_106, %c0_107] : memref<8x4x32xf32, #tpu.memory_space<vmem>>, vector<8x4x32xf32>
    tpu.vector_store %arg27[%c0_105, %c0_106, %c0_107], %299 {strides = array<i32>} : memref<8x4x32xf32, #tpu.memory_space<vmem>>, vector<8x4x32xf32>,
    return
  }
  func.func @transform_0(%arg0: i32) -> (i32, i32, i32) {
    %c0_i32 = arith.constant 0 : i32
    %c0_i32_0 = arith.constant 0 : i32
    %c0_i32_1 = arith.constant 0 : i32
    return %arg0, %c0_i32, %c0_i32_0 : i32, i32, i32
  }
  func.func @transform_1(%arg0: i32) -> (i32, i32, i32) {
    %c0_i32 = arith.constant 0 : i32
    %c0_i32_0 = arith.constant 0 : i32
    %c0_i32_1 = arith.constant 0 : i32
    %c0_i32_2 = arith.constant 0 : i32
    return %c0_i32, %c0_i32_0, %c0_i32_1 : i32, i32, i32
  }
  func.func @transform_2(%arg0: i32) -> (i32, i32) {
    %c0_i32 = arith.constant 0 : i32
    %c0_i32_0 = arith.constant 0 : i32
    %c0_i32_1 = arith.constant 0 : i32
    return %c0_i32, %c0_i32_0 : i32, i32
  }
  func.func @transform_3(%arg0: i32) -> (i32, i32) {
    %c0_i32 = arith.constant 0 : i32
    %c0_i32_0 = arith.constant 0 : i32
    %c0_i32_1 = arith.constant 0 : i32
    return %c0_i32, %c0_i32_0 : i32, i32
  }
  func.func @transform_4(%arg0: i32) -> (i32, i32) {
    %c0_i32 = arith.constant 0 : i32
    %c0_i32_0 = arith.constant 0 : i32
    %c0_i32_1 = arith.constant 0 : i32
    return %c0_i32, %c0_i32_0 : i32, i32
  }
  func.func @transform_5(%arg0: i32) -> (i32, i32) {
    %c0_i32 = arith.constant 0 : i32
    %c0_i32_0 = arith.constant 0 : i32
    %c0_i32_1 = arith.constant 0 : i32
    return %c0_i32, %c0_i32_0 : i32, i32
  }
  func.func @transform_6(%arg0: i32) -> (i32, i32) {
    %c0_i32 = arith.constant 0 : i32
    %c0_i32_0 = arith.constant 0 : i32
    %c0_i32_1 = arith.constant 0 : i32
    return %c0_i32, %c0_i32_0 : i32, i32
  }
  func.func @transform_7(%arg0: i32) -> (i32, i32) {
    %c0_i32 = arith.constant 0 : i32
    %c0_i32_0 = arith.constant 0 : i32
    %c0_i32_1 = arith.constant 0 : i32
    return %c0_i32, %c0_i32_0 : i32, i32
  }
  func.func @transform_8(%arg0: i32) -> (i32, i32, i32) {
    %c0_i32 = arith.constant 0 : i32
    %c0_i32_0 = arith.constant 0 : i32
    %c0_i32_1 = arith.constant 0 : i32
    %c0_i32_2 = arith.constant 0 : i32
    return %c0_i32, %c0_i32_0, %c0_i32_1 : i32, i32, i32
  }
  func.func @transform_9(%arg0: i32) -> (i32, i32) {
    %c0_i32 = arith.constant 0 : i32
    %c0_i32_0 = arith.constant 0 : i32
    %c0_i32_1 = arith.constant 0 : i32
    return %c0_i32, %c0_i32_0 : i32, i32
  }
  func.func @transform_10(%arg0: i32) -> (i32, i32) {
    %c0_i32 = arith.constant 0 : i32
    %c0_i32_0 = arith.constant 0 : i32
    %c0_i32_1 = arith.constant 0 : i32
    return %c0_i32, %c0_i32_0 : i32, i32
  }
  func.func @transform_11(%arg0: i32) -> (i32, i32) {
    %c0_i32 = arith.constant 0 : i32
    %c0_i32_0 = arith.constant 0 : i32
    %c0_i32_1 = arith.constant 0 : i32
    return %c0_i32, %c0_i32_0 : i32, i32
  }
  func.func @transform_12(%arg0: i32) -> (i32, i32) {
    %c0_i32 = arith.constant 0 : i32
    %c0_i32_0 = arith.constant 0 : i32
    %c0_i32_1 = arith.constant 0 : i32
    return %c0_i32, %c0_i32_0 : i32, i32
  }
  func.func @transform_13(%arg0: i32) -> (i32, i32) {
    %c0_i32 = arith.constant 0 : i32
    %c0_i32_0 = arith.constant 0 : i32
    %c0_i32_1 = arith.constant 0 : i32
    return %c0_i32, %c0_i32_0 : i32, i32
  }
  func.func @transform_14(%arg0: i32) -> (i32, i32) {
    %c0_i32 = arith.constant 0 : i32
    %c0_i32_0 = arith.constant 0 : i32
    %c0_i32_1 = arith.constant 0 : i32
    return %c0_i32, %c0_i32_0 : i32, i32
  }
  func.func @transform_15(%arg0: i32) -> (i32, i32) {
    %c0_i32 = arith.constant 0 : i32
    %c0_i32_0 = arith.constant 0 : i32
    %c0_i32_1 = arith.constant 0 : i32
    return %c0_i32, %c0_i32_0 : i32, i32
  }
  func.func @transform_16(%arg0: i32) -> (i32, i32, i32) {
    %c0_i32 = arith.constant 0 : i32
    %c0_i32_0 = arith.constant 0 : i32
    %c0_i32_1 = arith.constant 0 : i32
    %c0_i32_2 = arith.constant 0 : i32
    return %c0_i32, %c0_i32_0, %c0_i32_1 : i32, i32, i32
  }
  func.func @transform_17(%arg0: i32) -> (i32, i32) {
    %c0_i32 = arith.constant 0 : i32
    %c0_i32_0 = arith.constant 0 : i32
    %c0_i32_1 = arith.constant 0 : i32
    return %c0_i32, %c0_i32_0 : i32, i32
  }
  func.func @transform_18(%arg0: i32) -> (i32, i32) {
    %c0_i32 = arith.constant 0 : i32
    %c0_i32_0 = arith.constant 0 : i32
    %c0_i32_1 = arith.constant 0 : i32
    return %c0_i32, %c0_i32_0 : i32, i32
  }
  func.func @transform_19(%arg0: i32) -> (i32, i32) {
    %c0_i32 = arith.constant 0 : i32
    %c0_i32_0 = arith.constant 0 : i32
    %c0_i32_1 = arith.constant 0 : i32
    return %c0_i32, %c0_i32_0 : i32, i32
  }
  func.func @transform_20(%arg0: i32) -> (i32, i32) {
    %c0_i32 = arith.constant 0 : i32
    %c0_i32_0 = arith.constant 0 : i32
    %c0_i32_1 = arith.constant 0 : i32
    return %c0_i32, %c0_i32_0 : i32, i32
  }
  func.func @transform_21(%arg0: i32) -> (i32, i32) {
    %c0_i32 = arith.constant 0 : i32
    %c0_i32_0 = arith.constant 0 : i32
    %c0_i32_1 = arith.constant 0 : i32
    return %c0_i32, %c0_i32_0 : i32, i32
  }
  func.func @transform_22(%arg0: i32) -> (i32, i32) {
    %c0_i32 = arith.constant 0 : i32
    %c0_i32_0 = arith.constant 0 : i32
    %c0_i32_1 = arith.constant 0 : i32
    return %c0_i32, %c0_i32_0 : i32, i32
  }
  func.func @transform_23(%arg0: i32) -> (i32, i32) {
    %c0_i32 = arith.constant 0 : i32
    %c0_i32_0 = arith.constant 0 : i32
    %c0_i32_1 = arith.constant 0 : i32
    return %c0_i32, %c0_i32_0 : i32, i32
  }
  func.func @transform_24(%arg0: i32) -> (i32, i32) {
    %c0_i32 = arith.constant 0 : i32
    %c0_i32_0 = arith.constant 0 : i32
    %c0_i32_1 = arith.constant 0 : i32
    return %c0_i32, %c0_i32_0 : i32, i32
  }
  func.func @transform_25(%arg0: i32) -> (i32, i32) {
    %c0_i32 = arith.constant 0 : i32
    %c0_i32_0 = arith.constant 0 : i32
    %c0_i32_1 = arith.constant 0 : i32
    return %c0_i32, %c0_i32_0 : i32, i32
  }
  func.func @transform_26(%arg0: i32) -> (i32, i32, i32) {
    %c0_i32 = arith.constant 0 : i32
    %c0_i32_0 = arith.constant 0 : i32
    %c0_i32_1 = arith.constant 0 : i32
    return %arg0, %c0_i32, %c0_i32_0 : i32, i32, i32
  }
}

module attributes {stable_mosaic.version = 11 : i64} {
  func.func @_stage1_kernel(%arg0: i32, %arg1: memref<4x8x32xf32, #tpu.memory_space<vmem>>, %arg2: memref<32x32xbf16, #tpu.memory_space<vmem>>, %arg3: memref<1x32xf32, #tpu.memory_space<vmem>>, %arg4: memref<32x32xbf16, #tpu.memory_space<vmem>>, %arg5: memref<1x32xf32, #tpu.memory_space<vmem>>, %arg6: memref<32x32xbf16, #tpu.memory_space<vmem>>, %arg7: memref<1x32xf32, #tpu.memory_space<vmem>>, %arg8: memref<4x8x32xbf16, #tpu.memory_space<vmem>>, %arg9: memref<1x32xf32, #tpu.memory_space<vmem>>, %arg10: memref<1x32xf32, #tpu.memory_space<vmem>>, %arg11: memref<1x32xf32, #tpu.memory_space<vmem>>, %arg12: memref<32x64xbf16, #tpu.memory_space<vmem>>, %arg13: memref<1x64xf32, #tpu.memory_space<vmem>>, %arg14: memref<64x32xbf16, #tpu.memory_space<vmem>>, %arg15: memref<1x32xf32, #tpu.memory_space<vmem>>, %arg16: memref<1x32xf32, #tpu.memory_space<vmem>>, %arg17: memref<1x32xf32, #tpu.memory_space<vmem>>, %arg18: memref<4x8x32xf32, #tpu.memory_space<vmem>>) attributes {dimension_semantics = [#tpu.dimension_semantics<parallel>], iteration_bounds = array<i64: 2>, scalar_prefetch = 0 : i64, scratch_operands = 0 : i64, tpu.core_type = #tpu.core_type<tc>, window_params = [{transform_indices = @transform_0, window_bounds = array<i64: 4, 8, 32>}, {pipeline_mode = #tpu.pipeline_mode<synchronous>, transform_indices = @transform_1, window_bounds = array<i64: 32, 32>}, {pipeline_mode = #tpu.pipeline_mode<synchronous>, transform_indices = @transform_2, window_bounds = array<i64: 1, 32>}, {pipeline_mode = #tpu.pipeline_mode<synchronous>, transform_indices = @transform_3, window_bounds = array<i64: 32, 32>}, {pipeline_mode = #tpu.pipeline_mode<synchronous>, transform_indices = @transform_4, window_bounds = array<i64: 1, 32>}, {pipeline_mode = #tpu.pipeline_mode<synchronous>, transform_indices = @transform_5, window_bounds = array<i64: 32, 32>}, {pipeline_mode = #tpu.pipeline_mode<synchronous>, transform_indices = @transform_6, window_bounds = array<i64: 1, 32>}, {pipeline_mode = #tpu.pipeline_mode<synchronous>, transform_indices = @transform_7, window_bounds = array<i64: 4, 8, 32>}, {pipeline_mode = #tpu.pipeline_mode<synchronous>, transform_indices = @transform_8, window_bounds = array<i64: 1, 32>}, {pipeline_mode = #tpu.pipeline_mode<synchronous>, transform_indices = @transform_9, window_bounds = array<i64: 1, 32>}, {pipeline_mode = #tpu.pipeline_mode<synchronous>, transform_indices = @transform_10, window_bounds = array<i64: 1, 32>}, {pipeline_mode = #tpu.pipeline_mode<synchronous>, transform_indices = @transform_11, window_bounds = array<i64: 32, 64>}, {pipeline_mode = #tpu.pipeline_mode<synchronous>, transform_indices = @transform_12, window_bounds = array<i64: 1, 64>}, {pipeline_mode = #tpu.pipeline_mode<synchronous>, transform_indices = @transform_13, window_bounds = array<i64: 64, 32>}, {pipeline_mode = #tpu.pipeline_mode<synchronous>, transform_indices = @transform_14, window_bounds = array<i64: 1, 32>}, {pipeline_mode = #tpu.pipeline_mode<synchronous>, transform_indices = @transform_15, window_bounds = array<i64: 1, 32>}, {pipeline_mode = #tpu.pipeline_mode<synchronous>, transform_indices = @transform_16, window_bounds = array<i64: 1, 32>}, {transform_indices = @transform_17, window_bounds = array<i64: 4, 8, 32>}]} {
    %c0 = arith.constant 0 : index
    %c0_0 = arith.constant 0 : index
    %c0_1 = arith.constant 0 : index
    %0 = vector.load %arg1[%c0, %c0_0, %c0_1] : memref<4x8x32xf32, #tpu.memory_space<vmem>>, vector<4x8x32xf32>
    %1 = vector.shape_cast %0 : vector<4x8x32xf32> to vector<32x32xf32>
    %c0_2 = arith.constant 0 : index
    %c0_3 = arith.constant 0 : index
    %2 = vector.load %arg2[%c0_2, %c0_3] : memref<32x32xbf16, #tpu.memory_space<vmem>>, vector<32x32xbf16>
    %c0_4 = arith.constant 0 : index
    %c0_5 = arith.constant 0 : index
    %3 = vector.load %arg3[%c0_4, %c0_5] : memref<1x32xf32, #tpu.memory_space<vmem>>, vector<1x32xf32>
    %c0_6 = arith.constant 0 : index
    %c0_7 = arith.constant 0 : index
    %4 = vector.load %arg4[%c0_6, %c0_7] : memref<32x32xbf16, #tpu.memory_space<vmem>>, vector<32x32xbf16>
    %c0_8 = arith.constant 0 : index
    %c0_9 = arith.constant 0 : index
    %5 = vector.load %arg5[%c0_8, %c0_9] : memref<1x32xf32, #tpu.memory_space<vmem>>, vector<1x32xf32>
    %c0_10 = arith.constant 0 : index
    %c0_11 = arith.constant 0 : index
    %6 = vector.load %arg6[%c0_10, %c0_11] : memref<32x32xbf16, #tpu.memory_space<vmem>>, vector<32x32xbf16>
    %c0_12 = arith.constant 0 : index
    %c0_13 = arith.constant 0 : index
    %7 = vector.load %arg7[%c0_12, %c0_13] : memref<1x32xf32, #tpu.memory_space<vmem>>, vector<1x32xf32>
    %c0_14 = arith.constant 0 : index
    %c0_15 = arith.constant 0 : index
    %c0_16 = arith.constant 0 : index
    %8 = vector.load %arg8[%c0_14, %c0_15, %c0_16] : memref<4x8x32xbf16, #tpu.memory_space<vmem>>, vector<4x8x32xbf16>
    %c0_17 = arith.constant 0 : index
    %c0_18 = arith.constant 0 : index
    %9 = vector.load %arg9[%c0_17, %c0_18] : memref<1x32xf32, #tpu.memory_space<vmem>>, vector<1x32xf32>
    %10 = arith.truncf %1 : vector<32x32xf32> to vector<32x32xbf16>
    %cst = arith.constant dense<0.000000e+00> : vector<32x32xf32>
    %11 = tpu.matmul %10, %2, %cst {dimension_numbers = #tpu.dot_dimension_numbers<[1], [0], [0], [1], [0, 0, 1, 1], [], []>} : vector<32x32xbf16>, vector<32x32xbf16>, vector<32x32xf32> -> vector<32x32xf32>
    %12 = vector.broadcast %3 : vector<1x32xf32> to vector<32x32xf32>
    %13 = arith.addf %11, %12 : vector<32x32xf32>
    %14 = arith.truncf %1 : vector<32x32xf32> to vector<32x32xbf16>
    %cst_19 = arith.constant dense<0.000000e+00> : vector<32x32xf32>
    %15 = tpu.matmul %14, %4, %cst_19 {dimension_numbers = #tpu.dot_dimension_numbers<[1], [0], [0], [1], [0, 0, 1, 1], [], []>} : vector<32x32xbf16>, vector<32x32xbf16>, vector<32x32xf32> -> vector<32x32xf32>
    %16 = vector.broadcast %5 : vector<1x32xf32> to vector<32x32xf32>
    %17 = arith.addf %15, %16 : vector<32x32xf32>
    %18 = arith.truncf %1 : vector<32x32xf32> to vector<32x32xbf16>
    %cst_20 = arith.constant dense<0.000000e+00> : vector<32x32xf32>
    %19 = tpu.matmul %18, %6, %cst_20 {dimension_numbers = #tpu.dot_dimension_numbers<[1], [0], [0], [1], [0, 0, 1, 1], [], []>} : vector<32x32xbf16>, vector<32x32xbf16>, vector<32x32xf32> -> vector<32x32xf32>
    %20 = vector.broadcast %7 : vector<1x32xf32> to vector<32x32xf32>
    %21 = arith.addf %19, %20 : vector<32x32xf32>
    %22 = vector.extract_strided_slice %13 {offsets = [0, 0], sizes = [32, 8], strides = [1, 1]} : vector<32x32xf32> to vector<32x8xf32>
    %23 = vector.extract_strided_slice %13 {offsets = [0, 8], sizes = [32, 8], strides = [1, 1]} : vector<32x32xf32> to vector<32x8xf32>
    %24 = vector.extract_strided_slice %13 {offsets = [0, 16], sizes = [32, 8], strides = [1, 1]} : vector<32x32xf32> to vector<32x8xf32>
    %25 = vector.extract_strided_slice %13 {offsets = [0, 24], sizes = [32, 8], strides = [1, 1]} : vector<32x32xf32> to vector<32x8xf32>
    %26 = vector.shape_cast %22 : vector<32x8xf32> to vector<1x32x8xf32>
    %27 = vector.shape_cast %23 : vector<32x8xf32> to vector<1x32x8xf32>
    %28 = vector.shape_cast %24 : vector<32x8xf32> to vector<1x32x8xf32>
    %29 = vector.shape_cast %25 : vector<32x8xf32> to vector<1x32x8xf32>
    %30 = tpu.concatenate %26, %27, %28, %29 in 0 : vector<1x32x8xf32>, vector<1x32x8xf32>, vector<1x32x8xf32>, vector<1x32x8xf32> -> vector<4x32x8xf32>
    %31 = vector.shape_cast %30 : vector<4x32x8xf32> to vector<16x8x8xf32>
    %32 = arith.truncf %31 : vector<16x8x8xf32> to vector<16x8x8xbf16>
    %33 = vector.extract_strided_slice %17 {offsets = [0, 0], sizes = [32, 8], strides = [1, 1]} : vector<32x32xf32> to vector<32x8xf32>
    %34 = vector.extract_strided_slice %17 {offsets = [0, 8], sizes = [32, 8], strides = [1, 1]} : vector<32x32xf32> to vector<32x8xf32>
    %35 = vector.extract_strided_slice %17 {offsets = [0, 16], sizes = [32, 8], strides = [1, 1]} : vector<32x32xf32> to vector<32x8xf32>
    %36 = vector.extract_strided_slice %17 {offsets = [0, 24], sizes = [32, 8], strides = [1, 1]} : vector<32x32xf32> to vector<32x8xf32>
    %37 = vector.shape_cast %33 : vector<32x8xf32> to vector<1x32x8xf32>
    %38 = vector.shape_cast %34 : vector<32x8xf32> to vector<1x32x8xf32>
    %39 = vector.shape_cast %35 : vector<32x8xf32> to vector<1x32x8xf32>
    %40 = vector.shape_cast %36 : vector<32x8xf32> to vector<1x32x8xf32>
    %41 = tpu.concatenate %37, %38, %39, %40 in 0 : vector<1x32x8xf32>, vector<1x32x8xf32>, vector<1x32x8xf32>, vector<1x32x8xf32> -> vector<4x32x8xf32>
    %42 = vector.shape_cast %41 : vector<4x32x8xf32> to vector<16x8x8xf32>
    %43 = arith.truncf %42 : vector<16x8x8xf32> to vector<16x8x8xbf16>
    %44 = vector.extract_strided_slice %21 {offsets = [0, 0], sizes = [32, 8], strides = [1, 1]} : vector<32x32xf32> to vector<32x8xf32>
    %45 = vector.extract_strided_slice %21 {offsets = [0, 8], sizes = [32, 8], strides = [1, 1]} : vector<32x32xf32> to vector<32x8xf32>
    %46 = vector.extract_strided_slice %21 {offsets = [0, 16], sizes = [32, 8], strides = [1, 1]} : vector<32x32xf32> to vector<32x8xf32>
    %47 = vector.extract_strided_slice %21 {offsets = [0, 24], sizes = [32, 8], strides = [1, 1]} : vector<32x32xf32> to vector<32x8xf32>
    %48 = vector.shape_cast %44 : vector<32x8xf32> to vector<1x32x8xf32>
    %49 = vector.shape_cast %45 : vector<32x8xf32> to vector<1x32x8xf32>
    %50 = vector.shape_cast %46 : vector<32x8xf32> to vector<1x32x8xf32>
    %51 = vector.shape_cast %47 : vector<32x8xf32> to vector<1x32x8xf32>
    %52 = tpu.concatenate %48, %49, %50, %51 in 0 : vector<1x32x8xf32>, vector<1x32x8xf32>, vector<1x32x8xf32>, vector<1x32x8xf32> -> vector<4x32x8xf32>
    %53 = vector.shape_cast %52 : vector<4x32x8xf32> to vector<16x8x8xf32>
    %54 = arith.truncf %53 : vector<16x8x8xf32> to vector<16x8x8xbf16>
    %cst_21 = arith.constant dense<0.000000e+00> : vector<16x8x8xf32>
    %55 = tpu.matmul %32, %43, %cst_21 {dimension_numbers = #tpu.dot_dimension_numbers<[2], [2], [1], [1], [0, 0, 0, 1, 1, 1], [0], [0]>} : vector<16x8x8xbf16>, vector<16x8x8xbf16>, vector<16x8x8xf32> -> vector<16x8x8xf32>
    %cst_22 = arith.constant dense<0xFF800000> : vector<16x8xf32>
    %56 = vector.multi_reduction <maximumf>, %55, %cst_22 [2] : vector<16x8x8xf32> to vector<16x8xf32>
    %57 = vector.shape_cast %56 : vector<16x8xf32> to vector<16x8x1xf32>
    %58 = vector.broadcast %57 : vector<16x8x1xf32> to vector<16x8x8xf32>
    %59 = arith.subf %55, %58 : vector<16x8x8xf32>
    %60 = math.exp %59 : vector<16x8x8xf32>
    %cst_23 = arith.constant dense<0.000000e+00> : vector<16x8xf32>
    %61 = vector.multi_reduction <add>, %60, %cst_23 [2] : vector<16x8x8xf32> to vector<16x8xf32>
    %62 = vector.shape_cast %61 : vector<16x8xf32> to vector<16x8x1xf32>
    %63 = tpu.reciprocal %62 {approx = true} : vector<16x8x1xf32> -> vector<16x8x1xf32>
    %64 = vector.broadcast %63 : vector<16x8x1xf32> to vector<16x8x8xf32>
    %65 = arith.mulf %60, %64 : vector<16x8x8xf32>
    %66 = arith.truncf %65 : vector<16x8x8xf32> to vector<16x8x8xbf16>
    %cst_24 = arith.constant dense<0.000000e+00> : vector<16x8x8xf32>
    %67 = tpu.matmul %66, %54, %cst_24 {dimension_numbers = #tpu.dot_dimension_numbers<[2], [1], [1], [2], [0, 0, 0, 1, 1, 2], [0], [0]>} : vector<16x8x8xbf16>, vector<16x8x8xbf16>, vector<16x8x8xf32> -> vector<16x8x8xf32>
    %68 = vector.shape_cast %67 : vector<16x8x8xf32> to vector<4x32x8xf32>
    %69 = arith.truncf %68 : vector<4x32x8xf32> to vector<4x32x8xbf16>
    %70 = vector.extract_strided_slice %69 {offsets = [0, 0, 0], sizes = [1, 32, 8], strides = [1, 1, 1]} : vector<4x32x8xbf16> to vector<1x32x8xbf16>
    %71 = vector.shape_cast %70 : vector<1x32x8xbf16> to vector<32x8xbf16>
    %72 = vector.extract_strided_slice %8 {offsets = [0, 0, 0], sizes = [1, 8, 32], strides = [1, 1, 1]} : vector<4x8x32xbf16> to vector<1x8x32xbf16>
    %73 = vector.shape_cast %72 : vector<1x8x32xbf16> to vector<8x32xbf16>
    %cst_25 = arith.constant dense<0.000000e+00> : vector<32x32xf32>
    %74 = tpu.matmul %71, %73, %cst_25 {dimension_numbers = #tpu.dot_dimension_numbers<[1], [0], [0], [1], [0, 0, 1, 1], [], []>} : vector<32x8xbf16>, vector<8x32xbf16>, vector<32x32xf32> -> vector<32x32xf32>
    %75 = vector.broadcast %9 : vector<1x32xf32> to vector<32x32xf32>
    %76 = arith.addf %75, %74 : vector<32x32xf32>
    %77 = vector.extract_strided_slice %69 {offsets = [1, 0, 0], sizes = [1, 32, 8], strides = [1, 1, 1]} : vector<4x32x8xbf16> to vector<1x32x8xbf16>
    %78 = vector.shape_cast %77 : vector<1x32x8xbf16> to vector<32x8xbf16>
    %79 = vector.extract_strided_slice %8 {offsets = [1, 0, 0], sizes = [1, 8, 32], strides = [1, 1, 1]} : vector<4x8x32xbf16> to vector<1x8x32xbf16>
    %80 = vector.shape_cast %79 : vector<1x8x32xbf16> to vector<8x32xbf16>
    %cst_26 = arith.constant dense<0.000000e+00> : vector<32x32xf32>
    %81 = tpu.matmul %78, %80, %cst_26 {dimension_numbers = #tpu.dot_dimension_numbers<[1], [0], [0], [1], [0, 0, 1, 1], [], []>} : vector<32x8xbf16>, vector<8x32xbf16>, vector<32x32xf32> -> vector<32x32xf32>
    %82 = arith.addf %76, %81 : vector<32x32xf32>
    %83 = vector.extract_strided_slice %69 {offsets = [2, 0, 0], sizes = [1, 32, 8], strides = [1, 1, 1]} : vector<4x32x8xbf16> to vector<1x32x8xbf16>
    %84 = vector.shape_cast %83 : vector<1x32x8xbf16> to vector<32x8xbf16>
    %85 = vector.extract_strided_slice %8 {offsets = [2, 0, 0], sizes = [1, 8, 32], strides = [1, 1, 1]} : vector<4x8x32xbf16> to vector<1x8x32xbf16>
    %86 = vector.shape_cast %85 : vector<1x8x32xbf16> to vector<8x32xbf16>
    %cst_27 = arith.constant dense<0.000000e+00> : vector<32x32xf32>
    %87 = tpu.matmul %84, %86, %cst_27 {dimension_numbers = #tpu.dot_dimension_numbers<[1], [0], [0], [1], [0, 0, 1, 1], [], []>} : vector<32x8xbf16>, vector<8x32xbf16>, vector<32x32xf32> -> vector<32x32xf32>
    %88 = arith.addf %82, %87 : vector<32x32xf32>
    %89 = vector.extract_strided_slice %69 {offsets = [3, 0, 0], sizes = [1, 32, 8], strides = [1, 1, 1]} : vector<4x32x8xbf16> to vector<1x32x8xbf16>
    %90 = vector.shape_cast %89 : vector<1x32x8xbf16> to vector<32x8xbf16>
    %91 = vector.extract_strided_slice %8 {offsets = [3, 0, 0], sizes = [1, 8, 32], strides = [1, 1, 1]} : vector<4x8x32xbf16> to vector<1x8x32xbf16>
    %92 = vector.shape_cast %91 : vector<1x8x32xbf16> to vector<8x32xbf16>
    %cst_28 = arith.constant dense<0.000000e+00> : vector<32x32xf32>
    %93 = tpu.matmul %90, %92, %cst_28 {dimension_numbers = #tpu.dot_dimension_numbers<[1], [0], [0], [1], [0, 0, 1, 1], [], []>} : vector<32x8xbf16>, vector<8x32xbf16>, vector<32x32xf32> -> vector<32x32xf32>
    %94 = arith.addf %88, %93 : vector<32x32xf32>
    %95 = arith.addf %1, %94 : vector<32x32xf32>
    %c0_29 = arith.constant 0 : index
    %c0_30 = arith.constant 0 : index
    %96 = vector.load %arg10[%c0_29, %c0_30] : memref<1x32xf32, #tpu.memory_space<vmem>>, vector<1x32xf32>
    %c0_31 = arith.constant 0 : index
    %c0_32 = arith.constant 0 : index
    %97 = vector.load %arg11[%c0_31, %c0_32] : memref<1x32xf32, #tpu.memory_space<vmem>>, vector<1x32xf32>
    %cst_33 = arith.constant dense<0.000000e+00> : vector<32xf32>
    %98 = vector.multi_reduction <add>, %95, %cst_33 [1] : vector<32x32xf32> to vector<32xf32>
    %99 = vector.shape_cast %98 : vector<32xf32> to vector<32x1xf32>
    %cst_34 = arith.constant 3.200000e+01 : f32
    %100 = vector.broadcast %cst_34 : f32 to vector<32x1xf32>
    %101 = arith.divf %99, %100 : vector<32x1xf32>
    %102 = vector.broadcast %101 : vector<32x1xf32> to vector<32x32xf32>
    %103 = arith.subf %95, %102 : vector<32x32xf32>
    %104 = arith.mulf %103, %103 : vector<32x32xf32>
    %cst_35 = arith.constant dense<0.000000e+00> : vector<32xf32>
    %105 = vector.multi_reduction <add>, %104, %cst_35 [1] : vector<32x32xf32> to vector<32xf32>
    %106 = vector.shape_cast %105 : vector<32xf32> to vector<32x1xf32>
    %cst_36 = arith.constant 3.200000e+01 : f32
    %107 = vector.broadcast %cst_36 : f32 to vector<32x1xf32>
    %108 = arith.divf %106, %107 : vector<32x1xf32>
    %109 = vector.broadcast %101 : vector<32x1xf32> to vector<32x32xf32>
    %110 = arith.subf %95, %109 : vector<32x32xf32>
    %cst_37 = arith.constant 9.99999974E-6 : f32
    %111 = vector.broadcast %cst_37 : f32 to vector<32x1xf32>
    %112 = arith.addf %108, %111 : vector<32x1xf32>
    %113 = math.rsqrt %112 : vector<32x1xf32>
    %114 = vector.broadcast %113 : vector<32x1xf32> to vector<32x32xf32>
    %115 = arith.mulf %110, %114 : vector<32x32xf32>
    %116 = vector.broadcast %96 : vector<1x32xf32> to vector<32x32xf32>
    %117 = arith.mulf %115, %116 : vector<32x32xf32>
    %118 = vector.broadcast %97 : vector<1x32xf32> to vector<32x32xf32>
    %119 = arith.addf %117, %118 : vector<32x32xf32>
    %120 = arith.truncf %119 : vector<32x32xf32> to vector<32x32xbf16>
    %c0_38 = arith.constant 0 : index
    %c0_39 = arith.constant 0 : index
    %121 = vector.load %arg12[%c0_38, %c0_39] : memref<32x64xbf16, #tpu.memory_space<vmem>>, vector<32x64xbf16>
    %cst_40 = arith.constant dense<0.000000e+00> : vector<32x64xf32>
    %122 = tpu.matmul %120, %121, %cst_40 {dimension_numbers = #tpu.dot_dimension_numbers<[1], [0], [0], [1], [0, 0, 1, 1], [], []>} : vector<32x32xbf16>, vector<32x64xbf16>, vector<32x64xf32> -> vector<32x64xf32>
    %c0_41 = arith.constant 0 : index
    %c0_42 = arith.constant 0 : index
    %123 = vector.load %arg13[%c0_41, %c0_42] : memref<1x64xf32, #tpu.memory_space<vmem>>, vector<1x64xf32>
    %124 = vector.broadcast %123 : vector<1x64xf32> to vector<32x64xf32>
    %125 = arith.addf %122, %124 : vector<32x64xf32>
    %cst_43 = arith.constant 5.000000e-01 : f32
    %126 = vector.broadcast %cst_43 : f32 to vector<32x64xf32>
    %127 = arith.mulf %126, %125 : vector<32x64xf32>
    %cst_44 = arith.constant 0.707106769 : f32
    %128 = vector.broadcast %cst_44 : f32 to vector<32x64xf32>
    %129 = arith.mulf %125, %128 : vector<32x64xf32>
    %cst_45 = arith.constant -4.000000e+00 : f32
    %cst_46 = arith.constant 4.000000e+00 : f32
    %130 = vector.broadcast %cst_45 : f32 to vector<32x64xf32>
    %131 = arith.maximumf %130, %129 : vector<32x64xf32>
    %132 = vector.broadcast %cst_46 : f32 to vector<32x64xf32>
    %133 = arith.minimumf %132, %131 : vector<32x64xf32>
    %134 = arith.mulf %133, %133 : vector<32x64xf32>
    %cst_47 = arith.constant -2.72614237E-10 : f32
    %135 = vector.broadcast %cst_47 : f32 to vector<32x64xf32>
    %136 = arith.mulf %135, %134 : vector<32x64xf32>
    %cst_48 = arith.constant 2.77068146E-8 : f32
    %137 = vector.broadcast %cst_48 : f32 to vector<32x64xf32>
    %138 = arith.addf %136, %137 : vector<32x64xf32>
    %139 = arith.mulf %138, %134 : vector<32x64xf32>
    %cst_49 = arith.constant -2.10102394E-6 : f32
    %140 = vector.broadcast %cst_49 : f32 to vector<32x64xf32>
    %141 = arith.addf %139, %140 : vector<32x64xf32>
    %142 = arith.mulf %141, %134 : vector<32x64xf32>
    %cst_50 = arith.constant -5.69250624E-5 : f32
    %143 = vector.broadcast %cst_50 : f32 to vector<32x64xf32>
    %144 = arith.addf %142, %143 : vector<32x64xf32>
    %145 = arith.mulf %144, %134 : vector<32x64xf32>
    %cst_51 = arith.constant -7.34990637E-4 : f32
    %146 = vector.broadcast %cst_51 : f32 to vector<32x64xf32>
    %147 = arith.addf %145, %146 : vector<32x64xf32>
    %148 = arith.mulf %147, %134 : vector<32x64xf32>
    %cst_52 = arith.constant -0.00295460015 : f32
    %149 = vector.broadcast %cst_52 : f32 to vector<32x64xf32>
    %150 = arith.addf %148, %149 : vector<32x64xf32>
    %151 = arith.mulf %150, %134 : vector<32x64xf32>
    %cst_53 = arith.constant -0.0160960332 : f32
    %152 = vector.broadcast %cst_53 : f32 to vector<32x64xf32>
    %153 = arith.addf %151, %152 : vector<32x64xf32>
    %cst_54 = arith.constant -1.45660715E-5 : f32
    %154 = vector.broadcast %cst_54 : f32 to vector<32x64xf32>
    %155 = arith.mulf %154, %134 : vector<32x64xf32>
    %cst_55 = arith.constant -2.13374049E-4 : f32
    %156 = vector.broadcast %cst_55 : f32 to vector<32x64xf32>
    %157 = arith.addf %155, %156 : vector<32x64xf32>
    %158 = arith.mulf %157, %134 : vector<32x64xf32>
    %cst_56 = arith.constant -0.00168282702 : f32
    %159 = vector.broadcast %cst_56 : f32 to vector<32x64xf32>
    %160 = arith.addf %158, %159 : vector<32x64xf32>
    %161 = arith.mulf %160, %134 : vector<32x64xf32>
    %cst_57 = arith.constant -0.00737332925 : f32
    %162 = vector.broadcast %cst_57 : f32 to vector<32x64xf32>
    %163 = arith.addf %161, %162 : vector<32x64xf32>
    %164 = arith.mulf %163, %134 : vector<32x64xf32>
    %cst_58 = arith.constant -0.0142647391 : f32
    %165 = vector.broadcast %cst_58 : f32 to vector<32x64xf32>
    %166 = arith.addf %164, %165 : vector<32x64xf32>
    %167 = arith.mulf %133, %153 : vector<32x64xf32>
    %168 = tpu.reciprocal %166 {approx = true} : vector<32x64xf32> -> vector<32x64xf32>
    %169 = arith.mulf %167, %168 : vector<32x64xf32>
    %cst_59 = arith.constant 1.000000e+00 : f32
    %170 = vector.broadcast %cst_59 : f32 to vector<32x64xf32>
    %171 = arith.addf %170, %169 : vector<32x64xf32>
    %172 = arith.mulf %127, %171 : vector<32x64xf32>
    %173 = arith.truncf %172 : vector<32x64xf32> to vector<32x64xbf16>
    %c0_60 = arith.constant 0 : index
    %c0_61 = arith.constant 0 : index
    %174 = vector.load %arg14[%c0_60, %c0_61] : memref<64x32xbf16, #tpu.memory_space<vmem>>, vector<64x32xbf16>
    %cst_62 = arith.constant dense<0.000000e+00> : vector<32x32xf32>
    %175 = tpu.matmul %173, %174, %cst_62 {dimension_numbers = #tpu.dot_dimension_numbers<[1], [0], [0], [1], [0, 0, 1, 1], [], []>} : vector<32x64xbf16>, vector<64x32xbf16>, vector<32x32xf32> -> vector<32x32xf32>
    %c0_63 = arith.constant 0 : index
    %c0_64 = arith.constant 0 : index
    %176 = vector.load %arg15[%c0_63, %c0_64] : memref<1x32xf32, #tpu.memory_space<vmem>>, vector<1x32xf32>
    %177 = vector.broadcast %176 : vector<1x32xf32> to vector<32x32xf32>
    %178 = arith.addf %175, %177 : vector<32x32xf32>
    %179 = arith.addf %119, %178 : vector<32x32xf32>
    %c0_65 = arith.constant 0 : index
    %c0_66 = arith.constant 0 : index
    %180 = vector.load %arg16[%c0_65, %c0_66] : memref<1x32xf32, #tpu.memory_space<vmem>>, vector<1x32xf32>
    %c0_67 = arith.constant 0 : index
    %c0_68 = arith.constant 0 : index
    %181 = vector.load %arg17[%c0_67, %c0_68] : memref<1x32xf32, #tpu.memory_space<vmem>>, vector<1x32xf32>
    %cst_69 = arith.constant dense<0.000000e+00> : vector<32xf32>
    %182 = vector.multi_reduction <add>, %179, %cst_69 [1] : vector<32x32xf32> to vector<32xf32>
    %183 = vector.shape_cast %182 : vector<32xf32> to vector<32x1xf32>
    %cst_70 = arith.constant 3.200000e+01 : f32
    %184 = vector.broadcast %cst_70 : f32 to vector<32x1xf32>
    %185 = arith.divf %183, %184 : vector<32x1xf32>
    %186 = vector.broadcast %185 : vector<32x1xf32> to vector<32x32xf32>
    %187 = arith.subf %179, %186 : vector<32x32xf32>
    %188 = arith.mulf %187, %187 : vector<32x32xf32>
    %cst_71 = arith.constant dense<0.000000e+00> : vector<32xf32>
    %189 = vector.multi_reduction <add>, %188, %cst_71 [1] : vector<32x32xf32> to vector<32xf32>
    %190 = vector.shape_cast %189 : vector<32xf32> to vector<32x1xf32>
    %cst_72 = arith.constant 3.200000e+01 : f32
    %191 = vector.broadcast %cst_72 : f32 to vector<32x1xf32>
    %192 = arith.divf %190, %191 : vector<32x1xf32>
    %193 = vector.broadcast %185 : vector<32x1xf32> to vector<32x32xf32>
    %194 = arith.subf %179, %193 : vector<32x32xf32>
    %cst_73 = arith.constant 9.99999974E-6 : f32
    %195 = vector.broadcast %cst_73 : f32 to vector<32x1xf32>
    %196 = arith.addf %192, %195 : vector<32x1xf32>
    %197 = math.rsqrt %196 : vector<32x1xf32>
    %198 = vector.broadcast %197 : vector<32x1xf32> to vector<32x32xf32>
    %199 = arith.mulf %194, %198 : vector<32x32xf32>
    %200 = vector.broadcast %180 : vector<1x32xf32> to vector<32x32xf32>
    %201 = arith.mulf %199, %200 : vector<32x32xf32>
    %202 = vector.broadcast %181 : vector<1x32xf32> to vector<32x32xf32>
    %203 = arith.addf %201, %202 : vector<32x32xf32>
    %204 = vector.shape_cast %203 : vector<32x32xf32> to vector<4x8x32xf32>
    %c0_74 = arith.constant 0 : index
    %c0_75 = arith.constant 0 : index
    %c0_76 = arith.constant 0 : index
    %205 = vector.load %arg18[%c0_74, %c0_75, %c0_76] : memref<4x8x32xf32, #tpu.memory_space<vmem>>, vector<4x8x32xf32>
    tpu.vector_store %arg18[%c0_74, %c0_75, %c0_76], %204 {strides = array<i32>} : memref<4x8x32xf32, #tpu.memory_space<vmem>>, vector<4x8x32xf32>,
    return
  }
  func.func @transform_0(%arg0: i32) -> (i32, i32, i32) {
    %c0_i32 = arith.constant 0 : i32
    %c0_i32_0 = arith.constant 0 : i32
    %c0_i32_1 = arith.constant 0 : i32
    return %arg0, %c0_i32, %c0_i32_0 : i32, i32, i32
  }
  func.func @transform_1(%arg0: i32) -> (i32, i32) {
    %c0_i32 = arith.constant 0 : i32
    %c0_i32_0 = arith.constant 0 : i32
    %c0_i32_1 = arith.constant 0 : i32
    return %c0_i32, %c0_i32_0 : i32, i32
  }
  func.func @transform_2(%arg0: i32) -> (i32, i32) {
    %c0_i32 = arith.constant 0 : i32
    %c0_i32_0 = arith.constant 0 : i32
    %c0_i32_1 = arith.constant 0 : i32
    return %c0_i32, %c0_i32_0 : i32, i32
  }
  func.func @transform_3(%arg0: i32) -> (i32, i32) {
    %c0_i32 = arith.constant 0 : i32
    %c0_i32_0 = arith.constant 0 : i32
    %c0_i32_1 = arith.constant 0 : i32
    return %c0_i32, %c0_i32_0 : i32, i32
  }
  func.func @transform_4(%arg0: i32) -> (i32, i32) {
    %c0_i32 = arith.constant 0 : i32
    %c0_i32_0 = arith.constant 0 : i32
    %c0_i32_1 = arith.constant 0 : i32
    return %c0_i32, %c0_i32_0 : i32, i32
  }
  func.func @transform_5(%arg0: i32) -> (i32, i32) {
    %c0_i32 = arith.constant 0 : i32
    %c0_i32_0 = arith.constant 0 : i32
    %c0_i32_1 = arith.constant 0 : i32
    return %c0_i32, %c0_i32_0 : i32, i32
  }
  func.func @transform_6(%arg0: i32) -> (i32, i32) {
    %c0_i32 = arith.constant 0 : i32
    %c0_i32_0 = arith.constant 0 : i32
    %c0_i32_1 = arith.constant 0 : i32
    return %c0_i32, %c0_i32_0 : i32, i32
  }
  func.func @transform_7(%arg0: i32) -> (i32, i32, i32) {
    %c0_i32 = arith.constant 0 : i32
    %c0_i32_0 = arith.constant 0 : i32
    %c0_i32_1 = arith.constant 0 : i32
    %c0_i32_2 = arith.constant 0 : i32
    return %c0_i32, %c0_i32_0, %c0_i32_1 : i32, i32, i32
  }
  func.func @transform_8(%arg0: i32) -> (i32, i32) {
    %c0_i32 = arith.constant 0 : i32
    %c0_i32_0 = arith.constant 0 : i32
    %c0_i32_1 = arith.constant 0 : i32
    return %c0_i32, %c0_i32_0 : i32, i32
  }
  func.func @transform_9(%arg0: i32) -> (i32, i32) {
    %c0_i32 = arith.constant 0 : i32
    %c0_i32_0 = arith.constant 0 : i32
    %c0_i32_1 = arith.constant 0 : i32
    return %c0_i32, %c0_i32_0 : i32, i32
  }
  func.func @transform_10(%arg0: i32) -> (i32, i32) {
    %c0_i32 = arith.constant 0 : i32
    %c0_i32_0 = arith.constant 0 : i32
    %c0_i32_1 = arith.constant 0 : i32
    return %c0_i32, %c0_i32_0 : i32, i32
  }
  func.func @transform_11(%arg0: i32) -> (i32, i32) {
    %c0_i32 = arith.constant 0 : i32
    %c0_i32_0 = arith.constant 0 : i32
    %c0_i32_1 = arith.constant 0 : i32
    return %c0_i32, %c0_i32_0 : i32, i32
  }
  func.func @transform_12(%arg0: i32) -> (i32, i32) {
    %c0_i32 = arith.constant 0 : i32
    %c0_i32_0 = arith.constant 0 : i32
    %c0_i32_1 = arith.constant 0 : i32
    return %c0_i32, %c0_i32_0 : i32, i32
  }
  func.func @transform_13(%arg0: i32) -> (i32, i32) {
    %c0_i32 = arith.constant 0 : i32
    %c0_i32_0 = arith.constant 0 : i32
    %c0_i32_1 = arith.constant 0 : i32
    return %c0_i32, %c0_i32_0 : i32, i32
  }
  func.func @transform_14(%arg0: i32) -> (i32, i32) {
    %c0_i32 = arith.constant 0 : i32
    %c0_i32_0 = arith.constant 0 : i32
    %c0_i32_1 = arith.constant 0 : i32
    return %c0_i32, %c0_i32_0 : i32, i32
  }
  func.func @transform_15(%arg0: i32) -> (i32, i32) {
    %c0_i32 = arith.constant 0 : i32
    %c0_i32_0 = arith.constant 0 : i32
    %c0_i32_1 = arith.constant 0 : i32
    return %c0_i32, %c0_i32_0 : i32, i32
  }
  func.func @transform_16(%arg0: i32) -> (i32, i32) {
    %c0_i32 = arith.constant 0 : i32
    %c0_i32_0 = arith.constant 0 : i32
    %c0_i32_1 = arith.constant 0 : i32
    return %c0_i32, %c0_i32_0 : i32, i32
  }
  func.func @transform_17(%arg0: i32) -> (i32, i32, i32) {
    %c0_i32 = arith.constant 0 : i32
    %c0_i32_0 = arith.constant 0 : i32
    %c0_i32_1 = arith.constant 0 : i32
    return %arg0, %c0_i32, %c0_i32_0 : i32, i32, i32
  }
}

</mosaic_0001>

<bundles_post_ra>
// kernel: two_stage_attention.2
= control target key start
LH: loop header
LB: loop body
LE: loop exit
PB: predicated region body
PF: predicated region fallthrough
CT: control target
= control target key end

     0   :  { %s2792_s24 = smov 0   ;;  %s3296_s0 = inlined_call_operand.vmem [shape: f32[8,8,32], index: 0, kind: input, shape index: {}]   ;;  %s3297_s1 = inlined_call_operand.vmem [shape: bf16[32,32], index: 1, kind: input, shape index: {}]   ;;  %s3298_s2 = inlined_call_operand.vmem [shape: f32[1,32], index: 2, kind: input, shape index: {}]   ;;  %s3299_s3 = inlined_call_operand.vmem [shape: bf16[32,32], index: 3, kind: input, shape index: {}]   ;;  %s3300_s4 = inlined_call_operand.vmem [shape: f32[1,32], index: 4, kind: input, shape index: {}]   ;;  %s3301_s5 = inlined_call_operand.vmem [shape: bf16[32,32], index: 5, kind: input, shape index: {}]   ;;  %s3302_s6 = inlined_call_operand.vmem [shape: f32[1,32], index: 6, kind: input, shape index: {}]   ;;  %s3303_s7 = inlined_call_operand.vmem [shape: bf16[4,8,32], index: 7, kind: input, shape index: {}]   ;;  %s3304_s8 = inlined_call_operand.vmem [shape: f32[1,32], index: 8, kind: input, shape index: {}]   ;;  %s3305_s9 = inlined_call_operand.vmem [shape: f32[1,32], index: 9, kind: input, shape index: {}]   ;;  %s3306_s10 = inlined_call_operand.vmem [shape: f32[1,32], index: 10, kind: input, shape index: {}]   ;;  %s3307_s11 = inlined_call_operand.vmem [shape: bf16[32,64], index: 11, kind: input, shape index: {}]   ;;  %s3308_s12 = inlined_call_operand.vmem [shape: f32[1,64], index: 12, kind: input, shape index: {}]   ;;  %s3309_s13 = inlined_call_operand.vmem [shape: bf16[64,32], index: 13, kind: input, shape index: {}]   ;;  %s3310_s14 = inlined_call_operand.vmem [shape: f32[1,32], index: 14, kind: input, shape index: {}]   ;;  %s3311_s15 = inlined_call_operand.vmem [shape: f32[1,32], index: 15, kind: input, shape index: {}]   ;;  %s3312_s16 = inlined_call_operand.vmem [shape: f32[1,32], index: 16, kind: input, shape index: {}]   ;;  %s3313_s17 = inlined_call_operand.vmem [shape: f32[8,8,32], index: 17, kind: output, shape index: {}]  }
   0x1   :  { %3315 = sst [smem:[#allocation2_spill]] %s3296_s0 }
   0x2   :  { %3316 = sst [smem:[#allocation3_spill]] %s3297_s1 }
   0x3 LB: > { %s2359_s25 = sadd.s32 4294967295, %s2696_s24   ;;  %p2363_p0 = scmp.ge.s32.totalorder %s2696_s24, 1  ;;  %s2696_s24 = sphi %s2792_s24, %s27_s24  }
   0x4   : > { %p488_p1 = scmp.lt.s32.totalorder %s2696_s24, 3 }
   0x6   : > { %p489_p2 = pnand %p2363_p0, %p488_p1 }
   0x7   : > { %s3317_s28 = sld [smem:[#allocation3_spill]] (!%p489_p2)  ;;  %s2364_s30 = sshll.u32 (!%p489_p2), %s2359_s25, 2 }
   0x8   : > { %492 = sbr.rel (%p489_p2) target bundleno = 1926 (0x786), region = 88  ;;  %p541_p3 = scmp.lt.s32.totalorder (!%p489_p2), %s2364_s30, 7 }
   0x9   : > { %s3318_s0 = sld [smem:[#allocation2_spill]] (!%p489_p2)  ;;  %s2698_s22 = smov (!%p489_p2), 112  }
   0xa   : > { %s2699_s23 = smov (!%p489_p2), 120   ;;  %s2700_s25 = smov (!%p489_p2), 104  }
   0xd   : > { %v2473_v0 = vld [vmem:[%s3317_s28 + $0x8] sm:$0xff]  ;;  %v2472_v2 = vld [vmem:[%s3317_s28] sm:$0xff]  ;;  %s3320_s30 = smov (!%p541_p3, %s2364_s30), 7  ;;  %vm594_vm0 = vcmask 261120   ;;  %vm856_vm1 = vcmask 64512   ;;  %vm1356_vm2 = vcmask 1043456  }
   0xe   : > { %v2475_v1 = vld [vmem:[%s3299_s3 + $0x8] sm:$0xff]  ;;  %607 = vmatpush.bf16.msra.mxu0 %v2473_v0  ;;  %v2474_v4 = vld [vmem:[%s3299_s3] sm:$0xff]  ;;  %s2365_s26 = sshll.u32 %s3320_s30, 3 }
   0xf   : > { %v2477_v3 = vld [vmem:[%s3301_s5 + $0x8] sm:$0xff]  ;;  %641 = vmatpush.bf16.msra.mxu1 %v2475_v1  ;;  %v2476_v5 = vld [vmem:[%s3301_s5] sm:$0xff]  ;;  %s2826_s18 = scalar_lea.vmem %s3318_s0, %s2365_s26  ;;  %s3279_s20 = scalar_lea.vmem %s3313_s17, %s2365_s26 }
  0x10   : > { %675 = vmatpush.bf16.msra.mxu2 %v2477_v3  ;;  %v553_v6 = vld [vmem:[%s2826_s18] sm:$0xff]  ;;  %v554_v7 = vld [vmem:[%s2826_s18 + $0x8] sm:$0xff]  ;;  %v555_v9 = vld [vmem:[%s2826_s18 + $0x10] sm:$0xff] }
  0x11   : > { %v577_v8 = vpack.c.bf16 %v554_v7, %v553_v6  ;;  %v556_v10 = vld [vmem:[%s2826_s18 + $0x18] sm:$0xff]  ;;  %v2587_v12 = vld [vmem:[%s3300_s4] ss:$0 sm:$0xff] }
  0x12   : > { %608 = vmatpush.bf16.msra.mxu0 %v2472_v2  ;;  %v578_v11 = vpack.c.bf16 %v556_v10, %v555_v9  ;;  %v2586_v16 = vld [vmem:[%s3298_s2] ss:$0 sm:$0xff] }
  0x13   : > { %642 = vmatpush.bf16.msra.mxu1 %v2474_v4  ;;  %v2588_v49 = vld [vmem:[%s3302_s6] ss:$0 sm:$0xff] }
  0x14   : > { %676 = vmatpush.bf16.msra.mxu2 %v2476_v5 }
  0x15   : > { %2376 = vmatmul.msk.bf16.vlgmr.msra.gmra.mxu0 %vm594_vm0, %v577_v8 }
  0x16   : > { %2386 = vmatmul.msk.bf16.vlgmr.msra.gmra.mxu1 %vm594_vm0, %v577_v8 }
  0x17   : > { %2396 = vmatmul.msk.bf16.vlgmr.msra.gmra.mxu2 %vm594_vm0, %v577_v8 }
  0x25   : > { %2377 = vmatmul.msk.bf16.gmra.mxu0 %vm594_vm0, %v578_v11 }
  0x26   : > { %2387 = vmatmul.msk.bf16.gmra.mxu1 %vm594_vm0, %v578_v11 }
  0x27   : > { %2397 = vmatmul.msk.bf16.gmra.mxu2 %vm594_vm0, %v578_v11 }
  0x92   : > { %v610_v13 = vpop.f32.mrf.mxu0 }
  0x93   : > { %v644_v14 = vpop.f32.mrf.mxu1  ;;  %v611_v19 = vadd.f32 %v2586_v16, %v610_v13 }
  0x94   : > { %v645_v15 = vadd.f32 %v2587_v12, %v644_v14 }
  0x95   : > { %v728_v23 = vpack.c.bf16 %v611_v19, %v611_v19 }
  0x96   : > { %v784_v17 = vpack.c.bf16 %v645_v15, %v645_v15 }
  0x98   : > { %v861_v18 = vsel %vm856_vm1, %v784_v17, 0 }
  0x99   : > { %870 = vmatpush.bf16.xpose.msra.mxu3 %v861_v18 }
  0x9a   : > { %v612_v20 = vpop.f32.mrf.mxu0  ;;  %v678_v27 = vpop.f32.mrf.mxu2 }
  0x9b   : > { %v646_v21 = vpop.f32.mrf.mxu1  ;;  %v613_v28 = vadd.f32 %v2586_v16, %v612_v20  ;;  %v2877_v54 = vadd.f32 %v2588_v49, %v678_v27 }
  0x9c   : > { %v647_v22 = vadd.f32 %v2587_v12, %v646_v21 }
  0x9d   : > { %v2501_v32 = vpack.i.bf16 %v613_v28, %v611_v19  ;;  %v729_v45 = vpack.c.bf16 %v613_v28, %v613_v28 }
  0x9e   : > { %v2506_v24 = vpack.i.bf16 %v647_v22, %v645_v15  ;;  %v785_v25 = vpack.c.bf16 %v647_v22, %v647_v22 }
  0xa0   : > { %2507 = vrot.lane.b32.xlu1 %v2506_v24, %s2698_s22  ;;  %2497 = vrot.lane.b32.xlu0 %v2506_v24, %s2699_s23  ;;  %v880_v26 = vsel %vm856_vm1, %v785_v25, 0 }
  0xa1   : > { %2398 = vmatmul.msk.bf16.vlgmr.msra.gmra.mxu3 %vm856_vm1, %v728_v23 }
  0xa2   : > { %889 = vmatpush.bf16.xpose.msrb.mxu3 %v880_v26  ;;  %v615_v29 = vpop.f32.mrf.mxu0  ;;  %v680_v36 = vpop.f32.mrf.mxu2 }
  0xa3   : > { %v649_v30 = vpop.f32.mrf.mxu1  ;;  %v616_v34 = vadd.f32 %v2586_v16, %v615_v29  ;;  %v2879_v55 = vadd.f32 %v2588_v49, %v680_v36 }
  0xa4   : > { %v650_v31 = vadd.f32 %v2587_v12, %v649_v30 }
  0xa5   : > { %v730_v41 = vpack.c.bf16 %v616_v34, %v616_v34  ;;  %v2883_v56 = vpack.i.bf16 %v2879_v55, %v2877_v54 }
  0xa6   : > { %v786_v33 = vpack.c.bf16 %v650_v31, %v650_v31 }
  0xa8   : > { %2502 = vrot.lane.b32.xlu0 %v2501_v32, %s2699_s23  ;;  %v899_v35 = vsel %vm856_vm1, %v786_v33, 0  ;;  %2512 = vrot.lane.b32.xlu1 %v2501_v32, %s2698_s22 }
  0xa9   : > { %908 = vmatpush.bf16.xpose.msrb.mxu0 %v899_v35 }
  0xaa   : > { %v617_v37 = vpop.f32.mrf.mxu0  ;;  %v683_v47 = vpop.f32.mrf.mxu2 }
  0xab   : > { %v651_v38 = vpop.f32.mrf.mxu1  ;;  %v618_v39 = vadd.f32 %v2586_v16, %v617_v37  ;;  %v2864_v51 = vadd.f32 %v2588_v49, %v683_v47 }
  0xac   : > { %v652_v40 = vadd.f32 %v2587_v12, %v651_v38 }
  0xad   : > { %v2526_v43 = vpack.i.bf16 %v618_v39, %v616_v34  ;;  %v731_v48 = vpack.c.bf16 %v618_v39, %v618_v39 }
  0xae   : > { %v2516_v42 = vpack.i.bf16 %v652_v40, %v650_v31  ;;  %v787_v44 = vpack.c.bf16 %v652_v40, %v652_v40 }
  0xb0   : > { %2517 = vrot.lane.b32.xlu2 %v2516_v42, %s2699_s23  ;;  %2400 = vmatmul.msk.bf16.vlgmr.msrb.gmra.mxu0 %vm856_vm1, %v730_v41  ;;  %v918_v46 = vsel %vm856_vm1, %v787_v44, 0 }
  0xb1   : > { %2527 = vrot.lane.b32.xlu0 %v2526_v43, %s2699_s23  ;;  %2399 = vmatmul.msk.bf16.vlgmr.msrb.gmra.mxu3 %vm856_vm1, %v729_v45  ;;  %v840_v45 = vpack.c.bf16 %v2877_v54, %v2877_v54 }
  0xb2   : > { %2532 = vrot.lane.b32.xlu1 %v2501_v32, %s2700_s25  ;;  %927 = vmatpush.bf16.xpose.msrb.mxu1 %v918_v46  ;;  %v685_v50 = vpop.f32.mrf.mxu2  ;;  %v841_v46 = vpack.c.bf16 %v2879_v55, %v2879_v55 }
  0xb3   : > { %v2866_v52 = vadd.f32 %v2588_v49, %v685_v50  ;;  %v1358_v54 = vsel %vm1356_vm2, %v840_v45, 0 }
  0xb4   : > { %v1377_v55 = vsel %vm1356_vm2, %v841_v46, 0 }
  0xb5   : > { %v2871_v53 = vpack.i.bf16 %v2866_v52, %v2864_v51 }
  0xb8   : > { %2522 = vrot.lane.b32.xlu2 %v2506_v24, %s2700_s25 }
  0xb9   : > { %2401 = vmatmul.msk.bf16.vlgmr.msrb.gmra.mxu1 %vm856_vm1, %v731_v48  ;;  %2542 = vrot.lane.b32.xlu0 %v2526_v43, %s2698_s22 }
  0xba   : > { %2547 = vrot.lane.b32.xlu1 %v2516_v42, %s2700_s25 }
  0xc0   : > { %2537 = vrot.lane.b32.xlu2 %v2516_v42, %s2698_s22 }
  0xc1   : > { %2567 = vrot.lane.b32.xlu0 %v2871_v53, %s2699_s23 }
  0xc2   : > { %2557 = vrot.lane.b32.xlu1 %v2883_v56, %s2699_s23 }
  0xc8   : > { %2552 = vrot.lane.b32.xlu2 %v2526_v43, %s2700_s25 }
  0xd0   : > { %2562 = vrot.lane.b32.xlu2 %v2883_v56, %s2698_s22 }
 0x10a   : > { %v2518_v57 = vpop.permute.xlu2 %2517 }
 0x10b   : > { %v2520_v58 = vunpack.i.h.bf16 %v2518_v57  ;;  %v2519_v59 = vunpack.i.l.bf16 %v2518_v57 }
 0x10d   : > { %v791_v60 = vpack.c.bf16 %v2520_v58, %v2520_v58  ;;  %v790_v61 = vpack.c.bf16 %v2519_v59, %v2519_v59 }
 0x10f   : > { %v975_v62 = vsel %vm856_vm1, %v790_v61, 0  ;;  %v994_v63 = vsel %vm856_vm1, %v791_v60, 0 }
 0x110   : > { %984 = vmatpush.bf16.xpose.msra.mxu0 %v975_v62  ;;  %1003 = vmatpush.bf16.xpose.msra.mxu1 %v994_v63 }
 0x112   : > { %v2523_v0 = vpop.permute.xlu2 %2522  ;;  %v2508_v1 = vpop.permute.xlu1 %2507 }
 0x113   : > { %v2510_v2 = vunpack.i.h.bf16 %v2508_v1  ;;  %v2509_v3 = vunpack.i.l.bf16 %v2508_v1  ;;  %v2498_v4 = vpop.permute.xlu0 %2497  ;;  %v2525_v13 = vunpack.i.h.bf16 %v2523_v0  ;;  %v2524_v14 = vunpack.i.l.bf16 %v2523_v0 }
 0x114   : > { %v2500_v5 = vunpack.i.h.bf16 %v2498_v4  ;;  %v2499_v6 = vunpack.i.l.bf16 %v2498_v4 }
 0x115   : > { %v793_v7 = vpack.c.bf16 %v2510_v2, %v2510_v2  ;;  %v792_v8 = vpack.c.bf16 %v2509_v3, %v2509_v3  ;;  %v797_v22 = vpack.c.bf16 %v2525_v13, %v2525_v13  ;;  %v796_v23 = vpack.c.bf16 %v2524_v14, %v2524_v14 }
 0x116   : > { %v789_v9 = vpack.c.bf16 %v2500_v5, %v2500_v5  ;;  %v788_v10 = vpack.c.bf16 %v2499_v6, %v2499_v6  ;;  %v842_v6 = vpack.c.bf16 %v2864_v51, %v2864_v51 }
 0x117   : > { %v1013_v11 = vsel %vm856_vm1, %v792_v8, 0  ;;  %v1032_v12 = vsel %vm856_vm1, %v793_v7, 0  ;;  %v1089_v32 = vsel %vm856_vm1, %v796_v23, 0  ;;  %v1108_v33 = vsel %vm856_vm1, %v797_v22, 0 }
 0x118   : > { %v937_v15 = vsel %vm856_vm1, %v788_v10, 0  ;;  %v956_v16 = vsel %vm856_vm1, %v789_v9, 0  ;;  %v843_v7 = vpack.c.bf16 %v2866_v52, %v2866_v52 }
 0x119   : > { %946 = vmatpush.bf16.xpose.msrb.mxu2 %v937_v15  ;;  %965 = vmatpush.bf16.xpose.msra.mxu3 %v956_v16 }
 0x11a   : > { %v2513_v17 = vpop.permute.xlu1 %2512  ;;  %v2538_v18 = vpop.permute.xlu2 %2537 }
 0x11b   : > { %v2503_v19 = vpop.permute.xlu0 %2502  ;;  %v2540_v20 = vunpack.i.h.bf16 %v2538_v18  ;;  %v2539_v21 = vunpack.i.l.bf16 %v2538_v18  ;;  %v2515_v42 = vunpack.i.h.bf16 %v2513_v17  ;;  %v2514_v43 = vunpack.i.l.bf16 %v2513_v17 }
 0x11c   : > { %v2505_v24 = vunpack.i.h.bf16 %v2503_v19  ;;  %v2504_v25 = vunpack.i.l.bf16 %v2503_v19 }
 0x11d   : > { %v795_v26 = vpack.c.bf16 %v2540_v20, %v2540_v20  ;;  %v794_v27 = vpack.c.bf16 %v2539_v21, %v2539_v21  ;;  %v737_v58 = vpack.c.bf16 %v2515_v42, %v2515_v42  ;;  %v736_v59 = vpack.c.bf16 %v2514_v43, %v2514_v43 }
 0x11e   : > { %v733_v28 = vpack.c.bf16 %v2505_v24, %v2505_v24  ;;  %v732_v29 = vpack.c.bf16 %v2504_v25, %v2504_v25 }
 0x11f   : > { %v1051_v30 = vsel %vm856_vm1, %v794_v27, 0  ;;  %v1070_v31 = vsel %vm856_vm1, %v795_v26, 0 }
 0x120   : > { %2402 = vmatmul.msk.bf16.vlgmr.msrb.gmra.mxu2 %vm856_vm1, %v732_v29  ;;  %2403 = vmatmul.msk.bf16.vlgmr.msra.gmra.mxu3 %vm856_vm1, %v733_v28 }
 0x121   : > { %1022 = vmatpush.bf16.xpose.msra.mxu2 %v1013_v11  ;;  %1041 = vmatpush.bf16.xpose.msrb.mxu3 %v1032_v12  ;;  %v1396_v11 = vsel %vm1356_vm2, %v842_v6, 0  ;;  %v1415_v12 = vsel %vm1356_vm2, %v843_v7, 0 }
 0x122   : > { %1060 = vmatpush.bf16.xpose.msrb.mxu0 %v1051_v30  ;;  %1079 = vmatpush.bf16.xpose.msrb.mxu1 %v1070_v31  ;;  %v2553_v21 = vpop.permute.xlu2 %2552 }
 0x123   : > { %v2528_v34 = vpop.permute.xlu0 %2527  ;;  %v2555_v22 = vunpack.i.h.bf16 %v2553_v21  ;;  %v2554_v23 = vunpack.i.l.bf16 %v2553_v21 }
 0x124   : > { %v2530_v35 = vunpack.i.h.bf16 %v2528_v34  ;;  %v2529_v36 = vunpack.i.l.bf16 %v2528_v34  ;;  %v2901_v37 = vpop.f32.mrf.mxu3  ;;  %v2533_v38 = vpop.permute.xlu1 %2532 }
 0x125   : > { %v1161_v39 = vsel %vm856_vm1, %v2901_v37, -inf  ;;  %v2535_v51 = vunpack.i.h.bf16 %v2533_v38  ;;  %v2534_v13 = vunpack.i.l.bf16 %v2533_v38  ;;  %v743_v26 = vpack.c.bf16 %v2555_v22, %v2555_v22 }
 0x126   : > { %v735_v40 = vpack.c.bf16 %v2530_v35, %v2530_v35  ;;  %v734_v41 = vpack.c.bf16 %v2529_v36, %v2529_v36  ;;  %1162 = vmax.xlane.f32.xlu0 %v1161_v39  ;;  %v742_v27 = vpack.c.bf16 %v2554_v23, %v2554_v23 }
 0x127   : > { %v741_v16 = vpack.c.bf16 %v2535_v51, %v2535_v51  ;;  %v740_v17 = vpack.c.bf16 %v2534_v13, %v2534_v13 }
 0x128   : > { %2404 = vmatmul.msk.bf16.vlgmr.msra.gmra.mxu0 %vm856_vm1, %v734_v41  ;;  %2405 = vmatmul.msk.bf16.vlgmr.msra.gmra.mxu1 %vm856_vm1, %v735_v40 }
 0x129   : > { %1098 = vmatpush.bf16.xpose.msrb.mxu2 %v1089_v32  ;;  %1117 = vmatpush.bf16.xpose.msra.mxu3 %v1108_v33 }
 0x12b   : > { %v2543_v57 = vpop.permute.xlu0 %2542 }
 0x12c   : > { %v874_v44 = vpop.f32.mrf.mxu3  ;;  %v2548_v47 = vpop.permute.xlu1 %2547  ;;  %v2545_v63 = vunpack.i.h.bf16 %v2543_v57  ;;  %v2544_v0 = vunpack.i.l.bf16 %v2543_v57 }
 0x12d   : > { %v2911_v48 = vpop.f32.mrf.mxu0  ;;  %v2550_v49 = vunpack.i.h.bf16 %v2548_v47  ;;  %v2549_v50 = vunpack.i.l.bf16 %v2548_v47 }
 0x12e   : > { %v1167_v60 = vsel %vm856_vm1, %v2911_v48, -inf  ;;  %v739_v3 = vpack.c.bf16 %v2545_v63, %v2545_v63  ;;  %v738_v4 = vpack.c.bf16 %v2544_v0, %v2544_v0 }
 0x12f   : > { %1168 = vmax.xlane.f32.xlu0 %v1167_v60  ;;  %v799_v61 = vpack.c.bf16 %v2550_v49, %v2550_v49  ;;  %v798_v62 = vpack.c.bf16 %v2549_v50, %v2549_v50 }
 0x130   : > { %2406 = vmatmul.msk.bf16.vlgmr.msra.gmra.mxu2 %vm856_vm1, %v736_v59  ;;  %2407 = vmatmul.msk.bf16.vlgmr.msrb.gmra.mxu3 %vm856_vm1, %v737_v58 }
 0x131   : > { %1367 = vmatpush.bf16.msra.mxu2 %v1358_v54  ;;  %1386 = vmatpush.bf16.msrb.mxu3 %v1377_v55  ;;  %v1127_v1 = vsel %vm856_vm1, %v798_v62, 0  ;;  %v1146_v2 = vsel %vm856_vm1, %v799_v61, 0 }
 0x132   : > { %1136 = vmatpush.bf16.xpose.msra.mxu0 %v1127_v1  ;;  %1155 = vmatpush.bf16.xpose.msra.mxu1 %v1146_v2 }
 0x133   : > { %v2568_v14 = vpop.permute.xlu0 %2567 }
 0x134   : > { %v2921_v5 = vpop.f32.mrf.mxu3  ;;  %v2570_v19 = vunpack.i.h.bf16 %v2568_v14  ;;  %v2569_v20 = vunpack.i.l.bf16 %v2568_v14  ;;  %v2558_v28 = vpop.permute.xlu1 %2557 }
 0x135   : > { %v1164_v8 = vsel %vm856_vm1, %v2921_v5, -inf  ;;  %v912_v9 = vpop.f32.mrf.mxu0  ;;  %v2560_v31 = vunpack.i.h.bf16 %v2558_v28  ;;  %v2559_v32 = vunpack.i.l.bf16 %v2558_v28 }
 0x136   : > { %1165 = vmax.xlane.f32.xlu1 %v1164_v8  ;;  %v2929_v10 = vpop.f32.mrf.mxu1  ;;  %v847_v24 = vpack.c.bf16 %v2570_v19, %v2570_v19  ;;  %v846_v25 = vpack.c.bf16 %v2569_v20, %v2569_v20 }
 0x137   : > { %v1170_v52 = vsel %vm856_vm1, %v2929_v10, -inf  ;;  %v845_v33 = vpack.c.bf16 %v2560_v31, %v2560_v31  ;;  %v844_v34 = vpack.c.bf16 %v2559_v32, %v2559_v32  ;;  %v2563_v31 = vpop.permute.xlu2 %2562 }
 0x138   : > { %2408 = vmatmul.msk.bf16.vlgmr.msrb.gmra.mxu0 %vm856_vm1, %v738_v4  ;;  %2409 = vmatmul.msk.bf16.vlgmr.msrb.gmra.mxu1 %vm856_vm1, %v739_v3  ;;  %v1472_v29 = vsel %vm1356_vm2, %v846_v25, 0  ;;  %v1491_v30 = vsel %vm1356_vm2, %v847_v24, 0 }
 0x139   : > { %v1434_v35 = vsel %vm1356_vm2, %v844_v34, 0  ;;  %v1453_v36 = vsel %vm1356_vm2, %v845_v33, 0 }
 0x13a   : > { %1405 = vmatpush.bf16.msrb.mxu0 %v1396_v11  ;;  %1424 = vmatpush.bf16.msrb.mxu1 %v1415_v12 }
 0x13c   : > { %v893_v15 = vpop.f32.mrf.mxu3 }
 0x13e   : > { %1171 = vmax.xlane.f32.xlu1 %v1170_v52  ;;  %v931_v18 = vpop.f32.mrf.mxu1 }
 0x140   : > { %2410 = vmatmul.msk.bf16.vlgmr.msrb.gmra.mxu2 %vm856_vm1, %v740_v17  ;;  %2411 = vmatmul.msk.bf16.vlgmr.msra.gmra.mxu3 %vm856_vm1, %v741_v16 }
 0x141   : > { %1443 = vmatpush.bf16.msrb.mxu2 %v1434_v35  ;;  %1462 = vmatpush.bf16.msra.mxu3 %v1453_v36 }
 0x148   : > { %2412 = vmatmul.msk.bf16.vlgmr.msra.gmra.mxu0 %vm856_vm1, %v742_v27  ;;  %2413 = vmatmul.msk.bf16.vlgmr.msra.gmra.mxu1 %vm856_vm1, %v743_v26 }
 0x149   : > { %1481 = vmatpush.bf16.msra.mxu0 %v1472_v29  ;;  %1500 = vmatpush.bf16.msra.mxu1 %v1491_v30 }
 0x199   : > { %v1163_v38 = vpop.xlane.xlu0 %1162 }
 0x19a   : > { %v1209_v39 = vsub.f32 %v2901_v37, %v1163_v38 }
 0x19c   : > { %v1225_v46 = vmul.f32 1.442695, %v1209_v39 }
 0x19e   : > { %2596 = vpow2.f32 %v1225_v46 }
 0x1a2   : > { %v1169_v6 = vpop.xlane.xlu0 %1168 }
 0x1a3   : > { %v2946_v40 = vpop.f32.mrf.mxu2  ;;  %v2948_v41 = vpop.f32.mrf.mxu3  ;;  %v1211_v8 = vsub.f32 %v2911_v48, %v1169_v6 }
 0x1a4   : > { %v1173_v42 = vsel %vm856_vm1, %v2946_v40, -inf  ;;  %v1176_v57 = vsel %vm856_vm1, %v2948_v41, -inf  ;;  %v2961_v61 = vpop.eup %2596 }
 0x1a5   : > { %v2952_v43 = vpop.f32.mrf.mxu0  ;;  %v2954_v44 = vpop.f32.mrf.mxu1  ;;  %1174 = vmax.xlane.f32.xlu2 %v1173_v42  ;;  %v1257_v0 = vsel %vm856_vm1, %v2961_v61, 0.0  ;;  %v1229_v52 = vmul.f32 1.442695, %v1211_v8 }
 0x1a6   : > { %v1179_v45 = vsel %vm856_vm1, %v2952_v43, -inf  ;;  %v1182_v16 = vsel %vm856_vm1, %v2954_v44, -inf }
 0x1a7   : > { %1180 = vmax.xlane.f32.xlu1 %v1179_v45 }
 0x1a9   : > { %v1166_v47 = vpop.xlane.xlu1 %1165 }
 0x1aa   : > { %v1210_v37 = vsub.f32 %v2921_v5, %v1166_v47 }
 0x1ab   : > { %v950_v49 = vpop.f32.mrf.mxu2  ;;  %v969_v50 = vpop.f32.mrf.mxu3 }
 0x1ac   : > { %v1227_v60 = vmul.f32 1.442695, %v1210_v37 }
 0x1ad   : > { %v988_v58 = vpop.f32.mrf.mxu0  ;;  %v1007_v59 = vpop.f32.mrf.mxu1  ;;  %1177 = vmax.xlane.f32.xlu2 %v1176_v57 }
 0x1ae   : > { %2598 = vpow2.f32 %v1227_v60 }
 0x1b1   : > { %v1172_v62 = vpop.xlane.xlu1 %1171 }
 0x1b2   : > { %v1212_v54 = vsub.f32 %v2929_v10, %v1172_v62 }
 0x1b3   : > { %v2964_v55 = vpop.f32.mrf.mxu2  ;;  %v2966_v63 = vpop.f32.mrf.mxu3 }
 0x1b4   : > { %v1188_v1 = vsel %vm856_vm1, %v2966_v63, -inf  ;;  %v1231_v5 = vmul.f32 1.442695, %v1212_v54  ;;  %v2978_v7 = vpop.eup %2598  ;;  %v1185_v11 = vsel %vm856_vm1, %v2964_v55, -inf }
 0x1b5   : > { %v2972_v2 = vpop.f32.mrf.mxu0  ;;  %v2974_v3 = vpop.f32.mrf.mxu1  ;;  %1258 = vadd.xlane.f32.xlu2 %v1257_v0  ;;  %1189 = vmax.xlane.f32.xlu0 %v1188_v1  ;;  %v1260_v12 = vsel %vm856_vm1, %v2978_v7, 0.0 }
 0x1b6   : > { %v1191_v4 = vsel %vm856_vm1, %v2972_v2, -inf  ;;  %2600 = vpow2.f32 %v1231_v5  ;;  %v1194_v28 = vsel %vm856_vm1, %v2974_v3, -inf }
 0x1b7   : > { %1192 = vmax.xlane.f32.xlu1 %v1191_v4  ;;  %2602 = vpow2.f32 %v1229_v52 }
 0x1bb   : > { %v1026_v9 = vpop.f32.mrf.mxu2  ;;  %v1045_v10 = vpop.f32.mrf.mxu3 }
 0x1bc   : > { %v2985_v14 = vpop.eup %2600  ;;  %v2565_v10 = vunpack.i.h.bf16 %v2563_v31 }
 0x1bd   : > { %v1064_v51 = vpop.f32.mrf.mxu0  ;;  %v1083_v13 = vpop.f32.mrf.mxu1  ;;  %1186 = vmax.xlane.f32.xlu2 %v1185_v11  ;;  %1261 = vadd.xlane.f32.xlu0 %v1260_v12  ;;  %v1266_v17 = vsel %vm856_vm1, %v2985_v14, 0.0 }
 0x1be   : > { %v3001_v21 = vpop.eup %2602  ;;  %v849_v51 = vpack.c.bf16 %v2565_v10, %v2565_v10 }
 0x1bf   : > { %v1263_v24 = vsel %vm856_vm1, %v3001_v21, 0.0 }
 0x1c3   : > { %v2987_v15 = vpop.f32.mrf.mxu2  ;;  %v2989_v48 = vpop.f32.mrf.mxu3 }
 0x1c4   : > { %v1200_v18 = vsel %vm856_vm1, %v2989_v48, -inf  ;;  %v1197_v25 = vsel %vm856_vm1, %v2987_v15, -inf }
 0x1c5   : > { %v2997_v19 = vpop.f32.mrf.mxu0  ;;  %v2999_v20 = vpop.f32.mrf.mxu1  ;;  %1183 = vmax.xlane.f32.xlu2 %v1182_v16  ;;  %1267 = vadd.xlane.f32.xlu0 %v1266_v17 }
 0x1c6   : > { %1201 = vmax.xlane.f32.xlu1 %v1200_v18  ;;  %v1206_v29 = vsel %vm856_vm1, %v2999_v20, -inf  ;;  %v1203_v30 = vsel %vm856_vm1, %v2997_v19, -inf }
 0x1cb   : > { %v1102_v22 = vpop.f32.mrf.mxu2  ;;  %v1121_v23 = vpop.f32.mrf.mxu3 }
 0x1cd   : > { %v1140_v26 = vpop.f32.mrf.mxu0  ;;  %v1159_v27 = vpop.f32.mrf.mxu1  ;;  %1264 = vadd.xlane.f32.xlu2 %v1263_v24  ;;  %1198 = vmax.xlane.f32.xlu0 %v1197_v25 }
 0x1ce   : > { %v1529_v26 = vsel %vm1356_vm2, %v849_v51, 0 }
 0x1d5   : > { %1195 = vmax.xlane.f32.xlu2 %v1194_v28  ;;  %1207 = vmax.xlane.f32.xlu0 %v1206_v29 }
 0x1dd   : > { %1204 = vmax.xlane.f32.xlu2 %v1203_v30 }
 0x218   : > { %v1175_v32 = vpop.xlane.xlu2 %1174 }
 0x219   : > { %v1213_v33 = vsub.f32 %v2946_v40, %v1175_v32 }
 0x21a   : > { %v1181_v34 = vpop.xlane.xlu1 %1180 }
 0x21b   : > { %v1233_v35 = vmul.f32 1.442695, %v1213_v33  ;;  %v1215_v36 = vsub.f32 %v2952_v43, %v1181_v34 }
 0x21d   : > { %2604 = vpow2.f32 %v1233_v35  ;;  %v1237_v38 = vmul.f32 1.442695, %v1215_v36 }
 0x21f   : > { %2606 = vpow2.f32 %v1237_v38 }
 0x220   : > { %v1178_v39 = vpop.xlane.xlu2 %1177 }
 0x221   : > { %v1214_v42 = vsub.f32 %v2948_v41, %v1178_v39  ;;  %v2564_v41 = vunpack.i.l.bf16 %v2563_v31 }
 0x223   : > { %v3016_v45 = vpop.eup %2604  ;;  %v1235_v46 = vmul.f32 1.442695, %v1214_v42  ;;  %v848_v54 = vpack.c.bf16 %v2564_v41, %v2564_v41 }
 0x224   : > { %v1269_v47 = vsel %vm856_vm1, %v3016_v45, 0.0 }
 0x225   : > { %2608 = vpow2.f32 %v1235_v46  ;;  %1270 = vadd.xlane.f32.xlu0 %v1269_v47  ;;  %v3020_v49 = vpop.eup %2606  ;;  %v1510_v11 = vsel %vm1356_vm2, %v848_v54, 0 }
 0x226   : > { %v1275_v58 = vsel %vm856_vm1, %v3020_v49, 0.0 }
 0x228   : > { %v1259_v37 = vpop.xlane.xlu2 %1258  ;;  %v1190_v40 = vpop.xlane.xlu0 %1189 }
 0x229   : > { %2610 = vrcp.f32 %v1259_v37  ;;  %v1218_v43 = vsub.f32 %v2966_v63, %v1190_v40 }
 0x22a   : > { %v1193_v62 = vpop.xlane.xlu1 %1192 }
 0x22b   : > { %v3023_v50 = vpop.eup %2608  ;;  %v1243_v57 = vmul.f32 1.442695, %v1218_v43  ;;  %v1219_v8 = vsub.f32 %v2972_v2, %v1193_v62 }
 0x22c   : > { %v1272_v59 = vsel %vm856_vm1, %v3023_v50, 0.0 }
 0x22d   : > { %2612 = vpow2.f32 %v1243_v57  ;;  %1276 = vadd.xlane.f32.xlu0 %v1275_v58  ;;  %1273 = vadd.xlane.f32.xlu1 %v1272_v59 }
 0x22f   : > { %v2611_v60 = vpop.eup %2610 }
 0x230   : > { %v1321_v0 = vmul.f32 %v2611_v60, %v2961_v61  ;;  %v1187_v1 = vpop.xlane.xlu2 %1186  ;;  %v1262_v63 = vpop.xlane.xlu0 %1261 }
 0x231   : > { %v1217_v4 = vsub.f32 %v2964_v55, %v1187_v1  ;;  %2614 = vrcp.f32 %v1262_v63  ;;  %v1245_v55 = vmul.f32 1.442695, %v1219_v8 }
 0x232   : > { %v1337_v5 = vpack.c.bf16 %v1321_v0, %v1321_v0 }
 0x233   : > { %v3031_v6 = vpop.eup %2612  ;;  %v1241_v9 = vmul.f32 1.442695, %v1217_v4 }
 0x234   : > { %2414 = vmatmul.msk.bf16.vlgmr.msra.gmra.mxu2 %vm856_vm1, %v1337_v5  ;;  %v1284_v12 = vsel %vm856_vm1, %v3031_v6, 0.0 }
 0x235   : > { %2616 = vpow2.f32 %v1241_v9  ;;  %1519 = vmatpush.bf16.msra.mxu2 %v1510_v11  ;;  %1285 = vadd.xlane.f32.xlu0 %v1284_v12 }
 0x237   : > { %v2615_v61 = vpop.eup %2614 }
 0x238   : > { %v1322_v13 = vmul.f32 %v2615_v61, %v2978_v7  ;;  %v1184_v52 = vpop.xlane.xlu2 %1183  ;;  %v1268_v16 = vpop.xlane.xlu0 %1267 }
 0x239   : > { %v1216_v2 = vsub.f32 %v2954_v44, %v1184_v52  ;;  %2618 = vrcp.f32 %v1268_v16  ;;  %v1202_v17 = vpop.xlane.xlu1 %1201 }
 0x23a   : > { %v1338_v18 = vpack.c.bf16 %v1322_v13, %v1322_v13  ;;  %v1222_v22 = vsub.f32 %v2989_v48, %v1202_v17  ;;  %2620 = vpow2.f32 %v1245_v55 }
 0x23b   : > { %v3041_v23 = vpop.eup %2616  ;;  %v1239_v24 = vmul.f32 1.442695, %v1216_v2 }
 0x23c   : > { %v1251_v25 = vmul.f32 1.442695, %v1222_v22  ;;  %2415 = vmatmul.msk.bf16.vlgmr.msrb.gmra.mxu3 %vm856_vm1, %v1338_v18  ;;  %v1281_v7 = vsel %vm856_vm1, %v3041_v23, 0.0 }
 0x23d   : > { %2622 = vpow2.f32 %v1239_v24  ;;  %1538 = vmatpush.bf16.msrb.mxu3 %v1529_v26  ;;  %1282 = vadd.xlane.f32.xlu2 %v1281_v7 }
 0x23e   : > { %2624 = vpow2.f32 %v1251_v25 }
 0x23f   : > { %v2619_v44 = vpop.eup %2618 }
 0x240   : > { %v1324_v27 = vmul.f32 %v2619_v44, %v2985_v14  ;;  %v1265_v48 = vpop.xlane.xlu2 %1264  ;;  %v1199_v28 = vpop.xlane.xlu0 %1198 }
 0x241   : > { %v3048_v29 = vpop.eup %2620  ;;  %2626 = vrcp.f32 %v1265_v48  ;;  %v1221_v30 = vsub.f32 %v2987_v15, %v1199_v28 }
 0x242   : > { %v1340_v31 = vpack.c.bf16 %v1324_v27, %v1324_v27  ;;  %v1287_v35 = vsel %vm856_vm1, %v3048_v29, 0.0 }
 0x243   : > { %v3051_v32 = vpop.eup %2622  ;;  %v1249_v33 = vmul.f32 1.442695, %v1221_v30 }
 0x244   : > { %v3053_v34 = vpop.eup %2624  ;;  %2417 = vmatmul.msk.bf16.vlgmr.msrb.gmra.mxu1 %vm856_vm1, %v1340_v31  ;;  %v1278_v14 = vsel %vm856_vm1, %v3051_v32, 0.0 }
 0x245   : > { %2628 = vpow2.f32 %v1249_v33  ;;  %1288 = vadd.xlane.f32.xlu2 %v1287_v35  ;;  %1279 = vadd.xlane.f32.xlu1 %v1278_v14  ;;  %v1296_v15 = vsel %vm856_vm1, %v3053_v34, 0.0 }
 0x246   : > { %1297 = vadd.xlane.f32.xlu0 %v1296_v15 }
 0x247   : > { %v2627_v36 = vpop.eup %2626 }
 0x248   : > { %v1323_v38 = vmul.f32 %v2627_v36, %v3001_v21  ;;  %v1196_v39 = vpop.xlane.xlu2 %1195  ;;  %v1208_v37 = vpop.xlane.xlu0 %1207 }
 0x249   : > { %v1224_v57 = vsub.f32 %v2999_v20, %v1208_v37  ;;  %v1220_v20 = vsub.f32 %v2974_v3, %v1196_v39 }
 0x24a   : > { %v1339_v42 = vpack.c.bf16 %v1323_v38, %v1323_v38 }
 0x24b   : > { %v3063_v46 = vpop.eup %2628  ;;  %v1255_v58 = vmul.f32 1.442695, %v1224_v57  ;;  %v1247_v62 = vmul.f32 1.442695, %v1220_v20 }
 0x24c   : > { %2416 = vmatmul.msk.bf16.vlgmr.msrb.gmra.mxu0 %vm856_vm1, %v1339_v42  ;;  %v1293_v47 = vsel %vm856_vm1, %v3063_v46, 0.0 }
 0x24d   : > { %1294 = vadd.xlane.f32.xlu2 %v1293_v47 }
 0x250   : > { %v1205_v40 = vpop.xlane.xlu2 %1204 }
 0x251   : > { %v1223_v43 = vsub.f32 %v2997_v19, %v1205_v40 }
 0x253   : > { %v1253_v41 = vmul.f32 1.442695, %v1223_v43  ;;  %v572_v43 = vld [vmem:[%s3303_s7] sm:$0xf] }
 0x254   : > { %v1691_v20 = vsel %vm1356_vm2, %v572_v43, 0 }
 0x255   : > { %2630 = vpow2.f32 %v1253_v41 }
 0x256   : > { %2632 = vpow2.f32 %v1255_v58 }
 0x257   : > { %2634 = vpow2.f32 %v1247_v62 }
 0x25a   : > { %2577 = vrot.lane.b32.xlu0 %v2871_v53, %s2698_s22 }
 0x25b   : > { %v3072_v21 = vpop.eup %2630 }
 0x25c   : > { %v1299_v59 = vsel %vm856_vm1, %v3072_v21, 0.0  ;;  %v3078_v60 = vpop.eup %2632 }
 0x25d   : > { %1300 = vadd.xlane.f32.xlu2 %v1299_v59  ;;  %v1302_v19 = vsel %vm856_vm1, %v3078_v60, 0.0  ;;  %v3085_v54 = vpop.eup %2634 }
 0x25e   : > { %2572 = vrot.lane.b32.xlu1 %v2883_v56, %s2700_s25  ;;  %v1290_v0 = vsel %vm856_vm1, %v3085_v54, 0.0 }
 0x265   : > { %1303 = vadd.xlane.f32.xlu2 %v1302_v19 }
 0x27d   : > { %2582 = vrot.lane.b32.xlu2 %v2871_v53, %s2700_s25 }
 0x288   : > { %1291 = vadd.xlane.f32.xlu1 %v1290_v0 }
 0x298   : > { %v1271_v56 = vpop.xlane.xlu0 %1270 }
 0x299   : > { %2636 = vrcp.f32 %v1271_v56 }
 0x29f   : > { %v2637_v1 = vpop.eup %2636 }
 0x2a0   : > { %v1325_v63 = vmul.f32 %v2637_v1, %v3016_v45  ;;  %v1277_v4 = vpop.xlane.xlu0 %1276  ;;  %v1274_v5 = vpop.xlane.xlu1 %1273 }
 0x2a1   : > { %2638 = vrcp.f32 %v1277_v4 }
 0x2a2   : > { %v1341_v3 = vpack.c.bf16 %v1325_v63, %v1325_v63  ;;  %2640 = vrcp.f32 %v1274_v5 }
 0x2a4   : > { %2418 = vmatmul.msk.bf16.vlgmr.msrb.gmra.mxu2 %vm856_vm1, %v1341_v3 }
 0x2a7   : > { %v2639_v53 = vpop.eup %2638 }
 0x2a8   : > { %v2641_v8 = vpop.eup %2640  ;;  %v1327_v9 = vmul.f32 %v2639_v53, %v3020_v49  ;;  %v1286_v61 = vpop.xlane.xlu0 %1285 }
 0x2a9   : > { %v1326_v10 = vmul.f32 %v2641_v8, %v3023_v50  ;;  %2642 = vrcp.f32 %v1286_v61 }
 0x2aa   : > { %v1343_v11 = vpack.c.bf16 %v1327_v9, %v1327_v9 }
 0x2ab   : > { %v1342_v12 = vpack.c.bf16 %v1326_v10, %v1326_v10 }
 0x2ac   : > { %2420 = vmatmul.msk.bf16.vlgmr.msra.gmra.mxu0 %vm856_vm1, %v1343_v11 }
 0x2ad   : > { %2419 = vmatmul.msk.bf16.vlgmr.msra.gmra.mxu3 %vm856_vm1, %v1342_v12 }
 0x2af   : > { %v2643_v55 = vpop.eup %2642 }
 0x2b0   : > { %v1283_v45 = vpop.xlane.xlu2 %1282  ;;  %v1330_v13 = vmul.f32 %v2643_v55, %v3031_v6 }
 0x2b1   : > { %2644 = vrcp.f32 %v1283_v45 }
 0x2b2   : > { %v1346_v2 = vpack.c.bf16 %v1330_v13, %v1330_v13 }
 0x2b7   : > { %v2645_v51 = vpop.eup %2644  ;;  %v3096_v52 = vpop.f32.mrf.mxu2 }
 0x2b8   : > { %v1329_v49 = vmul.f32 %v2645_v51, %v3041_v23  ;;  %v1280_v16 = vpop.xlane.xlu1 %1279  ;;  %v1289_v17 = vpop.xlane.xlu2 %1288  ;;  %v1658_v5 = vpack.c.bf16 %v3096_v52, %v3096_v52 }
 0x2b9   : > { %2646 = vrcp.f32 %v1280_v16  ;;  %v1298_v26 = vpop.xlane.xlu0 %1297 }
 0x2ba   : > { %v1345_v50 = vpack.c.bf16 %v1329_v49, %v1329_v49  ;;  %2648 = vrcp.f32 %v1289_v17  ;;  %v1678_v12 = vunpack.c.l.b16 %v1658_v5 }
 0x2bb   : > { %2650 = vrcp.f32 %v1298_v26 }
 0x2bc   : > { %2422 = vmatmul.msk.bf16.vlgmr.msra.gmra.mxu2 %vm856_vm1, %v1345_v50 }
 0x2bd   : > { %2423 = vmatmul.msk.bf16.vlgmr.msrb.gmra.mxu3 %vm856_vm1, %v1346_v2 }
 0x2bf   : > { %v1371_v18 = vpop.f32.mrf.mxu2  ;;  %v1388_v22 = vpop.f32.mrf.mxu3 }
 0x2c0   : > { %v2647_v24 = vpop.eup %2646  ;;  %v1295_v23 = vpop.xlane.xlu2 %1294 }
 0x2c1   : > { %v3101_v25 = vpop.f32.mrf.mxu1  ;;  %v1328_v6 = vmul.f32 %v2647_v24, %v3051_v32  ;;  %2652 = vrcp.f32 %v1295_v23  ;;  %v2649_v28 = vpop.eup %2648 }
 0x2c2   : > { %v2651_v35 = vpop.eup %2650  ;;  %v1331_v14 = vmul.f32 %v2649_v28, %v3048_v29  ;;  %v1661_v52 = vpack.c.bf16 %v3101_v25, %v3101_v25  ;;  %v573_v25 = vld [vmem:[%s3303_s7 + $0x4] sm:$0xf] }
 0x2c3   : > { %v1344_v7 = vpack.c.bf16 %v1328_v6, %v1328_v6  ;;  %v1334_v57 = vmul.f32 %v2651_v35, %v3053_v34  ;;  %v1736_v6 = vsel %vm1356_vm2, %v573_v25, 0 }
 0x2c4   : > { %v1347_v29 = vpack.c.bf16 %v1331_v14, %v1331_v14  ;;  %v1681_v49 = vunpack.c.l.b16 %v1661_v52 }
 0x2c5   : > { %2421 = vmatmul.msk.bf16.vlgmr.msra.gmra.mxu1 %vm856_vm1, %v1344_v7  ;;  %v1350_v34 = vpack.c.bf16 %v1334_v57, %v1334_v57 }
 0x2c7   : > { %v1390_v44 = vpop.f32.mrf.mxu3  ;;  %v2653_v36 = vpop.eup %2652 }
 0x2c8   : > { %v1333_v58 = vmul.f32 %v2653_v36, %v3063_v46  ;;  %v1659_v46 = vpack.c.bf16 %v1388_v22, %v1388_v22 }
 0x2c9   : > { %v1407_v27 = vpop.f32.mrf.mxu0  ;;  %v1428_v48 = vpop.f32.mrf.mxu1 }
 0x2ca   : > { %v1349_v56 = vpack.c.bf16 %v1333_v58, %v1333_v58  ;;  %v1679_v8 = vunpack.c.l.b16 %v1659_v46  ;;  %v1660_v13 = vpack.c.bf16 %v1407_v27, %v1407_v27 }
 0x2cc   : > { %v2578_v30 = vpop.permute.xlu0 %2577  ;;  %v1682_v55 = vpack.c.b16 %v1679_v8, %v1678_v12 }
 0x2cd   : > { %v2580_v31 = vunpack.i.h.bf16 %v2578_v30  ;;  %v2579_v33 = vunpack.i.l.bf16 %v2578_v30 }
 0x2cf   : > { %v851_v15 = vpack.c.bf16 %v2580_v31, %v2580_v31  ;;  %v850_v32 = vpack.c.bf16 %v2579_v33, %v2579_v33 }
 0x2d0   : > { %v1301_v38 = vpop.xlane.xlu2 %1300  ;;  %v2573_v39 = vpop.permute.xlu1 %2572 }
 0x2d1   : > { %v2575_v42 = vunpack.i.h.bf16 %v2573_v39  ;;  %v2574_v47 = vunpack.i.l.bf16 %v2573_v39  ;;  %v1409_v37 = vpop.f32.mrf.mxu0  ;;  %v1548_v40 = vsel %vm1356_vm2, %v850_v32, 0  ;;  %v1567_v41 = vsel %vm1356_vm2, %v851_v15, 0 }
 0x2d2   : > { %1557 = vmatpush.bf16.msrb.mxu0 %v1548_v40  ;;  %1576 = vmatpush.bf16.msrb.mxu1 %v1567_v41  ;;  %2654 = vrcp.f32 %v1301_v38  ;;  %v575_v38 = vld [vmem:[%s3303_s7 + $0xc] sm:$0xf] }
 0x2d3   : > { %v853_v59 = vpack.c.bf16 %v2575_v42, %v2575_v42  ;;  %v852_v19 = vpack.c.bf16 %v2574_v47, %v2574_v47  ;;  %v1820_v42 = vsel %vm1356_vm2, %v575_v38, 0 }
 0x2d5   : > { %2424 = vmatmul.msk.bf16.vlgmr.msrb.gmra.mxu0 %vm856_vm1, %v1347_v29  ;;  %v1586_v62 = vsel %vm1356_vm2, %v852_v19, 0  ;;  %v1605_v0 = vsel %vm1356_vm2, %v853_v59, 0 }
 0x2d6   : > { %1595 = vmatpush.bf16.msrb.mxu2 %v1586_v62  ;;  %1614 = vmatpush.bf16.msra.mxu3 %v1605_v0 }
 0x2d8   : > { %v1304_v1 = vpop.xlane.xlu2 %1303  ;;  %v2655_v63 = vpop.eup %2654 }
 0x2d9   : > { %2426 = vmatmul.msk.bf16.vlgmr.msrb.gmra.mxu2 %vm856_vm1, %v1349_v56  ;;  %2427 = vmatmul.msk.bf16.vlgmr.msra.gmra.mxu3 %vm856_vm1, %v1350_v34  ;;  %v1335_v9 = vmul.f32 %v2655_v63, %v3072_v21  ;;  %v1680_v21 = vunpack.c.l.b16 %v1660_v13 }
 0x2da   : > { %1700 = vmatpush.bf16.msra.mxu2 %v1691_v20  ;;  %1745 = vmatpush.bf16.msrb.mxu3 %v1736_v6 }
 0x2db   : > { %v1351_v51 = vpack.c.bf16 %v1335_v9, %v1335_v9  ;;  %v1683_v16 = vpack.c.b16 %v1681_v49, %v1680_v21 }
 0x2e0   : > { %v2583_v4 = vpop.permute.xlu2 %2582 }
 0x2e1   : > { %v2585_v3 = vunpack.i.h.bf16 %v2583_v4  ;;  %v2584_v53 = vunpack.i.l.bf16 %v2583_v4 }
 0x2e3   : > { %v855_v10 = vpack.c.bf16 %v2585_v3, %v2585_v3  ;;  %v854_v11 = vpack.c.bf16 %v2584_v53, %v2584_v53 }
 0x2e5   : > { %v1624_v61 = vsel %vm1356_vm2, %v854_v11, 0  ;;  %v1643_v45 = vsel %vm1356_vm2, %v855_v10, 0 }
 0x2e6   : > { %1633 = vmatpush.bf16.msra.mxu0 %v1624_v61  ;;  %1652 = vmatpush.bf16.msra.mxu1 %v1643_v45 }
 0x2e9   : > { %2428 = vmatmul.msk.bf16.vlgmr.msra.gmra.mxu0 %vm856_vm1, %v1351_v51  ;;  %2430 = vmatmul.msk.bf16.vlgmr.msra.gmra.mxu2 %vm856_vm1, %v1682_v55 }
 0x2f9   : > { %2431 = vmatmul.msk.bf16.gmra.mxu2 %vm856_vm1, %v1683_v16 }
 0x2fb   : > { %v1292_v50 = vpop.xlane.xlu1 %1291 }
 0x2fc   : > { %2656 = vrcp.f32 %v1292_v50 }
 0x2fd   : > { %2658 = vrcp.f32 %v1304_v1 }
 0x302   : > { %v2657_v2 = vpop.eup %2656 }
 0x303   : > { %v1332_v17 = vmul.f32 %v2657_v2, %v3085_v54  ;;  %v2659_v22 = vpop.eup %2658  ;;  %v574_v54 = vld [vmem:[%s3303_s7 + $0x8] sm:$0xf] }
 0x304   : > { %v1336_v24 = vmul.f32 %v2659_v22, %v3078_v60  ;;  %v1778_v7 = vsel %vm1356_vm2, %v574_v54, 0  ;;  %v2589_v22 = vld [vmem:[%s3304_s8] ss:$0 sm:$0xff] }
 0x305   : > { %v1348_v18 = vpack.c.bf16 %v1332_v17, %v1332_v17  ;;  %1787 = vmatpush.bf16.msrb.mxu0 %v1778_v7 }
 0x306   : > { %v1352_v26 = vpack.c.bf16 %v1336_v24, %v1336_v24 }
 0x307   : > { %2425 = vmatmul.msk.bf16.vlgmr.msrb.gmra.mxu1 %vm856_vm1, %v1348_v18 }
 0x308   : > { %1829 = vmatpush.bf16.msrb.mxu1 %v1820_v42 }
 0x317   : > { %2429 = vmatmul.msk.bf16.vlgmr.msra.gmra.mxu1 %vm856_vm1, %v1352_v26 }
 0x327   : > { %v1445_v23 = vpop.f32.mrf.mxu2 }
 0x328   : > { %v1662_v60 = vpack.c.bf16 %v1445_v23, %v1445_v23 }
 0x329   : > { %v1483_v44 = vpop.f32.mrf.mxu0 }
 0x32a   : > { %v1723_v31 = vunpack.c.l.b16 %v1662_v60  ;;  %v1664_v47 = vpack.c.bf16 %v1483_v44, %v1483_v44 }
 0x32c   : > { %v1725_v29 = vunpack.c.l.b16 %v1664_v47 }
 0x32f   : > { %v1447_v27 = vpop.f32.mrf.mxu2 }
 0x330   : > { %v1464_v48 = vpop.f32.mrf.mxu3 }
 0x331   : > { %v1663_v28 = vpack.c.bf16 %v1464_v48, %v1464_v48  ;;  %v1485_v30 = vpop.f32.mrf.mxu0  ;;  %v2686_v48 = vld [vmem:[%s2826_s18] sm:$0xff] }
 0x333   : > { %v1724_v33 = vunpack.c.l.b16 %v1663_v28 }
 0x335   : > { %v1727_v35 = vpack.c.b16 %v1724_v33, %v1723_v31 }
 0x337   : > { %2432 = vmatmul.msk.bf16.vlgmr.msrb.gmra.mxu3 %vm856_vm1, %v1727_v35 }
 0x338   : > { %v1466_v14 = vpop.f32.mrf.mxu3 }
 0x33f   : > { %v1521_v15 = vpop.f32.mrf.mxu2 }
 0x340   : > { %v1666_v32 = vpack.c.bf16 %v1521_v15, %v1521_v15  ;;  %v1540_v36 = vpop.f32.mrf.mxu3 }
 0x341   : > { %v1667_v39 = vpack.c.bf16 %v1540_v36, %v1540_v36 }
 0x342   : > { %v1765_v37 = vunpack.c.l.b16 %v1666_v32  ;;  %v1502_v43 = vpop.f32.mrf.mxu1  ;;  %v2687_v32 = vld [vmem:[%s2826_s18 + $0x8] sm:$0xff] }
 0x343   : > { %v1766_v40 = vunpack.c.l.b16 %v1667_v39  ;;  %v1665_v57 = vpack.c.bf16 %v1502_v43, %v1502_v43 }
 0x345   : > { %v1769_v41 = vpack.c.b16 %v1766_v40, %v1765_v37  ;;  %v1726_v58 = vunpack.c.l.b16 %v1665_v57 }
 0x347   : > { %2434 = vmatmul.msk.bf16.vlgmr.msrb.gmra.mxu0 %vm856_vm1, %v1769_v41  ;;  %v1523_v59 = vpop.f32.mrf.mxu2  ;;  %v1728_v19 = vpack.c.b16 %v1726_v58, %v1725_v29 }
 0x348   : > { %v1542_v20 = vpop.f32.mrf.mxu3 }
 0x349   : > { %2433 = vmatmul.msk.bf16.gmra.mxu3 %vm856_vm1, %v1728_v19  ;;  %v2688_v19 = vld [vmem:[%s2826_s18 + $0x10] sm:$0xff] }
 0x34a   : > { %v1504_v62 = vpop.f32.mrf.mxu1 }
 0x352   : > { %v1559_v0 = vpop.f32.mrf.mxu0 }
 0x353   : > { %v1668_v11 = vpack.c.bf16 %v1559_v0, %v1559_v0 }
 0x355   : > { %v1767_v45 = vunpack.c.l.b16 %v1668_v11 }
 0x35a   : > { %v1561_v34 = vpop.f32.mrf.mxu0 }
 0x35c   : > { %v1597_v56 = vpop.f32.mrf.mxu2  ;;  %v1616_v1 = vpop.f32.mrf.mxu3 }
 0x35d   : > { %v1670_v46 = vpack.c.bf16 %v1597_v56, %v1597_v56  ;;  %v1671_v63 = vpack.c.bf16 %v1616_v1, %v1616_v1 }
 0x35f   : > { %v1807_v4 = vunpack.c.l.b16 %v1670_v46  ;;  %v1808_v5 = vunpack.c.l.b16 %v1671_v63  ;;  %v2689_v63 = vld [vmem:[%s2826_s18 + $0x18] sm:$0xff] }
 0x361   : > { %v1811_v3 = vpack.c.b16 %v1808_v5, %v1807_v4 }
 0x363   : > { %2436 = vmatmul.msk.bf16.vlgmr.msrb.gmra.mxu1 %vm856_vm1, %v1811_v3  ;;  %v2701_v3 = vmov 32.0  }
 0x364   : > { %v1599_v53 = vpop.f32.mrf.mxu2  ;;  %v1618_v8 = vpop.f32.mrf.mxu3  ;;  %2660 = vrcp.f32 %v2701_v3 }
 0x366   : > { %v1635_v9 = vpop.f32.mrf.mxu0 }
 0x367   : > { %v1672_v52 = vpack.c.bf16 %v1635_v9, %v1635_v9 }
 0x369   : > { %v1809_v16 = vunpack.c.l.b16 %v1672_v52 }
 0x36a   : > { %v2661_v53 = vpop.eup %2660 }
 0x36b   : > { %v1864_v8 = vmul.f32 32.0, %v2661_v53  ;;  %vm1868_vm3 = vweird.f32 %v2661_v53 }
 0x36c   : > { %v1702_v18 = vpop.f32.mrf.mxu2 }
 0x36d   : > { %v1715_v6 = vadd.f32 %v2589_v22, %v1702_v18  ;;  %v1865_v9 = vsub.f32 1.0, %v1864_v8 }
 0x36e   : > { %v1637_v10 = vpop.f32.mrf.mxu0 }
 0x36f   : > { %v1866_v10 = vmul.f32 %v2661_v53, %v1865_v9 }
 0x371   : > { %v1867_v11 = vadd.f32 %v2661_v53, %v1866_v10 }
 0x374   : > { %v1704_v7 = vpop.f32.mrf.mxu2 }
 0x375   : > { %v1716_v27 = vadd.f32 %v2589_v22, %v1704_v7 }
 0x37c   : > { %v1707_v39 = vpop.f32.mrf.mxu2 }
 0x37d   : > { %v1717_v37 = vadd.f32 %v2589_v22, %v1707_v39 }
 0x384   : > { %v1578_v12 = vpop.f32.mrf.mxu1  ;;  %v1709_v57 = vpop.f32.mrf.mxu2 }
 0x385   : > { %v1669_v61 = vpack.c.bf16 %v1578_v12, %v1578_v12  ;;  %v1718_v59 = vadd.f32 %v2589_v22, %v1709_v57  ;;  %v3162_v12 = vsel %vm1868_vm3, %v2661_v53, %v1867_v11 }
 0x387   : > { %v1768_v55 = vunpack.c.l.b16 %v1669_v61 }
 0x389   : > { %v1770_v51 = vpack.c.b16 %v1768_v55, %v1767_v45 }
 0x38b   : > { %2435 = vmatmul.msk.bf16.gmra.mxu0 %vm856_vm1, %v1770_v51 }
 0x38c   : > { %v1580_v13 = vpop.f32.mrf.mxu1 }
 0x394   : > { %v1654_v21 = vpop.f32.mrf.mxu1 }
 0x395   : > { %v1673_v49 = vpack.c.bf16 %v1654_v21, %v1654_v21 }
 0x397   : > { %v1810_v50 = vunpack.c.l.b16 %v1673_v49 }
 0x399   : > { %v1812_v2 = vpack.c.b16 %v1810_v50, %v1809_v16 }
 0x39b   : > { %2437 = vmatmul.msk.bf16.gmra.mxu1 %vm856_vm1, %v1812_v2  ;;  %vm2165_vm1 = vcmask 523264  }
 0x39c   : > { %v1656_v17 = vpop.f32.mrf.mxu1 }
 0x3ba   : > { %v1747_v24 = vpop.f32.mrf.mxu3 }
 0x3bb   : > { %v1757_v26 = vadd.f32 %v1747_v24, %v1715_v6 }
 0x3c2   : > { %v1749_v60 = vpop.f32.mrf.mxu3 }
 0x3c3   : > { %v1758_v31 = vadd.f32 %v1749_v60, %v1716_v27 }
 0x3c4   : > { %v1789_v25 = vpop.f32.mrf.mxu0 }
 0x3c5   : > { %v1799_v54 = vadd.f32 %v1789_v25, %v1757_v26 }
 0x3cc   : > { %v1791_v30 = vpop.f32.mrf.mxu0  ;;  %v1752_v42 = vpop.f32.mrf.mxu3 }
 0x3cd   : > { %v1800_v35 = vadd.f32 %v1791_v30, %v1758_v31  ;;  %v1759_v40 = vadd.f32 %v1752_v42, %v1717_v37 }
 0x3d4   : > { %v1754_v58 = vpop.f32.mrf.mxu3 }
 0x3d5   : > { %v1760_v0 = vadd.f32 %v1754_v58, %v1718_v59  ;;  %v2591_v58 = vld [vmem:[%s3306_s10] ss:$0 sm:$0xff] }
 0x3e0   : > { %v1831_v23 = vpop.f32.mrf.mxu1 }
 0x3e1   : > { %v1841_v44 = vadd.f32 %v1831_v23, %v1799_v54 }
 0x3e3   : > { %v1845_v28 = vadd.f32 %v2686_v48, %v1841_v44  ;;  %v2479_v44 = vld [vmem:[%s3307_s11 + $0x8] sm:$0xff]  ;;  %v2478_v48 = vld [vmem:[%s3307_s11] sm:$0xff] }
 0x3e4   : > { %1994 = vmatpush.bf16.msrb.mxu2 %v2479_v44 }
 0x3e5   : > { %v1851_v33 = vsel %vm594_vm0, %v1845_v28, 0.0 }
 0x3e6   : > { %1852 = vadd.xlane.f32.xlu0 %v1851_v33 }
 0x3e8   : > { %v1833_v14 = vpop.f32.mrf.mxu1  ;;  %1995 = vmatpush.bf16.msrb.mxu2 %v2478_v48 }
 0x3e9   : > { %v1842_v15 = vadd.f32 %v1833_v14, %v1800_v35 }
 0x3eb   : > { %v1846_v36 = vadd.f32 %v2687_v32, %v1842_v15 }
 0x3ed   : > { %v1854_v38 = vsel %vm594_vm0, %v1846_v36, 0.0 }
 0x3ee   : > { %1855 = vadd.xlane.f32.xlu1 %v1854_v38 }
 0x408   : > { %v1794_v47 = vpop.f32.mrf.mxu0 }
 0x409   : > { %v1801_v43 = vadd.f32 %v1794_v47, %v1759_v40 }
 0x410   : > { %v1796_v62 = vpop.f32.mrf.mxu0 }
 0x411   : > { %v1802_v56 = vadd.f32 %v1796_v62, %v1760_v0 }
 0x418   : > { %v1836_v41 = vpop.f32.mrf.mxu1 }
 0x419   : > { %v1843_v29 = vadd.f32 %v1836_v41, %v1801_v43  ;;  %v2590_v43 = vld [vmem:[%s3305_s9] ss:$0 sm:$0xff] }
 0x41b   : > { %v1847_v20 = vadd.f32 %v2688_v19, %v1843_v29 }
 0x41d   : > { %v1857_v34 = vsel %vm594_vm0, %v1847_v20, 0.0 }
 0x41e   : > { %1858 = vadd.xlane.f32.xlu2 %v1857_v34 }
 0x420   : > { %v1838_v1 = vpop.f32.mrf.mxu1 }
 0x421   : > { %v1844_v46 = vadd.f32 %v1838_v1, %v1802_v56 }
 0x423   : > { %v1848_v4 = vadd.f32 %v2689_v63, %v1844_v46 }
 0x425   : > { %v1860_v5 = vsel %vm594_vm0, %v1848_v4, 0.0 }
 0x426   : > { %1861 = vadd.xlane.f32.xlu1 %v1860_v5 }
 0x459   : > { %v1853_v61 = vpop.xlane.xlu0 %1852 }
 0x45a   : > { %v1870_v45 = vmul.f32 %v3162_v12, %v1853_v61 }
 0x45c   : > { %v1874_v55 = vsub.f32 %v1845_v28, %v1870_v45 }
 0x45e   : > { %v1878_v51 = vmul.f32 %v1874_v55, %v1874_v55 }
 0x460   : > { %v1882_v13 = vsel %vm594_vm0, %v1878_v51, 0.0 }
 0x461   : > { %v1856_v52 = vpop.xlane.xlu1 %1855  ;;  %1883 = vadd.xlane.f32.xlu1 %v1882_v13 }
 0x462   : > { %v1871_v21 = vmul.f32 %v3162_v12, %v1856_v52 }
 0x464   : > { %v1875_v49 = vsub.f32 %v1846_v36, %v1871_v21 }
 0x466   : > { %v1879_v16 = vmul.f32 %v1875_v49, %v1875_v49 }
 0x468   : > { %v1885_v50 = vsel %vm594_vm0, %v1879_v16, 0.0 }
 0x469   : > { %1886 = vadd.xlane.f32.xlu0 %v1885_v50 }
 0x491   : > { %v1859_v2 = vpop.xlane.xlu2 %1858 }
 0x492   : > { %v1872_v17 = vmul.f32 %v3162_v12, %v1859_v2 }
 0x494   : > { %v3169_v18 = vsub.f32 %v1847_v20, %v1872_v17 }
 0x496   : > { %v1880_v22 = vmul.f32 %v3169_v18, %v3169_v18 }
 0x498   : > { %v1888_v24 = vsel %vm594_vm0, %v1880_v22, 0.0 }
 0x499   : > { %1889 = vadd.xlane.f32.xlu1 %v1888_v24  ;;  %v1862_v25 = vpop.xlane.xlu1 %1861 }
 0x49a   : > { %v1873_v6 = vmul.f32 %v3162_v12, %v1862_v25 }
 0x49c   : > { %v3175_v26 = vsub.f32 %v1848_v4, %v1873_v6 }
 0x49e   : > { %v1881_v54 = vmul.f32 %v3175_v26, %v3175_v26 }
 0x4a0   : > { %v1891_v7 = vsel %vm594_vm0, %v1881_v54, 0.0 }
 0x4a1   : > { %1892 = vadd.xlane.f32.xlu0 %v1891_v7  ;;  %v2483_v7 = vld [vmem:[%s3309_s13 + $0x18] sm:$0xff] }
 0x4a2   : > { %2176 = vmatpush.bf16.msra.mxu3 %v2483_v7 }
 0x4d4   : > { %v1884_v23 = vpop.xlane.xlu1 %1883 }
 0x4d5   : > { %v1894_v60 = vmul.f32 %v1884_v23, %v3162_v12 }
 0x4d7   : > { %v1898_v27 = vadd.f32 1e-05, %v1894_v60 }
 0x4d9   : > { %2662 = vrsqrt.f32 %v1898_v27  ;;  %vm1908_vm5 = vweird.f32 %v1898_v27 }
 0x4dc   : > { %v1887_v28 = vpop.xlane.xlu0 %1886 }
 0x4dd   : > { %v1895_v30 = vmul.f32 %v1887_v28, %v3162_v12 }
 0x4df   : > { %v2663_v31 = vpop.eup %2662  ;;  %v1899_v33 = vadd.f32 1e-05, %v1895_v30 }
 0x4e0   : > { %v1903_v35 = vmul.f32 %v2663_v31, %v1898_v27  ;;  %vm1909_vm4 = vweird.f32 %v2663_v31  ;;  %v2482_v27 = vld [vmem:[%s3309_s13 + $0x10] sm:$0xff] }
 0x4e1   : > { %2664 = vrsqrt.f32 %v1899_v33  ;;  %vm1910_vm6 = vmor %vm1908_vm5, %vm1909_vm4  ;;  %vm1918_vm8 = vweird.f32 %v1899_v33  ;;  %2177 = vmatpush.bf16.msra.mxu3 %v2482_v27 }
 0x4e2   : > { %v1904_v14 = vmul.f32 %v2663_v31, %v1903_v35 }
 0x4e4   : > { %v1905_v15 = vmul.f32 0.5, %v1904_v14  ;;  %v2481_v14 = vld [vmem:[%s3309_s13 + $0x8] sm:$0xff] }
 0x4e5   : > { %2178 = vmatpush.bf16.msra.mxu3 %v2481_v14 }
 0x4e6   : > { %v1906_v32 = vsub.f32 1.5, %v1905_v15 }
 0x4e7   : > { %v2665_v36 = vpop.eup %2664 }
 0x4e8   : > { %v1907_v38 = vmul.f32 %v2663_v31, %v1906_v32  ;;  %v1913_v39 = vmul.f32 %v2665_v36, %v1899_v33  ;;  %vm1919_vm7 = vweird.f32 %v2665_v36 }
 0x4e9   : > { %vm1920_vm9 = vmor %vm1918_vm8, %vm1919_vm7 }
 0x4ea   : > { %v1914_v42 = vmul.f32 %v2665_v36, %v1913_v39  ;;  %v1911_v47 = vsel %vm1910_vm6, %v2663_v31, %v1907_v38 }
 0x4eb   : > { %v1942_v57 = vmul.f32 %v1911_v47, %v1874_v55  ;;  %v2480_v47 = vld [vmem:[%s3309_s13] sm:$0xff] }
 0x4ec   : > { %v1915_v37 = vmul.f32 0.5, %v1914_v42  ;;  %2179 = vmatpush.bf16.msra.mxu3 %v2480_v47 }
 0x4ed   : > { %v1949_v59 = vmul.f32 %v2590_v43, %v1942_v57 }
 0x4ee   : > { %v1916_v40 = vsub.f32 1.5, %v1915_v37 }
 0x4ef   : > { %v3194_v62 = vadd.f32 %v2591_v58, %v1949_v59 }
 0x4f0   : > { %v1917_v41 = vmul.f32 %v2665_v36, %v1916_v40 }
 0x4f2   : > { %v1921_v29 = vsel %vm1920_vm9, %v2665_v36, %v1917_v41 }
 0x4f3   : > { %v1943_v19 = vmul.f32 %v1921_v29, %v1875_v49 }
 0x4f5   : > { %v1950_v20 = vmul.f32 %v2590_v43, %v1943_v19 }
 0x4f7   : > { %v3196_v0 = vadd.f32 %v2591_v58, %v1950_v20 }
 0x4f9   : > { %v1960_v34 = vpack.c.bf16 %v3196_v0, %v3194_v62 }
 0x4fb   : > { %2446 = vmatmul.msk.bf16.vlgmr.msrb.gmra.mxu2 %vm594_vm0, %v1960_v34 }
 0x50c   : > { %v1890_v56 = vpop.xlane.xlu1 %1889 }
 0x50d   : > { %v1896_v1 = vmul.f32 %v1890_v56, %v3162_v12 }
 0x50f   : > { %v1900_v46 = vadd.f32 1e-05, %v1896_v1 }
 0x511   : > { %2666 = vrsqrt.f32 %v1900_v46  ;;  %vm1928_vm11 = vweird.f32 %v1900_v46 }
 0x514   : > { %v1893_v63 = vpop.xlane.xlu0 %1892 }
 0x515   : > { %v1897_v4 = vmul.f32 %v1893_v63, %v3162_v12 }
 0x517   : > { %v2667_v5 = vpop.eup %2666  ;;  %v1901_v3 = vadd.f32 1e-05, %v1897_v4 }
 0x518   : > { %v1923_v53 = vmul.f32 %v2667_v5, %v1900_v46  ;;  %vm1929_vm10 = vweird.f32 %v2667_v5 }
 0x519   : > { %2668 = vrsqrt.f32 %v1901_v3  ;;  %vm1930_vm12 = vmor %vm1928_vm11, %vm1929_vm10  ;;  %vm1938_vm14 = vweird.f32 %v1901_v3 }
 0x51a   : > { %v1924_v8 = vmul.f32 %v2667_v5, %v1923_v53 }
 0x51c   : > { %v1925_v9 = vmul.f32 0.5, %v1924_v8 }
 0x51e   : > { %v1926_v10 = vsub.f32 1.5, %v1925_v9 }
 0x51f   : > { %v2669_v11 = vpop.eup %2668 }
 0x520   : > { %v1927_v61 = vmul.f32 %v2667_v5, %v1926_v10  ;;  %v1933_v45 = vmul.f32 %v2669_v11, %v1901_v3  ;;  %vm1939_vm13 = vweird.f32 %v2669_v11 }
 0x521   : > { %vm1940_vm15 = vmor %vm1938_vm14, %vm1939_vm13 }
 0x522   : > { %v1934_v55 = vmul.f32 %v2669_v11, %v1933_v45  ;;  %v1931_v51 = vsel %vm1930_vm12, %v2667_v5, %v1927_v61 }
 0x523   : > { %v1944_v21 = vmul.f32 %v1931_v51, %v3169_v18  ;;  %v3215_v18 = vld [vmem:[%s3308_s12] ss:$0 sm:$0xff] }
 0x524   : > { %v1935_v13 = vmul.f32 0.5, %v1934_v55 }
 0x525   : > { %v1951_v2 = vmul.f32 %v2590_v43, %v1944_v21 }
 0x526   : > { %v1936_v52 = vsub.f32 1.5, %v1935_v13 }
 0x527   : > { %v3205_v22 = vadd.f32 %v2591_v58, %v1951_v2 }
 0x528   : > { %v1937_v49 = vmul.f32 %v2669_v11, %v1936_v52 }
 0x52a   : > { %v1941_v16 = vsel %vm1940_vm15, %v2669_v11, %v1937_v49 }
 0x52b   : > { %v1945_v50 = vmul.f32 %v1941_v16, %v3175_v26 }
 0x52d   : > { %v1952_v17 = vmul.f32 %v2590_v43, %v1945_v50 }
 0x52f   : > { %v3207_v24 = vadd.f32 %v2591_v58, %v1952_v17 }
 0x531   : > { %v1961_v25 = vpack.c.bf16 %v3207_v24, %v3205_v22 }
 0x533   : > { %2447 = vmatmul.msk.bf16.gmra.mxu2 %vm594_vm0, %v1961_v25 }
 0x57e   : > { %v1997_v6 = vpop.f32.mrf.mxu2 }
 0x57f   : > { %v3218_v54 = vadd.f32 %v3215_v18, %v1997_v6 }
 0x581   : > { %v2011_v26 = vmul.f32 0.70710677, %v3218_v54 }
 0x583   : > { %v2448_v23 = vclamps-f32 %v2011_v26, 4.0 }
 0x585   : > { %v2023_v44 = vmul.f32 %v2448_v23, %v2448_v23 }
 0x586   : > { %v1999_v60 = vpop.f32.mrf.mxu2 }
 0x587   : > { %v2027_v48 = vmul.f32 -2.7261424e-10, %v2023_v44  ;;  %v2075_v28 = vmul.f32 -1.45660715e-05, %v2023_v44  ;;  %v2000_v30 = vadd.f32 %v3215_v18, %v1999_v60 }
 0x589   : > { %v2031_v31 = vadd.f32 2.7706815e-08, %v2027_v48  ;;  %v2079_v33 = vadd.f32 -0.00021337405, %v2075_v28  ;;  %v2012_v35 = vmul.f32 0.70710677, %v2000_v30 }
 0x58a   : > { %v2008_v60 = vmul.f32 0.5, %v2000_v30 }
 0x58b   : > { %v2035_v15 = vmul.f32 %v2031_v31, %v2023_v44  ;;  %v2083_v32 = vmul.f32 %v2079_v33, %v2023_v44  ;;  %v2449_v36 = vclamps-f32 %v2012_v35, 4.0 }
 0x58d   : > { %v2039_v38 = vadd.f32 -2.101024e-06, %v2035_v15  ;;  %v2087_v39 = vadd.f32 -0.001682827, %v2083_v32  ;;  %v2024_v42 = vmul.f32 %v2449_v36, %v2449_v36 }
 0x58f   : > { %v2043_v37 = vmul.f32 %v2039_v38, %v2023_v44  ;;  %v2091_v40 = vmul.f32 %v2087_v39, %v2023_v44  ;;  %v2028_v43 = vmul.f32 -2.7261424e-10, %v2024_v42  ;;  %v2076_v57 = vmul.f32 -1.45660715e-05, %v2024_v42 }
 0x591   : > { %v2047_v41 = vadd.f32 -5.6925062e-05, %v2043_v37  ;;  %v2032_v29 = vadd.f32 2.7706815e-08, %v2028_v43  ;;  %v2080_v58 = vadd.f32 -0.00021337405, %v2076_v57 }
 0x592   : > { %v2095_v19 = vadd.f32 -0.0073733293, %v2091_v40 }
 0x593   : > { %v2051_v59 = vmul.f32 %v2047_v41, %v2023_v44  ;;  %v2036_v20 = vmul.f32 %v2032_v29, %v2024_v42  ;;  %v2084_v34 = vmul.f32 %v2080_v58, %v2024_v42 }
 0x594   : > { %v2099_v4 = vmul.f32 %v2095_v19, %v2023_v44 }
 0x595   : > { %v2055_v56 = vadd.f32 -0.00073499064, %v2051_v59  ;;  %v2040_v1 = vadd.f32 -2.101024e-06, %v2036_v20  ;;  %v2088_v46 = vadd.f32 -0.001682827, %v2084_v34 }
 0x596   : > { %v2103_v11 = vadd.f32 -0.014264739, %v2099_v4 }
 0x597   : > { %v2059_v63 = vmul.f32 %v2055_v56, %v2023_v44  ;;  %v2044_v5 = vmul.f32 %v2040_v1, %v2024_v42  ;;  %v2092_v3 = vmul.f32 %v2088_v46, %v2024_v42 }
 0x598   : > { %2670 = vrcp.f32 %v2103_v11 }
 0x599   : > { %v2063_v53 = vadd.f32 -0.0029546001, %v2059_v63  ;;  %v2048_v8 = vadd.f32 -5.6925062e-05, %v2044_v5  ;;  %v2096_v9 = vadd.f32 -0.0073733293, %v2092_v3 }
 0x59b   : > { %v2067_v10 = vmul.f32 %v2063_v53, %v2023_v44  ;;  %v2052_v61 = vmul.f32 %v2048_v8, %v2024_v42  ;;  %v2100_v45 = vmul.f32 %v2096_v9, %v2024_v42  ;;  %v2007_v44 = vmul.f32 0.5, %v3218_v54 }
 0x59d   : > { %v2071_v55 = vadd.f32 -0.016096033, %v2067_v10  ;;  %v2056_v51 = vadd.f32 -0.00073499064, %v2052_v61  ;;  %v2104_v13 = vadd.f32 -0.014264739, %v2100_v45 }
 0x59e   : > { %v2671_v50 = vpop.eup %2670 }
 0x59f   : > { %v2060_v52 = vmul.f32 %v2056_v51, %v2024_v42  ;;  %v2107_v21 = vmul.f32 %v2448_v23, %v2071_v55  ;;  %2672 = vrcp.f32 %v2104_v13 }
 0x5a1   : > { %v2064_v49 = vadd.f32 -0.0029546001, %v2060_v52  ;;  %v2115_v2 = vmul.f32 %v2671_v50, %v2107_v21 }
 0x5a3   : > { %v2068_v16 = vmul.f32 %v2064_v49, %v2024_v42  ;;  %v2119_v26 = vadd.f32 1.0, %v2115_v2 }
 0x5a5   : > { %v2072_v17 = vadd.f32 -0.016096033, %v2068_v16  ;;  %v2673_v6 = vpop.eup %2672  ;;  %v2123_v48 = vmul.f32 %v2119_v26, %v2007_v44 }
 0x5a7   : > { %v2108_v25 = vmul.f32 %v2449_v36, %v2072_v17 }
 0x5a9   : > { %v2116_v7 = vmul.f32 %v2673_v6, %v2108_v25 }
 0x5ab   : > { %v2120_v27 = vadd.f32 1.0, %v2116_v7 }
 0x5ad   : > { %v2124_v28 = vmul.f32 %v2120_v27, %v2008_v60 }
 0x5af   : > { %v2127_v31 = vpack.c.bf16 %v2124_v28, %v2123_v48 }
 0x5b1   : > { %2468 = vmatmul.msk.bf16.vlgmr.msra.gmra.mxu3 %vm2165_vm1, %v2127_v31 }
 0x5b6   : > { %v2002_v23 = vpop.f32.mrf.mxu2 }
 0x5b7   : > { %v2003_v33 = vadd.f32 %v3215_v18, %v2002_v23 }
 0x5b9   : > { %v2013_v35 = vmul.f32 0.70710677, %v2003_v33  ;;  %v2009_v28 = vmul.f32 0.5, %v2003_v33 }
 0x5bb   : > { %v2450_v14 = vclamps-f32 %v2013_v35, 4.0 }
 0x5bd   : > { %v2025_v15 = vmul.f32 %v2450_v14, %v2450_v14 }
 0x5be   : > { %v2004_v32 = vpop.f32.mrf.mxu2 }
 0x5bf   : > { %v2029_v36 = vmul.f32 -2.7261424e-10, %v2025_v15  ;;  %v2077_v38 = vmul.f32 -1.45660715e-05, %v2025_v15  ;;  %v2005_v39 = vadd.f32 %v3215_v18, %v2004_v32 }
 0x5c1   : > { %v2033_v54 = vadd.f32 2.7706815e-08, %v2029_v36  ;;  %v2081_v30 = vadd.f32 -0.00021337405, %v2077_v38  ;;  %v2014_v42 = vmul.f32 0.70710677, %v2005_v39 }
 0x5c2   : > { %v2010_v31 = vmul.f32 0.5, %v2005_v39 }
 0x5c3   : > { %v2037_v47 = vmul.f32 %v2033_v54, %v2025_v15  ;;  %v2085_v37 = vmul.f32 %v2081_v30, %v2025_v15  ;;  %v2451_v40 = vclamps-f32 %v2014_v42, 4.0 }
 0x5c5   : > { %v2041_v43 = vadd.f32 -2.101024e-06, %v2037_v47  ;;  %v2089_v57 = vadd.f32 -0.001682827, %v2085_v37  ;;  %v2026_v41 = vmul.f32 %v2451_v40, %v2451_v40 }
 0x5c7   : > { %v2045_v29 = vmul.f32 %v2041_v43, %v2025_v15  ;;  %v2093_v58 = vmul.f32 %v2089_v57, %v2025_v15  ;;  %v2030_v59 = vmul.f32 -2.7261424e-10, %v2026_v41  ;;  %v2078_v19 = vmul.f32 -1.45660715e-05, %v2026_v41 }
 0x5c9   : > { %v2049_v20 = vadd.f32 -5.6925062e-05, %v2045_v29  ;;  %v2034_v34 = vadd.f32 2.7706815e-08, %v2030_v59  ;;  %v2082_v56 = vadd.f32 -0.00021337405, %v2078_v19 }
 0x5ca   : > { %v2097_v46 = vadd.f32 -0.0073733293, %v2093_v58 }
 0x5cb   : > { %v2053_v1 = vmul.f32 %v2049_v20, %v2025_v15  ;;  %v2038_v63 = vmul.f32 %v2034_v34, %v2026_v41  ;;  %v2086_v18 = vmul.f32 %v2082_v56, %v2026_v41 }
 0x5cc   : > { %v2101_v8 = vmul.f32 %v2097_v46, %v2025_v15 }
 0x5cd   : > { %v2057_v4 = vadd.f32 -0.00073499064, %v2053_v1  ;;  %v2042_v5 = vadd.f32 -2.101024e-06, %v2038_v63  ;;  %v2090_v3 = vadd.f32 -0.001682827, %v2086_v18 }
 0x5ce   : > { %v2105_v51 = vadd.f32 -0.014264739, %v2101_v8 }
 0x5cf   : > { %v2061_v53 = vmul.f32 %v2057_v4, %v2025_v15  ;;  %v2046_v9 = vmul.f32 %v2042_v5, %v2026_v41  ;;  %v2094_v10 = vmul.f32 %v2090_v3, %v2026_v41 }
 0x5d0   : > { %2674 = vrcp.f32 %v2105_v51 }
 0x5d1   : > { %v2065_v11 = vadd.f32 -0.0029546001, %v2061_v53  ;;  %v2050_v61 = vadd.f32 -5.6925062e-05, %v2046_v9  ;;  %v2098_v45 = vadd.f32 -0.0073733293, %v2094_v10 }
 0x5d3   : > { %v2069_v55 = vmul.f32 %v2065_v11, %v2025_v15  ;;  %v2054_v13 = vmul.f32 %v2050_v61, %v2026_v41  ;;  %v2102_v52 = vmul.f32 %v2098_v45, %v2026_v41 }
 0x5d5   : > { %v2073_v21 = vadd.f32 -0.016096033, %v2069_v55  ;;  %v2058_v49 = vadd.f32 -0.00073499064, %v2054_v13  ;;  %v2106_v16 = vadd.f32 -0.014264739, %v2102_v52 }
 0x5d6   : > { %v2675_v6 = vpop.eup %2674 }
 0x5d7   : > { %v2062_v50 = vmul.f32 %v2058_v49, %v2026_v41  ;;  %v2109_v2 = vmul.f32 %v2450_v14, %v2073_v21  ;;  %2676 = vrcp.f32 %v2106_v16  ;;  %v2593_v14 = vld [vmem:[%s3310_s14] ss:$0 sm:$0xff] }
 0x5d9   : > { %v2066_v17 = vadd.f32 -0.0029546001, %v2062_v50  ;;  %v2117_v26 = vmul.f32 %v2675_v6, %v2109_v2 }
 0x5db   : > { %v2070_v25 = vmul.f32 %v2066_v17, %v2026_v41  ;;  %v2121_v27 = vadd.f32 1.0, %v2117_v26  ;;  %v2594_v26 = vld [vmem:[%s3311_s15] ss:$0 sm:$0xff] }
 0x5dd   : > { %v2074_v7 = vadd.f32 -0.016096033, %v2070_v25  ;;  %v2677_v60 = vpop.eup %2676  ;;  %v2125_v35 = vmul.f32 %v2121_v27, %v2009_v28 }
 0x5df   : > { %v2110_v44 = vmul.f32 %v2451_v40, %v2074_v7 }
 0x5e1   : > { %v2118_v48 = vmul.f32 %v2677_v60, %v2110_v44  ;;  %v2595_v60 = vld [vmem:[%s3312_s16] ss:$0 sm:$0xff] }
 0x5e3   : > { %v2122_v23 = vadd.f32 1.0, %v2118_v48 }
 0x5e5   : > { %v2126_v15 = vmul.f32 %v2122_v23, %v2010_v31 }
 0x5e7   : > { %v2128_v32 = vpack.c.bf16 %v2126_v15, %v2125_v35 }
 0x5e9   : > { %2469 = vmatmul.msk.bf16.gmra.mxu3 %vm2165_vm1, %v2128_v32 }
 0x634   : > { %v2181_v36 = vpop.f32.mrf.mxu3 }
 0x635   : > { %v2182_v38 = vadd.f32 %v2593_v14, %v2181_v36 }
 0x637   : > { %v2191_v54 = vadd.f32 %v2182_v38, %v3194_v62 }
 0x639   : > { %v2197_v30 = vsel %vm594_vm0, %v2191_v54, 0.0 }
 0x63a   : > { %2198 = vadd.xlane.f32.xlu1 %v2197_v30 }
 0x63c   : > { %v2183_v42 = vpop.f32.mrf.mxu3 }
 0x63d   : > { %v2184_v33 = vadd.f32 %v2593_v14, %v2183_v42 }
 0x63f   : > { %v2192_v39 = vadd.f32 %v2184_v33, %v3196_v0 }
 0x641   : > { %v2200_v47 = vsel %vm594_vm0, %v2192_v39, 0.0 }
 0x642   : > { %2201 = vadd.xlane.f32.xlu0 %v2200_v47 }
 0x66c   : > { %v2186_v37 = vpop.f32.mrf.mxu3 }
 0x66d   : > { %v2187_v40 = vadd.f32 %v2593_v14, %v2186_v37 }
 0x66f   : > { %v2193_v43 = vadd.f32 %v2187_v40, %v3205_v22 }
 0x671   : > { %v2203_v57 = vsel %vm594_vm0, %v2193_v43, 0.0 }
 0x672   : > { %2204 = vadd.xlane.f32.xlu1 %v2203_v57 }
 0x674   : > { %v2188_v41 = vpop.f32.mrf.mxu3 }
 0x675   : > { %v2189_v29 = vadd.f32 %v2593_v14, %v2188_v41 }
 0x677   : > { %v2194_v62 = vadd.f32 %v2189_v29, %v3207_v24 }
 0x679   : > { %v2206_v58 = vsel %vm594_vm0, %v2194_v62, 0.0 }
 0x67a   : > { %2207 = vadd.xlane.f32.xlu2 %v2206_v58 }
 0x6ad   : > { %v2199_v59 = vpop.xlane.xlu1 %2198 }
 0x6ae   : > { %v2209_v0 = vmul.f32 %v2199_v59, %v3162_v12 }
 0x6b0   : > { %v2213_v19 = vsub.f32 %v2191_v54, %v2209_v0 }
 0x6b2   : > { %v2217_v20 = vmul.f32 %v2213_v19, %v2213_v19 }
 0x6b4   : > { %v2221_v34 = vsel %vm594_vm0, %v2217_v20, 0.0 }
 0x6b5   : > { %v2202_v56 = vpop.xlane.xlu0 %2201  ;;  %2222 = vadd.xlane.f32.xlu0 %v2221_v34 }
 0x6b6   : > { %v2210_v22 = vmul.f32 %v2202_v56, %v3162_v12 }
 0x6b8   : > { %v2214_v1 = vsub.f32 %v2192_v39, %v2210_v22 }
 0x6ba   : > { %v2218_v46 = vmul.f32 %v2214_v1, %v2214_v1 }
 0x6bc   : > { %v2224_v63 = vsel %vm594_vm0, %v2218_v46, 0.0 }
 0x6bd   : > { %2225 = vadd.xlane.f32.xlu1 %v2224_v63 }
 0x6e5   : > { %v2205_v24 = vpop.xlane.xlu1 %2204 }
 0x6e6   : > { %v2211_v18 = vmul.f32 %v2205_v24, %v3162_v12 }
 0x6e8   : > { %v3255_v4 = vsub.f32 %v2193_v43, %v2211_v18 }
 0x6ea   : > { %v2219_v5 = vmul.f32 %v3255_v4, %v3255_v4 }
 0x6ec   : > { %v2227_v3 = vsel %vm594_vm0, %v2219_v5, 0.0 }
 0x6ed   : > { %v2208_v53 = vpop.xlane.xlu2 %2207  ;;  %2228 = vadd.xlane.f32.xlu2 %v2227_v3 }
 0x6ee   : > { %v2212_v8 = vmul.f32 %v2208_v53, %v3162_v12 }
 0x6f0   : > { %v3261_v9 = vsub.f32 %v2194_v62, %v2212_v8 }
 0x6f2   : > { %v2220_v10 = vmul.f32 %v3261_v9, %v3261_v9 }
 0x6f4   : > { %v2230_v11 = vsel %vm594_vm0, %v2220_v10, 0.0 }
 0x6f5   : > { %2231 = vadd.xlane.f32.xlu0 %v2230_v11 }
 0x728   : > { %v2223_v61 = vpop.xlane.xlu0 %2222 }
 0x729   : > { %v2233_v45 = vmul.f32 %v2223_v61, %v3162_v12 }
 0x72b   : > { %v2237_v55 = vadd.f32 1e-05, %v2233_v45 }
 0x72d   : > { %2678 = vrsqrt.f32 %v2237_v55  ;;  %vm2247_vm3 = vweird.f32 %v2237_v55 }
 0x730   : > { %v2226_v51 = vpop.xlane.xlu1 %2225 }
 0x731   : > { %v2234_v13 = vmul.f32 %v2226_v51, %v3162_v12 }
 0x733   : > { %v2679_v52 = vpop.eup %2678  ;;  %v2238_v21 = vadd.f32 1e-05, %v2234_v13 }
 0x734   : > { %v2242_v49 = vmul.f32 %v2679_v52, %v2237_v55  ;;  %vm2248_vm2 = vweird.f32 %v2679_v52 }
 0x735   : > { %2680 = vrsqrt.f32 %v2238_v21  ;;  %vm2249_vm4 = vmor %vm2247_vm3, %vm2248_vm2  ;;  %vm2257_vm6 = vweird.f32 %v2238_v21 }
 0x736   : > { %v2243_v16 = vmul.f32 %v2679_v52, %v2242_v49 }
 0x738   : > { %v2244_v50 = vmul.f32 0.5, %v2243_v16 }
 0x73a   : > { %v2245_v2 = vsub.f32 1.5, %v2244_v50 }
 0x73b   : > { %v2681_v17 = vpop.eup %2680 }
 0x73c   : > { %v2246_v25 = vmul.f32 %v2679_v52, %v2245_v2  ;;  %v2252_v6 = vmul.f32 %v2681_v17, %v2238_v21  ;;  %vm2258_vm5 = vweird.f32 %v2681_v17 }
 0x73d   : > { %vm2259_vm7 = vmor %vm2257_vm6, %vm2258_vm5 }
 0x73e   : > { %v2250_v7 = vsel %vm2249_vm4, %v2679_v52, %v2246_v25  ;;  %v2253_v44 = vmul.f32 %v2681_v17, %v2252_v6 }
 0x73f   : > { %v2281_v27 = vmul.f32 %v2250_v7, %v2213_v19 }
 0x740   : > { %v2254_v48 = vmul.f32 0.5, %v2253_v44 }
 0x741   : > { %v2288_v28 = vmul.f32 %v2594_v26, %v2281_v27 }
 0x742   : > { %v2255_v31 = vsub.f32 1.5, %v2254_v48 }
 0x743   : > { %v2295_v23 = vadd.f32 %v2595_v60, %v2288_v28 }
 0x744   : > { %v2256_v35 = vmul.f32 %v2681_v17, %v2255_v31 }
 0x745   : > { %2299 = vst.msk [vmem:[%s3279_s20] sm:$0xff] %vm594_vm0, %v2295_v23 }
 0x746   : > { %v2260_v15 = vsel %vm2259_vm7, %v2681_v17, %v2256_v35 }
 0x747   : > { %v2282_v32 = vmul.f32 %v2260_v15, %v2214_v1 }
 0x749   : > { %v2289_v14 = vmul.f32 %v2594_v26, %v2282_v32 }
 0x74b   : > { %v2296_v36 = vadd.f32 %v2595_v60, %v2289_v14 }
 0x74d   : > { %2300 = vst.msk [vmem:[%s3279_s20 + $0x8] sm:$0xff] %vm594_vm0, %v2296_v36 }
 0x760   : > { %v2229_v38 = vpop.xlane.xlu2 %2228 }
 0x761   : > { %v2235_v54 = vmul.f32 %v2229_v38, %v3162_v12 }
 0x763   : > { %v2239_v30 = vadd.f32 1e-05, %v2235_v54 }
 0x765   : > { %2682 = vrsqrt.f32 %v2239_v30  ;;  %vm2267_vm9 = vweird.f32 %v2239_v30 }
 0x768   : > { %v2232_v42 = vpop.xlane.xlu0 %2231 }
 0x769   : > { %v2236_v33 = vmul.f32 %v2232_v42, %v3162_v12 }
 0x76b   : > { %v2683_v39 = vpop.eup %2682  ;;  %v2240_v47 = vadd.f32 1e-05, %v2236_v33 }
 0x76c   : > { %v2262_v37 = vmul.f32 %v2683_v39, %v2239_v30  ;;  %vm2268_vm8 = vweird.f32 %v2683_v39 }
 0x76d   : > { %2684 = vrsqrt.f32 %v2240_v47  ;;  %vm2269_vm10 = vmor %vm2267_vm9, %vm2268_vm8  ;;  %vm2277_vm12 = vweird.f32 %v2240_v47 }
 0x76e   : > { %v2263_v40 = vmul.f32 %v2683_v39, %v2262_v37 }
 0x770   : > { %v2264_v43 = vmul.f32 0.5, %v2263_v40 }
 0x772   : > { %v2265_v57 = vsub.f32 1.5, %v2264_v43 }
 0x773   : > { %v2685_v41 = vpop.eup %2684 }
 0x774   : > { %v2266_v29 = vmul.f32 %v2683_v39, %v2265_v57  ;;  %v2272_v62 = vmul.f32 %v2685_v41, %v2240_v47  ;;  %vm2278_vm11 = vweird.f32 %v2685_v41 }
 0x775   : > { %vm2279_vm13 = vmor %vm2277_vm12, %vm2278_vm11 }
 0x776   : > { %v2270_v58 = vsel %vm2269_vm10, %v2683_v39, %v2266_v29  ;;  %v2273_v59 = vmul.f32 %v2685_v41, %v2272_v62 }
 0x777   : > { %v2283_v0 = vmul.f32 %v2270_v58, %v3255_v4 }
 0x778   : > { %v2274_v12 = vmul.f32 0.5, %v2273_v59 }
 0x779   : > { %v2290_v19 = vmul.f32 %v2594_v26, %v2283_v0 }
 0x77a   : > { %v2275_v20 = vsub.f32 1.5, %v2274_v12 }
 0x77b   : > { %v2297_v34 = vadd.f32 %v2595_v60, %v2290_v19 }
 0x77c   : > { %v2276_v56 = vmul.f32 %v2685_v41, %v2275_v20 }
 0x77d   : > { %2301 = vst.msk [vmem:[%s3279_s20 + $0x10] sm:$0xff] %vm594_vm0, %v2297_v34 }
 0x77e   : > { %v2280_v22 = vsel %vm2279_vm13, %v2685_v41, %v2276_v56 }
 0x77f   : > { %v2284_v1 = vmul.f32 %v2280_v22, %v3261_v9 }
 0x781   : > { %v2291_v46 = vmul.f32 %v2594_v26, %v2284_v1 }
 0x783   : > { %v2298_v63 = vadd.f32 %v2595_v60, %v2291_v46 }
 0x785   : > { %2302 = vst.msk [vmem:[%s3279_s20 + $0x18] sm:$0xff] %vm594_vm0, %v2298_v63 }
 0x786 PF: > { %s27_s24 = sadd.s32 1, %s2696_s24  }
 0x787   : > { %p24_p4 = scmp.ge.s32.totalorder %s27_s24, 4  }
 0x789   :  { %26 = sbr.rel (!%p24_p4) target bundleno = 3 (0x3), region = 118 }

// kernel: two_stage_attention.3
= control target key start
LH: loop header
LB: loop body
LE: loop exit
PB: predicated region body
PF: predicated region fallthrough
CT: control target
= control target key end

     0   :  { %s8698_s27 = smov 0   ;;  %s11226_s0 = inlined_call_operand.vmem [shape: f32[16,4,32], index: 0, kind: input, shape index: {}]   ;;  %s11227_s1 = inlined_call_operand.vmem [shape: f32[8,5,32], index: 1, kind: input, shape index: {}]   ;;  %s11228_s2 = inlined_call_operand.vmem [shape: bf16[32,32], index: 2, kind: input, shape index: {}]   ;;  %s11229_s3 = inlined_call_operand.vmem [shape: f32[1,32], index: 3, kind: input, shape index: {}]   ;;  %s11230_s4 = inlined_call_operand.vmem [shape: bf16[32,32], index: 4, kind: input, shape index: {}]   ;;  %s11231_s5 = inlined_call_operand.vmem [shape: f32[1,32], index: 5, kind: input, shape index: {}]   ;;  %s11232_s6 = inlined_call_operand.vmem [shape: bf16[32,32], index: 6, kind: input, shape index: {}]   ;;  %s11233_s7 = inlined_call_operand.vmem [shape: f32[1,32], index: 7, kind: input, shape index: {}]   ;;  %s11234_s8 = inlined_call_operand.vmem [shape: bf16[4,8,32], index: 8, kind: input, shape index: {}]   ;;  %s11235_s9 = inlined_call_operand.vmem [shape: f32[1,32], index: 9, kind: input, shape index: {}]   ;;  %s11236_s10 = inlined_call_operand.vmem [shape: bf16[32,32], index: 10, kind: input, shape index: {}]   ;;  %s11237_s11 = inlined_call_operand.vmem [shape: f32[1,32], index: 11, kind: input, shape index: {}]   ;;  %s11238_s12 = inlined_call_operand.vmem [shape: bf16[32,32], index: 12, kind: input, shape index: {}]   ;;  %s11239_s13 = inlined_call_operand.vmem [shape: f32[1,32], index: 13, kind: input, shape index: {}]   ;;  %s11240_s14 = inlined_call_operand.vmem [shape: bf16[32,32], index: 14, kind: input, shape index: {}]   ;;  %s11241_s15 = inlined_call_operand.vmem [shape: f32[1,32], index: 15, kind: input, shape index: {}]   ;;  %s11242_s16 = inlined_call_operand.vmem [shape: bf16[4,8,32], index: 16, kind: input, shape index: {}]   ;;  %s11243_s17 = inlined_call_operand.vmem [shape: f32[1,32], index: 17, kind: input, shape index: {}]   ;;  %s11244_s18 = inlined_call_operand.vmem [shape: f32[1,32], index: 18, kind: input, shape index: {}]   ;;  %s11245_s19 = inlined_call_operand.vmem [shape: f32[1,32], index: 19, kind: input, shape index: {}]   ;;  %s11246_s20 = inlined_call_operand.vmem [shape: bf16[32,64], index: 20, kind: input, shape index: {}]   ;;  %s11247_s21 = inlined_call_operand.vmem [shape: f32[1,64], index: 21, kind: input, shape index: {}]   ;;  %s11248_s22 = inlined_call_operand.vmem [shape: bf16[64,32], index: 22, kind: input, shape index: {}]   ;;  %s11249_s23 = inlined_call_operand.vmem [shape: f32[1,32], index: 23, kind: input, shape index: {}]   ;;  %s11250_s24 = inlined_call_operand.vmem [shape: f32[1,32], index: 24, kind: input, shape index: {}]   ;;  %s11251_s25 = inlined_call_operand.vmem [shape: f32[1,32], index: 25, kind: input, shape index: {}]   ;;  %s11252_s26 = inlined_call_operand.vmem [shape: f32[16,4,32], index: 26, kind: output, shape index: {}]  }
   0x1   :  { %11268 = sst [smem:[#allocation3_spill]] %s11226_s0 }
   0x2   :  { %11269 = sst [smem:[#allocation4_spill]] %s11227_s1 }
   0x3   :  { %11270 = sst [smem:[#allocation5_spill]] %s11228_s2 }
   0x4   :  { %11271 = sst [smem:[#allocation6_spill]] %s11229_s3 }
   0x5   :  { %11272 = sst [smem:[#allocation7_spill]] %s11230_s4 }
   0x6   :  { %11273 = sst [smem:[#allocation8_spill]] %s11231_s5 }
   0x7   :  { %11274 = sst [smem:[#allocation9_spill]] %s11232_s6 }
   0x8   :  { %11275 = sst [smem:[#allocation10_spill]] %s11233_s7 }
   0x9   :  { %11276 = sst [smem:[#allocation11_spill]] %s11234_s8 }
   0xa   :  { %11277 = sst [smem:[#allocation12_spill]] %s11235_s9 }
   0xb   :  { %11278 = sst [smem:[#allocation13_spill]] %s11236_s10 }
   0xc LB: > { %s7878_s3 = sadd.s32 4294967295, %s8554_s27   ;;  %p7882_p0 = scmp.ge.s32.totalorder %s8554_s27, 1  ;;  %s8554_s27 = sphi %s8698_s27, %s36_s27  }
   0xd   : > { %p713_p1 = scmp.lt.s32.totalorder %s8554_s27, 3 }
   0xf   : > { %p714_p2 = pnand %p7882_p0, %p713_p1 }
  0x11   : > { %717 = sbr.rel (%p714_p2) target bundleno = 3476 (0xd94), region = 124 }
  0x16   : > { %s11279_s8 = sld [smem:[#allocation5_spill]]  ;;  %vm947_vm0 = vcmask 261120   ;;  %s7883_s28 = sshll.u32 %s7878_s3, 3  ;;  %vm1730_vm1 = vcmask 64512   ;;  %vm2339_vm2 = vcmask 28672   ;;  %vm2728_vm3 = vcmask 1041408  }
  0x17   : > { %s11280_s0 = sld [smem:[#allocation4_spill]]  ;;  %p784_p3 = scmp.lt.s32.totalorder %s7883_s28, 15  ;;  %vm2724_vm4 = vcmask 31744   ;;  %vm3743_vm5 = vcmask 1043456   ;;  %vm5661_vm6 = vcmask 35840   ;;  %vm6050_vm7 = vcmask 1042432  }
  0x18   : > { %s11281_s6 = sld [smem:[#allocation7_spill]]  ;;  %s11262_s10 = smov 112   ;;  %vm6046_vm8 = vcmask 39936  }
  0x19   : > { %s11297_s28 = smov (!%p784_p3, %s7883_s28), 15  ;;  %s11282_s2 = sld [smem:[#allocation3_spill]] }
  0x1a   : > { %s11259_s9 = sshll.u32 %s11297_s28, 2  ;;  %s11284_s7 = sld [smem:[#allocation9_spill]] }
  0x1b   : > { %s11286_s29 = sld [smem:[#allocation8_spill]]  ;;  %s11260_s3 = smov 104  }
  0x1c   : > { %v8133_v0 = vld [vmem:[%s11279_s8 + $0x8] sm:$0xff]  ;;  %v8132_v3 = vld [vmem:[%s11279_s8] sm:$0xff]  ;;  %s11287_s1 = sld [smem:[#allocation10_spill]] }
  0x1d   : > { %v804_v1 = vld [vmem:[%s11280_s0] sm:$0x1f]  ;;  %v805_v2 = vld [vmem:[%s11280_s0 + $0x8] sm:$0x1f]  ;;  %963 = vmatpush.bf16.msra.mxu0 %v8133_v0  ;;  %8150 = vmatpush.bf16.msra.mxu1 %v8133_v0  ;;  %v806_v10 = vld [vmem:[%s11280_s0 + $0x10] sm:$0x1f] }
  0x1e   : > { %v820_v4 = vrot.slane %v804_v1, 1  ;;  %v821_v5 = vrot.slane %v804_v1, 2  ;;  %v822_v6 = vrot.slane %v804_v1, 3  ;;  %872 = vst [vmem:[#allocation1] ss:$9 sm:$0xff] %v804_v1  ;;  %v823_v7 = vrot.slane %v804_v1, 4 }
  0x1f   : > { %882 = vst [vmem:[#allocation1 + $0x5] ss:$9 sm:$0xff] %v805_v2  ;;  %v824_v8 = vrot.slane %v805_v2, 1  ;;  %v825_v9 = vrot.slane %v805_v2, 2  ;;  %v826_v11 = vrot.slane %v805_v2, 3  ;;  %v827_v12 = vrot.slane %v805_v2, 4  ;;  %s787_s5 = scalar_lea.vmem %s11282_s2, %s11259_s9 }
  0x20   : > { %874 = vst [vmem:[#allocation1 + $0x1] ss:$9 sm:$0xff] %v820_v4  ;;  %v828_v13 = vrot.slane %v806_v10, 1  ;;  %v829_v15 = vrot.slane %v806_v10, 2  ;;  %v830_v16 = vrot.slane %v806_v10, 3  ;;  %v831_v17 = vrot.slane %v806_v10, 4 }
  0x21   : > { %876 = vst [vmem:[#allocation1 + $0x2] ss:$9 sm:$0xff] %v821_v5  ;;  %964 = vmatpush.bf16.msra.mxu0 %v8132_v3  ;;  %8151 = vmatpush.bf16.msra.mxu1 %v8132_v3  ;;  %v807_v18 = vld [vmem:[%s11280_s0 + $0x18] sm:$0x1f]  ;;  %v808_v21 = vld [vmem:[%s11280_s0 + $0x20] sm:$0x1f] }
  0x22   : > { %878 = vst [vmem:[#allocation1 + $0x3] ss:$9 sm:$0xff] %v822_v6  ;;  %v832_v19 = vrot.slane %v807_v18, 1  ;;  %v833_v20 = vrot.slane %v807_v18, 2  ;;  %v834_v22 = vrot.slane %v807_v18, 3  ;;  %v835_v24 = vrot.slane %v807_v18, 4 }
  0x23   : > { %880 = vst [vmem:[#allocation1 + $0x4] ss:$9 sm:$0xff] %v823_v7  ;;  %v836_v26 = vrot.slane %v808_v21, 1  ;;  %v837_v27 = vrot.slane %v808_v21, 2  ;;  %v838_v28 = vrot.slane %v808_v21, 3  ;;  %v839_v30 = vrot.slane %v808_v21, 4 }
  0x24   : > { %884 = vst [vmem:[#allocation1 + $0x6] ss:$9 sm:$0xff] %v824_v8  ;;  %v809_v29 = vld [vmem:[%s11280_s0 + $0x28] sm:$0x1f]  ;;  %v810_v34 = vld [vmem:[%s11280_s0 + $0x30] sm:$0x1f] }
  0x25   : > { %886 = vst [vmem:[#allocation1 + $0x7] ss:$9 sm:$0xff] %v825_v9  ;;  %v840_v31 = vrot.slane %v809_v29, 1  ;;  %v841_v32 = vrot.slane %v809_v29, 2  ;;  %v842_v35 = vrot.slane %v809_v29, 3  ;;  %v8135_v36 = vld [vmem:[%s11281_s6 + $0x8] sm:$0xff] }
  0x26   : > { %v843_v37 = vrot.slane %v809_v29, 4  ;;  %1040 = vmatpush.bf16.msrb.mxu1 %v8135_v36  ;;  %v8134_v38 = vld [vmem:[%s11281_s6] sm:$0xff]  ;;  %v844_v39 = vrot.slane %v810_v34, 1  ;;  %v845_v40 = vrot.slane %v810_v34, 2  ;;  %v811_v41 = vld [vmem:[%s11280_s0 + $0x38] sm:$0x1f] }
  0x27   : > { %v846_v42 = vrot.slane %v810_v34, 3  ;;  %v847_v43 = vrot.slane %v810_v34, 4  ;;  %v848_v46 = vrot.slane %v811_v41, 1  ;;  %v849_v47 = vrot.slane %v811_v41, 2  ;;  %v8754_v50 = vld [vmem:[%s787_s5 + $0x8] sm:$0xf] }
  0x28   : > { %v850_v48 = vrot.slane %v811_v41, 3  ;;  %v851_v49 = vrot.slane %v811_v41, 4  ;;  %v8756_v51 = vld [vmem:[%s787_s5 + $0xc] sm:$0xf]  ;;  %v8758_v52 = vld [vmem:[%s787_s5 + $0x10] sm:$0xf] }
  0x29   : > { %v8761_v53 = vld [vmem:[%s787_s5 + $0x14] sm:$0xf]  ;;  %v8764_v54 = vld [vmem:[%s787_s5 + $0x18] sm:$0xf]  ;;  %v8766_v55 = vld [vmem:[%s787_s5 + $0x1c] sm:$0xf] }
  0x2a   : > { %1041 = vmatpush.bf16.msrb.mxu1 %v8134_v38  ;;  %11283 = vst [vmem:[#allocation2_spill] sm:$0xff] %v8766_v55  ;;  %v8770_v56 = vld [vmem:[%s787_s5] sm:$0xf]  ;;  %v8773_v57 = vld [vmem:[%s787_s5 + $0x4] sm:$0xf]  ;;  %v8137_v60 = vld [vmem:[%s11284_s7 + $0x8] sm:$0xff] }
  0x2b   : > { %1074 = vmatpush.bf16.msra.mxu2 %v8137_v60  ;;  %v8136_v61 = vld [vmem:[%s11284_s7] sm:$0xff]  ;;  %s11285_s2 = sld [smem:[#allocation6_spill]]  ;;  %s11264_s5 = smov 120  }
  0x2c   : > { %v887_v14 = vld [vmem:[#allocation1] sm:$0xff]  ;;  %s11288_s30 = sld [smem:[#allocation11_spill]] }
  0x2d   : > { %888 = vst [vmem:[#allocation1] ss:$9 sm:$0xff] %v826_v11  ;;  %s11290_s4 = sld [smem:[#allocation13_spill]] }
  0x2e   : > { %889 = vst [vmem:[#allocation1 + $0x1] ss:$9 sm:$0xff] %v827_v12 }
  0x2f   : > { %890 = vst [vmem:[#allocation1 + $0x2] ss:$9 sm:$0xff] %v806_v10  ;;  %1075 = vmatpush.bf16.msra.mxu2 %v8136_v61 }
  0x30   : > { %891 = vst [vmem:[#allocation1 + $0x3] ss:$9 sm:$0xff] %v828_v13 }
  0x31   : > { %892 = vst [vmem:[#allocation1 + $0x4] ss:$9 sm:$0xff] %v829_v15  ;;  %v8252_v4 = vld [vmem:[%s11285_s2] ss:$0 sm:$0xff]  ;;  %s11289_s2 = sld [smem:[#allocation12_spill]] }
  0x32   : > { %893 = vst [vmem:[#allocation1 + $0x5] ss:$9 sm:$0xff] %v830_v16 }
  0x33   : > { %894 = vst [vmem:[#allocation1 + $0x6] ss:$9 sm:$0xff] %v831_v17 }
  0x34   : > { %895 = vst [vmem:[#allocation1 + $0x7] ss:$9 sm:$0xff] %v807_v18 }
  0x3b   : > { %v896_v23 = vld [vmem:[#allocation1] sm:$0xff] }
  0x3c   : > { %v929_v25 = vpack.c.bf16 %v896_v23, %v887_v14  ;;  %897 = vst [vmem:[#allocation1] ss:$9 sm:$0xff] %v832_v19 }
  0x3d   : > { %898 = vst [vmem:[#allocation1 + $0x1] ss:$9 sm:$0xff] %v833_v20 }
  0x3e   : > { %7895 = vmatmul.msk.bf16.vlgmr.msra.gmra.mxu0 %vm947_vm0, %v929_v25  ;;  %899 = vst [vmem:[#allocation1 + $0x2] ss:$9 sm:$0xff] %v834_v22 }
  0x3f   : > { %900 = vst [vmem:[#allocation1 + $0x3] ss:$9 sm:$0xff] %v835_v24 }
  0x40   : > { %901 = vst [vmem:[#allocation1 + $0x4] ss:$9 sm:$0xff] %v808_v21 }
  0x41   : > { %902 = vst [vmem:[#allocation1 + $0x5] ss:$9 sm:$0xff] %v836_v26 }
  0x42   : > { %903 = vst [vmem:[#allocation1 + $0x6] ss:$9 sm:$0xff] %v837_v27 }
  0x43   : > { %904 = vst [vmem:[#allocation1 + $0x7] ss:$9 sm:$0xff] %v838_v28 }
  0x4a   : > { %v905_v33 = vld [vmem:[#allocation1] sm:$0xff] }
  0x4b   : > { %906 = vst [vmem:[#allocation1] ss:$9 sm:$0xff] %v839_v30 }
  0x4c   : > { %907 = vst [vmem:[#allocation1 + $0x1] ss:$9 sm:$0xff] %v809_v29 }
  0x4d   : > { %908 = vst [vmem:[#allocation1 + $0x2] ss:$9 sm:$0xff] %v840_v31 }
  0x4e   : > { %909 = vst [vmem:[#allocation1 + $0x3] ss:$9 sm:$0xff] %v841_v32 }
  0x4f   : > { %910 = vst [vmem:[#allocation1 + $0x4] ss:$9 sm:$0xff] %v842_v35 }
  0x50   : > { %911 = vst [vmem:[#allocation1 + $0x5] ss:$9 sm:$0xff] %v843_v37 }
  0x51   : > { %912 = vst [vmem:[#allocation1 + $0x6] ss:$9 sm:$0xff] %v810_v34 }
  0x52   : > { %913 = vst [vmem:[#allocation1 + $0x7] ss:$9 sm:$0xff] %v844_v39 }
  0x59   : > { %v914_v44 = vld [vmem:[#allocation1] sm:$0xff] }
  0x5a   : > { %v930_v45 = vpack.c.bf16 %v914_v44, %v905_v33  ;;  %915 = vst [vmem:[#allocation1] ss:$9 sm:$0xff] %v845_v40 }
  0x5b   : > { %916 = vst [vmem:[#allocation1 + $0x1] ss:$9 sm:$0xff] %v846_v42 }
  0x5c   : > { %7896 = vmatmul.msk.bf16.gmra.mxu0 %vm947_vm0, %v930_v45  ;;  %917 = vst [vmem:[#allocation1 + $0x2] ss:$9 sm:$0xff] %v847_v43 }
  0x5d   : > { %918 = vst [vmem:[#allocation1 + $0x3] ss:$9 sm:$0xff] %v811_v41  ;;  %v8862_v41 = vld [vmem:[%s11286_s29] ss:$0 sm:$0xff]  ;;  %s11293_s29 = smov 104  }
  0x5e   : > { %919 = vst [vmem:[#allocation1 + $0x4] ss:$9 sm:$0xff] %v848_v46 }
  0x5f   : > { %920 = vst [vmem:[#allocation1 + $0x5] ss:$9 sm:$0xff] %v849_v47 }
  0x60   : > { %921 = vst [vmem:[#allocation1 + $0x6] ss:$9 sm:$0xff] %v850_v48 }
  0x61   : > { %922 = vst [vmem:[#allocation1 + $0x7] ss:$9 sm:$0xff] %v851_v49 }
  0x62   : > { %992 = vst [vmem:[#allocation1 + $0x10] ss:$2 sm:$0xff] %v8754_v50 }
  0x63   : > { %994 = vst [vmem:[#allocation1 + $0x11] ss:$2 sm:$0xff] %v8756_v51 }
  0x64   : > { %996 = vst [vmem:[#allocation1 + $0x20] ss:$2 sm:$0xff] %v8758_v52 }
  0x65   : > { %998 = vst [vmem:[#allocation1 + $0x21] ss:$2 sm:$0xff] %v8761_v53 }
  0x66   : > { %1000 = vst [vmem:[#allocation1 + $0x30] ss:$2 sm:$0xff] %v8764_v54 }
  0x67   : > { %1002 = vst [vmem:[#allocation1 + $0x31] ss:$2 sm:$0xff] %v8766_v55 }
  0x68   : > { %v923_v58 = vld [vmem:[#allocation1] sm:$0xff] }
  0x69   : > { %v931_v59 = vpack.c.bf16 %v923_v58, %v923_v58  ;;  %988 = vst [vmem:[#allocation1] ss:$2 sm:$0xff] %v8770_v56 }
  0x6a   : > { %990 = vst [vmem:[#allocation1 + $0x1] ss:$2 sm:$0xff] %v8773_v57  ;;  %v1004_v62 = vld.sshfl [vmem:[#allocation1 + $0x10] sm:$0xff pattern:$0x75316420] }
  0x6b   : > { %7897 = vmatmul.msk.bf16.vlgmr.msra.gmra.mxu1 %vm947_vm0, %v931_v59 }
  0x6c   : > { %v1005_v1 = vld.sshfl [vmem:[#allocation1 + $0x20] sm:$0xff pattern:$0x75316420] }
  0x6e   : > { %v1006_v2 = vld.sshfl [vmem:[#allocation1 + $0x30] sm:$0xff pattern:$0x75316420] }
  0x6f   : > { %v8791_v3 = vpack.c.bf16 %v1006_v2, %v1005_v1 }
  0x71   : > { %v1003_v63 = vld.sshfl [vmem:[#allocation1] sm:$0xff pattern:$0x75316420] }
  0x72   : > { %v8785_v0 = vpack.c.bf16 %v1004_v62, %v1003_v63 }
  0x74   : > { %7916 = vmatmul.msk.bf16.vlgmr.msra.gmra.mxu2 %vm947_vm0, %v8785_v0 }
  0x7b   : > { %7906 = vmatmul.msk.bf16.vlgmr.msrb.gmra.mxu1 %vm947_vm0, %v8785_v0 }
  0x84   : > { %7917 = vmatmul.msk.bf16.gmra.mxu2 %vm947_vm0, %v8791_v3 }
  0x8b   : > { %7907 = vmatmul.msk.bf16.gmra.mxu1 %vm947_vm0, %v8791_v3 }
  0xbb   : > { %v966_v5 = vpop.f32.mrf.mxu0 }
  0xbc   : > { %v8800_v6 = vadd.f32 %v8252_v4, %v966_v5 }
  0xbe   : > { %v1122_v7 = vrot.slane %v8800_v6, 1  ;;  %v1123_v8 = vrot.slane %v8800_v6, 2  ;;  %v1124_v9 = vrot.slane %v8800_v6, 3  ;;  %1262 = vst [vmem:[#allocation1] ss:$9 sm:$0xff] %v8800_v6  ;;  %1092 = vrot.lane.b32.xlu0 %v8800_v6, %s11264_s5  ;;  %v1125_v10 = vrot.slane %v8800_v6, 4 }
  0xbf   : > { %v1126_v13 = vrot.slane %v8800_v6, 5  ;;  %v1127_v14 = vrot.slane %v8800_v6, 6  ;;  %v1128_v15 = vrot.slane %v8800_v6, 7 }
  0xc0   : > { %1264 = vst [vmem:[#allocation1 + $0x1] ss:$9 sm:$0xff] %v1122_v7 }
  0xc1   : > { %1266 = vst [vmem:[#allocation1 + $0x2] ss:$9 sm:$0xff] %v1123_v8 }
  0xc2   : > { %1268 = vst [vmem:[#allocation1 + $0x3] ss:$9 sm:$0xff] %v1124_v9 }
  0xc3   : > { %1270 = vst [vmem:[#allocation1 + $0x4] ss:$9 sm:$0xff] %v1125_v10  ;;  %v968_v11 = vpop.f32.mrf.mxu0 }
  0xc4   : > { %v8809_v12 = vadd.f32 %v8252_v4, %v968_v11 }
  0xc6   : > { %1094 = vrot.lane.b32.xlu0 %v8809_v12, %s11264_s5  ;;  %v1129_v17 = vrot.slane %v8809_v12, 1  ;;  %v1130_v18 = vrot.slane %v8809_v12, 2  ;;  %v1131_v19 = vrot.slane %v8809_v12, 3  ;;  %v1132_v21 = vrot.slane %v8809_v12, 4 }
  0xc7   : > { %v1133_v22 = vrot.slane %v8809_v12, 5  ;;  %v1134_v23 = vrot.slane %v8809_v12, 6  ;;  %v1135_v26 = vrot.slane %v8809_v12, 7 }
  0xca   : > { %v8816_v16 = vld [vmem:[#allocation1] sm:$0xff] }
  0xcb   : > { %1272 = vst [vmem:[#allocation1] ss:$9 sm:$0xff] %v1126_v13  ;;  %v1490_v7 = vpack.c.bf16 %v8816_v16, %v8816_v16 }
  0xcc   : > { %1273 = vst [vmem:[#allocation1 + $0x1] ss:$9 sm:$0xff] %v1127_v14 }
  0xcd   : > { %1274 = vst [vmem:[#allocation1 + $0x2] ss:$9 sm:$0xff] %v1128_v15 }
  0xce   : > { %1275 = vst [vmem:[#allocation1 + $0x3] ss:$9 sm:$0xff] %v8809_v12 }
  0xcf   : > { %1276 = vst [vmem:[#allocation1 + $0x4] ss:$9 sm:$0xff] %v1129_v17 }
  0xd6   : > { %v8822_v20 = vld [vmem:[#allocation1] sm:$0xff] }
  0xd7   : > { %1278 = vst [vmem:[#allocation1] ss:$9 sm:$0xff] %v1130_v18 }
  0xd8   : > { %1279 = vst [vmem:[#allocation1 + $0x1] ss:$9 sm:$0xff] %v1131_v19 }
  0xd9   : > { %1280 = vst [vmem:[#allocation1 + $0x2] ss:$9 sm:$0xff] %v1132_v21  ;;  %v971_v24 = vpop.f32.mrf.mxu0 }
  0xda   : > { %1281 = vst [vmem:[#allocation1 + $0x3] ss:$9 sm:$0xff] %v1133_v22  ;;  %v8827_v25 = vadd.f32 %v8252_v4, %v971_v24 }
  0xdb   : > { %1282 = vst [vmem:[#allocation1 + $0x4] ss:$9 sm:$0xff] %v1134_v23 }
  0xdc   : > { %1096 = vrot.lane.b32.xlu1 %v8827_v25, %s11264_s5  ;;  %v1136_v27 = vrot.slane %v8827_v25, 1  ;;  %v1137_v30 = vrot.slane %v8827_v25, 2  ;;  %v1138_v32 = vrot.slane %v8827_v25, 3  ;;  %v1139_v35 = vrot.slane %v8827_v25, 4 }
  0xdd   : > { %v1140_v36 = vrot.slane %v8827_v25, 5  ;;  %v1141_v37 = vrot.slane %v8827_v25, 6  ;;  %v1142_v38 = vrot.slane %v8827_v25, 7 }
  0xe1   : > { %v973_v28 = vpop.f32.mrf.mxu0 }
  0xe2   : > { %v8833_v29 = vld [vmem:[#allocation1] sm:$0xff]  ;;  %v8836_v31 = vadd.f32 %v8252_v4, %v973_v28 }
  0xe3   : > { %1284 = vst [vmem:[#allocation1] ss:$9 sm:$0xff] %v1135_v26  ;;  %v1492_v19 = vpack.c.bf16 %v8833_v29, %v8833_v29 }
  0xe4   : > { %1285 = vst [vmem:[#allocation1 + $0x1] ss:$9 sm:$0xff] %v8827_v25  ;;  %1098 = vrot.lane.b32.xlu1 %v8836_v31, %s11264_s5  ;;  %v1143_v43 = vrot.slane %v8836_v31, 1  ;;  %v1144_v45 = vrot.slane %v8836_v31, 2  ;;  %v1145_v47 = vrot.slane %v8836_v31, 3  ;;  %v1146_v58 = vrot.slane %v8836_v31, 4 }
  0xe5   : > { %1286 = vst [vmem:[#allocation1 + $0x2] ss:$9 sm:$0xff] %v1136_v27  ;;  %v1147_v59 = vrot.slane %v8836_v31, 5  ;;  %v1148_v8 = vrot.slane %v8836_v31, 6  ;;  %v1149_v11 = vrot.slane %v8836_v31, 7 }
  0xe6   : > { %1287 = vst [vmem:[#allocation1 + $0x3] ss:$9 sm:$0xff] %v1137_v30 }
  0xe7   : > { %1288 = vst [vmem:[#allocation1 + $0x4] ss:$9 sm:$0xff] %v1138_v32 }
  0xe8   : > { %v976_v33 = vpop.f32.mrf.mxu1 }
  0xe9   : > { %v8842_v34 = vadd.f32 %v8252_v4, %v976_v33 }
  0xeb   : > { %1100 = vrot.lane.b32.xlu2 %v8842_v34, %s11264_s5  ;;  %v1150_v15 = vrot.slane %v8842_v34, 1  ;;  %v1151_v17 = vrot.slane %v8842_v34, 2  ;;  %v1152_v29 = vrot.slane %v8842_v34, 3  ;;  %v1153_v32 = vrot.slane %v8842_v34, 4 }
  0xec   : > { %1104 = vrot.lane.b32.xlu1 %v8809_v12, %s11262_s10  ;;  %v1154_v33 = vrot.slane %v8842_v34, 5 }
  0xee   : > { %v8852_v39 = vld [vmem:[#allocation1] sm:$0xff] }
  0xef   : > { %1290 = vst [vmem:[#allocation1] ss:$9 sm:$0xff] %v1139_v35  ;;  %v1493_v24 = vpack.c.bf16 %v8852_v39, %v8852_v39  ;;  %v1155_v39 = vrot.slane %v8842_v34, 6 }
  0xf0   : > { %1291 = vst [vmem:[#allocation1 + $0x1] ss:$9 sm:$0xff] %v1140_v36  ;;  %v978_v40 = vpop.f32.mrf.mxu1 }
  0xf1   : > { %1292 = vst [vmem:[#allocation1 + $0x2] ss:$9 sm:$0xff] %v1141_v37  ;;  %v1491_v40 = vpack.c.bf16 %v8822_v20, %v8822_v20 }
  0xf2   : > { %1293 = vst [vmem:[#allocation1 + $0x3] ss:$9 sm:$0xff] %v1142_v38 }
  0xf3   : > { %1294 = vst [vmem:[#allocation1 + $0x4] ss:$9 sm:$0xff] %v8836_v31  ;;  %1102 = vrot.lane.b32.xlu2 %v8800_v6, %s11262_s10 }
  0xf4   : > { %1108 = vrot.lane.b32.xlu1 %v8836_v31, %s11262_s10 }
  0xf8   : > { %v1043_v42 = vpop.f32.mrf.mxu1 }
  0xf9   : > { %v1044_v44 = vadd.f32 %v8862_v41, %v1043_v42  ;;  %v1156_v42 = vrot.slane %v8842_v34, 7 }
  0xfa   : > { %v8867_v46 = vld [vmem:[#allocation1] sm:$0xff] }
  0xfb   : > { %1296 = vst [vmem:[#allocation1] ss:$9 sm:$0xff] %v1143_v43  ;;  %v1594_v48 = vpack.c.bf16 %v1044_v44, %v1044_v44  ;;  %v1562_v49 = vrot.slane %v1044_v44, 4 }
  0xfc   : > { %1297 = vst [vmem:[#allocation1 + $0x1] ss:$9 sm:$0xff] %v1144_v45 }
  0xfd   : > { %1298 = vst [vmem:[#allocation1 + $0x2] ss:$9 sm:$0xff] %v1145_v47  ;;  %v1735_v60 = vsel %vm1730_vm1, %v1594_v48, 0  ;;  %v1595_v61 = vpack.c.bf16 %v1562_v49, %v1562_v49  ;;  %v1494_v49 = vpack.c.bf16 %v8867_v46, %v8867_v46 }
  0xfe   : > { %1299 = vst [vmem:[#allocation1 + $0x3] ss:$9 sm:$0xff] %v1146_v58  ;;  %1744 = vmatpush.bf16.xpose.msra.mxu3 %v1735_v60  ;;  %v1077_v58 = vpop.f32.mrf.mxu2 }
  0xff   : > { %1300 = vst [vmem:[#allocation1 + $0x4] ss:$9 sm:$0xff] %v1147_v59  ;;  %v1754_v62 = vsel %vm1730_vm1, %v1595_v61, 0 }
 0x100   : > { %v1045_v63 = vpop.f32.mrf.mxu1 }
 0x101   : > { %v1046_v1 = vadd.f32 %v8862_v41, %v1045_v63 }
 0x103   : > { %v8875_v2 = vpack.i.bf16 %v1046_v1, %v1044_v44  ;;  %v1596_v4 = vpack.c.bf16 %v1046_v1, %v1046_v1  ;;  %v1563_v5 = vrot.slane %v1046_v1, 4 }
 0x105   : > { %8183 = vrot.lane.b32.xlu1 %v8875_v2, %s11260_s3  ;;  %8168 = vrot.lane.b32.xlu0 %v8875_v2, %s11264_s5  ;;  %v1773_v9 = vsel %vm1730_vm1, %v1596_v4, 0  ;;  %v1597_v10 = vpack.c.bf16 %v1563_v5, %v1563_v5 }
 0x106   : > { %1763 = vmatpush.bf16.xpose.msrb.mxu3 %v1754_v62  ;;  %v1301_v13 = vld [vmem:[#allocation1] sm:$0xff]  ;;  %1782 = vmatpush.bf16.xpose.msra.mxu1 %v1773_v9  ;;  %v1079_v62 = vpop.f32.mrf.mxu2 }
 0x107   : > { %7918 = vmatmul.msk.bf16.vlgmr.msra.gmra.mxu3 %vm1730_vm1, %v1490_v7  ;;  %1302 = vst [vmem:[#allocation1] ss:$9 sm:$0xff] %v1148_v8  ;;  %v1792_v14 = vsel %vm1730_vm1, %v1597_v10, 0  ;;  %v1495_v43 = vpack.c.bf16 %v1301_v13, %v1301_v13 }
 0x108   : > { %1303 = vst [vmem:[#allocation1 + $0x1] ss:$9 sm:$0xff] %v1149_v11  ;;  %v1048_v16 = vpop.f32.mrf.mxu1  ;;  %1801 = vmatpush.bf16.xpose.msrb.mxu2 %v1792_v14 }
 0x109   : > { %1304 = vst [vmem:[#allocation1 + $0x2] ss:$9 sm:$0xff] %v8842_v34  ;;  %v1049_v18 = vadd.f32 %v8862_v41, %v1048_v16 }
 0x10a   : > { %1305 = vst [vmem:[#allocation1 + $0x3] ss:$9 sm:$0xff] %v1150_v15 }
 0x10b   : > { %1306 = vst [vmem:[#allocation1 + $0x4] ss:$9 sm:$0xff] %v1151_v17  ;;  %v1598_v21 = vpack.c.bf16 %v1049_v18, %v1049_v18  ;;  %v1564_v22 = vrot.slane %v1049_v18, 4 }
 0x10d   : > { %7920 = vmatmul.msk.bf16.vlgmr.msra.gmra.mxu1 %vm1730_vm1, %v1492_v19  ;;  %1106 = vrot.lane.b32.xlu0 %v8827_v25, %s11262_s10  ;;  %v1811_v23 = vsel %vm1730_vm1, %v1598_v21, 0  ;;  %v1599_v26 = vpack.c.bf16 %v1564_v22, %v1564_v22 }
 0x10e   : > { %1820 = vmatpush.bf16.xpose.msra.mxu3 %v1811_v23  ;;  %v1082_v1 = vpop.f32.mrf.mxu2 }
 0x10f   : > { %7921 = vmatmul.msk.bf16.vlgmr.msrb.gmra.mxu2 %vm1730_vm1, %v1493_v24  ;;  %v1830_v27 = vsel %vm1730_vm1, %v1599_v26, 0 }
 0x110   : > { %v1050_v28 = vpop.f32.mrf.mxu1  ;;  %1839 = vmatpush.bf16.xpose.msrb.mxu0 %v1830_v27 }
 0x111   : > { %v1051_v30 = vadd.f32 %v8862_v41, %v1050_v28 }
 0x112   : > { %v1307_v35 = vld [vmem:[#allocation1] sm:$0xff] }
 0x113   : > { %1308 = vst [vmem:[#allocation1] ss:$9 sm:$0xff] %v1152_v29  ;;  %v8172_v36 = vpack.i.bf16 %v1051_v30, %v1049_v18  ;;  %v1600_v37 = vpack.c.bf16 %v1051_v30, %v1051_v30  ;;  %v1565_v38 = vrot.slane %v1051_v30, 4  ;;  %v1496_v45 = vpack.c.bf16 %v1307_v35, %v1307_v35 }
 0x114   : > { %1309 = vst [vmem:[#allocation1 + $0x1] ss:$9 sm:$0xff] %v1153_v32 }
 0x115   : > { %1310 = vst [vmem:[#allocation1 + $0x2] ss:$9 sm:$0xff] %v1154_v33  ;;  %8173 = vrot.lane.b32.xlu2 %v8172_v36, %s11264_s5  ;;  %8198 = vrot.lane.b32.xlu1 %v8172_v36, %s11262_s10  ;;  %v1849_v41 = vsel %vm1730_vm1, %v1600_v37, 0  ;;  %v1601_v44 = vpack.c.bf16 %v1565_v38, %v1565_v38 }
 0x116   : > { %1311 = vst [vmem:[#allocation1 + $0x3] ss:$9 sm:$0xff] %v1155_v39  ;;  %1110 = vrot.lane.b32.xlu0 %v8842_v34, %s11262_s10  ;;  %1858 = vmatpush.bf16.xpose.msrb.mxu1 %v1849_v41  ;;  %v1084_v9 = vpop.f32.mrf.mxu2 }
 0x117   : > { %7919 = vmatmul.msk.bf16.vlgmr.msrb.gmra.mxu3 %vm1730_vm1, %v1491_v40  ;;  %1312 = vst [vmem:[#allocation1 + $0x4] ss:$9 sm:$0xff] %v1156_v42  ;;  %7923 = vmatmul.msk.bf16.vlgmr.msrb.gmra.mxu0 %vm1730_vm1, %v1495_v43  ;;  %v1868_v20 = vsel %vm1730_vm1, %v1601_v44, 0 }
 0x118   : > { %1877 = vmatpush.bf16.xpose.msra.mxu2 %v1868_v20 }
 0x11d   : > { %8203 = vrot.lane.b32.xlu1 %v8172_v36, %s11260_s3  ;;  %8178 = vrot.lane.b32.xlu2 %v8875_v2, %s11262_s10 }
 0x11e   : > { %v1313_v47 = vld [vmem:[#allocation1] sm:$0xff]  ;;  %7924 = vmatmul.msk.bf16.vlgmr.msrb.gmra.mxu1 %vm1730_vm1, %v1496_v45  ;;  %1114 = vrot.lane.b32.xlu0 %v8809_v12, %s11260_s3 }
 0x11f   : > { %v1497_v48 = vpack.c.bf16 %v1313_v47, %v1313_v47 }
 0x121   : > { %7925 = vmatmul.msk.bf16.vlgmr.msra.gmra.mxu2 %vm1730_vm1, %v1497_v48 }
 0x125   : > { %1112 = vrot.lane.b32.xlu2 %v8800_v6, %s11260_s3  ;;  %v8254_v6 = vld [vmem:[%s11287_s1] ss:$0 sm:$0xff] }
 0x126   : > { %1118 = vrot.lane.b32.xlu0 %v8836_v31, %s11260_s3  ;;  %v8939_v4 = vadd.f32 %v8254_v6, %v1077_v58  ;;  %v8943_v7 = vadd.f32 %v8254_v6, %v1079_v62  ;;  %v8951_v11 = vadd.f32 %v8254_v6, %v1082_v1  ;;  %v8953_v13 = vadd.f32 %v8254_v6, %v1084_v9 }
 0x127   : > { %7922 = vmatmul.msk.bf16.vlgmr.msra.gmra.mxu3 %vm1730_vm1, %v1494_v49 }
 0x128   : > { %v8959_v19 = vpack.i.bf16 %v8953_v13, %v8951_v11 }
 0x12d   : > { %1116 = vrot.lane.b32.xlu2 %v8827_v25, %s11260_s3 }
 0x12e   : > { %8193 = vrot.lane.b32.xlu0 %v8959_v19, %s11264_s5 }
 0x130   : > { %v1093_v59 = vpop.permute.xlu0 %1092 }
 0x131   : > { %v1157_v12 = vrot.slane %v1093_v59, 1  ;;  %v1158_v60 = vrot.slane %v1093_v59, 2  ;;  %v1159_v61 = vrot.slane %v1093_v59, 3  ;;  %1314 = vst [vmem:[#allocation1] ss:$9 sm:$0xff] %v1093_v59  ;;  %v1160_v63 = vrot.slane %v1093_v59, 4 }
 0x132   : > { %v1161_v31 = vrot.slane %v1093_v59, 5  ;;  %v1162_v25 = vrot.slane %v1093_v59, 6  ;;  %v1163_v2 = vrot.slane %v1093_v59, 7 }
 0x133   : > { %1315 = vst [vmem:[#allocation1 + $0x1] ss:$9 sm:$0xff] %v1157_v12 }
 0x134   : > { %1316 = vst [vmem:[#allocation1 + $0x2] ss:$9 sm:$0xff] %v1158_v60 }
 0x135   : > { %1120 = vrot.lane.b32.xlu2 %v8842_v34, %s11260_s3  ;;  %1317 = vst [vmem:[#allocation1 + $0x3] ss:$9 sm:$0xff] %v1159_v61  ;;  %v8947_v34 = vpack.i.bf16 %v8943_v7, %v8939_v4 }
 0x136   : > { %1318 = vst [vmem:[#allocation1 + $0x4] ss:$9 sm:$0xff] %v1160_v63 }
 0x138   : > { %v1095_v46 = vpop.permute.xlu0 %1094 }
 0x139   : > { %v1164_v8 = vrot.slane %v1095_v46, 1  ;;  %v1165_v10 = vrot.slane %v1095_v46, 2  ;;  %v1166_v14 = vrot.slane %v1095_v46, 3  ;;  %v1167_v16 = vrot.slane %v1095_v46, 4 }
 0x13a   : > { %v1168_v17 = vrot.slane %v1095_v46, 5  ;;  %v1169_v18 = vrot.slane %v1095_v46, 6  ;;  %v1170_v22 = vrot.slane %v1095_v46, 7 }
 0x13d   : > { %v8941_v5 = vld [vmem:[#allocation1] sm:$0xff]  ;;  %8188 = vrot.lane.b32.xlu2 %v8947_v34, %s11264_s5  ;;  %s11291_s5 = smov 120  }
 0x13e   : > { %1320 = vst [vmem:[#allocation1] ss:$9 sm:$0xff] %v1161_v31 }
 0x13f   : > { %1321 = vst [vmem:[#allocation1 + $0x1] ss:$9 sm:$0xff] %v1162_v25 }
 0x140   : > { %1322 = vst [vmem:[#allocation1 + $0x2] ss:$9 sm:$0xff] %v1163_v2 }
 0x141   : > { %1323 = vst [vmem:[#allocation1 + $0x3] ss:$9 sm:$0xff] %v1095_v46 }
 0x142   : > { %1324 = vst [vmem:[#allocation1 + $0x4] ss:$9 sm:$0xff] %v1164_v8 }
 0x145   : > { %v8965_v29 = vpop.permute.xlu2 %1100 }
 0x146   : > { %v1185_v60 = vrot.slane %v8965_v29, 1  ;;  %v1186_v1 = vrot.slane %v8965_v29, 2 }
 0x149   : > { %v8955_v15 = vld [vmem:[#allocation1] sm:$0xff] }
 0x14a   : > { %1326 = vst [vmem:[#allocation1] ss:$9 sm:$0xff] %v1165_v10 }
 0x14b   : > { %1327 = vst [vmem:[#allocation1 + $0x1] ss:$9 sm:$0xff] %v1166_v14 }
 0x14c   : > { %1328 = vst [vmem:[#allocation1 + $0x2] ss:$9 sm:$0xff] %v1167_v16 }
 0x14d   : > { %1329 = vst [vmem:[#allocation1 + $0x3] ss:$9 sm:$0xff] %v1168_v17  ;;  %v8969_v37 = vpop.permute.xlu2 %1102 }
 0x14e   : > { %1330 = vst [vmem:[#allocation1 + $0x4] ss:$9 sm:$0xff] %v1169_v18  ;;  %v1097_v21 = vpop.permute.xlu1 %1096 }
 0x14f   : > { %v1171_v23 = vrot.slane %v1097_v21, 1  ;;  %v1172_v26 = vrot.slane %v1097_v21, 2  ;;  %v1173_v27 = vrot.slane %v1097_v21, 3  ;;  %v1174_v28 = vrot.slane %v1097_v21, 4 }
 0x150   : > { %v1175_v30 = vrot.slane %v1097_v21, 5  ;;  %v1176_v32 = vrot.slane %v1097_v21, 6  ;;  %v1177_v33 = vrot.slane %v1097_v21, 7 }
 0x155   : > { %v8963_v24 = vld [vmem:[#allocation1] sm:$0xff] }
 0x156   : > { %1332 = vst [vmem:[#allocation1] ss:$9 sm:$0xff] %v1170_v22  ;;  %v1099_v36 = vpop.permute.xlu1 %1098 }
 0x157   : > { %1333 = vst [vmem:[#allocation1 + $0x1] ss:$9 sm:$0xff] %v1097_v21  ;;  %v1178_v38 = vrot.slane %v1099_v36, 1  ;;  %v1179_v39 = vrot.slane %v1099_v36, 2  ;;  %v1180_v42 = vrot.slane %v1099_v36, 3  ;;  %v1181_v41 = vrot.slane %v1099_v36, 4 }
 0x158   : > { %1334 = vst [vmem:[#allocation1 + $0x2] ss:$9 sm:$0xff] %v1171_v23  ;;  %v1182_v43 = vrot.slane %v1099_v36, 5  ;;  %v1183_v47 = vrot.slane %v1099_v36, 6  ;;  %v1184_v49 = vrot.slane %v1099_v36, 7 }
 0x159   : > { %1335 = vst [vmem:[#allocation1 + $0x3] ss:$9 sm:$0xff] %v1172_v26 }
 0x15a   : > { %1336 = vst [vmem:[#allocation1 + $0x4] ss:$9 sm:$0xff] %v1173_v27 }
 0x161   : > { %v8967_v35 = vld [vmem:[#allocation1] sm:$0xff] }
 0x162   : > { %1338 = vst [vmem:[#allocation1] ss:$9 sm:$0xff] %v1174_v28 }
 0x163   : > { %1339 = vst [vmem:[#allocation1 + $0x1] ss:$9 sm:$0xff] %v1175_v30  ;;  %v1187_v30 = vrot.slane %v8965_v29, 3 }
 0x164   : > { %1340 = vst [vmem:[#allocation1 + $0x2] ss:$9 sm:$0xff] %v1176_v32 }
 0x165   : > { %1341 = vst [vmem:[#allocation1 + $0x3] ss:$9 sm:$0xff] %v1177_v33 }
 0x166   : > { %1342 = vst [vmem:[#allocation1 + $0x4] ss:$9 sm:$0xff] %v1099_v36 }
 0x16d   : > { %v8971_v40 = vld [vmem:[#allocation1] sm:$0xff] }
 0x16e   : > { %1344 = vst [vmem:[#allocation1] ss:$9 sm:$0xff] %v1178_v38 }
 0x16f   : > { %1345 = vst [vmem:[#allocation1 + $0x1] ss:$9 sm:$0xff] %v1179_v39  ;;  %v8174_v44 = vpop.permute.xlu2 %8173  ;;  %v1498_v39 = vpack.c.bf16 %v8941_v5, %v8941_v5 }
 0x170   : > { %1346 = vst [vmem:[#allocation1 + $0x2] ss:$9 sm:$0xff] %v1180_v42  ;;  %v8176_v20 = vunpack.i.h.bf16 %v8174_v44  ;;  %v8175_v45 = vunpack.i.l.bf16 %v8174_v44  ;;  %v1500_v42 = vpack.c.bf16 %v8963_v24, %v8963_v24  ;;  %v8994_v44 = vpop.permute.xlu1 %1104  ;;  %v1190_v24 = vrot.slane %v8965_v29, 6 }
 0x171   : > { %1347 = vst [vmem:[#allocation1 + $0x3] ss:$9 sm:$0xff] %v1181_v41  ;;  %v1188_v41 = vrot.slane %v8965_v29, 4 }
 0x172   : > { %1348 = vst [vmem:[#allocation1 + $0x4] ss:$9 sm:$0xff] %v1182_v43  ;;  %v1606_v61 = vpack.c.bf16 %v8175_v45, %v8175_v45  ;;  %v1608_v62 = vpack.c.bf16 %v8176_v20, %v8176_v20  ;;  %v1569_v2 = vrot.slane %v8176_v20, 4  ;;  %v1568_v8 = vrot.slane %v8175_v45, 4 }
 0x173   : > { %v1189_v20 = vrot.slane %v8965_v29, 5 }
 0x174   : > { %v1963_v17 = vsel %vm1730_vm1, %v1606_v61, 0  ;;  %v2001_v18 = vsel %vm1730_vm1, %v1608_v62, 0  ;;  %v1607_v23 = vpack.c.bf16 %v1568_v8, %v1568_v8  ;;  %v1609_v26 = vpack.c.bf16 %v1569_v2, %v1569_v2 }
 0x176   : > { %v1982_v36 = vsel %vm1730_vm1, %v1607_v23, 0  ;;  %v2020_v38 = vsel %vm1730_vm1, %v1609_v26, 0 }
 0x177   : > { %v8169_v48 = vpop.permute.xlu0 %8168  ;;  %v8179_v63 = vpop.permute.xlu2 %8178 }
 0x178   : > { %v8171_v59 = vunpack.i.h.bf16 %v8169_v48  ;;  %v8170_v12 = vunpack.i.l.bf16 %v8169_v48  ;;  %v8181_v14 = vunpack.i.h.bf16 %v8179_v63  ;;  %v8180_v16 = vunpack.i.l.bf16 %v8179_v63  ;;  %v9009_v62 = vpop.permute.xlu1 %1108 }
 0x179   : > { %v8973_v58 = vld [vmem:[#allocation1] sm:$0xff]  ;;  %v1499_v48 = vpack.c.bf16 %v8955_v15, %v8955_v15  ;;  %v1192_v15 = vrot.slane %v8969_v37, 1 }
 0x17a   : > { %1350 = vst [vmem:[#allocation1] ss:$9 sm:$0xff] %v1183_v47  ;;  %v1567_v6 = vrot.slane %v8171_v59, 4  ;;  %v1566_v31 = vrot.slane %v8170_v12, 4  ;;  %v1602_v25 = vpack.c.bf16 %v8170_v12, %v8170_v12  ;;  %v1604_v46 = vpack.c.bf16 %v8171_v59, %v8171_v59 }
 0x17b   : > { %1351 = vst [vmem:[#allocation1 + $0x1] ss:$9 sm:$0xff] %v1184_v49  ;;  %v1610_v27 = vpack.c.bf16 %v8180_v16, %v8180_v16  ;;  %v1612_v28 = vpack.c.bf16 %v8181_v14, %v8181_v14  ;;  %v1191_v47 = vrot.slane %v8965_v29, 7  ;;  %v1501_v49 = vpack.c.bf16 %v8967_v35, %v8967_v35 }
 0x17c   : > { %1352 = vst [vmem:[#allocation1 + $0x2] ss:$9 sm:$0xff] %v8965_v29  ;;  %v1887_v9 = vsel %vm1730_vm1, %v1602_v25, 0  ;;  %v1925_v10 = vsel %vm1730_vm1, %v1604_v46, 0  ;;  %v1603_v21 = vpack.c.bf16 %v1566_v31, %v1566_v31  ;;  %v1605_v22 = vpack.c.bf16 %v1567_v6, %v1567_v6 }
 0x17d   : > { %1353 = vst [vmem:[#allocation1 + $0x3] ss:$9 sm:$0xff] %v1185_v60  ;;  %1896 = vmatpush.bf16.xpose.msrb.mxu3 %v1887_v9  ;;  %1934 = vmatpush.bf16.xpose.msra.mxu1 %v1925_v10  ;;  %v2039_v5 = vsel %vm1730_vm1, %v1610_v27, 0  ;;  %v2077_v45 = vsel %vm1730_vm1, %v1612_v28, 0  ;;  %v1571_v59 = vrot.slane %v8181_v14, 4  ;;  %v1570_v12 = vrot.slane %v8180_v16, 4 }
 0x17e   : > { %1354 = vst [vmem:[#allocation1 + $0x4] ss:$9 sm:$0xff] %v1186_v1  ;;  %v1906_v32 = vsel %vm1730_vm1, %v1603_v21, 0  ;;  %v1944_v33 = vsel %vm1730_vm1, %v1605_v22, 0  ;;  %v1193_v35 = vrot.slane %v8969_v37, 2  ;;  %v1194_v31 = vrot.slane %v8969_v37, 3 }
 0x17f   : > { %1915 = vmatpush.bf16.xpose.msra.mxu0 %v1906_v32  ;;  %1953 = vmatpush.bf16.xpose.msrb.mxu2 %v1944_v33  ;;  %v1611_v60 = vpack.c.bf16 %v1570_v12, %v1570_v12  ;;  %v1613_v61 = vpack.c.bf16 %v1571_v59, %v1571_v59  ;;  %v1195_v25 = vrot.slane %v8969_v37, 4  ;;  %v1502_v46 = vpack.c.bf16 %v8971_v40, %v8971_v40 }
 0x180   : > { %v9023_v2 = vpop.permute.xlu1 %8183  ;;  %v1503_v40 = vpack.c.bf16 %v8973_v58, %v8973_v58  ;;  %v1196_v14 = vrot.slane %v8969_v37, 5  ;;  %v1197_v16 = vrot.slane %v8969_v37, 6  ;;  %v1198_v21 = vrot.slane %v8969_v37, 7 }
 0x181   : > { %v2058_v29 = vsel %vm1730_vm1, %v1611_v60, 0  ;;  %v2096_v63 = vsel %vm1730_vm1, %v1613_v61, 0  ;;  %v1199_v58 = vrot.slane %v8994_v44, 1 }
 0x184   : > { %7926 = vmatmul.msk.bf16.vlgmr.msrb.gmra.mxu3 %vm1730_vm1, %v1498_v39  ;;  %7928 = vmatmul.msk.bf16.vlgmr.msra.gmra.mxu1 %vm1730_vm1, %v1500_v42  ;;  %v1201_v39 = vrot.slane %v8994_v44, 3  ;;  %v1202_v42 = vrot.slane %v8994_v44, 4 }
 0x185   : > { %1972 = vmatpush.bf16.xpose.msra.mxu3 %v1963_v17  ;;  %2010 = vmatpush.bf16.xpose.msrb.mxu1 %v2001_v18  ;;  %v8992_v43 = vld [vmem:[#allocation1] sm:$0xff] }
 0x186   : > { %1356 = vst [vmem:[#allocation1] ss:$9 sm:$0xff] %v1187_v30  ;;  %7927 = vmatmul.msk.bf16.vlgmr.msra.gmra.mxu0 %vm1730_vm1, %v1499_v48  ;;  %7929 = vmatmul.msk.bf16.vlgmr.msrb.gmra.mxu2 %vm1730_vm1, %v1501_v49  ;;  %v1504_v18 = vpack.c.bf16 %v8992_v43, %v8992_v43 }
 0x187   : > { %1991 = vmatpush.bf16.xpose.msrb.mxu0 %v1982_v36  ;;  %2029 = vmatpush.bf16.xpose.msra.mxu2 %v2020_v38  ;;  %1357 = vst [vmem:[#allocation1 + $0x1] ss:$9 sm:$0xff] %v1188_v41 }
 0x188   : > { %1358 = vst [vmem:[#allocation1 + $0x2] ss:$9 sm:$0xff] %v1189_v20  ;;  %v8199_v23 = vpop.permute.xlu1 %8198 }
 0x189   : > { %1359 = vst [vmem:[#allocation1 + $0x3] ss:$9 sm:$0xff] %v1190_v24  ;;  %v8201_v27 = vunpack.i.h.bf16 %v8199_v23  ;;  %v8200_v28 = vunpack.i.l.bf16 %v8199_v23  ;;  %v1203_v24 = vrot.slane %v8994_v44, 5 }
 0x18a   : > { %1360 = vst [vmem:[#allocation1 + $0x4] ss:$9 sm:$0xff] %v1191_v47  ;;  %v9020_v1 = vpop.f32.mrf.mxu3  ;;  %v9027_v9 = vpop.f32.mrf.mxu1  ;;  %v1204_v47 = vrot.slane %v8994_v44, 6 }
 0x18b   : > { %v2340_v8 = vsel %vm2339_vm2, %v9020_v1, -inf  ;;  %v2346_v10 = vsel %vm2339_vm2, %v9027_v9, -inf  ;;  %v1573_v32 = vrot.slane %v8201_v27, 4  ;;  %v1572_v33 = vrot.slane %v8200_v28, 4 }
 0x18c   : > { %2341 = vmax.xlane.f32.xlu0 %v2340_v8  ;;  %2347 = vmax.xlane.f32.xlu2 %v2346_v10  ;;  %v1614_v36 = vpack.c.bf16 %v8200_v28, %v8200_v28  ;;  %v1616_v38 = vpack.c.bf16 %v8201_v27, %v8201_v27  ;;  %v8186_v28 = vunpack.i.h.bf16 %v9023_v2 }
 0x18d   : > { %2048 = vmatpush.bf16.xpose.msrb.mxu3 %v2039_v5  ;;  %2086 = vmatpush.bf16.xpose.msra.mxu1 %v2077_v45  ;;  %v1615_v5 = vpack.c.bf16 %v1572_v33, %v1572_v33  ;;  %v1617_v45 = vpack.c.bf16 %v1573_v32, %v1573_v32 }
 0x18e   : > { %v2115_v43 = vsel %vm1730_vm1, %v1614_v36, 0  ;;  %v2153_v20 = vsel %vm1730_vm1, %v1616_v38, 0 }
 0x18f   : > { %2067 = vmatpush.bf16.xpose.msra.mxu0 %v2058_v29  ;;  %2105 = vmatpush.bf16.xpose.msrb.mxu2 %v2096_v63  ;;  %v2134_v48 = vsel %vm1730_vm1, %v1615_v5, 0  ;;  %v2172_v49 = vsel %vm1730_vm1, %v1617_v45, 0  ;;  %v1107_v29 = vpop.permute.xlu0 %1106  ;;  %v1205_v63 = vrot.slane %v8994_v44, 7 }
 0x190   : > { %v1211_v23 = vrot.slane %v1107_v29, 6  ;;  %v1212_v27 = vrot.slane %v1107_v29, 7 }
 0x191   : > { %v1361_v6 = vld [vmem:[#allocation1] sm:$0xff] }
 0x192   : > { %1362 = vst [vmem:[#allocation1] ss:$9 sm:$0xff] %v8969_v37  ;;  %v1748_v22 = vpop.f32.mrf.mxu3  ;;  %v1786_v26 = vpop.f32.mrf.mxu1  ;;  %v1505_v30 = vpack.c.bf16 %v1361_v6, %v1361_v6  ;;  %v1200_v37 = vrot.slane %v8994_v44, 2 }
 0x193   : > { %1363 = vst [vmem:[#allocation1 + $0x1] ss:$9 sm:$0xff] %v1192_v15  ;;  %v9054_v59 = vpop.f32.mrf.mxu2  ;;  %v8185_v15 = vunpack.i.l.bf16 %v9023_v2  ;;  %v1213_v2 = vrot.slane %v9009_v62, 1 }
 0x194   : > { %1364 = vst [vmem:[#allocation1 + $0x2] ss:$9 sm:$0xff] %v1193_v35  ;;  %7930 = vmatmul.msk.bf16.vlgmr.msra.gmra.mxu3 %vm1730_vm1, %v1502_v46  ;;  %7932 = vmatmul.msk.bf16.vlgmr.msrb.gmra.mxu1 %vm1730_vm1, %v1504_v18  ;;  %v2349_v12 = vsel %vm2339_vm2, %v9054_v59, -inf  ;;  %v9058_v60 = vpop.f32.mrf.mxu0  ;;  %v1206_v35 = vrot.slane %v1107_v29, 1  ;;  %v1208_v46 = vrot.slane %v1107_v29, 3 }
 0x195   : > { %1365 = vst [vmem:[#allocation1 + $0x3] ss:$9 sm:$0xff] %v1194_v31  ;;  %2124 = vmatpush.bf16.xpose.msra.mxu3 %v2115_v43  ;;  %2162 = vmatpush.bf16.xpose.msrb.mxu1 %v2153_v20  ;;  %v2355_v61 = vsel %vm2339_vm2, %v9058_v60, -inf  ;;  %v1207_v31 = vrot.slane %v1107_v29, 2  ;;  %v1618_v8 = vpack.c.bf16 %v8185_v15, %v8185_v15  ;;  %v1214_v20 = vrot.slane %v9009_v62, 2 }
 0x196   : > { %1366 = vst [vmem:[#allocation1 + $0x4] ss:$9 sm:$0xff] %v1195_v25  ;;  %7931 = vmatmul.msk.bf16.vlgmr.msrb.gmra.mxu0 %vm1730_vm1, %v1503_v40  ;;  %7933 = vmatmul.msk.bf16.vlgmr.msra.gmra.mxu2 %vm1730_vm1, %v1505_v30 }
 0x197   : > { %2143 = vmatpush.bf16.xpose.msrb.mxu0 %v2134_v48  ;;  %2181 = vmatpush.bf16.xpose.msra.mxu2 %v2172_v49  ;;  %v1217_v48 = vrot.slane %v9009_v62, 5 }
 0x198   : > { %2350 = vmax.xlane.f32.xlu2 %v2349_v12  ;;  %2356 = vmax.xlane.f32.xlu1 %v2355_v61  ;;  %v8204_v12 = vpop.permute.xlu1 %8203 }
 0x19b   : > { %v1805_v25 = vpop.f32.mrf.mxu2  ;;  %v9073_v30 = vpop.f32.mrf.mxu1 }
 0x19c   : > { %v1843_v10 = vpop.f32.mrf.mxu0  ;;  %v2358_v33 = vsel %vm2339_vm2, %v9073_v30, -inf  ;;  %v1111_v25 = vpop.permute.xlu0 %1110 }
 0x19d   : > { %v9036_v17 = vld [vmem:[#allocation1] sm:$0xff] }
 0x19e   : > { %1368 = vst [vmem:[#allocation1] ss:$9 sm:$0xff] %v1196_v14  ;;  %v1506_v40 = vpack.c.bf16 %v9036_v17, %v9036_v17  ;;  %v1574_v14 = vrot.slane %v8185_v15, 4 }
 0x19f   : > { %1369 = vst [vmem:[#allocation1 + $0x1] ss:$9 sm:$0xff] %v1197_v16  ;;  %v1209_v16 = vrot.slane %v1107_v29, 4 }
 0x1a0   : > { %1370 = vst [vmem:[#allocation1 + $0x2] ss:$9 sm:$0xff] %v1198_v21  ;;  %v1619_v18 = vpack.c.bf16 %v1574_v14, %v1574_v14  ;;  %v1210_v21 = vrot.slane %v1107_v29, 5  ;;  %2359 = vmax.xlane.f32.xlu2 %v2358_v33  ;;  %v1225_v33 = vrot.slane %v1111_v25, 6 }
 0x1a1   : > { %1371 = vst [vmem:[#allocation1 + $0x3] ss:$9 sm:$0xff] %v8994_v44  ;;  %v2191_v44 = vsel %vm1730_vm1, %v1618_v8, 0  ;;  %v1219_v8 = vrot.slane %v9009_v62, 7 }
 0x1a2   : > { %1372 = vst [vmem:[#allocation1 + $0x4] ss:$9 sm:$0xff] %v1199_v58  ;;  %v9068_v58 = vpop.f32.mrf.mxu3  ;;  %v2210_v32 = vsel %vm1730_vm1, %v1619_v18, 0 }
 0x1a3   : > { %v2343_v17 = vsel %vm2339_vm2, %v9068_v58, -inf }
 0x1a4   : > { %7934 = vmatmul.msk.bf16.vlgmr.msrb.gmra.mxu3 %vm1730_vm1, %v1506_v40  ;;  %2344 = vmax.xlane.f32.xlu1 %v2343_v17  ;;  %v1223_v17 = vrot.slane %v1111_v25, 4 }
 0x1a5   : > { %2200 = vmatpush.bf16.xpose.msrb.mxu3 %v2191_v44  ;;  %v1220_v44 = vrot.slane %v1111_v25, 1 }
 0x1a9   : > { %v1373_v41 = vld [vmem:[#allocation1] sm:$0xff] }
 0x1aa   : > { %1374 = vst [vmem:[#allocation1] ss:$9 sm:$0xff] %v1200_v37  ;;  %v1507_v26 = vpack.c.bf16 %v1373_v41, %v1373_v41  ;;  %v1620_v37 = vpack.c.bf16 %v8186_v28, %v8186_v28  ;;  %v1767_v36 = vpop.f32.mrf.mxu3  ;;  %v9081_v41 = vpop.f32.mrf.mxu2 }
 0x1ab   : > { %1375 = vst [vmem:[#allocation1 + $0x1] ss:$9 sm:$0xff] %v1201_v39  ;;  %v1575_v39 = vrot.slane %v8186_v28, 4  ;;  %v2361_v45 = vsel %vm2339_vm2, %v9081_v41, -inf }
 0x1ac   : > { %1376 = vst [vmem:[#allocation1 + $0x2] ss:$9 sm:$0xff] %v1202_v42  ;;  %7935 = vmatmul.msk.bf16.vlgmr.msra.gmra.mxu0 %vm1730_vm1, %v1507_v26  ;;  %v1862_v42 = vpop.f32.mrf.mxu1  ;;  %v2229_v43 = vsel %vm1730_vm1, %v1620_v37, 0  ;;  %2362 = vmax.xlane.f32.xlu0 %v2361_v45  ;;  %v1222_v26 = vrot.slane %v1111_v25, 3  ;;  %v1226_v37 = vrot.slane %v1111_v25, 7 }
 0x1ad   : > { %1377 = vst [vmem:[#allocation1 + $0x3] ss:$9 sm:$0xff] %v1203_v24  ;;  %2219 = vmatpush.bf16.xpose.msra.mxu0 %v2210_v32  ;;  %v1216_v24 = vrot.slane %v9009_v62, 4  ;;  %v1621_v49 = vpack.c.bf16 %v1575_v39, %v1575_v39  ;;  %v1224_v32 = vrot.slane %v1111_v25, 5  ;;  %v1113_v42 = vpop.permute.xlu2 %1112 }
 0x1ae   : > { %1378 = vst [vmem:[#allocation1 + $0x4] ss:$9 sm:$0xff] %v1204_v47  ;;  %v1215_v47 = vrot.slane %v9009_v62, 3  ;;  %v1228_v45 = vrot.slane %v1113_v42, 2 }
 0x1b2   : > { %v9091_v61 = vpop.f32.mrf.mxu3  ;;  %v1881_v15 = vpop.f32.mrf.mxu2 }
 0x1b5   : > { %v1379_v6 = vld [vmem:[#allocation1] sm:$0xff] }
 0x1b6   : > { %1380 = vst [vmem:[#allocation1] ss:$9 sm:$0xff] %v1205_v63  ;;  %v1508_v38 = vpack.c.bf16 %v1379_v6, %v1379_v6  ;;  %v8205_v63 = vunpack.i.l.bf16 %v8204_v12  ;;  %v2248_v6 = vsel %vm1730_vm1, %v1621_v49, 0 }
 0x1b7   : > { %1381 = vst [vmem:[#allocation1 + $0x1] ss:$9 sm:$0xff] %v1107_v29 }
 0x1b8   : > { %1382 = vst [vmem:[#allocation1 + $0x2] ss:$9 sm:$0xff] %v1206_v35  ;;  %7936 = vmatmul.msk.bf16.vlgmr.msra.gmra.mxu1 %vm1730_vm1, %v1508_v38  ;;  %v2352_v35 = vsel %vm2339_vm2, %v9091_v61, -inf  ;;  %v1576_v18 = vrot.slane %v8205_v63, 4 }
 0x1b9   : > { %1383 = vst [vmem:[#allocation1 + $0x3] ss:$9 sm:$0xff] %v1207_v31  ;;  %2238 = vmatpush.bf16.xpose.msra.mxu1 %v2229_v43  ;;  %2353 = vmax.xlane.f32.xlu0 %v2352_v35  ;;  %v1218_v31 = vrot.slane %v9009_v62, 6  ;;  %v1233_v35 = vrot.slane %v1113_v42, 7 }
 0x1ba   : > { %1384 = vst [vmem:[#allocation1 + $0x4] ss:$9 sm:$0xff] %v1208_v46  ;;  %v1622_v46 = vpack.c.bf16 %v8205_v63, %v8205_v63  ;;  %v1824_v40 = vpop.f32.mrf.mxu3  ;;  %v1232_v63 = vrot.slane %v1113_v42, 6 }
 0x1c1   : > { %v1385_v22 = vld [vmem:[#allocation1] sm:$0xff] }
 0x1c2   : > { %1386 = vst [vmem:[#allocation1] ss:$9 sm:$0xff] %v1209_v16  ;;  %v1509_v29 = vpack.c.bf16 %v1385_v22, %v1385_v22  ;;  %v1221_v16 = vrot.slane %v1111_v25, 2  ;;  %v1623_v22 = vpack.c.bf16 %v1576_v18, %v1576_v18 }
 0x1c3   : > { %1387 = vst [vmem:[#allocation1 + $0x1] ss:$9 sm:$0xff] %v1210_v21  ;;  %v2267_v21 = vsel %vm1730_vm1, %v1622_v46, 0 }
 0x1c4   : > { %1388 = vst [vmem:[#allocation1 + $0x2] ss:$9 sm:$0xff] %v1211_v23  ;;  %7937 = vmatmul.msk.bf16.vlgmr.msrb.gmra.mxu2 %vm1730_vm1, %v1509_v29  ;;  %v1698_v29 = vpack.c.bf16 %v8939_v4, %v8939_v4 }
 0x1c5   : > { %1389 = vst [vmem:[#allocation1 + $0x3] ss:$9 sm:$0xff] %v1212_v27  ;;  %2257 = vmatpush.bf16.xpose.msrb.mxu2 %v2248_v6  ;;  %v2286_v27 = vsel %vm1730_vm1, %v1623_v22, 0  ;;  %v1115_v6 = vpop.permute.xlu0 %1114 }
 0x1c6   : > { %1390 = vst [vmem:[#allocation1 + $0x4] ss:$9 sm:$0xff] %v9009_v62  ;;  %v8206_v62 = vunpack.i.h.bf16 %v8204_v12  ;;  %v1231_v12 = vrot.slane %v1113_v42, 5  ;;  %v2730_v46 = vsel %vm2728_vm3, %v1698_v29, 0  ;;  %v1239_v22 = vrot.slane %v1115_v6, 6 }
 0x1c8   : > { %v1624_v36 = vpack.c.bf16 %v8206_v62, %v8206_v62 }
 0x1ca   : > { %v2305_v39 = vsel %vm1730_vm1, %v1624_v36, 0 }
 0x1cd   : > { %v1391_v5 = vld [vmem:[#allocation1] sm:$0xff] }
 0x1ce   : > { %1392 = vst [vmem:[#allocation1] ss:$9 sm:$0xff] %v1213_v2  ;;  %v1510_v14 = vpack.c.bf16 %v1391_v5, %v1391_v5  ;;  %v1577_v2 = vrot.slane %v8206_v62, 4  ;;  %v1700_v62 = vpack.c.bf16 %v8943_v7, %v8943_v7 }
 0x1cf   : > { %1393 = vst [vmem:[#allocation1 + $0x1] ss:$9 sm:$0xff] %v1214_v20  ;;  %v1227_v20 = vrot.slane %v1113_v42, 1 }
 0x1d0   : > { %1395 = vst [vmem:[#allocation1 + $0x3] ss:$9 sm:$0xff] %v1216_v24  ;;  %7938 = vmatmul.msk.bf16.vlgmr.msra.gmra.mxu3 %vm1730_vm1, %v1510_v14  ;;  %v1625_v43 = vpack.c.bf16 %v1577_v2, %v1577_v2  ;;  %v1236_v14 = vrot.slane %v1115_v6, 3  ;;  %v2768_v36 = vsel %vm2728_vm3, %v1700_v62, 0  ;;  %v1667_v2 = vrot.slane %v8943_v7, 4 }
 0x1d1   : > { %1394 = vst [vmem:[#allocation1 + $0x2] ss:$9 sm:$0xff] %v1215_v47  ;;  %2276 = vmatpush.bf16.xpose.msra.mxu3 %v2267_v21  ;;  %v1230_v47 = vrot.slane %v1113_v42, 4  ;;  %v1238_v21 = vrot.slane %v1115_v6, 5  ;;  %v1668_v62 = vrot.slane %v8951_v11, 4 }
 0x1d2   : > { %1396 = vst [vmem:[#allocation1 + $0x4] ss:$9 sm:$0xff] %v1217_v48  ;;  %v1229_v48 = vrot.slane %v1113_v42, 3  ;;  %v2324_v49 = vsel %vm1730_vm1, %v1625_v43, 0  ;;  %v1701_v43 = vpack.c.bf16 %v1667_v2, %v1667_v2 }
 0x1d3   : > { %v1703_v2 = vpack.c.bf16 %v1668_v62, %v1668_v62 }
 0x1d9   : > { %v1397_v10 = vld [vmem:[#allocation1] sm:$0xff] }
 0x1da   : > { %1398 = vst [vmem:[#allocation1] ss:$9 sm:$0xff] %v1218_v31  ;;  %v1511_v23 = vpack.c.bf16 %v1397_v10, %v1397_v10  ;;  %v1235_v10 = vrot.slane %v1115_v6, 2 }
 0x1db   : > { %1399 = vst [vmem:[#allocation1 + $0x1] ss:$9 sm:$0xff] %v1219_v8  ;;  %v1666_v8 = vrot.slane %v8939_v4, 4  ;;  %v1240_v4 = vrot.slane %v1115_v6, 7 }
 0x1dc   : > { %1400 = vst [vmem:[#allocation1 + $0x2] ss:$9 sm:$0xff] %v1111_v25  ;;  %7939 = vmatmul.msk.bf16.vlgmr.msrb.gmra.mxu0 %vm1730_vm1, %v1511_v23  ;;  %v1234_v25 = vrot.slane %v1115_v6, 1 }
 0x1dd   : > { %1401 = vst [vmem:[#allocation1 + $0x3] ss:$9 sm:$0xff] %v1220_v44  ;;  %2295 = vmatpush.bf16.xpose.msrb.mxu0 %v2286_v27  ;;  %v1699_v40 = vpack.c.bf16 %v1666_v8, %v1666_v8 }
 0x1de   : > { %1402 = vst [vmem:[#allocation1 + $0x4] ss:$9 sm:$0xff] %v1221_v16  ;;  %v1237_v16 = vrot.slane %v1115_v6, 4 }
 0x1df   : > { %v2749_v23 = vsel %vm2728_vm3, %v1699_v40, 0 }
 0x1e5   : > { %v1403_v28 = vld [vmem:[#allocation1] sm:$0xff] }
 0x1e6   : > { %1404 = vst [vmem:[#allocation1] ss:$9 sm:$0xff] %v1222_v26  ;;  %v1512_v38 = vpack.c.bf16 %v1403_v28, %v1403_v28  ;;  %v1117_v26 = vpop.permute.xlu2 %1116 }
 0x1e7   : > { %1405 = vst [vmem:[#allocation1 + $0x1] ss:$9 sm:$0xff] %v1223_v17  ;;  %v1241_v17 = vrot.slane %v1117_v26, 1 }
 0x1e8   : > { %1406 = vst [vmem:[#allocation1 + $0x2] ss:$9 sm:$0xff] %v1224_v32  ;;  %7940 = vmatmul.msk.bf16.vlgmr.msrb.gmra.mxu1 %vm1730_vm1, %v1512_v38  ;;  %v1242_v32 = vrot.slane %v1117_v26, 2 }
 0x1e9   : > { %1407 = vst [vmem:[#allocation1 + $0x3] ss:$9 sm:$0xff] %v1225_v33  ;;  %2314 = vmatpush.bf16.xpose.msrb.mxu1 %v2305_v39  ;;  %v9116_v33 = vpop.permute.xlu0 %1118 }
 0x1ea   : > { %1408 = vst [vmem:[#allocation1 + $0x4] ss:$9 sm:$0xff] %v1226_v37  ;;  %v1243_v37 = vrot.slane %v1117_v26, 3 }
 0x1ee   : > { %v9120_v38 = vpop.permute.xlu2 %1120 }
 0x1f1   : > { %v1409_v5 = vld [vmem:[#allocation1] sm:$0xff]  ;;  %v9123_v39 = vpop.permute.xlu0 %8193 }
 0x1f2   : > { %1410 = vst [vmem:[#allocation1] ss:$9 sm:$0xff] %v1113_v42  ;;  %v1513_v24 = vpack.c.bf16 %v1409_v5, %v1409_v5  ;;  %v1244_v42 = vrot.slane %v1117_v26, 4 }
 0x1f3   : > { %1411 = vst [vmem:[#allocation1 + $0x1] ss:$9 sm:$0xff] %v1227_v20  ;;  %v1245_v20 = vrot.slane %v1117_v26, 5 }
 0x1f4   : > { %1412 = vst [vmem:[#allocation1 + $0x2] ss:$9 sm:$0xff] %v1228_v45  ;;  %7941 = vmatmul.msk.bf16.vlgmr.msra.gmra.mxu2 %vm1730_vm1, %v1513_v24  ;;  %v1246_v24 = vrot.slane %v1117_v26, 6 }
 0x1f5   : > { %1414 = vst [vmem:[#allocation1 + $0x4] ss:$9 sm:$0xff] %v1230_v47  ;;  %2333 = vmatpush.bf16.xpose.msra.mxu2 %v2324_v49  ;;  %v2787_v49 = vsel %vm2728_vm3, %v1701_v43, 0 }
 0x1f6   : > { %1413 = vst [vmem:[#allocation1 + $0x3] ss:$9 sm:$0xff] %v1229_v48  ;;  %v9125_v45 = vpop.permute.xlu2 %8188  ;;  %v1247_v48 = vrot.slane %v1117_v26, 7 }
 0x1fd   : > { %v1415_v15 = vld [vmem:[#allocation1] sm:$0xff] }
 0x1fe   : > { %1416 = vst [vmem:[#allocation1] ss:$9 sm:$0xff] %v1231_v12  ;;  %v1514_v31 = vpack.c.bf16 %v1415_v15, %v1415_v15  ;;  %v1248_v15 = vrot.slane %v9116_v33, 1 }
 0x1ff   : > { %1417 = vst [vmem:[#allocation1 + $0x1] ss:$9 sm:$0xff] %v1232_v63  ;;  %v2342_v7 = vpop.xlane.xlu0 %2341  ;;  %v2348_v29 = vpop.xlane.xlu2 %2347 }
 0x200   : > { %1418 = vst [vmem:[#allocation1 + $0x2] ss:$9 sm:$0xff] %v1233_v35  ;;  %7942 = vmatmul.msk.bf16.vlgmr.msrb.gmra.mxu3 %vm1730_vm1, %v1514_v31  ;;  %v2436_v12 = vsub.f32 %v9020_v1, %v2342_v7  ;;  %v2438_v35 = vsub.f32 %v9027_v9, %v2348_v29  ;;  %v1249_v31 = vrot.slane %v9116_v33, 2  ;;  %v1255_v7 = vrot.slane %v9120_v38, 1 }
 0x201   : > { %1419 = vst [vmem:[#allocation1 + $0x3] ss:$9 sm:$0xff] %v1115_v6  ;;  %2739 = vmatpush.bf16.msrb.mxu3 %v2730_v46  ;;  %v9131_v63 = vpop.f32.mrf.mxu1  ;;  %v1702_v6 = vpack.c.bf16 %v8951_v11, %v8951_v11 }
 0x202   : > { %1420 = vst [vmem:[#allocation1 + $0x4] ss:$9 sm:$0xff] %v1234_v25  ;;  %v2468_v46 = vmul.f32 1.442695, %v2436_v12 }
 0x203   : > { %v9138_v8 = vpop.f32.mrf.mxu0  ;;  %v2806_v9 = vsel %vm2728_vm3, %v1702_v6, 0 }
 0x204   : > { %v2367_v40 = vsel %vm2339_vm2, %v9138_v8, -inf  ;;  %8266 = vpow2.f32 %v2468_v46 }
 0x205   : > { %2368 = vmax.xlane.f32.xlu2 %v2367_v40 }
 0x209   : > { %v1421_v44 = vld [vmem:[#allocation1] sm:$0xff] }
 0x20a   : > { %1422 = vst [vmem:[#allocation1] ss:$9 sm:$0xff] %v1235_v10  ;;  %v1515_v18 = vpack.c.bf16 %v1421_v44, %v1421_v44  ;;  %v1250_v10 = vrot.slane %v9116_v33, 3  ;;  %v1252_v44 = vrot.slane %v9116_v33, 5 }
 0x20b   : > { %1423 = vst [vmem:[#allocation1 + $0x1] ss:$9 sm:$0xff] %v1236_v14  ;;  %v1251_v14 = vrot.slane %v9116_v33, 4 }
 0x20c   : > { %1424 = vst [vmem:[#allocation1 + $0x2] ss:$9 sm:$0xff] %v1237_v16  ;;  %7943 = vmatmul.msk.bf16.vlgmr.msra.gmra.mxu0 %vm1730_vm1, %v1515_v18  ;;  %v2472_v16 = vmul.f32 1.442695, %v2438_v35  ;;  %v2351_v18 = vpop.xlane.xlu2 %2350 }
 0x20d   : > { %1425 = vst [vmem:[#allocation1 + $0x3] ss:$9 sm:$0xff] %v1238_v21  ;;  %2758 = vmatpush.bf16.msra.mxu0 %v2749_v23  ;;  %v9147_v21 = vpop.f32.mrf.mxu3  ;;  %v9151_v23 = vpop.f32.mrf.mxu2 }
 0x20e   : > { %1426 = vst [vmem:[#allocation1 + $0x4] ss:$9 sm:$0xff] %v1239_v22  ;;  %v9149_v22 = vpop.xlane.xlu1 %2356  ;;  %8268 = vpow2.f32 %v2472_v16  ;;  %v1257_v16 = vrot.slane %v9120_v38, 3 }
 0x215   : > { %v1427_v27 = vld [vmem:[#allocation1] sm:$0xff] }
 0x216   : > { %1428 = vst [vmem:[#allocation1] ss:$9 sm:$0xff] %v1240_v4  ;;  %v1516_v28 = vpack.c.bf16 %v1427_v27, %v1427_v27  ;;  %v1938_v4 = vpop.f32.mrf.mxu1  ;;  %v2439_v27 = vsub.f32 %v9054_v59, %v2351_v18  ;;  %v1704_v18 = vpack.c.bf16 %v8953_v13, %v8953_v13 }
 0x217   : > { %1429 = vst [vmem:[#allocation1 + $0x1] ss:$9 sm:$0xff] %v1117_v26  ;;  %v2364_v26 = vsel %vm2339_vm2, %v9147_v21, -inf }
 0x218   : > { %1430 = vst [vmem:[#allocation1 + $0x2] ss:$9 sm:$0xff] %v1241_v17  ;;  %7944 = vmatmul.msk.bf16.vlgmr.msra.gmra.mxu1 %vm1730_vm1, %v1516_v28  ;;  %2365 = vmax.xlane.f32.xlu1 %v2364_v26  ;;  %v1919_v17 = vpop.f32.mrf.mxu0  ;;  %v2373_v28 = vsel %vm2339_vm2, %v9151_v23, -inf  ;;  %v2441_v26 = vsub.f32 %v9058_v60, %v9149_v22  ;;  %v1261_v22 = vrot.slane %v9120_v38, 7 }
 0x219   : > { %1431 = vst [vmem:[#allocation1 + $0x3] ss:$9 sm:$0xff] %v1242_v32  ;;  %2777 = vmatpush.bf16.msra.mxu1 %v2768_v36  ;;  %2374 = vmax.xlane.f32.xlu0 %v2373_v28  ;;  %v2370_v32 = vsel %vm2339_vm2, %v9131_v63, -inf  ;;  %v1253_v36 = vrot.slane %v9116_v33, 6  ;;  %v1259_v17 = vrot.slane %v9120_v38, 5 }
 0x21a   : > { %1432 = vst [vmem:[#allocation1 + $0x4] ss:$9 sm:$0xff] %v1243_v37  ;;  %v9161_v37 = vpop.eup %8266  ;;  %2371 = vmax.xlane.f32.xlu2 %v2370_v32 }
 0x21b   : > { %v9165_v59 = vpop.eup %8268 }
 0x21c   : > { %v2538_v35 = vsel %vm2339_vm2, %v9165_v59, 0.0 }
 0x21e   : > { %v9170_v12 = vpop.f32.mrf.mxu1 }
 0x21f   : > { %v2363_v46 = vpop.xlane.xlu0 %2362 }
 0x220   : > { %v9177_v6 = vpop.f32.mrf.mxu0 }
 0x221   : > { %v1433_v5 = vld [vmem:[#allocation1] sm:$0xff]  ;;  %2539 = vadd.xlane.f32.xlu0 %v2538_v35 }
 0x222   : > { %1434 = vst [vmem:[#allocation1] ss:$9 sm:$0xff] %v1244_v42  ;;  %v1517_v47 = vpack.c.bf16 %v1433_v5, %v1433_v5  ;;  %v1254_v42 = vrot.slane %v9116_v33, 7  ;;  %v1900_v5 = vpop.f32.mrf.mxu3 }
 0x223   : > { %1435 = vst [vmem:[#allocation1 + $0x1] ss:$9 sm:$0xff] %v1245_v20  ;;  %v2474_v20 = vmul.f32 1.442695, %v2439_v27 }
 0x224   : > { %1436 = vst [vmem:[#allocation1 + $0x2] ss:$9 sm:$0xff] %v1246_v24  ;;  %7945 = vmatmul.msk.bf16.vlgmr.msrb.gmra.mxu2 %vm1730_vm1, %v1517_v47  ;;  %v1957_v47 = vpop.f32.mrf.mxu2 }
 0x225   : > { %1437 = vst [vmem:[#allocation1 + $0x3] ss:$9 sm:$0xff] %v1247_v48  ;;  %2796 = vmatpush.bf16.msrb.mxu2 %v2787_v49  ;;  %v2345_v48 = vpop.xlane.xlu1 %2344  ;;  %v2532_v49 = vsel %vm2339_vm2, %v9161_v37, 0.0  ;;  %8270 = vpow2.f32 %v2474_v20  ;;  %v2443_v20 = vsub.f32 %v9081_v41, %v2363_v46  ;;  %v2382_v41 = vsel %vm2339_vm2, %v9170_v12, -inf }
 0x226   : > { %1438 = vst [vmem:[#allocation1 + $0x4] ss:$9 sm:$0xff] %v9116_v33  ;;  %v2437_v29 = vsub.f32 %v9068_v58, %v2345_v48  ;;  %2533 = vadd.xlane.f32.xlu1 %v2532_v49  ;;  %v1256_v33 = vrot.slane %v9120_v38, 2  ;;  %v2379_v58 = vsel %vm2339_vm2, %v9177_v6, -inf }
 0x227   : > { %2380 = vmax.xlane.f32.xlu2 %v2379_v58 }
 0x228   : > { %v1995_v62 = vpop.f32.mrf.mxu0 }
 0x22c   : > { %v9186_v40 = vpop.f32.mrf.mxu2  ;;  %v2354_v5 = vpop.xlane.xlu0 %2353 }
 0x22d   : > { %v1439_v25 = vld [vmem:[#allocation1] sm:$0xff]  ;;  %v2440_v47 = vsub.f32 %v9091_v61, %v2354_v5 }
 0x22e   : > { %1440 = vst [vmem:[#allocation1] ss:$9 sm:$0xff] %v1248_v15  ;;  %v1518_v1 = vpack.c.bf16 %v1439_v25, %v1439_v25  ;;  %v2825_v15 = vsel %vm2728_vm3, %v1703_v2, 0  ;;  %v2360_v25 = vpop.xlane.xlu2 %2359  ;;  %v1260_v2 = vrot.slane %v9120_v38, 6 }
 0x22f   : > { %1441 = vst [vmem:[#allocation1 + $0x1] ss:$9 sm:$0xff] %v1249_v31  ;;  %v2470_v31 = vmul.f32 1.442695, %v2437_v29  ;;  %v2482_v29 = vmul.f32 1.442695, %v2443_v20 }
 0x230   : > { %1442 = vst [vmem:[#allocation1 + $0x2] ss:$9 sm:$0xff] %v1250_v10  ;;  %7946 = vmatmul.msk.bf16.vlgmr.msra.gmra.mxu3 %vm1730_vm1, %v1518_v1  ;;  %v9183_v10 = vpop.f32.mrf.mxu3  ;;  %v2442_v1 = vsub.f32 %v9073_v30, %v2360_v25  ;;  %v1258_v30 = vrot.slane %v9120_v38, 4 }
 0x231   : > { %1443 = vst [vmem:[#allocation1 + $0x3] ss:$9 sm:$0xff] %v1251_v14  ;;  %2815 = vmatpush.bf16.msra.mxu3 %v2806_v9  ;;  %8272 = vpow2.f32 %v2470_v31  ;;  %v9188_v14 = vpop.eup %8270  ;;  %v2385_v9 = vsel %vm2339_vm2, %v9186_v40, -inf  ;;  %v2376_v27 = vsel %vm2339_vm2, %v9183_v10, -inf }
 0x232   : > { %1444 = vst [vmem:[#allocation1 + $0x4] ss:$9 sm:$0xff] %v1252_v44  ;;  %v2014_v44 = vpop.f32.mrf.mxu1  ;;  %2386 = vmax.xlane.f32.xlu1 %v2385_v9  ;;  %v2480_v32 = vmul.f32 1.442695, %v2442_v1  ;;  %2377 = vmax.xlane.f32.xlu0 %v2376_v27 }
 0x234   : > { %8274 = vpow2.f32 %v2480_v32  ;;  %v2033_v48 = vpop.f32.mrf.mxu2 }
 0x237   : > { %v9204_v60 = vpop.eup %8272 }
 0x239   : > { %v1445_v43 = vld [vmem:[#allocation1] sm:$0xff] }
 0x23a   : > { %1446 = vst [vmem:[#allocation1] ss:$9 sm:$0xff] %v1253_v36  ;;  %v1519_v24 = vpack.c.bf16 %v1445_v43, %v1445_v43  ;;  %v2541_v36 = vsel %vm2339_vm2, %v9188_v14, 0.0  ;;  %v2478_v43 = vmul.f32 1.442695, %v2441_v26  ;;  %v9211_v49 = vpop.f32.mrf.mxu1  ;;  %2383 = vmax.xlane.f32.xlu0 %v2382_v41  ;;  %v9220_v35 = vpop.eup %8274 }
 0x23b   : > { %1447 = vst [vmem:[#allocation1 + $0x1] ss:$9 sm:$0xff] %v1254_v42  ;;  %2542 = vadd.xlane.f32.xlu2 %v2541_v36  ;;  %v2844_v42 = vsel %vm2728_vm3, %v1704_v18, 0  ;;  %v2550_v9 = vsel %vm2339_vm2, %v9220_v35, 0.0 }
 0x23c   : > { %1448 = vst [vmem:[#allocation1 + $0x2] ss:$9 sm:$0xff] %v9120_v38  ;;  %7947 = vmatmul.msk.bf16.vlgmr.msrb.gmra.mxu0 %vm1730_vm1, %v1519_v24  ;;  %v1976_v24 = vpop.f32.mrf.mxu3  ;;  %v2535_v38 = vsel %vm2339_vm2, %v9204_v60, 0.0  ;;  %8276 = vpow2.f32 %v2478_v43  ;;  %v2394_v43 = vsel %vm2339_vm2, %v9211_v49, -inf }
 0x23d   : > { %1449 = vst [vmem:[#allocation1 + $0x3] ss:$9 sm:$0xff] %v1255_v7  ;;  %2834 = vmatpush.bf16.msrb.mxu0 %v2825_v15  ;;  %v1669_v7 = vrot.slane %v8953_v13, 4  ;;  %2536 = vadd.xlane.f32.xlu1 %v2535_v38  ;;  %v2476_v15 = vmul.f32 1.442695, %v2440_v47  ;;  %8278 = vpow2.f32 %v2482_v29 }
 0x23e   : > { %1450 = vst [vmem:[#allocation1 + $0x4] ss:$9 sm:$0xff] %v1256_v33  ;;  %v9216_v33 = vpop.f32.mrf.mxu0 }
 0x23f   : > { %v1705_v61 = vpack.c.bf16 %v1669_v7, %v1669_v7  ;;  %8280 = vpow2.f32 %v2476_v15  ;;  %v2391_v32 = vsel %vm2339_vm2, %v9216_v33, -inf }
 0x242   : > { %v9224_v25 = vpop.eup %8276  ;;  %v2090_v44 = vpop.f32.mrf.mxu1 }
 0x243   : > { %v2547_v26 = vsel %vm2339_vm2, %v9224_v25, 0.0 }
 0x244   : > { %v9222_v58 = vpop.f32.mrf.mxu3  ;;  %2548 = vadd.xlane.f32.xlu0 %v2547_v26 }
 0x245   : > { %v1451_v4 = vld [vmem:[#allocation1] sm:$0xff]  ;;  %v2388_v1 = vsel %vm2339_vm2, %v9222_v58, -inf  ;;  %2551 = vadd.xlane.f32.xlu1 %v2550_v9 }
 0x246   : > { %1452 = vst [vmem:[#allocation1] ss:$9 sm:$0xff] %v1257_v16  ;;  %v1520_v28 = vpack.c.bf16 %v1451_v4, %v1451_v4  ;;  %2389 = vmax.xlane.f32.xlu2 %v2388_v1  ;;  %v2863_v16 = vsel %vm2728_vm3, %v1705_v61, 0  ;;  %v2071_v18 = vpop.f32.mrf.mxu0 }
 0x247   : > { %1453 = vst [vmem:[#allocation1 + $0x1] ss:$9 sm:$0xff] %v1258_v30  ;;  %v9234_v30 = vpop.eup %8278  ;;  %v9236_v4 = vpop.f32.mrf.mxu2 }
 0x248   : > { %1454 = vst [vmem:[#allocation1 + $0x2] ss:$9 sm:$0xff] %v1259_v17  ;;  %7948 = vmatmul.msk.bf16.vlgmr.msrb.gmra.mxu1 %vm1730_vm1, %v1520_v28  ;;  %v9238_v62 = vpop.eup %8280  ;;  %v2553_v17 = vsel %vm2339_vm2, %v9234_v30, 0.0 }
 0x249   : > { %1455 = vst [vmem:[#allocation1 + $0x3] ss:$9 sm:$0xff] %v1260_v2  ;;  %2853 = vmatpush.bf16.msrb.mxu1 %v2844_v42  ;;  %v2544_v28 = vsel %vm2339_vm2, %v9238_v62, 0.0  ;;  %v2397_v42 = vsel %vm2339_vm2, %v9236_v4, -inf }
 0x24a   : > { %1456 = vst [vmem:[#allocation1 + $0x4] ss:$9 sm:$0xff] %v1261_v22 }
 0x24c   : > { %v2052_v27 = vpop.f32.mrf.mxu3  ;;  %2392 = vmax.xlane.f32.xlu0 %v2391_v32 }
 0x24d   : > { %2545 = vadd.xlane.f32.xlu1 %v2544_v28 }
 0x24e   : > { %2554 = vadd.xlane.f32.xlu2 %v2553_v17 }
 0x24f   : > { %v2109_v36 = vpop.f32.mrf.mxu2 }
 0x251   : > { %v1457_v31 = vld [vmem:[#allocation1] sm:$0xff] }
 0x252   : > { %v1521_v46 = vpack.c.bf16 %v1457_v31, %v1457_v31 }
 0x254   : > { %7949 = vmatmul.msk.bf16.vlgmr.msra.gmra.mxu2 %vm1730_vm1, %v1521_v46  ;;  %v9246_v2 = vpop.f32.mrf.mxu3  ;;  %2395 = vmax.xlane.f32.xlu0 %v2394_v43 }
 0x255   : > { %2872 = vmatpush.bf16.msra.mxu2 %v2863_v16  ;;  %2398 = vmax.xlane.f32.xlu1 %v2397_v42  ;;  %v2400_v47 = vsel %vm2339_vm2, %v9246_v2, -inf }
 0x259   : > { %v9248_v22 = vpop.f32.mrf.mxu0 }
 0x25a   : > { %v2403_v48 = vsel %vm2339_vm2, %v9248_v22, -inf }
 0x25c   : > { %v2128_v20 = vpop.f32.mrf.mxu3  ;;  %2404 = vmax.xlane.f32.xlu0 %v2403_v48 }
 0x25d   : > { %2401 = vmax.xlane.f32.xlu1 %v2400_v47 }
 0x261   : > { %v2147_v5 = vpop.f32.mrf.mxu0 }
 0x265   : > { %v9254_v24 = vpop.f32.mrf.mxu1 }
 0x266   : > { %v2406_v7 = vsel %vm2339_vm2, %v9254_v24, -inf }
 0x267   : > { %2407 = vmax.xlane.f32.xlu1 %v2406_v7 }
 0x26d   : > { %v2166_v38 = vpop.f32.mrf.mxu1 }
 0x277   : > { %v9262_v29 = vpop.f32.mrf.mxu2 }
 0x278   : > { %v2409_v41 = vsel %vm2339_vm2, %v9262_v29, -inf  ;;  %v2369_v27 = vpop.xlane.xlu2 %2368 }
 0x279   : > { %2410 = vmax.xlane.f32.xlu2 %v2409_v41  ;;  %v2445_v17 = vsub.f32 %v9138_v8, %v2369_v27 }
 0x27b   : > { %v2486_v28 = vmul.f32 1.442695, %v2445_v17 }
 0x27d   : > { %8282 = vpow2.f32 %v2486_v28  ;;  %v8191_v28 = vunpack.i.h.bf16 %v9125_v45 }
 0x27f   : > { %v2185_v15 = vpop.f32.mrf.mxu2 }
 0x283   : > { %v9266_v61 = vpop.f32.mrf.mxu3  ;;  %v9286_v7 = vpop.eup %8282 }
 0x284   : > { %v2412_v31 = vsel %vm2339_vm2, %v9266_v61, -inf }
 0x285   : > { %2413 = vmax.xlane.f32.xlu1 %v2412_v31 }
 0x289   : > { %v9270_v46 = vpop.f32.mrf.mxu0 }
 0x28a   : > { %v2415_v44 = vsel %vm2339_vm2, %v9270_v46, -inf }
 0x28b   : > { %v2204_v1 = vpop.f32.mrf.mxu3  ;;  %v2366_v32 = vpop.xlane.xlu1 %2365 }
 0x28c   : > { %v2444_v42 = vsub.f32 %v9147_v21, %v2366_v32  ;;  %v2375_v5 = vpop.xlane.xlu0 %2374  ;;  %v2559_v21 = vsel %vm2339_vm2, %v9286_v7, 0.0 }
 0x28d   : > { %2416 = vmax.xlane.f32.xlu1 %v2415_v44  ;;  %v2447_v47 = vsub.f32 %v9151_v23, %v2375_v5  ;;  %v2372_v48 = vpop.xlane.xlu2 %2371  ;;  %2560 = vadd.xlane.f32.xlu0 %v2559_v21 }
 0x28e   : > { %v2484_v20 = vmul.f32 1.442695, %v2444_v42  ;;  %v2446_v38 = vsub.f32 %v9131_v63, %v2372_v48 }
 0x28f   : > { %v2490_v8 = vmul.f32 1.442695, %v2447_v47 }
 0x290   : > { %8284 = vpow2.f32 %v2484_v20  ;;  %v2488_v41 = vmul.f32 1.442695, %v2446_v38 }
 0x291   : > { %v2223_v9 = vpop.f32.mrf.mxu0  ;;  %8286 = vpow2.f32 %v2490_v8 }
 0x292   : > { %8288 = vpow2.f32 %v2488_v41  ;;  %v9295_v9 = vunpack.i.l.bf16 %v9125_v45 }
 0x294   : > { %v2540_v23 = vpop.xlane.xlu0 %2539  ;;  %v1706_v47 = vpack.c.bf16 %v9295_v9, %v9295_v9 }
 0x295   : > { %v9274_v16 = vpop.f32.mrf.mxu1 }
 0x296   : > { %v2418_v18 = vsel %vm2339_vm2, %v9274_v16, -inf  ;;  %v9290_v1 = vpop.eup %8284 }
 0x297   : > { %2419 = vmax.xlane.f32.xlu2 %v2418_v18  ;;  %v2556_v63 = vsel %vm2339_vm2, %v9290_v1, 0.0  ;;  %v9300_v27 = vpop.eup %8286 }
 0x298   : > { %v9302_v17 = vpop.eup %8288  ;;  %v2565_v42 = vsel %vm2339_vm2, %v9300_v27, 0.0 }
 0x299   : > { %v2534_v15 = vpop.xlane.xlu1 %2533  ;;  %v2562_v5 = vsel %vm2339_vm2, %v9302_v17, 0.0 }
 0x29a   : > { %8290 = vrcp.f32 %v2534_v15  ;;  %v2381_v44 = vpop.xlane.xlu2 %2380  ;;  %2563 = vadd.xlane.f32.xlu0 %v2562_v5 }
 0x29b   : > { %8292 = vrcp.f32 %v2540_v23 }
 0x29d   : > { %v2242_v26 = vpop.f32.mrf.mxu1 }
 0x29e   : > { %v2449_v26 = vsub.f32 %v9177_v6, %v2381_v44 }
 0x29f   : > { %2557 = vadd.xlane.f32.xlu2 %v2556_v63 }
 0x2a0   : > { %v2494_v32 = vmul.f32 1.442695, %v2449_v26  ;;  %v2882_v26 = vsel %vm2728_vm3, %v1706_v47, 0 }
 0x2a2   : > { %8294 = vpow2.f32 %v2494_v32 }
 0x2a5   : > { %v2387_v6 = vpop.xlane.xlu1 %2386  ;;  %v2378_v15 = vpop.xlane.xlu0 %2377 }
 0x2a6   : > { %v2451_v45 = vsub.f32 %v9186_v40, %v2387_v6 }
 0x2a7   : > { %v9279_v36 = vpop.f32.mrf.mxu2 }
 0x2a8   : > { %v2421_v43 = vsel %vm2339_vm2, %v9279_v36, -inf  ;;  %v2498_v21 = vmul.f32 1.442695, %v2451_v45 }
 0x2a9   : > { %2422 = vmax.xlane.f32.xlu1 %v2421_v43  ;;  %v8291_v43 = vpop.eup %8290 }
 0x2aa   : > { %v2660_v20 = vmul.f32 %v8291_v43, %v9161_v37  ;;  %v8293_v48 = vpop.eup %8292  ;;  %v1708_v37 = vpack.c.bf16 %v8191_v28, %v8191_v28 }
 0x2ab   : > { %v2662_v41 = vmul.f32 %v8293_v48, %v9165_v59  ;;  %v9319_v32 = vpop.eup %8294 }
 0x2ac   : > { %v2692_v8 = vpack.c.bf16 %v2660_v20, %v2660_v20  ;;  %v2920_v59 = vsel %vm2728_vm3, %v1708_v37, 0 }
 0x2ad   : > { %v2694_v63 = vpack.c.bf16 %v2662_v41, %v2662_v41  ;;  %v9327_v47 = vpop.xlane.xlu0 %2383 }
 0x2ae   : > { %v2543_v23 = vpop.xlane.xlu2 %2542  ;;  %7950 = vmatmul.msk.bf16.vlgmr.msrb.gmra.mxu3 %vm2724_vm4, %v2692_v8  ;;  %v1670_v8 = vrot.slane %v9295_v9, 4 }
 0x2af   : > { %v2261_v31 = vpop.f32.mrf.mxu2  ;;  %8296 = vrcp.f32 %v2543_v23  ;;  %2891 = vmatpush.bf16.msrb.mxu3 %v2882_v26  ;;  %7952 = vmatmul.msk.bf16.vlgmr.msra.gmra.mxu1 %vm2724_vm4, %v2694_v63 }
 0x2b0   : > { %v2448_v31 = vsub.f32 %v9183_v10, %v2378_v15  ;;  %8298 = vpow2.f32 %v2498_v21  ;;  %2929 = vmatpush.bf16.msra.mxu1 %v2920_v59  ;;  %v2571_v10 = vsel %vm2339_vm2, %v9319_v32, 0.0  ;;  %v2537_v20 = vpop.xlane.xlu1 %2536  ;;  %v1707_v26 = vpack.c.bf16 %v1670_v8, %v1670_v8 }
 0x2b1   : > { %2566 = vadd.xlane.f32.xlu1 %v2565_v42  ;;  %v1671_v42 = vrot.slane %v8191_v28, 4  ;;  %v8195_v8 = vunpack.i.l.bf16 %v9123_v39 }
 0x2b2   : > { %v2492_v40 = vmul.f32 1.442695, %v2448_v31 }
 0x2b3   : > { %v9297_v18 = vpop.f32.mrf.mxu3  ;;  %v1709_v45 = vpack.c.bf16 %v1671_v42, %v1671_v42  ;;  %v8196_v42 = vunpack.i.h.bf16 %v9123_v39 }
 0x2b4   : > { %8300 = vpow2.f32 %v2492_v40  ;;  %v2424_v43 = vsel %vm2339_vm2, %v9297_v18, -inf }
 0x2b5   : > { %2425 = vmax.xlane.f32.xlu0 %v2424_v43  ;;  %8302 = vrcp.f32 %v2537_v20  ;;  %v8297_v5 = vpop.eup %8296  ;;  %v2939_v31 = vsel %vm2728_vm3, %v1709_v45, 0  ;;  %v1712_v45 = vpack.c.bf16 %v8196_v42, %v8196_v42 }
 0x2b6   : > { %v2663_v48 = vmul.f32 %v8297_v5, %v9188_v14  ;;  %v9330_v28 = vpop.eup %8298 }
 0x2b7   : > { %v2577_v9 = vsel %vm2339_vm2, %v9330_v28, 0.0  ;;  %v2549_v59 = vpop.xlane.xlu0 %2548 }
 0x2b8   : > { %v2695_v15 = vpack.c.bf16 %v2663_v48, %v2663_v48  ;;  %v2552_v63 = vpop.xlane.xlu1 %2551 }
 0x2b9   : > { %v9313_v38 = vpop.f32.mrf.mxu0  ;;  %2572 = vadd.xlane.f32.xlu1 %v2571_v10  ;;  %v9339_v23 = vpop.xlane.xlu2 %2389  ;;  %8304 = vrcp.f32 %v2552_v63 }
 0x2ba   : > { %v9333_v41 = vpop.eup %8300  ;;  %7953 = vmatmul.msk.bf16.vlgmr.msrb.gmra.mxu2 %vm2724_vm4, %v2695_v15  ;;  %8306 = vrcp.f32 %v2549_v59 }
 0x2bb   : > { %v2280_v44 = vpop.f32.mrf.mxu3  ;;  %v8303_v21 = vpop.eup %8302  ;;  %2948 = vmatpush.bf16.msrb.mxu2 %v2939_v31  ;;  %v2568_v14 = vsel %vm2339_vm2, %v9333_v41, 0.0  ;;  %v1673_v31 = vrot.slane %v8196_v42, 4 }
 0x2bc   : > { %v2661_v44 = vmul.f32 %v8303_v21, %v9204_v60  ;;  %v2901_v60 = vsel %vm2728_vm3, %v1707_v26, 0 }
 0x2bd   : > { %2578 = vadd.xlane.f32.xlu0 %v2577_v9  ;;  %v1672_v9 = vrot.slane %v8195_v8, 4 }
 0x2be   : > { %v2693_v40 = vpack.c.bf16 %v2661_v44, %v2661_v44 }
 0x2bf   : > { %v8305_v43 = vpop.eup %8304  ;;  %v2393_v21 = vpop.xlane.xlu0 %2392 }
 0x2c0   : > { %7951 = vmatmul.msk.bf16.vlgmr.msra.gmra.mxu0 %vm2724_vm4, %v2693_v40  ;;  %v2666_v5 = vmul.f32 %v8305_v43, %v9220_v35  ;;  %v2546_v48 = vpop.xlane.xlu1 %2545  ;;  %v2453_v44 = vsub.f32 %v9216_v33, %v2393_v21  ;;  %v2996_v35 = vsel %vm2728_vm3, %v1712_v45, 0  ;;  %v1710_v43 = vpack.c.bf16 %v8195_v8, %v8195_v8 }
 0x2c1   : > { %v2299_v6 = vpop.f32.mrf.mxu0  ;;  %2569 = vadd.xlane.f32.xlu1 %v2568_v14  ;;  %2910 = vmatpush.bf16.msra.mxu0 %v2901_v60  ;;  %v2555_v20 = vpop.xlane.xlu2 %2554  ;;  %v1713_v60 = vpack.c.bf16 %v1673_v31, %v1673_v31 }
 0x2c2   : > { %8308 = vrcp.f32 %v2555_v20  ;;  %v2698_v15 = vpack.c.bf16 %v2666_v5, %v2666_v5  ;;  %v8307_v14 = vpop.eup %8306  ;;  %v2502_v63 = vmul.f32 1.442695, %v2453_v44  ;;  %v1711_v5 = vpack.c.bf16 %v1672_v9, %v1672_v9 }
 0x2c3   : > { %8310 = vrcp.f32 %v2546_v48  ;;  %v2665_v59 = vmul.f32 %v8307_v14, %v9224_v25  ;;  %v3015_v25 = vsel %vm2728_vm3, %v1713_v60, 0 }
 0x2c4   : > { %7956 = vmatmul.msk.bf16.vlgmr.msrb.gmra.mxu1 %vm2724_vm4, %v2698_v15  ;;  %8312 = vpow2.f32 %v2502_v63  ;;  %v2977_v31 = vsel %vm2728_vm3, %v1711_v5, 0 }
 0x2c5   : > { %v9335_v37 = vpop.f32.mrf.mxu1  ;;  %3005 = vmatpush.bf16.msrb.mxu1 %v2996_v35  ;;  %v2697_v45 = vpack.c.bf16 %v2665_v59, %v2665_v59 }
 0x2c6   : > { %v2430_v6 = vsel %vm2339_vm2, %v9335_v37, -inf }
 0x2c7   : > { %2431 = vmax.xlane.f32.xlu0 %v2430_v6  ;;  %v2396_v48 = vpop.xlane.xlu0 %2395 }
 0x2c8   : > { %v8309_v26 = vpop.eup %8308  ;;  %v2399_v42 = vpop.xlane.xlu1 %2398  ;;  %v2454_v15 = vsub.f32 %v9211_v49, %v2396_v48 }
 0x2c9   : > { %v8311_v40 = vpop.eup %8310  ;;  %v2667_v39 = vmul.f32 %v8309_v26, %v9234_v30  ;;  %v2455_v30 = vsub.f32 %v9236_v4, %v2399_v42 }
 0x2ca   : > { %v2664_v33 = vmul.f32 %v8311_v40, %v9238_v62  ;;  %v2958_v62 = vsel %vm2728_vm3, %v1710_v43, 0  ;;  %v9367_v21 = vpop.eup %8312  ;;  %v2504_v8 = vmul.f32 1.442695, %v2454_v15 }
 0x2cb   : > { %v2699_v20 = vpack.c.bf16 %v2667_v39, %v2667_v39  ;;  %v2583_v49 = vsel %vm2339_vm2, %v9367_v21, 0.0  ;;  %v2506_v44 = vmul.f32 1.442695, %v2455_v30 }
 0x2cc   : > { %v2696_v6 = vpack.c.bf16 %v2664_v33, %v2664_v33  ;;  %8314 = vpow2.f32 %v2504_v8  ;;  %2584 = vadd.xlane.f32.xlu2 %v2583_v49  ;;  %v2452_v8 = vsub.f32 %v9222_v58, %v9339_v23 }
 0x2cd   : > { %v2318_v10 = vpop.f32.mrf.mxu1  ;;  %7957 = vmatmul.msk.bf16.vlgmr.msra.gmra.mxu2 %vm2724_vm4, %v2699_v20  ;;  %8316 = vpow2.f32 %v2506_v44 }
 0x2ce   : > { %3024 = vmatpush.bf16.msra.mxu2 %v3015_v25  ;;  %7954 = vmatmul.msk.bf16.vlgmr.msra.gmra.mxu3 %vm2724_vm4, %v2696_v6 }
 0x2cf   : > { %2967 = vmatpush.bf16.msra.mxu3 %v2958_v62  ;;  %v2405_v9 = vpop.xlane.xlu0 %2404 }
 0x2d0   : > { %7955 = vmatmul.msk.bf16.vlgmr.msrb.gmra.mxu0 %vm2724_vm4, %v2697_v45  ;;  %v2402_v14 = vpop.xlane.xlu1 %2401  ;;  %v2457_v63 = vsub.f32 %v9248_v22, %v2405_v9 }
 0x2d1   : > { %2986 = vmatpush.bf16.msrb.mxu0 %v2977_v31  ;;  %v2456_v35 = vsub.f32 %v9246_v2, %v2402_v14 }
 0x2d2   : > { %v9377_v40 = vpop.eup %8314  ;;  %v2510_v39 = vmul.f32 1.442695, %v2457_v63  ;;  %v2427_v63 = vsel %vm2339_vm2, %v9313_v38, -inf }
 0x2d3   : > { %v2508_v26 = vmul.f32 1.442695, %v2456_v35  ;;  %v2586_v59 = vsel %vm2339_vm2, %v9377_v40, 0.0  ;;  %v9381_v33 = vpop.eup %8316 }
 0x2d4   : > { %2587 = vadd.xlane.f32.xlu2 %v2586_v59  ;;  %v2589_v43 = vsel %vm2339_vm2, %v9381_v33, 0.0 }
 0x2d5   : > { %8318 = vpow2.f32 %v2508_v26 }
 0x2d6   : > { %8320 = vpow2.f32 %v2510_v39 }
 0x2d7   : > { %v9358_v10 = vpop.f32.mrf.mxu2 }
 0x2da   : > { %8208 = vrot.lane.b32.xlu1 %v8947_v34, %s11262_s10  ;;  %v2408_v60 = vpop.xlane.xlu1 %2407 }
 0x2db   : > { %v9383_v2 = vpop.eup %8318  ;;  %v2458_v42 = vsub.f32 %v9254_v24, %v2408_v60  ;;  %v2450_v24 = vsub.f32 %v9170_v12, %v9327_v47 }
 0x2dc   : > { %v2592_v22 = vsel %vm2339_vm2, %v9383_v2, 0.0  ;;  %2590 = vadd.xlane.f32.xlu2 %v2589_v43  ;;  %v9390_v5 = vpop.eup %8320 }
 0x2dd   : > { %2593 = vadd.xlane.f32.xlu0 %v2592_v22  ;;  %v2512_v20 = vmul.f32 1.442695, %v2458_v42  ;;  %v2595_v6 = vsel %vm2339_vm2, %v9390_v5, 0.0  ;;  %v2496_v62 = vmul.f32 1.442695, %v2450_v24 }
 0x2df   : > { %v2337_v4 = vpop.f32.mrf.mxu2  ;;  %8322 = vpow2.f32 %v2512_v20 }
 0x2e0   : > { %v2500_v4 = vmul.f32 1.442695, %v2452_v8 }
 0x2e5   : > { %2596 = vadd.xlane.f32.xlu0 %v2595_v6  ;;  %v9394_v48 = vpop.eup %8322 }
 0x2e6   : > { %v2598_v30 = vsel %vm2339_vm2, %v9394_v48, 0.0 }
 0x2ec   : > { %v2411_v47 = vpop.xlane.xlu2 %2410 }
 0x2ed   : > { %2599 = vadd.xlane.f32.xlu0 %v2598_v30  ;;  %v2459_v26 = vsub.f32 %v9262_v29, %v2411_v47 }
 0x2ef   : > { %v2514_v60 = vmul.f32 1.442695, %v2459_v26 }
 0x2f4   : > { %8213 = vrot.lane.b32.xlu2 %v8959_v19, %s11262_s10  ;;  %s11292_s10 = smov 112  }
 0x2f8   : > { %v2414_v45 = vpop.xlane.xlu1 %2413 }
 0x2f9   : > { %v2460_v15 = vsub.f32 %v9266_v61, %v2414_v45 }
 0x2fb   : > { %v2516_v25 = vmul.f32 1.442695, %v2460_v15 }
 0x2fd   : > { %8324 = vpow2.f32 %v2516_v25 }
 0x2fe   : > { %8326 = vpow2.f32 %v2496_v62 }
 0x2ff   : > { %8328 = vpow2.f32 %v2500_v4 }
 0x300   : > { %v2417_v44 = vpop.xlane.xlu1 %2416  ;;  %v2561_v22 = vpop.xlane.xlu0 %2560 }
 0x301   : > { %v2461_v23 = vsub.f32 %v9270_v46, %v2417_v44 }
 0x303   : > { %v9403_v31 = vpop.eup %8324  ;;  %v2518_v35 = vmul.f32 1.442695, %v2461_v23 }
 0x304   : > { %v2604_v49 = vsel %vm2339_vm2, %v9403_v31, 0.0  ;;  %v9409_v12 = vpop.eup %8326 }
 0x305   : > { %2605 = vadd.xlane.f32.xlu0 %v2604_v49  ;;  %v2574_v61 = vsel %vm2339_vm2, %v9409_v12, 0.0  ;;  %v9413_v58 = vpop.eup %8328  ;;  %8330 = vpow2.f32 %v2518_v35 }
 0x306   : > { %2575 = vadd.xlane.f32.xlu1 %v2574_v61  ;;  %v2580_v14 = vsel %vm2339_vm2, %v9413_v58, 0.0 }
 0x30a   : > { %v2420_v9 = vpop.xlane.xlu2 %2419 }
 0x30b   : > { %v2462_v19 = vsub.f32 %v9274_v16, %v2420_v9  ;;  %v9424_v39 = vpop.eup %8330 }
 0x30c   : > { %v2607_v16 = vsel %vm2339_vm2, %v9424_v39, 0.0 }
 0x30d   : > { %v2520_v59 = vmul.f32 1.442695, %v2462_v19  ;;  %v2564_v15 = vpop.xlane.xlu0 %2563 }
 0x30e   : > { %2581 = vadd.xlane.f32.xlu1 %v2580_v14 }
 0x30f   : > { %8332 = vpow2.f32 %v2520_v59 }
 0x310   : > { %8334 = vrcp.f32 %v2561_v22 }
 0x311   : > { %8336 = vpow2.f32 %v2514_v60 }
 0x312   : > { %v2558_v43 = vpop.xlane.xlu2 %2557 }
 0x313   : > { %8338 = vrcp.f32 %v2558_v43 }
 0x315   : > { %v9429_v20 = vpop.eup %8332 }
 0x316   : > { %2428 = vmax.xlane.f32.xlu1 %v2427_v63  ;;  %v8335_v29 = vpop.eup %8334 }
 0x317   : > { %v2669_v45 = vmul.f32 %v8335_v29, %v9286_v7  ;;  %v9434_v24 = vpop.eup %8336 }
 0x318   : > { %v2601_v8 = vsel %vm2339_vm2, %v9434_v24, 0.0 }
 0x319   : > { %8218 = vrot.lane.b32.xlu0 %v8947_v34, %s11260_s3  ;;  %v2701_v25 = vpack.c.bf16 %v2669_v45, %v2669_v45  ;;  %v8339_v30 = vpop.eup %8338  ;;  %v2433_v45 = vsel %vm2339_vm2, %v9358_v10, -inf }
 0x31a   : > { %v2668_v62 = vmul.f32 %v8339_v30, %v9290_v1 }
 0x31b   : > { %7959 = vmatmul.msk.bf16.vlgmr.msra.gmra.mxu0 %vm2724_vm4, %v2701_v25 }
 0x31c   : > { %v2423_v46 = vpop.xlane.xlu1 %2422  ;;  %v2700_v4 = vpack.c.bf16 %v2668_v62, %v2668_v62 }
 0x31d   : > { %v2463_v42 = vsub.f32 %v9279_v36, %v2423_v46  ;;  %v2610_v36 = vsel %vm2339_vm2, %v9429_v20, 0.0  ;;  %2602 = vadd.xlane.f32.xlu2 %v2601_v8 }
 0x31e   : > { %2608 = vadd.xlane.f32.xlu1 %v2607_v16  ;;  %7958 = vmatmul.msk.bf16.vlgmr.msrb.gmra.mxu3 %vm2724_vm4, %v2700_v4 }
 0x31f   : > { %v2522_v34 = vmul.f32 1.442695, %v2463_v42 }
 0x321   : > { %8340 = vpow2.f32 %v2522_v34 }
 0x324   : > { %v2567_v6 = vpop.xlane.xlu1 %2566 }
 0x325   : > { %8342 = vrcp.f32 %v2567_v6 }
 0x326   : > { %2611 = vadd.xlane.f32.xlu1 %v2610_v36  ;;  %8344 = vrcp.f32 %v2564_v15 }
 0x327   : > { %v9440_v49 = vpop.eup %8340 }
 0x328   : > { %v2613_v44 = vsel %vm2339_vm2, %v9440_v49, 0.0  ;;  %v2426_v35 = vpop.xlane.xlu0 %2425 }
 0x329   : > { %v2464_v9 = vsub.f32 %v9297_v18, %v2426_v35 }
 0x32b   : > { %v8343_v7 = vpop.eup %8342  ;;  %v2524_v63 = vmul.f32 1.442695, %v2464_v9 }
 0x32c   : > { %v2671_v61 = vmul.f32 %v8343_v7, %v9300_v27  ;;  %v8345_v47 = vpop.eup %8344  ;;  %v2573_v14 = vpop.xlane.xlu1 %2572 }
 0x32d   : > { %v2670_v1 = vmul.f32 %v8345_v47, %v9302_v17  ;;  %8346 = vrcp.f32 %v2573_v14  ;;  %v9450_v26 = vpop.f32.mrf.mxu1 }
 0x32e   : > { %v2703_v23 = vpack.c.bf16 %v2671_v61, %v2671_v61  ;;  %2614 = vadd.xlane.f32.xlu1 %v2613_v44  ;;  %8348 = vpow2.f32 %v2524_v63 }
 0x32f   : > { %v2702_v19 = vpack.c.bf16 %v2670_v1, %v2670_v1 }
 0x330   : > { %7961 = vmatmul.msk.bf16.vlgmr.msrb.gmra.mxu2 %vm2724_vm4, %v2703_v23  ;;  %v2579_v17 = vpop.xlane.xlu0 %2578 }
 0x331   : > { %7960 = vmatmul.msk.bf16.vlgmr.msra.gmra.mxu1 %vm2724_vm4, %v2702_v19  ;;  %v2741_v18 = vpop.f32.mrf.mxu3  ;;  %v3376_v19 = vrot.slane %v9450_v26, 3 }
 0x332   : > { %v3366_v22 = vrot.slane %v2741_v18, 1  ;;  %v3367_v16 = vrot.slane %v2741_v18, 2  ;;  %v3368_v34 = vrot.slane %v2741_v18, 3  ;;  %3494 = vst [vmem:[#allocation1] ss:$9 sm:$0xff] %v2741_v18  ;;  %v3369_v43 = vrot.slane %v2741_v18, 4 }
 0x333   : > { %v8347_v27 = vpop.eup %8346  ;;  %v3375_v18 = vrot.slane %v9450_v26, 2 }
 0x334   : > { %v2673_v59 = vmul.f32 %v8347_v27, %v9319_v32  ;;  %v2570_v46 = vpop.xlane.xlu1 %2569  ;;  %v9453_v42 = vpop.eup %8348  ;;  %3496 = vst [vmem:[#allocation1 + $0x1] ss:$9 sm:$0xff] %v3366_v22  ;;  %v3377_v22 = vrot.slane %v9450_v26, 4 }
 0x335   : > { %8350 = vrcp.f32 %v2570_v46  ;;  %v2616_v29 = vsel %vm2339_vm2, %v9453_v42, 0.0  ;;  %3498 = vst [vmem:[#allocation1 + $0x2] ss:$9 sm:$0xff] %v3367_v16  ;;  %v2781_v6 = vpop.f32.mrf.mxu1 }
 0x336   : > { %v2705_v60 = vpack.c.bf16 %v2673_v59, %v2673_v59  ;;  %8352 = vrcp.f32 %v2579_v17  ;;  %2617 = vadd.xlane.f32.xlu2 %v2616_v29  ;;  %3500 = vst [vmem:[#allocation1 + $0x3] ss:$9 sm:$0xff] %v3368_v34  ;;  %v3374_v59 = vrot.slane %v9450_v26, 1 }
 0x337   : > { %3502 = vst [vmem:[#allocation1 + $0x4] ss:$9 sm:$0xff] %v3369_v43 }
 0x338   : > { %7963 = vmatmul.msk.bf16.vlgmr.msrb.gmra.mxu0 %vm2724_vm4, %v2705_v60 }
 0x339   : > { %v2743_v8 = vpop.f32.mrf.mxu3 }
 0x33a   : > { %v9477_v34 = vpop.xlane.xlu0 %2431 }
 0x33b   : > { %v8351_v32 = vpop.eup %8350 }
 0x33c   : > { %v8353_v36 = vpop.eup %8352  ;;  %v2672_v15 = vmul.f32 %v8351_v32, %v9333_v41 }
 0x33d   : > { %v2675_v25 = vmul.f32 %v8353_v36, %v9330_v28  ;;  %v2760_v7 = vpop.f32.mrf.mxu0  ;;  %v9464_v47 = vpop.f32.mrf.mxu2 }
 0x33e   : > { %v2704_v30 = vpack.c.bf16 %v2672_v15, %v2672_v15  ;;  %v3370_v4 = vrot.slane %v2760_v7, 1  ;;  %v3371_v61 = vrot.slane %v2760_v7, 2  ;;  %3504 = vst [vmem:[#allocation1 + $0x5] ss:$9 sm:$0xff] %v2760_v7  ;;  %v3372_v1 = vrot.slane %v2760_v7, 3 }
 0x33f   : > { %v2707_v62 = vpack.c.bf16 %v2675_v25, %v2675_v25  ;;  %v2585_v44 = vpop.xlane.xlu2 %2584  ;;  %v3373_v14 = vrot.slane %v2760_v7, 4 }
 0x340   : > { %7962 = vmatmul.msk.bf16.vlgmr.msra.gmra.mxu3 %vm2724_vm4, %v2704_v30  ;;  %3506 = vst [vmem:[#allocation1 + $0x6] ss:$9 sm:$0xff] %v3370_v4  ;;  %8354 = vrcp.f32 %v2585_v44 }
 0x341   : > { %7965 = vmatmul.msk.bf16.vlgmr.msra.gmra.mxu2 %vm2724_vm4, %v2707_v62  ;;  %3508 = vst [vmem:[#allocation1 + $0x7] ss:$9 sm:$0xff] %v3371_v61  ;;  %v9468_v41 = vpop.f32.mrf.mxu1 }
 0x343   : > { %2434 = vmax.xlane.f32.xlu0 %v2433_v45 }
 0x345   : > { %v2762_v28 = vpop.f32.mrf.mxu0  ;;  %v2800_v23 = vpop.f32.mrf.mxu2 }
 0x346   : > { %v8355_v16 = vpop.eup %8354  ;;  %v3379_v28 = vrot.slane %v9464_v47, 2 }
 0x347   : > { %1658 = vrot.lane.b32.xlu1 %v8951_v11, %s11260_s3  ;;  %v2677_v36 = vmul.f32 %v8355_v16, %v9367_v21  ;;  %v9482_v15 = vpop.xlane.xlu2 %2587  ;;  %v3378_v21 = vrot.slane %v9464_v47, 1 }
 0x348   : > { %v9470_v35 = vld [vmem:[#allocation1] sm:$0xff] }
 0x349   : > { %3510 = vst [vmem:[#allocation1] ss:$9 sm:$0xff] %v3372_v1  ;;  %v2857_v45 = vpop.f32.mrf.mxu1  ;;  %v3380_v1 = vrot.slane %v9464_v47, 3 }
 0x34a   : > { %3511 = vst [vmem:[#allocation1 + $0x1] ss:$9 sm:$0xff] %v3373_v14  ;;  %v3381_v14 = vrot.slane %v9464_v47, 4 }
 0x34b   : > { %3515 = vst [vmem:[#allocation1 + $0x5] ss:$9 sm:$0xff] %v3376_v19 }
 0x34c   : > { %v8209_v9 = vpop.permute.xlu1 %8208  ;;  %3512 = vst [vmem:[#allocation1 + $0x2] ss:$9 sm:$0xff] %v9450_v26  ;;  %v2709_v26 = vpack.c.bf16 %v2677_v36, %v2677_v36 }
 0x34d   : > { %v8211_v63 = vunpack.i.h.bf16 %v8209_v9  ;;  %v8210_v27 = vunpack.i.l.bf16 %v8209_v9  ;;  %3513 = vst [vmem:[#allocation1 + $0x3] ss:$9 sm:$0xff] %v3374_v59  ;;  %v9484_v25 = vpop.f32.mrf.mxu0 }
 0x34e   : > { %3514 = vst [vmem:[#allocation1 + $0x4] ss:$9 sm:$0xff] %v3375_v18 }
 0x34f   : > { %v1675_v11 = vrot.slane %v8211_v63, 4  ;;  %v1716_v46 = vpack.c.bf16 %v8211_v63, %v8211_v63  ;;  %v1674_v17 = vrot.slane %v8210_v27, 4  ;;  %v1714_v60 = vpack.c.bf16 %v8210_v27, %v8210_v27  ;;  %3516 = vst [vmem:[#allocation1 + $0x6] ss:$9 sm:$0xff] %v3377_v22  ;;  %v2591_v4 = vpop.xlane.xlu2 %2590 }
 0x350   : > { %3517 = vst [vmem:[#allocation1 + $0x7] ss:$9 sm:$0xff] %v9464_v47  ;;  %v9489_v8 = vpop.f32.mrf.mxu2  ;;  %v9493_v61 = vpop.xlane.xlu0 %2593  ;;  %8356 = vrcp.f32 %v2591_v4  ;;  %v3386_v4 = vrot.slane %v9484_v25, 1 }
 0x351   : > { %v1717_v43 = vpack.c.bf16 %v1675_v11, %v1675_v11  ;;  %v1715_v29 = vpack.c.bf16 %v1674_v17, %v1674_v17  ;;  %v3034_v32 = vsel %vm2728_vm3, %v1714_v60, 0  ;;  %v3072_v6 = vsel %vm2728_vm3, %v1716_v46, 0  ;;  %v2817_v7 = vpop.f32.mrf.mxu3 }
 0x352   : > { %3043 = vmatpush.bf16.msrb.mxu3 %v3034_v32  ;;  %3081 = vmatpush.bf16.msra.mxu1 %v3072_v6  ;;  %v3382_v9 = vrot.slane %v2817_v7, 1  ;;  %v3383_v19 = vrot.slane %v2817_v7, 2  ;;  %v3384_v27 = vrot.slane %v2817_v7, 3 }
 0x353   : > { %v3053_v30 = vsel %vm2728_vm3, %v1715_v29, 0  ;;  %v3091_v62 = vsel %vm2728_vm3, %v1717_v43, 0 }
 0x354   : > { %3062 = vmatpush.bf16.msra.mxu0 %v3053_v30  ;;  %3100 = vmatpush.bf16.msrb.mxu2 %v3091_v62 }
 0x355   : > { %v2838_v23 = vpop.f32.mrf.mxu0 }
 0x356   : > { %v8357_v11 = vpop.eup %8356 }
 0x357   : > { %7967 = vmatmul.msk.bf16.vlgmr.msra.gmra.mxu0 %vm2724_vm4, %v2709_v26  ;;  %v9496_v44 = vld [vmem:[#allocation1] sm:$0xff]  ;;  %v2679_v46 = vmul.f32 %v8357_v11, %v9381_v33  ;;  %v8214_v17 = vpop.permute.xlu2 %8213  ;;  %v3385_v33 = vrot.slane %v2817_v7, 4 }
 0x358   : > { %3519 = vst [vmem:[#allocation1] ss:$9 sm:$0xff] %v3378_v21  ;;  %v2876_v63 = vpop.f32.mrf.mxu2  ;;  %v2597_v60 = vpop.xlane.xlu0 %2596  ;;  %v9501_v18 = vunpack.i.h.bf16 %v8214_v17  ;;  %v8215_v47 = vunpack.i.l.bf16 %v8214_v17 }
 0x359   : > { %3520 = vst [vmem:[#allocation1 + $0x1] ss:$9 sm:$0xff] %v3379_v28  ;;  %v2819_v59 = vpop.f32.mrf.mxu3  ;;  %8358 = vrcp.f32 %v2597_v60  ;;  %v2711_v22 = vpack.c.bf16 %v2679_v46, %v2679_v46  ;;  %v3387_v28 = vrot.slane %v9484_v25, 2  ;;  %v3391_v63 = vrot.slane %v9468_v41, 2 }
 0x35a   : > { %3521 = vst [vmem:[#allocation1 + $0x2] ss:$9 sm:$0xff] %v3380_v1  ;;  %v1677_v16 = vrot.slane %v9501_v18, 4  ;;  %v1676_v43 = vrot.slane %v8215_v47, 4  ;;  %v1718_v29 = vpack.c.bf16 %v8215_v47, %v8215_v47  ;;  %v3389_v1 = vrot.slane %v9484_v25, 4 }
 0x35b   : > { %3522 = vst [vmem:[#allocation1 + $0x3] ss:$9 sm:$0xff] %v3381_v14  ;;  %7969 = vmatmul.msk.bf16.vlgmr.msrb.gmra.mxu2 %vm2724_vm4, %v2711_v22  ;;  %v3393_v59 = vrot.slane %v9468_v41, 4  ;;  %v3395_v46 = vrot.slane %v9489_v8, 2  ;;  %v3396_v60 = vrot.slane %v9489_v8, 3  ;;  %v3397_v47 = vrot.slane %v9489_v8, 4 }
 0x35c   : > { %3523 = vst [vmem:[#allocation1 + $0x4] ss:$9 sm:$0xff] %v2817_v7  ;;  %v1721_v32 = vpack.c.bf16 %v1677_v16, %v1677_v16  ;;  %v1719_v6 = vpack.c.bf16 %v1676_v43, %v1676_v43  ;;  %v3110_v45 = vsel %vm2728_vm3, %v1718_v29, 0  ;;  %v3388_v7 = vrot.slane %v9484_v25, 3 }
 0x35d   : > { %3524 = vst [vmem:[#allocation1 + $0x5] ss:$9 sm:$0xff] %v3382_v9  ;;  %3119 = vmatpush.bf16.msra.mxu3 %v3110_v45  ;;  %v1720_v22 = vpack.c.bf16 %v9501_v18, %v9501_v18 }
 0x35e   : > { %3525 = vst [vmem:[#allocation1 + $0x6] ss:$9 sm:$0xff] %v3383_v19  ;;  %v3129_v26 = vsel %vm2728_vm3, %v1719_v6, 0  ;;  %v3167_v30 = vsel %vm2728_vm3, %v1721_v32, 0  ;;  %v3394_v19 = vrot.slane %v9489_v8, 1 }
 0x35f   : > { %3526 = vst [vmem:[#allocation1 + $0x7] ss:$9 sm:$0xff] %v3384_v27  ;;  %v8359_v36 = vpop.eup %8358  ;;  %3138 = vmatpush.bf16.msrb.mxu0 %v3129_v26  ;;  %3176 = vmatpush.bf16.msra.mxu2 %v3167_v30  ;;  %v3148_v29 = vsel %vm2728_vm3, %v1720_v22, 0 }
 0x360   : > { %v2681_v21 = vmul.f32 %v8359_v36, %v9390_v5  ;;  %v3390_v5 = vrot.slane %v9468_v41, 1  ;;  %v9519_v14 = vpop.xlane.xlu0 %2599 }
 0x362   : > { %v2713_v23 = vpack.c.bf16 %v2681_v21, %v2681_v21 }
 0x366   : > { %v9508_v62 = vld [vmem:[#allocation1] sm:$0xff] }
 0x367   : > { %3528 = vst [vmem:[#allocation1] ss:$9 sm:$0xff] %v3385_v33  ;;  %7971 = vmatmul.msk.bf16.vlgmr.msrb.gmra.mxu0 %vm2724_vm4, %v2713_v23 }
 0x368   : > { %3529 = vst [vmem:[#allocation1 + $0x1] ss:$9 sm:$0xff] %v9484_v25  ;;  %v3392_v25 = vrot.slane %v9468_v41, 3 }
 0x369   : > { %3530 = vst [vmem:[#allocation1 + $0x2] ss:$9 sm:$0xff] %v3386_v4 }
 0x36a   : > { %3531 = vst [vmem:[#allocation1 + $0x3] ss:$9 sm:$0xff] %v3387_v28 }
 0x36b   : > { %3532 = vst [vmem:[#allocation1 + $0x4] ss:$9 sm:$0xff] %v3388_v7 }
 0x36c   : > { %3533 = vst [vmem:[#allocation1 + $0x5] ss:$9 sm:$0xff] %v3389_v1 }
 0x36d   : > { %3534 = vst [vmem:[#allocation1 + $0x6] ss:$9 sm:$0xff] %v9468_v41 }
 0x36e   : > { %3535 = vst [vmem:[#allocation1 + $0x7] ss:$9 sm:$0xff] %v3390_v5 }
 0x375   : > { %v9523_v27 = vld [vmem:[#allocation1] sm:$0xff] }
 0x376   : > { %3541 = vst [vmem:[#allocation1 + $0x4] ss:$9 sm:$0xff] %v3394_v19 }
 0x377   : > { %3537 = vst [vmem:[#allocation1] ss:$9 sm:$0xff] %v3391_v63 }
 0x378   : > { %3538 = vst [vmem:[#allocation1 + $0x1] ss:$9 sm:$0xff] %v3392_v25  ;;  %v9527_v11 = vpop.xlane.xlu0 %2605 }
 0x379   : > { %v2576_v9 = vpop.xlane.xlu1 %2575  ;;  %3539 = vst [vmem:[#allocation1 + $0x2] ss:$9 sm:$0xff] %v3393_v59 }
 0x37a   : > { %8360 = vrcp.f32 %v2576_v9  ;;  %3540 = vst [vmem:[#allocation1 + $0x3] ss:$9 sm:$0xff] %v9489_v8 }
 0x37b   : > { %3542 = vst [vmem:[#allocation1 + $0x5] ss:$9 sm:$0xff] %v3395_v46 }
 0x37c   : > { %3543 = vst [vmem:[#allocation1 + $0x6] ss:$9 sm:$0xff] %v3396_v60 }
 0x37d   : > { %3544 = vst [vmem:[#allocation1 + $0x7] ss:$9 sm:$0xff] %v3397_v47 }
 0x380   : > { %v8361_v17 = vpop.eup %8360 }
 0x381   : > { %v2674_v41 = vmul.f32 %v8361_v17, %v9409_v12  ;;  %v2582_v16 = vpop.xlane.xlu1 %2581 }
 0x382   : > { %8362 = vrcp.f32 %v2582_v16 }
 0x383   : > { %v2706_v43 = vpack.c.bf16 %v2674_v41, %v2674_v41  ;;  %8364 = vrcp.f32 %v9482_v15  ;;  %v2466_v15 = vsub.f32 %v9335_v37, %v9477_v34 }
 0x384   : > { %8366 = vrcp.f32 %v9493_v61 }
 0x385   : > { %7964 = vmatmul.msk.bf16.vlgmr.msrb.gmra.mxu1 %vm2724_vm4, %v2706_v43  ;;  %v2528_v9 = vmul.f32 1.442695, %v2466_v15 }
 0x386   : > { %3157 = vmatpush.bf16.msrb.mxu1 %v3148_v29 }
 0x388   : > { %v8363_v45 = vpop.eup %8362 }
 0x389   : > { %v2676_v18 = vmul.f32 %v8363_v45, %v9413_v58  ;;  %v2429_v33 = vpop.xlane.xlu1 %2428  ;;  %v8365_v23 = vpop.eup %8364 }
 0x38a   : > { %v2465_v30 = vsub.f32 %v9313_v38, %v2429_v33  ;;  %v2678_v38 = vmul.f32 %v8365_v23, %v9377_v40  ;;  %v8367_v34 = vpop.eup %8366 }
 0x38b   : > { %v8219_v32 = vpop.permute.xlu0 %8218  ;;  %v2708_v21 = vpack.c.bf16 %v2676_v18, %v2676_v18  ;;  %v2680_v40 = vmul.f32 %v8367_v34, %v9383_v2 }
 0x38c   : > { %v8221_v8 = vunpack.i.h.bf16 %v8219_v32  ;;  %v8220_v6 = vunpack.i.l.bf16 %v8219_v32  ;;  %v2526_v7 = vmul.f32 1.442695, %v2465_v30  ;;  %v2710_v63 = vpack.c.bf16 %v2678_v38, %v2678_v38 }
 0x38d   : > { %7966 = vmatmul.msk.bf16.vlgmr.msrb.gmra.mxu3 %vm2724_vm4, %v2708_v21  ;;  %v2712_v47 = vpack.c.bf16 %v2680_v40, %v2680_v40 }
 0x38e   : > { %v1679_v36 = vrot.slane %v8221_v8, 4  ;;  %v1678_v12 = vrot.slane %v8220_v6, 4  ;;  %v1722_v26 = vpack.c.bf16 %v8220_v6, %v8220_v6  ;;  %8368 = vpow2.f32 %v2526_v7  ;;  %v9570_v6 = vld [vmem:[#allocation1] sm:$0xff] }
 0x38f   : > { %v1724_v19 = vpack.c.bf16 %v8221_v8, %v8221_v8 }
 0x390   : > { %v1725_v4 = vpack.c.bf16 %v1679_v36, %v1679_v36  ;;  %v1723_v28 = vpack.c.bf16 %v1678_v12, %v1678_v12  ;;  %v3186_v1 = vsel %vm2728_vm3, %v1722_v26, 0  ;;  %v2603_v43 = vpop.xlane.xlu2 %2602 }
 0x391   : > { %3195 = vmatpush.bf16.msrb.mxu3 %v3186_v1  ;;  %v2609_v37 = vpop.xlane.xlu1 %2608  ;;  %v3224_v61 = vsel %vm2728_vm3, %v1724_v19, 0 }
 0x392   : > { %v3205_v58 = vsel %vm2728_vm3, %v1723_v28, 0  ;;  %v3243_v5 = vsel %vm2728_vm3, %v1725_v4, 0  ;;  %8370 = vrcp.f32 %v2609_v37 }
 0x393   : > { %3214 = vmatpush.bf16.msra.mxu0 %v3205_v58  ;;  %3252 = vmatpush.bf16.msrb.mxu2 %v3243_v5  ;;  %8372 = vpow2.f32 %v2528_v9 }
 0x394   : > { %v9549_v25 = vpop.eup %8368  ;;  %8374 = vrcp.f32 %v9519_v14 }
 0x395   : > { %7968 = vmatmul.msk.bf16.vlgmr.msra.gmra.mxu1 %vm2724_vm4, %v2710_v63  ;;  %v2619_v59 = vsel %vm2339_vm2, %v9549_v25, 0.0  ;;  %8376 = vrcp.f32 %v9527_v11 }
 0x396   : > { %3233 = vmatpush.bf16.msra.mxu1 %v3224_v61  ;;  %2620 = vadd.xlane.f32.xlu2 %v2619_v59  ;;  %8378 = vrcp.f32 %v2603_v43 }
 0x398   : > { %v8371_v46 = vpop.eup %8370  ;;  %v9568_v11 = vpop.f32.mrf.mxu0 }
 0x399   : > { %v2685_v17 = vmul.f32 %v8371_v46, %v9424_v39  ;;  %v9558_v60 = vpop.eup %8372  ;;  %v2612_v16 = vpop.xlane.xlu1 %2611  ;;  %v3402_v12 = vrot.slane %v9568_v11, 1  ;;  %3551 = vst [vmem:[#allocation1 + $0x5] ss:$9 sm:$0xff] %v9568_v11 }
 0x39a   : > { %v8375_v41 = vpop.eup %8374  ;;  %v2622_v14 = vsel %vm2339_vm2, %v9558_v60, 0.0  ;;  %8380 = vrcp.f32 %v2612_v16  ;;  %v3405_v16 = vrot.slane %v9568_v11, 4 }
 0x39b   : > { %v2717_v22 = vpack.c.bf16 %v2685_v17, %v2685_v17  ;;  %v2682_v2 = vmul.f32 %v8375_v41, %v9394_v48  ;;  %v8377_v39 = vpop.eup %8376  ;;  %v3403_v48 = vrot.slane %v9568_v11, 2  ;;  %3552 = vst [vmem:[#allocation1 + $0x6] ss:$9 sm:$0xff] %v3402_v12 }
 0x39c   : > { %v8379_v32 = vpop.eup %8378  ;;  %v2684_v45 = vmul.f32 %v8377_v39, %v9403_v31 }
 0x39d   : > { %7970 = vmatmul.msk.bf16.vlgmr.msra.gmra.mxu3 %vm2724_vm4, %v2712_v47  ;;  %7975 = vmatmul.msk.bf16.vlgmr.msra.gmra.mxu0 %vm2724_vm4, %v2717_v22  ;;  %v2714_v29 = vpack.c.bf16 %v2682_v2, %v2682_v2  ;;  %v2683_v8 = vmul.f32 %v8379_v32, %v9434_v24  ;;  %3553 = vst [vmem:[#allocation1 + $0x7] ss:$9 sm:$0xff] %v3403_v48  ;;  %v3404_v22 = vrot.slane %v9568_v11, 3  ;;  %v867_v11 = vld [vmem:[%s11288_s30] sm:$0xf] }
 0x39e   : > { %2623 = vadd.xlane.f32.xlu2 %v2622_v14  ;;  %v2716_v24 = vpack.c.bf16 %v2684_v45, %v2684_v45  ;;  %v3702_v48 = vpack.c.bf16 %v9496_v44, %v9496_v44 }
 0x39f   : > { %v2715_v18 = vpack.c.bf16 %v2683_v8, %v2683_v8 }
 0x3a0   : > { %v8381_v33 = vpop.eup %8380  ;;  %v2914_v26 = vpop.f32.mrf.mxu0 }
 0x3a1   : > { %v2615_v36 = vpop.xlane.xlu1 %2614  ;;  %7973 = vmatmul.msk.bf16.vlgmr.msra.gmra.mxu2 %vm2724_vm4, %v2715_v18  ;;  %v2686_v31 = vmul.f32 %v8381_v33, %v9429_v20  ;;  %v2893_v28 = vpop.f32.mrf.mxu3  ;;  %v3745_v18 = vsel %vm3743_vm5, %v867_v11, 0  ;;  %v3727_v33 = vunpack.c.l.b16 %v3702_v48 }
 0x3a2   : > { %8382 = vrcp.f32 %v2615_v36  ;;  %v3398_v23 = vrot.slane %v2893_v28, 1  ;;  %v3399_v15 = vrot.slane %v2893_v28, 2  ;;  %v3400_v7 = vrot.slane %v2893_v28, 3  ;;  %3546 = vst [vmem:[#allocation1] ss:$9 sm:$0xff] %v2893_v28 }
 0x3a3   : > { %v3401_v58 = vrot.slane %v2893_v28, 4  ;;  %v2718_v38 = vpack.c.bf16 %v2686_v31, %v2686_v31 }
 0x3a4   : > { %3547 = vst [vmem:[#allocation1 + $0x1] ss:$9 sm:$0xff] %v3398_v23 }
 0x3a5   : > { %7972 = vmatmul.msk.bf16.vlgmr.msrb.gmra.mxu1 %vm2724_vm4, %v2714_v29  ;;  %3548 = vst [vmem:[#allocation1 + $0x2] ss:$9 sm:$0xff] %v3399_v15 }
 0x3a6   : > { %3549 = vst [vmem:[#allocation1 + $0x3] ss:$9 sm:$0xff] %v3400_v7 }
 0x3a7   : > { %3550 = vst [vmem:[#allocation1 + $0x4] ss:$9 sm:$0xff] %v3401_v58  ;;  %v3704_v58 = vpack.c.bf16 %v9523_v27, %v9523_v27 }
 0x3a8   : > { %v8383_v4 = vpop.eup %8382 }
 0x3a9   : > { %v2618_v30 = vpop.xlane.xlu2 %2617  ;;  %v2687_v9 = vmul.f32 %v8383_v4, %v9440_v49  ;;  %v2895_v61 = vpop.f32.mrf.mxu3 }
 0x3aa   : > { %8384 = vrcp.f32 %v2618_v30 }
 0x3ab   : > { %v2719_v34 = vpack.c.bf16 %v2687_v9, %v2687_v9 }
 0x3ad   : > { %7974 = vmatmul.msk.bf16.vlgmr.msrb.gmra.mxu3 %vm2724_vm4, %v2716_v24  ;;  %v3701_v24 = vpack.c.bf16 %v9470_v35, %v9470_v35 }
 0x3ae   : > { %v2931_v21 = vpop.f32.mrf.mxu1  ;;  %v9595_v43 = vld [vmem:[#allocation1] sm:$0xff] }
 0x3af   : > { %3555 = vst [vmem:[#allocation1] ss:$9 sm:$0xff] %v3404_v22  ;;  %v3406_v39 = vrot.slane %v2931_v21, 1  ;;  %v3407_v32 = vrot.slane %v2931_v21, 2  ;;  %v3408_v8 = vrot.slane %v2931_v21, 3  ;;  %v3409_v45 = vrot.slane %v2931_v21, 4 }
 0x3b0   : > { %v8385_v37 = vpop.eup %8384  ;;  %3556 = vst [vmem:[#allocation1 + $0x1] ss:$9 sm:$0xff] %v3405_v16 }
 0x3b1   : > { %7977 = vmatmul.msk.bf16.vlgmr.msrb.gmra.mxu2 %vm2724_vm4, %v2719_v34  ;;  %v2688_v59 = vmul.f32 %v8385_v37, %v9453_v42  ;;  %3557 = vst [vmem:[#allocation1 + $0x2] ss:$9 sm:$0xff] %v2931_v21  ;;  %v3726_v21 = vunpack.c.l.b16 %v3701_v24 }
 0x3b2   : > { %3558 = vst [vmem:[#allocation1 + $0x3] ss:$9 sm:$0xff] %v3406_v39 }
 0x3b3   : > { %v9581_v19 = vpop.f32.mrf.mxu2  ;;  %v2720_v2 = vpack.c.bf16 %v2688_v59, %v2688_v59  ;;  %3559 = vst [vmem:[#allocation1 + $0x4] ss:$9 sm:$0xff] %v3407_v32  ;;  %v3731_v7 = vpack.c.b16 %v3727_v33, %v3726_v21  ;;  %v3705_v59 = vpack.c.bf16 %v9570_v6, %v9570_v6 }
 0x3b4   : > { %3560 = vst [vmem:[#allocation1 + $0x5] ss:$9 sm:$0xff] %v3408_v8  ;;  %v3410_v26 = vrot.slane %v9581_v19, 1  ;;  %v3411_v31 = vrot.slane %v9581_v19, 2  ;;  %v3412_v4 = vrot.slane %v9581_v19, 3  ;;  %v3413_v23 = vrot.slane %v9581_v19, 4 }
 0x3b5   : > { %7976 = vmatmul.msk.bf16.vlgmr.msra.gmra.mxu1 %vm2724_vm4, %v2718_v38  ;;  %3561 = vst [vmem:[#allocation1 + $0x6] ss:$9 sm:$0xff] %v3409_v45  ;;  %v3703_v38 = vpack.c.bf16 %v9508_v62, %v9508_v62 }
 0x3b6   : > { %v2435_v1 = vpop.xlane.xlu0 %2434  ;;  %1660 = vrot.lane.b32.xlu2 %v8953_v13, %s11260_s3  ;;  %v2933_v63 = vpop.f32.mrf.mxu1  ;;  %3562 = vst [vmem:[#allocation1 + $0x7] ss:$9 sm:$0xff] %v9581_v19  ;;  %v3729_v19 = vunpack.c.l.b16 %v3704_v58 }
 0x3b7   : > { %v2467_v5 = vsub.f32 %v9358_v10, %v2435_v1  ;;  %v9586_v10 = vpop.f32.mrf.mxu0  ;;  %v3728_v63 = vunpack.c.l.b16 %v3703_v38 }
 0x3b8   : > { %v3421_v34 = vrot.slane %v9586_v10, 4  ;;  %v3418_v61 = vrot.slane %v9586_v10, 1 }
 0x3b9   : > { %v2530_v20 = vmul.f32 1.442695, %v2467_v5  ;;  %v1659_v49 = vpop.permute.xlu1 %1658  ;;  %v3732_v27 = vpack.c.b16 %v3729_v19, %v3728_v63 }
 0x3ba   : > { %v1680_v40 = vrot.slane %v1659_v49, 4  ;;  %v1726_v46 = vpack.c.bf16 %v1659_v49, %v1659_v49  ;;  %v3419_v49 = vrot.slane %v9586_v10, 2 }
 0x3bb   : > { %8386 = vpow2.f32 %v2530_v20  ;;  %v2952_v17 = vpop.f32.mrf.mxu2  ;;  %v3420_v20 = vrot.slane %v9586_v10, 3 }
 0x3bc   : > { %v1727_v41 = vpack.c.bf16 %v1680_v40, %v1680_v40  ;;  %v3262_v13 = vsel %vm2728_vm3, %v1726_v46, 0  ;;  %v3730_v40 = vunpack.c.l.b16 %v3705_v59 }
 0x3bd   : > { %3271 = vmatpush.bf16.msra.mxu3 %v3262_v13  ;;  %v9614_v30 = vld [vmem:[#allocation1] sm:$0xff] }
 0x3be   : > { %v3281_v42 = vsel %vm2728_vm3, %v1727_v41, 0  ;;  %3564 = vst [vmem:[#allocation1] ss:$9 sm:$0xff] %v3410_v26  ;;  %v3733_v22 = vpack.c.b16 %v3730_v40, %v3730_v40  ;;  %v3707_v63 = vpack.c.bf16 %v9614_v30, %v9614_v30  ;;  %v868_v40 = vld [vmem:[%s11288_s30 + $0x4] sm:$0xf] }
 0x3bf   : > { %v2990_v29 = vpop.f32.mrf.mxu0  ;;  %3290 = vmatpush.bf16.msrb.mxu0 %v3281_v42  ;;  %3565 = vst [vmem:[#allocation1 + $0x1] ss:$9 sm:$0xff] %v3411_v31 }
 0x3c0   : > { %7978 = vmatmul.msk.bf16.vlgmr.msra.gmra.mxu3 %vm2724_vm4, %v2720_v2  ;;  %3566 = vst [vmem:[#allocation1 + $0x2] ss:$9 sm:$0xff] %v3412_v4  ;;  %v3784_v59 = vunpack.c.l.b16 %v3707_v63 }
 0x3c1   : > { %v9590_v47 = vpop.eup %8386  ;;  %3754 = vmatpush.bf16.msrb.mxu3 %v3745_v18  ;;  %3567 = vst [vmem:[#allocation1 + $0x3] ss:$9 sm:$0xff] %v3413_v23 }
 0x3c2   : > { %v2625_v14 = vsel %vm2339_vm2, %v9590_v47, 0.0 }
 0x3c3   : > { %2626 = vadd.xlane.f32.xlu1 %v2625_v14  ;;  %v2969_v36 = vpop.f32.mrf.mxu3 }
 0x3c4   : > { %v9606_v12 = vpop.f32.mrf.mxu2  ;;  %v3414_v15 = vrot.slane %v2969_v36, 1  ;;  %v3415_v35 = vrot.slane %v2969_v36, 2  ;;  %v3416_v1 = vrot.slane %v2969_v36, 3  ;;  %3568 = vst [vmem:[#allocation1 + $0x4] ss:$9 sm:$0xff] %v2969_v36  ;;  %v3417_v9 = vrot.slane %v2969_v36, 4 }
 0x3c5   : > { %v3426_v32 = vrot.slane %v9606_v12, 1  ;;  %v3427_v11 = vrot.slane %v9606_v12, 2  ;;  %v3428_v18 = vrot.slane %v9606_v12, 3  ;;  %v3429_v24 = vrot.slane %v9606_v12, 4 }
 0x3c6   : > { %3569 = vst [vmem:[#allocation1 + $0x5] ss:$9 sm:$0xff] %v3414_v15 }
 0x3c7   : > { %3570 = vst [vmem:[#allocation1 + $0x6] ss:$9 sm:$0xff] %v3415_v35 }
 0x3c8   : > { %3571 = vst [vmem:[#allocation1 + $0x7] ss:$9 sm:$0xff] %v3416_v1 }
 0x3cb   : > { %v2971_v28 = vpop.f32.mrf.mxu3 }
 0x3cc   : > { %v3028_v44 = vpop.f32.mrf.mxu2 }
 0x3cf   : > { %v9626_v37 = vld [vmem:[#allocation1] sm:$0xff] }
 0x3d0   : > { %7982 = vmatmul.msk.bf16.vlgmr.msrb.gmra.mxu3 %vm1730_vm1, %v3731_v7  ;;  %3573 = vst [vmem:[#allocation1] ss:$9 sm:$0xff] %v3417_v9 }
 0x3d1   : > { %3577 = vst [vmem:[#allocation1 + $0x4] ss:$9 sm:$0xff] %v3420_v20 }
 0x3d2   : > { %3578 = vst [vmem:[#allocation1 + $0x5] ss:$9 sm:$0xff] %v3421_v34 }
 0x3d3   : > { %3574 = vst [vmem:[#allocation1 + $0x1] ss:$9 sm:$0xff] %v9586_v10 }
 0x3d4   : > { %v9621_v5 = vpop.f32.mrf.mxu0  ;;  %3575 = vst [vmem:[#allocation1 + $0x2] ss:$9 sm:$0xff] %v3418_v61 }
 0x3d5   : > { %3576 = vst [vmem:[#allocation1 + $0x3] ss:$9 sm:$0xff] %v3419_v49  ;;  %v3434_v28 = vrot.slane %v9621_v5, 1  ;;  %v3435_v7 = vrot.slane %v9621_v5, 2  ;;  %v3706_v49 = vpack.c.bf16 %v9595_v43, %v9595_v43 }
 0x3dc   : > { %v3066_v62 = vpop.f32.mrf.mxu0 }
 0x3de   : > { %v9635_v46 = vpop.f32.mrf.mxu2 }
 0x3e0   : > { %7983 = vmatmul.msk.bf16.gmra.mxu3 %vm1730_vm1, %v3732_v27 }
 0x3e4   : > { %v9637_v17 = vpop.f32.mrf.mxu0 }
 0x3e6   : > { %v3104_v41 = vpop.f32.mrf.mxu2 }
 0x3e7   : > { %v3783_v41 = vunpack.c.l.b16 %v3706_v49  ;;  %v3450_v49 = vrot.slane %v9637_v17, 1 }
 0x3e9   : > { %v3788_v30 = vpack.c.b16 %v3784_v59, %v3783_v41  ;;  %v3451_v59 = vrot.slane %v9637_v17, 2 }
 0x3ec   : > { %v3142_v13 = vpop.f32.mrf.mxu0 }
 0x3f0   : > { %7984 = vmatmul.msk.bf16.gmra.mxu3 %vm1730_vm1, %v3733_v22  ;;  %v3801_v22 = vsel %vm3743_vm5, %v868_v40, 0 }
 0x3f1   : > { %3810 = vmatpush.bf16.msra.mxu0 %v3801_v22 }
 0x402   : > { %v3007_v16 = vpop.f32.mrf.mxu1 }
 0x403   : > { %v3422_v10 = vrot.slane %v3007_v16, 1  ;;  %3579 = vst [vmem:[#allocation1 + $0x6] ss:$9 sm:$0xff] %v3007_v16  ;;  %v3423_v42 = vrot.slane %v3007_v16, 2  ;;  %v3424_v39 = vrot.slane %v3007_v16, 3  ;;  %v3425_v29 = vrot.slane %v3007_v16, 4 }
 0x404   : > { %v3436_v16 = vrot.slane %v9621_v5, 3 }
 0x405   : > { %3580 = vst [vmem:[#allocation1 + $0x7] ss:$9 sm:$0xff] %v3422_v10  ;;  %v3437_v10 = vrot.slane %v9621_v5, 4 }
 0x409   : > { %v2621_v14 = vpop.xlane.xlu2 %2620 }
 0x40a   : > { %8388 = vrcp.f32 %v2621_v14  ;;  %v3009_v2 = vpop.f32.mrf.mxu1 }
 0x40c   : > { %v9640_v6 = vld [vmem:[#allocation1] sm:$0xff] }
 0x40d   : > { %3582 = vst [vmem:[#allocation1] ss:$9 sm:$0xff] %v3423_v42 }
 0x40e   : > { %3583 = vst [vmem:[#allocation1 + $0x1] ss:$9 sm:$0xff] %v3424_v39 }
 0x40f   : > { %3584 = vst [vmem:[#allocation1 + $0x2] ss:$9 sm:$0xff] %v3425_v29 }
 0x410   : > { %v8389_v8 = vpop.eup %8388  ;;  %3585 = vst [vmem:[#allocation1 + $0x3] ss:$9 sm:$0xff] %v9606_v12  ;;  %v3045_v45 = vpop.f32.mrf.mxu3 }
 0x411   : > { %3586 = vst [vmem:[#allocation1 + $0x4] ss:$9 sm:$0xff] %v3426_v32  ;;  %v2689_v36 = vmul.f32 %v8389_v8, %v9549_v25  ;;  %v2624_v48 = vpop.xlane.xlu2 %2623  ;;  %v3430_v38 = vrot.slane %v3045_v45, 1  ;;  %v3431_v19 = vrot.slane %v3045_v45, 2  ;;  %v3432_v20 = vrot.slane %v3045_v45, 3 }
 0x412   : > { %3587 = vst [vmem:[#allocation1 + $0x5] ss:$9 sm:$0xff] %v3427_v11  ;;  %8390 = vrcp.f32 %v2624_v48  ;;  %v9648_v33 = vpop.f32.mrf.mxu1  ;;  %v3433_v61 = vrot.slane %v3045_v45, 4  ;;  %v3708_v8 = vpack.c.bf16 %v9626_v37, %v9626_v37 }
 0x413   : > { %3588 = vst [vmem:[#allocation1 + $0x6] ss:$9 sm:$0xff] %v3428_v18  ;;  %v2721_v26 = vpack.c.bf16 %v2689_v36, %v2689_v36  ;;  %v3438_v2 = vrot.slane %v9648_v33, 1  ;;  %v3439_v42 = vrot.slane %v9648_v33, 2  ;;  %v3440_v39 = vrot.slane %v9648_v33, 3 }
 0x414   : > { %3589 = vst [vmem:[#allocation1 + $0x7] ss:$9 sm:$0xff] %v3429_v24  ;;  %v3441_v29 = vrot.slane %v9648_v33, 4  ;;  %v869_v18 = vld [vmem:[%s11288_s30 + $0x8] sm:$0xf]  ;;  %v3444_v36 = vrot.slane %v9635_v46, 3 }
 0x415   : > { %7979 = vmatmul.msk.bf16.vlgmr.msrb.gmra.mxu0 %vm2724_vm4, %v2721_v26  ;;  %v3854_v48 = vsel %vm3743_vm5, %v869_v18, 0 }
 0x418   : > { %v8391_v31 = vpop.eup %8390  ;;  %v3047_v21 = vpop.f32.mrf.mxu3 }
 0x419   : > { %v1661_v4 = vpop.permute.xlu2 %1660  ;;  %v2690_v23 = vmul.f32 %v8391_v31, %v9558_v60  ;;  %v3442_v21 = vrot.slane %v9635_v46, 1 }
 0x41a   : > { %v1681_v25 = vrot.slane %v1661_v4, 4  ;;  %v1728_v15 = vpack.c.bf16 %v1661_v4, %v1661_v4  ;;  %v3085_v44 = vpop.f32.mrf.mxu1  ;;  %v9653_v12 = vpop.f32.mrf.mxu0  ;;  %v3443_v4 = vrot.slane %v9635_v46, 2 }
 0x41b   : > { %v9656_v35 = vld [vmem:[#allocation1] sm:$0xff]  ;;  %v2722_v9 = vpack.c.bf16 %v2690_v23, %v2690_v23 }
 0x41c   : > { %3597 = vst [vmem:[#allocation1 + $0x6] ss:$9 sm:$0xff] %v3434_v28  ;;  %v1729_v1 = vpack.c.bf16 %v1681_v25, %v1681_v25  ;;  %v3300_v58 = vsel %vm2728_vm3, %v1728_v15, 0 }
 0x41d   : > { %3598 = vst [vmem:[#allocation1 + $0x7] ss:$9 sm:$0xff] %v3435_v7  ;;  %3309 = vmatpush.bf16.msrb.mxu1 %v3300_v58 }
 0x41e   : > { %3596 = vst [vmem:[#allocation1 + $0x5] ss:$9 sm:$0xff] %v9621_v5  ;;  %v3319_v60 = vsel %vm2728_vm3, %v1729_v1, 0  ;;  %v3709_v5 = vpack.c.bf16 %v9640_v6, %v9640_v6  ;;  %v3445_v6 = vrot.slane %v9635_v46, 4 }
 0x41f   : > { %3591 = vst [vmem:[#allocation1] ss:$9 sm:$0xff] %v3045_v45  ;;  %3328 = vmatpush.bf16.msra.mxu2 %v3319_v60  ;;  %v3785_v45 = vunpack.c.l.b16 %v3708_v8 }
 0x420   : > { %3592 = vst [vmem:[#allocation1 + $0x1] ss:$9 sm:$0xff] %v3430_v38  ;;  %v9661_v34 = vpop.f32.mrf.mxu3  ;;  %7980 = vmatmul.msk.bf16.vlgmr.msrb.gmra.mxu1 %vm2724_vm4, %v2722_v9  ;;  %v3786_v11 = vunpack.c.l.b16 %v3709_v5 }
 0x421   : > { %3593 = vst [vmem:[#allocation1 + $0x2] ss:$9 sm:$0xff] %v3431_v19  ;;  %3863 = vmatpush.bf16.msra.mxu1 %v3854_v48  ;;  %v3446_v15 = vrot.slane %v9661_v34, 1  ;;  %v3447_v44 = vrot.slane %v9661_v34, 2  ;;  %v3448_v1 = vrot.slane %v9661_v34, 3  ;;  %v3449_v19 = vrot.slane %v9661_v34, 4 }
 0x422   : > { %3594 = vst [vmem:[#allocation1 + $0x3] ss:$9 sm:$0xff] %v3432_v20  ;;  %v3218_v27 = vpop.f32.mrf.mxu0  ;;  %v9668_v62 = vpop.f32.mrf.mxu1  ;;  %v3452_v20 = vrot.slane %v9637_v17, 3  ;;  %v3467_v48 = vrot.slane %v9653_v12, 2 }
 0x423   : > { %3595 = vst [vmem:[#allocation1 + $0x4] ss:$9 sm:$0xff] %v3433_v61  ;;  %v3453_v27 = vrot.slane %v9637_v17, 4  ;;  %v3454_v22 = vrot.slane %v9668_v62, 1 }
 0x424   : > { %v9685_v32 = vpop.f32.mrf.mxu2 }
 0x425   : > { %7985 = vmatmul.msk.bf16.vlgmr.msra.gmra.mxu0 %vm1730_vm1, %v3788_v30  ;;  %v3460_v5 = vrot.slane %v9685_v32, 3 }
 0x428   : > { %v3123_v13 = vpop.f32.mrf.mxu3 }
 0x429   : > { %v3455_v13 = vrot.slane %v9668_v62, 2 }
 0x42a   : > { %v3599_v14 = vld [vmem:[#allocation1] sm:$0xff]  ;;  %v3161_v43 = vpop.f32.mrf.mxu1 }
 0x42b   : > { %3600 = vst [vmem:[#allocation1] ss:$9 sm:$0xff] %v3436_v16  ;;  %v3711_v24 = vpack.c.bf16 %v3599_v14, %v3599_v14  ;;  %v3458_v43 = vrot.slane %v9685_v32, 1 }
 0x42c   : > { %3601 = vst [vmem:[#allocation1 + $0x1] ss:$9 sm:$0xff] %v3437_v10  ;;  %v3180_v31 = vpop.f32.mrf.mxu2 }
 0x42d   : > { %3607 = vst [vmem:[#allocation1 + $0x7] ss:$9 sm:$0xff] %v9635_v46  ;;  %v3836_v23 = vunpack.c.l.b16 %v3711_v24  ;;  %v3710_v46 = vpack.c.bf16 %v9656_v35, %v9656_v35 }
 0x42e   : > { %3602 = vst [vmem:[#allocation1 + $0x2] ss:$9 sm:$0xff] %v9648_v33  ;;  %v3789_v33 = vpack.c.b16 %v3786_v11, %v3785_v45  ;;  %v3461_v11 = vrot.slane %v9685_v32, 4  ;;  %v3466_v45 = vrot.slane %v9653_v12, 1 }
 0x42f   : > { %3603 = vst [vmem:[#allocation1 + $0x3] ss:$9 sm:$0xff] %v3438_v2  ;;  %v3787_v9 = vunpack.c.l.b16 %v3710_v46 }
 0x430   : > { %3604 = vst [vmem:[#allocation1 + $0x4] ss:$9 sm:$0xff] %v3439_v42  ;;  %v9698_v28 = vpop.f32.mrf.mxu3 }
 0x431   : > { %3605 = vst [vmem:[#allocation1 + $0x5] ss:$9 sm:$0xff] %v3440_v39  ;;  %v3790_v61 = vpack.c.b16 %v3787_v9, %v3787_v9  ;;  %v3459_v39 = vrot.slane %v9685_v32, 2  ;;  %v3465_v31 = vrot.slane %v9698_v28, 4 }
 0x432   : > { %3606 = vst [vmem:[#allocation1 + $0x6] ss:$9 sm:$0xff] %v3441_v29  ;;  %v9707_v38 = vpop.f32.mrf.mxu1 }
 0x433   : > { %v3473_v46 = vrot.slane %v9707_v38, 4 }
 0x434   : > { %v9720_v30 = vpop.f32.mrf.mxu2 }
 0x435   : > { %7986 = vmatmul.msk.bf16.gmra.mxu0 %vm1730_vm1, %v3789_v33  ;;  %v3474_v9 = vrot.slane %v9720_v30, 1 }
 0x436   : > { %v2627_v58 = vpop.xlane.xlu1 %2626 }
 0x437   : > { %8392 = vrcp.f32 %v2627_v58 }
 0x438   : > { %v3199_v60 = vpop.f32.mrf.mxu3 }
 0x439   : > { %v3608_v26 = vld [vmem:[#allocation1] sm:$0xff] }
 0x43a   : > { %3611 = vst [vmem:[#allocation1 + $0x2] ss:$9 sm:$0xff] %v3444_v36  ;;  %v3712_v37 = vpack.c.bf16 %v3608_v26, %v3608_v26  ;;  %v3237_v40 = vpop.f32.mrf.mxu1  ;;  %v3464_v26 = vrot.slane %v9698_v28, 3 }
 0x43b   : > { %3612 = vst [vmem:[#allocation1 + $0x3] ss:$9 sm:$0xff] %v3445_v6  ;;  %v3463_v6 = vrot.slane %v9698_v28, 2 }
 0x43c   : > { %3609 = vst [vmem:[#allocation1] ss:$9 sm:$0xff] %v3442_v21  ;;  %v3837_v25 = vunpack.c.l.b16 %v3712_v37  ;;  %v3256_v29 = vpop.f32.mrf.mxu2  ;;  %v870_v37 = vld [vmem:[%s11288_s30 + $0xc] sm:$0xf] }
 0x43d   : > { %3610 = vst [vmem:[#allocation1 + $0x1] ss:$9 sm:$0xff] %v3443_v4  ;;  %v8393_v35 = vpop.eup %8392  ;;  %v3907_v4 = vsel %vm3743_vm5, %v870_v37, 0 }
 0x43e   : > { %3613 = vst [vmem:[#allocation1 + $0x4] ss:$9 sm:$0xff] %v9661_v34  ;;  %v3841_v7 = vpack.c.b16 %v3837_v25, %v3836_v23  ;;  %v2691_v34 = vmul.f32 %v8393_v35, %v9590_v47  ;;  %v3457_v47 = vrot.slane %v9668_v62, 4  ;;  %3916 = vmatpush.bf16.msrb.mxu2 %v3907_v4  ;;  %v3468_v25 = vrot.slane %v9653_v12, 3 }
 0x43f   : > { %3614 = vst [vmem:[#allocation1 + $0x5] ss:$9 sm:$0xff] %v3446_v15  ;;  %v3469_v15 = vrot.slane %v9653_v12, 4 }
 0x440   : > { %3615 = vst [vmem:[#allocation1 + $0x6] ss:$9 sm:$0xff] %v3447_v44  ;;  %7988 = vmatmul.msk.bf16.vlgmr.msra.gmra.mxu1 %vm1730_vm1, %v3841_v7  ;;  %v2723_v41 = vpack.c.bf16 %v2691_v34, %v2691_v34  ;;  %v3470_v44 = vrot.slane %v9707_v38, 1  ;;  %v3471_v7 = vrot.slane %v9707_v38, 2 }
 0x441   : > { %3616 = vst [vmem:[#allocation1 + $0x7] ss:$9 sm:$0xff] %v3448_v1  ;;  %v3472_v1 = vrot.slane %v9707_v38, 3 }
 0x442   : > { %7981 = vmatmul.msk.bf16.vlgmr.msra.gmra.mxu2 %vm2724_vm4, %v2723_v41  ;;  %v9774_v41 = vld [vmem:[%s11289_s2] ss:$0 sm:$0xff] }
 0x445   : > { %7987 = vmatmul.msk.bf16.gmra.mxu0 %vm1730_vm1, %v3790_v61 }
 0x448   : > { %v3617_v63 = vld [vmem:[#allocation1] sm:$0xff] }
 0x449   : > { %3618 = vst [vmem:[#allocation1] ss:$9 sm:$0xff] %v3449_v19  ;;  %v3713_v16 = vpack.c.bf16 %v3617_v63, %v3617_v63  ;;  %v3475_v19 = vrot.slane %v9720_v30, 2  ;;  %v3476_v63 = vrot.slane %v9720_v30, 3 }
 0x44a   : > { %3622 = vst [vmem:[#allocation1 + $0x4] ss:$9 sm:$0xff] %v3452_v20 }
 0x44b   : > { %3623 = vst [vmem:[#allocation1 + $0x5] ss:$9 sm:$0xff] %v3453_v27  ;;  %v3838_v2 = vunpack.c.l.b16 %v3713_v16 }
 0x44c   : > { %3619 = vst [vmem:[#allocation1 + $0x1] ss:$9 sm:$0xff] %v9637_v17  ;;  %v3456_v17 = vrot.slane %v9668_v62, 3 }
 0x44d   : > { %3620 = vst [vmem:[#allocation1 + $0x2] ss:$9 sm:$0xff] %v3450_v49 }
 0x44e   : > { %3621 = vst [vmem:[#allocation1 + $0x3] ss:$9 sm:$0xff] %v3451_v59 }
 0x44f   : > { %3624 = vst [vmem:[#allocation1 + $0x6] ss:$9 sm:$0xff] %v9668_v62  ;;  %v9731_v62 = vpop.f32.mrf.mxu3 }
 0x450   : > { %3625 = vst [vmem:[#allocation1 + $0x7] ss:$9 sm:$0xff] %v3454_v22  ;;  %v3478_v49 = vrot.slane %v9731_v62, 1  ;;  %v3479_v59 = vrot.slane %v9731_v62, 2  ;;  %v3480_v40 = vrot.slane %v9731_v62, 3 }
 0x457   : > { %v3626_v10 = vld [vmem:[#allocation1] sm:$0xff]  ;;  %v3275_v36 = vpop.f32.mrf.mxu3 }
 0x458   : > { %3627 = vst [vmem:[#allocation1] ss:$9 sm:$0xff] %v3455_v13  ;;  %v3714_v14 = vpack.c.bf16 %v3626_v10, %v3626_v10 }
 0x459   : > { %3628 = vst [vmem:[#allocation1 + $0x1] ss:$9 sm:$0xff] %v3456_v17 }
 0x45a   : > { %3629 = vst [vmem:[#allocation1 + $0x2] ss:$9 sm:$0xff] %v3457_v47  ;;  %v3839_v42 = vunpack.c.l.b16 %v3714_v14 }
 0x45b   : > { %3630 = vst [vmem:[#allocation1 + $0x3] ss:$9 sm:$0xff] %v9685_v32  ;;  %v3462_v32 = vrot.slane %v9698_v28, 1 }
 0x45c   : > { %3631 = vst [vmem:[#allocation1 + $0x4] ss:$9 sm:$0xff] %v3458_v43  ;;  %v3842_v8 = vpack.c.b16 %v3839_v42, %v3838_v2 }
 0x45d   : > { %3632 = vst [vmem:[#allocation1 + $0x5] ss:$9 sm:$0xff] %v3459_v39 }
 0x45e   : > { %3633 = vst [vmem:[#allocation1 + $0x6] ss:$9 sm:$0xff] %v3460_v5  ;;  %7989 = vmatmul.msk.bf16.gmra.mxu1 %vm1730_vm1, %v3842_v8 }
 0x45f   : > { %3634 = vst [vmem:[#allocation1 + $0x7] ss:$9 sm:$0xff] %v3461_v11  ;;  %v9746_v23 = vpop.f32.mrf.mxu3 }
 0x460   : > { %v3773_v11 = vadd.f32 %v9774_v41, %v9746_v23 }
 0x466   : > { %v3635_v18 = vld [vmem:[#allocation1] sm:$0xff] }
 0x467   : > { %3641 = vst [vmem:[#allocation1 + $0x5] ss:$9 sm:$0xff] %v9653_v12  ;;  %v3715_v24 = vpack.c.bf16 %v3635_v18, %v3635_v18  ;;  %v9755_v58 = vpop.f32.mrf.mxu3 }
 0x468   : > { %3642 = vst [vmem:[#allocation1 + $0x6] ss:$9 sm:$0xff] %v3466_v45 }
 0x469   : > { %3643 = vst [vmem:[#allocation1 + $0x7] ss:$9 sm:$0xff] %v3467_v48  ;;  %v3840_v33 = vunpack.c.l.b16 %v3715_v24 }
 0x46a   : > { %3636 = vst [vmem:[#allocation1] ss:$9 sm:$0xff] %v9698_v28 }
 0x46b   : > { %3637 = vst [vmem:[#allocation1 + $0x1] ss:$9 sm:$0xff] %v3462_v32  ;;  %v3843_v21 = vpack.c.b16 %v3840_v33, %v3840_v33 }
 0x46c   : > { %3638 = vst [vmem:[#allocation1 + $0x2] ss:$9 sm:$0xff] %v3463_v6 }
 0x46d   : > { %3639 = vst [vmem:[#allocation1 + $0x3] ss:$9 sm:$0xff] %v3464_v26 }
 0x46e   : > { %3640 = vst [vmem:[#allocation1 + $0x4] ss:$9 sm:$0xff] %v3465_v31  ;;  %7990 = vmatmul.msk.bf16.gmra.mxu1 %vm1730_vm1, %v3843_v21 }
 0x46f   : > { %v9758_v12 = vpop.f32.mrf.mxu3 }
 0x470   : > { %v3775_v37 = vadd.f32 %v9774_v41, %v9758_v12 }
 0x475   : > { %v3644_v28 = vld [vmem:[#allocation1] sm:$0xff] }
 0x476   : > { %3645 = vst [vmem:[#allocation1] ss:$9 sm:$0xff] %v3468_v25  ;;  %v3716_v60 = vpack.c.bf16 %v3644_v28, %v3644_v28 }
 0x477   : > { %3646 = vst [vmem:[#allocation1 + $0x1] ss:$9 sm:$0xff] %v3469_v15  ;;  %v9768_v22 = vpop.f32.mrf.mxu3 }
 0x478   : > { %3647 = vst [vmem:[#allocation1 + $0x2] ss:$9 sm:$0xff] %v9707_v38  ;;  %v3477_v38 = vrot.slane %v9720_v30, 4  ;;  %v3889_v27 = vunpack.c.l.b16 %v3716_v60 }
 0x479   : > { %3648 = vst [vmem:[#allocation1 + $0x3] ss:$9 sm:$0xff] %v3470_v44 }
 0x47a   : > { %3649 = vst [vmem:[#allocation1 + $0x4] ss:$9 sm:$0xff] %v3471_v7 }
 0x47b   : > { %3650 = vst [vmem:[#allocation1 + $0x5] ss:$9 sm:$0xff] %v3472_v1 }
 0x47c   : > { %3651 = vst [vmem:[#allocation1 + $0x6] ss:$9 sm:$0xff] %v3473_v46 }
 0x47d   : > { %3652 = vst [vmem:[#allocation1 + $0x7] ss:$9 sm:$0xff] %v9720_v30  ;;  %v3481_v30 = vrot.slane %v9731_v62, 4 }
 0x47f   : > { %v3766_v13 = vpop.f32.mrf.mxu3 }
 0x480   : > { %v3777_v10 = vadd.f32 %v9774_v41, %v3766_v13  ;;  %v8141_v13 = vld [vmem:[%s11238_s12 + $0x8] sm:$0xff] }
 0x481   : > { %4024 = vmatpush.bf16.msrb.mxu0 %v8141_v13 }
 0x484   : > { %v3653_v20 = vld [vmem:[#allocation1] sm:$0xff] }
 0x485   : > { %3654 = vst [vmem:[#allocation1] ss:$9 sm:$0xff] %v3474_v9  ;;  %v3717_v61 = vpack.c.bf16 %v3653_v20, %v3653_v20 }
 0x486   : > { %3655 = vst [vmem:[#allocation1 + $0x1] ss:$9 sm:$0xff] %v3475_v19 }
 0x487   : > { %3656 = vst [vmem:[#allocation1 + $0x2] ss:$9 sm:$0xff] %v3476_v63  ;;  %v3890_v35 = vunpack.c.l.b16 %v3717_v61  ;;  %v3768_v42 = vpop.f32.mrf.mxu3 }
 0x488   : > { %3657 = vst [vmem:[#allocation1 + $0x3] ss:$9 sm:$0xff] %v3477_v38  ;;  %v3774_v42 = vadd.f32 %v9774_v41, %v9755_v58 }
 0x489   : > { %3658 = vst [vmem:[#allocation1 + $0x4] ss:$9 sm:$0xff] %v9731_v62  ;;  %v3894_v34 = vpack.c.b16 %v3890_v35, %v3889_v27 }
 0x48a   : > { %3659 = vst [vmem:[#allocation1 + $0x5] ss:$9 sm:$0xff] %v3478_v49 }
 0x48b   : > { %3660 = vst [vmem:[#allocation1 + $0x6] ss:$9 sm:$0xff] %v3479_v59  ;;  %7991 = vmatmul.msk.bf16.vlgmr.msrb.gmra.mxu2 %vm1730_vm1, %v3894_v34 }
 0x48c   : > { %3661 = vst [vmem:[#allocation1 + $0x7] ss:$9 sm:$0xff] %v3480_v40 }
 0x492   : > { %v3292_v16 = vpop.f32.mrf.mxu0 }
 0x493   : > { %v3662_v17 = vld [vmem:[#allocation1] sm:$0xff]  ;;  %v3482_v47 = vrot.slane %v3292_v16, 1  ;;  %v3483_v14 = vrot.slane %v3292_v16, 2  ;;  %v3484_v43 = vrot.slane %v3292_v16, 3  ;;  %v3485_v2 = vrot.slane %v3292_v16, 4 }
 0x494   : > { %3663 = vst [vmem:[#allocation1] ss:$9 sm:$0xff] %v3481_v30  ;;  %v3718_v45 = vpack.c.bf16 %v3662_v17, %v3662_v17 }
 0x495   : > { %3664 = vst [vmem:[#allocation1 + $0x1] ss:$9 sm:$0xff] %v3292_v16  ;;  %v8143_v16 = vld [vmem:[%s11240_s14 + $0x8] sm:$0xff] }
 0x496   : > { %3665 = vst [vmem:[#allocation1 + $0x2] ss:$9 sm:$0xff] %v3482_v47  ;;  %v3891_v6 = vunpack.c.l.b16 %v3718_v45  ;;  %4062 = vmatpush.bf16.msrb.mxu1 %v8143_v16  ;;  %v8142_v47 = vld [vmem:[%s11240_s14] sm:$0xff] }
 0x497   : > { %3666 = vst [vmem:[#allocation1 + $0x3] ss:$9 sm:$0xff] %v3483_v14  ;;  %v8139_v14 = vld [vmem:[%s11290_s4 + $0x8] sm:$0xff] }
 0x498   : > { %3667 = vst [vmem:[#allocation1 + $0x4] ss:$9 sm:$0xff] %v3484_v43  ;;  %3978 = vmatpush.bf16.msra.mxu3 %v8139_v14  ;;  %v8138_v43 = vld [vmem:[%s11290_s4] sm:$0xff] }
 0x499   : > { %3668 = vst [vmem:[#allocation1 + $0x5] ss:$9 sm:$0xff] %v3485_v2 }
 0x49a   : > { %v3294_v39 = vpop.f32.mrf.mxu0  ;;  %4063 = vmatpush.bf16.msrb.mxu1 %v8142_v47 }
 0x49c   : > { %3979 = vmatpush.bf16.msra.mxu3 %v8138_v43 }
 0x49d   : > { %v3311_v29 = vpop.f32.mrf.mxu1 }
 0x49e   : > { %v3486_v5 = vrot.slane %v3311_v29, 1  ;;  %3669 = vst [vmem:[#allocation1 + $0x6] ss:$9 sm:$0xff] %v3311_v29  ;;  %v3487_v62 = vrot.slane %v3311_v29, 2  ;;  %v3488_v18 = vrot.slane %v3311_v29, 3  ;;  %v3489_v24 = vrot.slane %v3311_v29, 4 }
 0x49f   : > { %8002 = vmatmul.msk.bf16.vlgmr.msra.gmra.mxu3 %vm947_vm0, %v8785_v0  ;;  %v3776_v0 = vadd.f32 %v9774_v41, %v9768_v22  ;;  %v9819_v22 = vld [vmem:[%s11239_s13] ss:$0 sm:$0xff] }
 0x4a0   : > { %3670 = vst [vmem:[#allocation1 + $0x7] ss:$9 sm:$0xff] %v3486_v5 }
 0x4a2   : > { %v3812_v48 = vpop.f32.mrf.mxu0 }
 0x4a3   : > { %v3826_v32 = vadd.f32 %v3812_v48, %v3773_v11 }
 0x4a5   : > { %v3313_v8 = vpop.f32.mrf.mxu1 }
 0x4a7   : > { %v3671_v36 = vld [vmem:[#allocation1] sm:$0xff] }
 0x4a8   : > { %3672 = vst [vmem:[#allocation1] ss:$9 sm:$0xff] %v3487_v62  ;;  %v3719_v33 = vpack.c.bf16 %v3671_v36, %v3671_v36 }
 0x4a9   : > { %3673 = vst [vmem:[#allocation1 + $0x1] ss:$9 sm:$0xff] %v3488_v18 }
 0x4aa   : > { %3674 = vst [vmem:[#allocation1 + $0x2] ss:$9 sm:$0xff] %v3489_v24  ;;  %v3892_v26 = vunpack.c.l.b16 %v3719_v33  ;;  %v3814_v21 = vpop.f32.mrf.mxu0 }
 0x4ab   : > { %v3827_v39 = vadd.f32 %v3814_v21, %v3774_v42 }
 0x4ac   : > { %v3895_v31 = vpack.c.b16 %v3892_v26, %v3891_v6 }
 0x4ae   : > { %7992 = vmatmul.msk.bf16.gmra.mxu2 %vm1730_vm1, %v3895_v31 }
 0x4af   : > { %8003 = vmatmul.msk.bf16.gmra.mxu3 %vm947_vm0, %v8791_v3 }
 0x4b2   : > { %v3817_v4 = vpop.f32.mrf.mxu0 }
 0x4b3   : > { %v3828_v23 = vadd.f32 %v3817_v4, %v3775_v37 }
 0x4ba   : > { %v3819_v28 = vpop.f32.mrf.mxu0 }
 0x4bb   : > { %v3829_v18 = vadd.f32 %v3819_v28, %v3776_v0 }
 0x4bd   : > { %v3865_v25 = vpop.f32.mrf.mxu1 }
 0x4be   : > { %v3879_v15 = vadd.f32 %v3865_v25, %v3826_v32 }
 0x4c2   : > { %v3822_v44 = vpop.f32.mrf.mxu0 }
 0x4c3   : > { %v3830_v7 = vadd.f32 %v3822_v44, %v3777_v10  ;;  %v8140_v10 = vld [vmem:[%s11238_s12] sm:$0xff] }
 0x4c4   : > { %4025 = vmatpush.bf16.msrb.mxu0 %v8140_v10  ;;  %v9842_v44 = vld [vmem:[%s11237_s11] ss:$0 sm:$0xff] }
 0x4c5   : > { %v3867_v46 = vpop.f32.mrf.mxu1  ;;  %v3330_v9 = vpop.f32.mrf.mxu2 }
 0x4c6   : > { %v3490_v60 = vrot.slane %v3330_v9, 1  ;;  %v3491_v19 = vrot.slane %v3330_v9, 2  ;;  %v3492_v20 = vrot.slane %v3330_v9, 3  ;;  %3675 = vst [vmem:[#allocation1 + $0x3] ss:$9 sm:$0xff] %v3330_v9  ;;  %v3493_v63 = vrot.slane %v3330_v9, 4 }
 0x4c7   : > { %v3880_v29 = vadd.f32 %v3867_v46, %v3827_v39 }
 0x4c8   : > { %3676 = vst [vmem:[#allocation1 + $0x4] ss:$9 sm:$0xff] %v3490_v60 }
 0x4c9   : > { %3677 = vst [vmem:[#allocation1 + $0x5] ss:$9 sm:$0xff] %v3491_v19 }
 0x4ca   : > { %v3824_v1 = vpop.f32.mrf.mxu0  ;;  %3678 = vst [vmem:[#allocation1 + $0x6] ss:$9 sm:$0xff] %v3492_v20 }
 0x4cb   : > { %3679 = vst [vmem:[#allocation1 + $0x7] ss:$9 sm:$0xff] %v3493_v63 }
 0x4cd   : > { %v3332_v61 = vpop.f32.mrf.mxu2 }
 0x4d2   : > { %v3680_v27 = vld [vmem:[#allocation1] sm:$0xff] }
 0x4d3   : > { %v3720_v35 = vpack.c.bf16 %v3680_v27, %v3680_v27 }
 0x4d5   : > { %v3893_v59 = vunpack.c.l.b16 %v3720_v35 }
 0x4d7   : > { %v3896_v34 = vpack.c.b16 %v3893_v59, %v3893_v59 }
 0x4d9   : > { %7993 = vmatmul.msk.bf16.gmra.mxu2 %vm1730_vm1, %v3896_v34 }
 0x4db   : > { %v3870_v12 = vpop.f32.mrf.mxu1 }
 0x4dc   : > { %v3881_v38 = vadd.f32 %v3870_v12, %v3828_v23 }
 0x4e3   : > { %v3872_v49 = vpop.f32.mrf.mxu1 }
 0x4e4   : > { %v3882_v36 = vadd.f32 %v3872_v49, %v3829_v18 }
 0x4eb   : > { %v3875_v40 = vpop.f32.mrf.mxu1 }
 0x4ec   : > { %v3883_v30 = vadd.f32 %v3875_v40, %v3830_v7 }
 0x4f3   : > { %v3877_v17 = vpop.f32.mrf.mxu1 }
 0x50e   : > { %v3918_v2 = vpop.f32.mrf.mxu2 }
 0x50f   : > { %v3932_v8 = vadd.f32 %v3918_v2, %v3879_v15 }
 0x516   : > { %v3920_v5 = vpop.f32.mrf.mxu2 }
 0x517   : > { %v3933_v11 = vadd.f32 %v3920_v5, %v3880_v29 }
 0x519   : > { %v3991_v62 = vpack.c.bf16 %v3933_v11, %v3932_v8 }
 0x51b   : > { %8012 = vmatmul.msk.bf16.vlgmr.msrb.gmra.mxu0 %vm947_vm0, %v3991_v62  ;;  %8023 = vmatmul.msk.bf16.vlgmr.msrb.gmra.mxu1 %vm947_vm0, %v3991_v62 }
 0x522   : > { %v3981_v46 = vpop.f32.mrf.mxu3 }
 0x523   : > { %v9849_v63 = vadd.f32 %v9842_v44, %v3981_v46 }
 0x525   : > { %v4151_v12 = vpack.c.bf16 %v9849_v63, %v9849_v63 }
 0x52a   : > { %v3983_v43 = vpop.f32.mrf.mxu3 }
 0x52b   : > { %v3984_v5 = vadd.f32 %v9842_v44, %v3983_v43 }
 0x52d   : > { %v4153_v62 = vpack.c.bf16 %v3984_v5, %v3984_v5 }
 0x531   : > { %v3923_v45 = vpop.f32.mrf.mxu2 }
 0x532   : > { %v3934_v48 = vadd.f32 %v3923_v45, %v3881_v38 }
 0x539   : > { %v3925_v58 = vpop.f32.mrf.mxu2 }
 0x53a   : > { %v3935_v24 = vadd.f32 %v3925_v58, %v3882_v36 }
 0x53c   : > { %v3992_v32 = vpack.c.bf16 %v3935_v24, %v3934_v48 }
 0x53e   : > { %8013 = vmatmul.msk.bf16.gmra.mxu0 %vm947_vm0, %v3992_v32  ;;  %8024 = vmatmul.msk.bf16.gmra.mxu1 %vm947_vm0, %v3992_v32 }
 0x55c   : > { %v3928_v3 = vpop.f32.mrf.mxu2 }
 0x55d   : > { %v3936_v33 = vadd.f32 %v3928_v3, %v3883_v30  ;;  %v4119_v30 = vrot.slane %v9849_v63, 4 }
 0x55f   : > { %v3993_v6 = vpack.c.bf16 %v3936_v33, %v3936_v33  ;;  %v4152_v10 = vpack.c.bf16 %v4119_v30, %v4119_v30 }
 0x561   : > { %8014 = vmatmul.msk.bf16.gmra.mxu0 %vm947_vm0, %v3993_v6  ;;  %8025 = vmatmul.msk.bf16.gmra.mxu1 %vm947_vm0, %v3993_v6 }
 0x564   : > { %v3930_v26 = vpop.f32.mrf.mxu2 }
 0x598   : > { %v4027_v41 = vpop.f32.mrf.mxu0  ;;  %v9890_v48 = vpop.f32.mrf.mxu1 }
 0x599   : > { %v9822_v31 = vadd.f32 %v9819_v22, %v4027_v41  ;;  %v8232_v41 = vpack.i.bf16 %v9849_v63, %v3984_v5 }
 0x59b   : > { %v4218_v21 = vrot.slane %v9822_v31, 1  ;;  %v4219_v37 = vrot.slane %v9822_v31, 2  ;;  %v4220_v4 = vrot.slane %v9822_v31, 3  ;;  %4358 = vst [vmem:[#allocation1] ss:$9 sm:$0xff] %v9822_v31  ;;  %4188 = vrot.lane.b32.xlu0 %v9822_v31, %s11291_s5  ;;  %v4221_v23 = vrot.slane %v9822_v31, 4 }
 0x59c   : > { %v4222_v28 = vrot.slane %v9822_v31, 5  ;;  %v4223_v7 = vrot.slane %v9822_v31, 6  ;;  %v4224_v9 = vrot.slane %v9822_v31, 7 }
 0x59d   : > { %4360 = vst [vmem:[#allocation1 + $0x1] ss:$9 sm:$0xff] %v4218_v21 }
 0x59e   : > { %4362 = vst [vmem:[#allocation1 + $0x2] ss:$9 sm:$0xff] %v4219_v37 }
 0x59f   : > { %4364 = vst [vmem:[#allocation1 + $0x3] ss:$9 sm:$0xff] %v4220_v4 }
 0x5a0   : > { %4366 = vst [vmem:[#allocation1 + $0x4] ss:$9 sm:$0xff] %v4221_v23  ;;  %v4029_v25 = vpop.f32.mrf.mxu0  ;;  %v4067_v4 = vpop.f32.mrf.mxu1  ;;  %v4120_v23 = vrot.slane %v3984_v5, 4 }
 0x5a1   : > { %v9832_v15 = vadd.f32 %v9819_v22, %v4029_v25 }
 0x5a3   : > { %4200 = vrot.lane.b32.xlu1 %v9832_v15, %s11292_s10  ;;  %4190 = vrot.lane.b32.xlu2 %v9832_v15, %s11291_s5  ;;  %v4225_v60 = vrot.slane %v9832_v15, 1  ;;  %v4226_v61 = vrot.slane %v9832_v15, 2  ;;  %v4227_v38 = vrot.slane %v9832_v15, 3  ;;  %v4228_v35 = vrot.slane %v9832_v15, 4 }
 0x5a4   : > { %v4229_v59 = vrot.slane %v9832_v15, 5  ;;  %v4230_v34 = vrot.slane %v9832_v15, 6  ;;  %v4231_v17 = vrot.slane %v9832_v15, 7 }
 0x5a7   : > { %v4367_v1 = vld [vmem:[#allocation1] sm:$0xff] }
 0x5a8   : > { %4368 = vst [vmem:[#allocation1] ss:$9 sm:$0xff] %v4222_v28  ;;  %v4586_v19 = vpack.c.bf16 %v4367_v1, %v4367_v1 }
 0x5a9   : > { %4369 = vst [vmem:[#allocation1 + $0x1] ss:$9 sm:$0xff] %v4223_v7 }
 0x5aa   : > { %4370 = vst [vmem:[#allocation1 + $0x2] ss:$9 sm:$0xff] %v4224_v9  ;;  %v5057_v20 = vsel %vm1730_vm1, %v4586_v19, 0 }
 0x5ab   : > { %4371 = vst [vmem:[#allocation1 + $0x3] ss:$9 sm:$0xff] %v9832_v15  ;;  %5066 = vmatpush.bf16.xpose.msra.mxu2 %v5057_v20 }
 0x5ac   : > { %4372 = vst [vmem:[#allocation1 + $0x4] ss:$9 sm:$0xff] %v4225_v60  ;;  %v9912_v60 = vld [vmem:[%s11241_s15] ss:$0 sm:$0xff] }
 0x5ad   : > { %v9915_v19 = vadd.f32 %v9912_v60, %v4067_v4 }
 0x5b2   : > { %8026 = vmatmul.msk.bf16.vlgmr.msra.gmra.mxu2 %vm1730_vm1, %v4151_v12 }
 0x5b3   : > { %v4373_v27 = vld [vmem:[#allocation1] sm:$0xff] }
 0x5b4   : > { %4374 = vst [vmem:[#allocation1] ss:$9 sm:$0xff] %v4226_v61  ;;  %v4587_v49 = vpack.c.bf16 %v4373_v27, %v4373_v27 }
 0x5b5   : > { %4375 = vst [vmem:[#allocation1 + $0x1] ss:$9 sm:$0xff] %v4227_v38 }
 0x5b6   : > { %4376 = vst [vmem:[#allocation1 + $0x2] ss:$9 sm:$0xff] %v4228_v35  ;;  %v5076_v40 = vsel %vm1730_vm1, %v4587_v49, 0 }
 0x5b7   : > { %4377 = vst [vmem:[#allocation1 + $0x3] ss:$9 sm:$0xff] %v4229_v59  ;;  %5085 = vmatpush.bf16.xpose.msrb.mxu2 %v5076_v40 }
 0x5b8   : > { %4378 = vst [vmem:[#allocation1 + $0x4] ss:$9 sm:$0xff] %v4230_v34 }
 0x5bb   : > { %v4032_v13 = vpop.f32.mrf.mxu0  ;;  %v4070_v9 = vpop.f32.mrf.mxu1 }
 0x5bc   : > { %v9863_v16 = vadd.f32 %v9819_v22, %v4032_v13  ;;  %v3986_v13 = vpop.f32.mrf.mxu3 }
 0x5be   : > { %v4232_v47 = vrot.slane %v9863_v16, 1  ;;  %4212 = vrot.lane.b32.xlu1 %v9863_v16, %s11293_s29  ;;  %4192 = vrot.lane.b32.xlu0 %v9863_v16, %s11291_s5  ;;  %v4233_v2 = vrot.slane %v9863_v16, 2  ;;  %v4234_v39 = vrot.slane %v9863_v16, 3  ;;  %v4235_v45 = vrot.slane %v9863_v16, 4 }
 0x5bf   : > { %v4379_v14 = vld [vmem:[#allocation1] sm:$0xff]  ;;  %v4236_v0 = vrot.slane %v9863_v16, 5  ;;  %v4237_v36 = vrot.slane %v9863_v16, 6  ;;  %v4238_v58 = vrot.slane %v9863_v16, 7 }
 0x5c0   : > { %4380 = vst [vmem:[#allocation1] ss:$9 sm:$0xff] %v4231_v17  ;;  %v4588_v42 = vpack.c.bf16 %v4379_v14, %v4379_v14 }
 0x5c1   : > { %4381 = vst [vmem:[#allocation1 + $0x1] ss:$9 sm:$0xff] %v9863_v16 }
 0x5c2   : > { %v5095_v29 = vsel %vm1730_vm1, %v4588_v42, 0  ;;  %4382 = vst [vmem:[#allocation1 + $0x2] ss:$9 sm:$0xff] %v4232_v47  ;;  %8027 = vmatmul.msk.bf16.vlgmr.msrb.gmra.mxu2 %vm1730_vm1, %v4152_v10  ;;  %v9941_v10 = vadd.f32 %v9912_v60, %v4070_v9 }
 0x5c3   : > { %5104 = vmatpush.bf16.xpose.msrb.mxu3 %v5095_v29  ;;  %4383 = vst [vmem:[#allocation1 + $0x3] ss:$9 sm:$0xff] %v4233_v2  ;;  %v4034_v8 = vpop.f32.mrf.mxu0  ;;  %v4072_v12 = vpop.f32.mrf.mxu1 }
 0x5c4   : > { %4384 = vst [vmem:[#allocation1 + $0x4] ss:$9 sm:$0xff] %v4234_v39  ;;  %v9878_v11 = vadd.f32 %v9819_v22, %v4034_v8  ;;  %v9928_v27 = vadd.f32 %v9912_v60, %v4072_v12  ;;  %v3988_v8 = vpop.f32.mrf.mxu3 }
 0x5c6   : > { %4194 = vrot.lane.b32.xlu2 %v9878_v11, %s11291_s5  ;;  %v4239_v24 = vrot.slane %v9878_v11, 1  ;;  %v4240_v32 = vrot.slane %v9878_v11, 2  ;;  %v4241_v33 = vrot.slane %v9878_v11, 3  ;;  %v4242_v6 = vrot.slane %v9878_v11, 4  ;;  %8233 = vrot.lane.b32.xlu1 %v8232_v41, %s11292_s10 }
 0x5c7   : > { %v4243_v26 = vrot.slane %v9878_v11, 5  ;;  %v4244_v7 = vrot.slane %v9878_v11, 6  ;;  %v4245_v1 = vrot.slane %v9878_v11, 7 }
 0x5ca   : > { %8028 = vmatmul.msk.bf16.vlgmr.msrb.gmra.mxu3 %vm1730_vm1, %v4153_v62 }
 0x5cb   : > { %v4385_v18 = vld [vmem:[#allocation1] sm:$0xff] }
 0x5cc   : > { %4386 = vst [vmem:[#allocation1] ss:$9 sm:$0xff] %v4235_v45  ;;  %v4589_v21 = vpack.c.bf16 %v4385_v18, %v4385_v18  ;;  %v3989_v45 = vadd.f32 %v9842_v44, %v3988_v8 }
 0x5cd   : > { %4387 = vst [vmem:[#allocation1 + $0x1] ss:$9 sm:$0xff] %v4236_v0 }
 0x5ce   : > { %4388 = vst [vmem:[#allocation1 + $0x2] ss:$9 sm:$0xff] %v4237_v36  ;;  %4198 = vrot.lane.b32.xlu2 %v9822_v31, %s11292_s10  ;;  %v5114_v25 = vsel %vm1730_vm1, %v4589_v21, 0  ;;  %8243 = vrot.lane.b32.xlu1 %v8232_v41, %s11293_s29 }
 0x5cf   : > { %4389 = vst [vmem:[#allocation1 + $0x3] ss:$9 sm:$0xff] %v4238_v58  ;;  %5123 = vmatpush.bf16.xpose.msra.mxu2 %v5114_v25 }
 0x5d0   : > { %4390 = vst [vmem:[#allocation1 + $0x4] ss:$9 sm:$0xff] %v9878_v11 }
 0x5d6   : > { %4204 = vrot.lane.b32.xlu2 %v9878_v11, %s11292_s10  ;;  %4625 = vrot.lane.b32.xlu1 %v9915_v19, %s11291_s5 }
 0x5d7   : > { %v4391_v3 = vld [vmem:[#allocation1] sm:$0xff] }
 0x5d8   : > { %4392 = vst [vmem:[#allocation1] ss:$9 sm:$0xff] %v4239_v24  ;;  %v4590_v37 = vpack.c.bf16 %v4391_v3, %v4391_v3  ;;  %v4157_v24 = vpack.c.bf16 %v3989_v45, %v3989_v45 }
 0x5d9   : > { %4393 = vst [vmem:[#allocation1 + $0x1] ss:$9 sm:$0xff] %v4240_v32 }
 0x5da   : > { %4394 = vst [vmem:[#allocation1 + $0x2] ss:$9 sm:$0xff] %v4241_v33  ;;  %v5133_v28 = vsel %vm1730_vm1, %v4590_v37, 0  ;;  %v9968_v37 = vadd.f32 %v9912_v60, %v9890_v48 }
 0x5db   : > { %4395 = vst [vmem:[#allocation1 + $0x3] ss:$9 sm:$0xff] %v4242_v6  ;;  %5142 = vmatpush.bf16.xpose.msra.mxu3 %v5133_v28 }
 0x5dc   : > { %4396 = vst [vmem:[#allocation1 + $0x4] ss:$9 sm:$0xff] %v4243_v26 }
 0x5de   : > { %4208 = vrot.lane.b32.xlu2 %v9822_v31, %s11293_s29  ;;  %v4154_v31 = vpack.c.bf16 %v4120_v23, %v4120_v23  ;;  %v4037_v20 = vpop.f32.mrf.mxu0  ;;  %4629 = vrot.lane.b32.xlu1 %v9928_v27, %s11291_s5  ;;  %v9932_v35 = vpop.f32.mrf.mxu1 }
 0x5df   : > { %v9918_v63 = vadd.f32 %v9819_v22, %v4037_v20 }
 0x5e0   : > { %8029 = vmatmul.msk.bf16.vlgmr.msra.gmra.mxu2 %vm1730_vm1, %v4154_v31 }
 0x5e1   : > { %v4246_v61 = vrot.slane %v9918_v63, 1  ;;  %v4247_v38 = vrot.slane %v9918_v63, 2  ;;  %4196 = vrot.lane.b32.xlu0 %v9918_v63, %s11291_s5  ;;  %v4248_v49 = vrot.slane %v9918_v63, 3  ;;  %v4249_v59 = vrot.slane %v9918_v63, 4 }
 0x5e2   : > { %v4250_v30 = vrot.slane %v9918_v63, 5  ;;  %v4251_v17 = vrot.slane %v9918_v63, 6  ;;  %v4252_v47 = vrot.slane %v9918_v63, 7 }
 0x5e3   : > { %v4397_v46 = vld [vmem:[#allocation1] sm:$0xff] }
 0x5e4   : > { %4398 = vst [vmem:[#allocation1] ss:$9 sm:$0xff] %v4244_v7  ;;  %v4591_v40 = vpack.c.bf16 %v4397_v46, %v4397_v46 }
 0x5e5   : > { %4399 = vst [vmem:[#allocation1 + $0x1] ss:$9 sm:$0xff] %v4245_v1 }
 0x5e6   : > { %4400 = vst [vmem:[#allocation1 + $0x2] ss:$9 sm:$0xff] %v9918_v63  ;;  %v4039_v22 = vpop.f32.mrf.mxu0  ;;  %v5152_v14 = vsel %vm1730_vm1, %v4591_v40, 0  ;;  %4637 = vrot.lane.b32.xlu1 %v9941_v10, %s11292_s10  ;;  %v4077_v2 = vpop.f32.mrf.mxu1  ;;  %8223 = vrot.lane.b32.xlu2 %v8232_v41, %s11291_s5 }
 0x5e7   : > { %4401 = vst [vmem:[#allocation1 + $0x3] ss:$9 sm:$0xff] %v4246_v61  ;;  %5161 = vmatpush.bf16.xpose.msra.mxu0 %v5152_v14  ;;  %v9981_v61 = vadd.f32 %v9912_v60, %v9932_v35 }
 0x5e8   : > { %4402 = vst [vmem:[#allocation1 + $0x4] ss:$9 sm:$0xff] %v4247_v38 }
 0x5e9   : > { %4202 = vrot.lane.b32.xlu0 %v9863_v16, %s11292_s10  ;;  %v3987_v16 = vadd.f32 %v9842_v44, %v3986_v13 }
 0x5eb   : > { %v4155_v43 = vpack.c.bf16 %v3987_v16, %v3987_v16  ;;  %v4121_v5 = vrot.slane %v3987_v16, 4  ;;  %v8237_v44 = vpack.i.bf16 %v3987_v16, %v3989_v45 }
 0x5ed   : > { %8030 = vmatmul.msk.bf16.vlgmr.msra.gmra.mxu3 %vm1730_vm1, %v4155_v43  ;;  %v4156_v36 = vpack.c.bf16 %v4121_v5, %v4121_v5 }
 0x5ee   : > { %4639 = vrot.lane.b32.xlu1 %v9928_v27, %s11292_s10  ;;  %4214 = vrot.lane.b32.xlu2 %v9878_v11, %s11293_s29  ;;  %v4122_v11 = vrot.slane %v3989_v45, 4 }
 0x5ef   : > { %v4403_v34 = vld [vmem:[#allocation1] sm:$0xff]  ;;  %8031 = vmatmul.msk.bf16.vlgmr.msra.gmra.mxu0 %vm1730_vm1, %v4156_v36 }
 0x5f0   : > { %4404 = vst [vmem:[#allocation1] ss:$9 sm:$0xff] %v4248_v49  ;;  %v4592_v42 = vpack.c.bf16 %v4403_v34, %v4403_v34  ;;  %v4158_v33 = vpack.c.bf16 %v4122_v11, %v4122_v11 }
 0x5f1   : > { %4405 = vst [vmem:[#allocation1 + $0x1] ss:$9 sm:$0xff] %v4249_v59  ;;  %4206 = vrot.lane.b32.xlu0 %v9918_v63, %s11292_s10 }
 0x5f2   : > { %4406 = vst [vmem:[#allocation1 + $0x2] ss:$9 sm:$0xff] %v4250_v30  ;;  %v5171_v39 = vsel %vm1730_vm1, %v4592_v42, 0 }
 0x5f3   : > { %4407 = vst [vmem:[#allocation1 + $0x3] ss:$9 sm:$0xff] %v4251_v17  ;;  %5180 = vmatpush.bf16.xpose.msra.mxu1 %v5171_v39 }
 0x5f4   : > { %4408 = vst [vmem:[#allocation1 + $0x4] ss:$9 sm:$0xff] %v4252_v47 }
 0x5f6   : > { %8238 = vrot.lane.b32.xlu2 %v8237_v44, %s11292_s10 }
 0x5f9   : > { %4210 = vrot.lane.b32.xlu0 %v9832_v15, %s11293_s29 }
 0x5fa   : > { %8032 = vmatmul.msk.bf16.vlgmr.msra.gmra.mxu1 %vm1730_vm1, %v4157_v24 }
 0x5fb   : > { %v4409_v29 = vld [vmem:[#allocation1] sm:$0xff] }
 0x5fc   : > { %v4593_v32 = vpack.c.bf16 %v4409_v29, %v4409_v29 }
 0x5fd   : > { %v4191_v26 = vpop.permute.xlu2 %4190 }
 0x5fe   : > { %v5190_v15 = vsel %vm1730_vm1, %v4593_v32, 0  ;;  %v4260_v25 = vrot.slane %v4191_v26, 1  ;;  %4623 = vrot.lane.b32.xlu2 %v9968_v37, %s11291_s5  ;;  %v4261_v7 = vrot.slane %v4191_v26, 2  ;;  %v4262_v48 = vrot.slane %v4191_v26, 3 }
 0x5ff   : > { %5199 = vmatpush.bf16.xpose.msrb.mxu2 %v5190_v15  ;;  %v4263_v46 = vrot.slane %v4191_v26, 4  ;;  %v4264_v9 = vrot.slane %v4191_v26, 5  ;;  %v4265_v20 = vrot.slane %v4191_v26, 6 }
 0x601   : > { %8228 = vrot.lane.b32.xlu0 %v8237_v44, %s11291_s5 }
 0x606   : > { %8033 = vmatmul.msk.bf16.vlgmr.msrb.gmra.mxu2 %vm1730_vm1, %v4158_v33  ;;  %4635 = vrot.lane.b32.xlu2 %v9915_v19, %s11292_s10 }
 0x609   : > { %8248 = vrot.lane.b32.xlu0 %v8237_v44, %s11293_s29 }
 0x60d   : > { %v4189_v62 = vpop.permute.xlu0 %4188 }
 0x60e   : > { %v4253_v0 = vrot.slane %v4189_v62, 1  ;;  %4410 = vst [vmem:[#allocation1] ss:$9 sm:$0xff] %v4189_v62  ;;  %v4254_v18 = vrot.slane %v4189_v62, 2  ;;  %v4255_v58 = vrot.slane %v4189_v62, 3  ;;  %v4256_v3 = vrot.slane %v4189_v62, 4  ;;  %4641 = vrot.lane.b32.xlu2 %v9981_v61, %s11292_s10 }
 0x60f   : > { %v4257_v6 = vrot.slane %v4189_v62, 5  ;;  %v4258_v41 = vrot.slane %v4189_v62, 6  ;;  %v4259_v4 = vrot.slane %v4189_v62, 7 }
 0x610   : > { %4411 = vst [vmem:[#allocation1 + $0x1] ss:$9 sm:$0xff] %v4253_v0 }
 0x611   : > { %4412 = vst [vmem:[#allocation1 + $0x2] ss:$9 sm:$0xff] %v4254_v18  ;;  %4216 = vrot.lane.b32.xlu0 %v9918_v63, %s11293_s29  ;;  %v4266_v63 = vrot.slane %v4191_v26, 7 }
 0x612   : > { %4413 = vst [vmem:[#allocation1 + $0x3] ss:$9 sm:$0xff] %v4255_v58 }
 0x613   : > { %4414 = vst [vmem:[#allocation1 + $0x4] ss:$9 sm:$0xff] %v4256_v3 }
 0x619   : > { %4627 = vrot.lane.b32.xlu0 %v9941_v10, %s11291_s5 }
 0x61a   : > { %v4415_v21 = vld [vmem:[#allocation1] sm:$0xff] }
 0x61b   : > { %4416 = vst [vmem:[#allocation1] ss:$9 sm:$0xff] %v4257_v6  ;;  %v4594_v23 = vpack.c.bf16 %v4415_v21, %v4415_v21 }
 0x61c   : > { %4417 = vst [vmem:[#allocation1 + $0x1] ss:$9 sm:$0xff] %v4258_v41 }
 0x61d   : > { %4418 = vst [vmem:[#allocation1 + $0x2] ss:$9 sm:$0xff] %v4259_v4  ;;  %v5209_v28 = vsel %vm1730_vm1, %v4594_v23, 0 }
 0x61e   : > { %4419 = vst [vmem:[#allocation1 + $0x3] ss:$9 sm:$0xff] %v4191_v26  ;;  %5218 = vmatpush.bf16.xpose.msrb.mxu3 %v5209_v28 }
 0x61f   : > { %4420 = vst [vmem:[#allocation1 + $0x4] ss:$9 sm:$0xff] %v4260_v25 }
 0x620   : > { %v4195_v60 = vpop.permute.xlu2 %4194 }
 0x621   : > { %4633 = vrot.lane.b32.xlu0 %v9968_v37, %s11292_s10  ;;  %v4274_v8 = vrot.slane %v4195_v60, 1  ;;  %v4275_v62 = vrot.slane %v4195_v60, 2  ;;  %v4277_v0 = vrot.slane %v4195_v60, 4  ;;  %v4276_v36 = vrot.slane %v4195_v60, 3  ;;  %s11295_s10 = sshll.u32 %s11297_s28, 2 }
 0x622   : > { %v4278_v32 = vrot.slane %v4195_v60, 5  ;;  %v4279_v33 = vrot.slane %v4195_v60, 6  ;;  %v4280_v6 = vrot.slane %v4195_v60, 7 }
 0x626   : > { %v4421_v1 = vld [vmem:[#allocation1] sm:$0xff] }
 0x627   : > { %4422 = vst [vmem:[#allocation1] ss:$9 sm:$0xff] %v4261_v7  ;;  %v4595_v31 = vpack.c.bf16 %v4421_v1, %v4421_v1 }
 0x628   : > { %4423 = vst [vmem:[#allocation1 + $0x1] ss:$9 sm:$0xff] %v4262_v48  ;;  %v9994_v47 = vpop.permute.xlu2 %4198 }
 0x629   : > { %4424 = vst [vmem:[#allocation1 + $0x2] ss:$9 sm:$0xff] %v4263_v46  ;;  %v5228_v12 = vsel %vm1730_vm1, %v4595_v31, 0  ;;  %4643 = vrot.lane.b32.xlu0 %v9968_v37, %s11293_s29 }
 0x62a   : > { %4425 = vst [vmem:[#allocation1 + $0x3] ss:$9 sm:$0xff] %v4264_v9  ;;  %5237 = vmatpush.bf16.xpose.msrb.mxu0 %v5228_v12 }
 0x62b   : > { %4426 = vst [vmem:[#allocation1 + $0x4] ss:$9 sm:$0xff] %v4265_v20 }
 0x630   : > { %v4193_v38 = vpop.permute.xlu0 %4192  ;;  %v10001_v5 = vpop.permute.xlu2 %4204 }
 0x631   : > { %v4267_v59 = vrot.slane %v4193_v38, 1  ;;  %v4268_v35 = vrot.slane %v4193_v38, 2  ;;  %v4269_v40 = vrot.slane %v4193_v38, 3  ;;  %v4270_v17 = vrot.slane %v4193_v38, 4  ;;  %4645 = vrot.lane.b32.xlu0 %v9915_v19, %s11293_s29 }
 0x632   : > { %v4427_v22 = vld [vmem:[#allocation1] sm:$0xff]  ;;  %v4271_v16 = vrot.slane %v4193_v38, 5  ;;  %v4272_v43 = vrot.slane %v4193_v38, 6  ;;  %v4273_v42 = vrot.slane %v4193_v38, 7 }
 0x633   : > { %4428 = vst [vmem:[#allocation1] ss:$9 sm:$0xff] %v4266_v63  ;;  %v4596_v49 = vpack.c.bf16 %v4427_v22, %v4427_v22 }
 0x634   : > { %4429 = vst [vmem:[#allocation1 + $0x1] ss:$9 sm:$0xff] %v4193_v38 }
 0x635   : > { %v5247_v34 = vsel %vm1730_vm1, %v4596_v49, 0  ;;  %v9990_v30 = vpop.f32.mrf.mxu2  ;;  %4430 = vst [vmem:[#allocation1 + $0x2] ss:$9 sm:$0xff] %v4267_v59 }
 0x636   : > { %5256 = vmatpush.bf16.xpose.msrb.mxu1 %v5247_v34  ;;  %4431 = vst [vmem:[#allocation1 + $0x3] ss:$9 sm:$0xff] %v4268_v35  ;;  %v5662_v15 = vsel %vm5661_vm6, %v9990_v30, -inf }
 0x637   : > { %4432 = vst [vmem:[#allocation1 + $0x4] ss:$9 sm:$0xff] %v4269_v40  ;;  %5663 = vmax.xlane.f32.xlu2 %v5662_v15 }
 0x638   : > { %v10010_v11 = vpop.permute.xlu2 %4208 }
 0x639   : > { %4631 = vrot.lane.b32.xlu0 %v9981_v61, %s11291_s5 }
 0x63d   : > { %v5070_v13 = vpop.f32.mrf.mxu2 }
 0x63e   : > { %v4433_v14 = vld [vmem:[#allocation1] sm:$0xff] }
 0x63f   : > { %4434 = vst [vmem:[#allocation1] ss:$9 sm:$0xff] %v4270_v17  ;;  %v4597_v2 = vpack.c.bf16 %v4433_v14, %v4433_v14  ;;  %v4288_v17 = vrot.slane %v9994_v47, 1  ;;  %v4289_v14 = vrot.slane %v9994_v47, 2 }
 0x640   : > { %4435 = vst [vmem:[#allocation1 + $0x1] ss:$9 sm:$0xff] %v4271_v16  ;;  %v8224_v21 = vpop.permute.xlu2 %8223 }
 0x641   : > { %4436 = vst [vmem:[#allocation1 + $0x2] ss:$9 sm:$0xff] %v4272_v43  ;;  %v5266_v39 = vsel %vm1730_vm1, %v4597_v2, 0  ;;  %v8226_v4 = vunpack.i.h.bf16 %v8224_v21  ;;  %v8225_v23 = vunpack.i.l.bf16 %v8224_v21  ;;  %v4290_v43 = vrot.slane %v9994_v47, 3 }
 0x642   : > { %4437 = vst [vmem:[#allocation1 + $0x3] ss:$9 sm:$0xff] %v4273_v42  ;;  %5275 = vmatpush.bf16.xpose.msra.mxu2 %v5266_v39  ;;  %v4291_v2 = vrot.slane %v9994_v47, 4 }
 0x643   : > { %4438 = vst [vmem:[#allocation1 + $0x4] ss:$9 sm:$0xff] %v4195_v60  ;;  %v4123_v25 = vrot.slane %v8226_v4, 4  ;;  %v4159_v28 = vpack.c.bf16 %v8226_v4, %v8226_v4  ;;  %v4124_v7 = vrot.slane %v8225_v23, 4  ;;  %v4161_v48 = vpack.c.bf16 %v8225_v23, %v8225_v23 }
 0x645   : > { %v9999_v29 = vpop.f32.mrf.mxu2  ;;  %v4160_v1 = vpack.c.bf16 %v4123_v25, %v4123_v25  ;;  %v4162_v46 = vpack.c.bf16 %v4124_v7, %v4124_v7  ;;  %8034 = vmatmul.msk.bf16.vlgmr.msrb.gmra.mxu3 %vm1730_vm1, %v4159_v28  ;;  %8036 = vmatmul.msk.bf16.vlgmr.msrb.gmra.mxu1 %vm1730_vm1, %v4161_v48 }
 0x646   : > { %v5665_v39 = vsel %vm5661_vm6, %v9999_v29, -inf }
 0x647   : > { %8035 = vmatmul.msk.bf16.vlgmr.msrb.gmra.mxu0 %vm1730_vm1, %v4160_v1 }
 0x649   : > { %8037 = vmatmul.msk.bf16.vlgmr.msra.gmra.mxu2 %vm1730_vm1, %v4162_v46 }
 0x64a   : > { %v4439_v45 = vld [vmem:[#allocation1] sm:$0xff] }
 0x64b   : > { %4440 = vst [vmem:[#allocation1] ss:$9 sm:$0xff] %v4274_v8  ;;  %v4598_v18 = vpack.c.bf16 %v4439_v45, %v4439_v45 }
 0x64c   : > { %4441 = vst [vmem:[#allocation1 + $0x1] ss:$9 sm:$0xff] %v4275_v62 }
 0x64d   : > { %v10005_v58 = vpop.f32.mrf.mxu3  ;;  %v5089_v24 = vpop.f32.mrf.mxu2  ;;  %4443 = vst [vmem:[#allocation1 + $0x3] ss:$9 sm:$0xff] %v4277_v0  ;;  %v5285_v3 = vsel %vm1730_vm1, %v4598_v18, 0  ;;  %v4292_v18 = vrot.slane %v9994_v47, 5 }
 0x64e   : > { %4442 = vst [vmem:[#allocation1 + $0x2] ss:$9 sm:$0xff] %v4276_v36  ;;  %5294 = vmatpush.bf16.xpose.msra.mxu3 %v5285_v3  ;;  %v5668_v41 = vsel %vm5661_vm6, %v10005_v58, -inf  ;;  %v4201_v0 = vpop.permute.xlu1 %4200 }
 0x64f   : > { %4444 = vst [vmem:[#allocation1 + $0x4] ss:$9 sm:$0xff] %v4278_v32  ;;  %5669 = vmax.xlane.f32.xlu2 %v5668_v41  ;;  %v4294_v32 = vrot.slane %v9994_v47, 7  ;;  %v4295_v15 = vrot.slane %v4201_v0, 1  ;;  %v4297_v41 = vrot.slane %v4201_v0, 3  ;;  %v4298_v4 = vrot.slane %v4201_v0, 4 }
 0x650   : > { %v4299_v23 = vrot.slane %v4201_v0, 5  ;;  %v4300_v25 = vrot.slane %v4201_v0, 6  ;;  %v4301_v48 = vrot.slane %v4201_v0, 7 }
 0x653   : > { %v4197_v31 = vpop.permute.xlu0 %4196 }
 0x654   : > { %v4281_v9 = vrot.slane %v4197_v31, 1  ;;  %v4282_v20 = vrot.slane %v4197_v31, 2  ;;  %v4283_v63 = vrot.slane %v4197_v31, 3  ;;  %v4284_v22 = vrot.slane %v4197_v31, 4 }
 0x655   : > { %v5108_v44 = vpop.f32.mrf.mxu3  ;;  %v4285_v59 = vrot.slane %v4197_v31, 5  ;;  %v4286_v34 = vrot.slane %v4197_v31, 6  ;;  %v4287_v60 = vrot.slane %v4197_v31, 7 }
 0x656   : > { %v4445_v26 = vld [vmem:[#allocation1] sm:$0xff]  ;;  %v4293_v44 = vrot.slane %v9994_v47, 6 }
 0x657   : > { %4446 = vst [vmem:[#allocation1] ss:$9 sm:$0xff] %v4279_v33  ;;  %v4599_v12 = vpack.c.bf16 %v4445_v26, %v4445_v26  ;;  %v4296_v26 = vrot.slane %v4201_v0, 2 }
 0x658   : > { %4447 = vst [vmem:[#allocation1 + $0x1] ss:$9 sm:$0xff] %v4280_v6 }
 0x659   : > { %4448 = vst [vmem:[#allocation1 + $0x2] ss:$9 sm:$0xff] %v4197_v31  ;;  %v5304_v38 = vsel %vm1730_vm1, %v4599_v12, 0 }
 0x65a   : > { %4449 = vst [vmem:[#allocation1 + $0x3] ss:$9 sm:$0xff] %v4281_v9  ;;  %5313 = vmatpush.bf16.xpose.msra.mxu0 %v5304_v38 }
 0x65b   : > { %4450 = vst [vmem:[#allocation1 + $0x4] ss:$9 sm:$0xff] %v4282_v20  ;;  %v10031_v45 = vpop.permute.xlu0 %4202 }
 0x65c   : > { %v4302_v9 = vrot.slane %v10031_v45, 1 }
 0x662   : > { %v4451_v49 = vld [vmem:[#allocation1] sm:$0xff] }
 0x663   : > { %4452 = vst [vmem:[#allocation1] ss:$9 sm:$0xff] %v4283_v63  ;;  %v10019_v35 = vpop.f32.mrf.mxu2  ;;  %v4600_v13 = vpack.c.bf16 %v4451_v49, %v4451_v49  ;;  %5666 = vmax.xlane.f32.xlu0 %v5665_v39  ;;  %v10039_v33 = vpop.permute.xlu0 %4206  ;;  %v4303_v63 = vrot.slane %v10031_v45, 2  ;;  %v4304_v49 = vrot.slane %v10031_v45, 3 }
 0x664   : > { %4453 = vst [vmem:[#allocation1 + $0x1] ss:$9 sm:$0xff] %v4284_v22  ;;  %v5671_v40 = vsel %vm5661_vm6, %v10019_v35, -inf }
 0x665   : > { %4454 = vst [vmem:[#allocation1 + $0x2] ss:$9 sm:$0xff] %v4285_v59  ;;  %5672 = vmax.xlane.f32.xlu1 %v5671_v40  ;;  %v5323_v42 = vsel %vm1730_vm1, %v4600_v13, 0 }
 0x666   : > { %4455 = vst [vmem:[#allocation1 + $0x3] ss:$9 sm:$0xff] %v4286_v34  ;;  %5332 = vmatpush.bf16.xpose.msra.mxu1 %v5323_v42 }
 0x667   : > { %4456 = vst [vmem:[#allocation1 + $0x4] ss:$9 sm:$0xff] %v4287_v60  ;;  %v10058_v60 = vpop.permute.xlu1 %4212 }
 0x66b   : > { %v5127_v8 = vpop.f32.mrf.mxu2  ;;  %v10041_v28 = vpop.permute.xlu0 %4210 }
 0x66c   : > { %v10045_v46 = vpop.f32.mrf.mxu0 }
 0x66d   : > { %v5677_v12 = vsel %vm5661_vm6, %v10045_v46, -inf }
 0x66e   : > { %v4457_v16 = vld [vmem:[#allocation1] sm:$0xff] }
 0x66f   : > { %4458 = vst [vmem:[#allocation1] ss:$9 sm:$0xff] %v9994_v47  ;;  %v4601_v62 = vpack.c.bf16 %v4457_v16, %v4457_v16 }
 0x670   : > { %4459 = vst [vmem:[#allocation1 + $0x1] ss:$9 sm:$0xff] %v4288_v17  ;;  %v10034_v36 = vpop.f32.mrf.mxu3 }
 0x671   : > { %4460 = vst [vmem:[#allocation1 + $0x2] ss:$9 sm:$0xff] %v4289_v14  ;;  %v5342_v24 = vsel %vm1730_vm1, %v4601_v62, 0  ;;  %v5674_v47 = vsel %vm5661_vm6, %v10034_v36, -inf  ;;  %v4305_v62 = vrot.slane %v10031_v45, 4 }
 0x672   : > { %4461 = vst [vmem:[#allocation1 + $0x3] ss:$9 sm:$0xff] %v4290_v43  ;;  %5351 = vmatpush.bf16.xpose.msrb.mxu2 %v5342_v24  ;;  %5675 = vmax.xlane.f32.xlu0 %v5674_v47  ;;  %v4307_v24 = vrot.slane %v10031_v45, 6 }
 0x673   : > { %4462 = vst [vmem:[#allocation1 + $0x4] ss:$9 sm:$0xff] %v4291_v2  ;;  %v8229_v38 = vpop.permute.xlu0 %8228 }
 0x674   : > { %v8231_v59 = vunpack.i.h.bf16 %v8229_v38  ;;  %v8230_v34 = vunpack.i.l.bf16 %v8229_v38  ;;  %v5165_v39 = vpop.f32.mrf.mxu0  ;;  %v4315_v38 = vrot.slane %v10001_v5, 7 }
 0x676   : > { %v4125_v40 = vrot.slane %v8231_v59, 4  ;;  %v4163_v13 = vpack.c.bf16 %v8231_v59, %v8231_v59  ;;  %v4126_v17 = vrot.slane %v8230_v34, 4  ;;  %v4165_v16 = vpack.c.bf16 %v8230_v34, %v8230_v34 }
 0x677   : > { %v10049_v20 = vpop.f32.mrf.mxu1  ;;  %v4317_v59 = vrot.slane %v10039_v33, 2  ;;  %v4318_v34 = vrot.slane %v10039_v33, 3 }
 0x678   : > { %v5146_v6 = vpop.f32.mrf.mxu3  ;;  %v5680_v22 = vsel %vm5661_vm6, %v10049_v20, -inf  ;;  %v4164_v43 = vpack.c.bf16 %v4125_v40, %v4125_v40  ;;  %v4166_v2 = vpack.c.bf16 %v4126_v17, %v4126_v17  ;;  %8038 = vmatmul.msk.bf16.vlgmr.msra.gmra.mxu3 %vm1730_vm1, %v4163_v13  ;;  %8040 = vmatmul.msk.bf16.vlgmr.msra.gmra.mxu1 %vm1730_vm1, %v4165_v16  ;;  %v4319_v40 = vrot.slane %v10039_v33, 4 }
 0x679   : > { %5681 = vmax.xlane.f32.xlu2 %v5680_v22  ;;  %v4321_v17 = vrot.slane %v10039_v33, 6  ;;  %v4322_v16 = vrot.slane %v10039_v33, 7 }
 0x67a   : > { %v4463_v3 = vld [vmem:[#allocation1] sm:$0xff]  ;;  %5678 = vmax.xlane.f32.xlu0 %v5677_v12  ;;  %8041 = vmatmul.msk.bf16.vlgmr.msrb.gmra.mxu2 %vm1730_vm1, %v4166_v2  ;;  %v4313_v12 = vrot.slane %v10001_v5, 5 }
 0x67b   : > { %4464 = vst [vmem:[#allocation1] ss:$9 sm:$0xff] %v4292_v18  ;;  %v4602_v7 = vpack.c.bf16 %v4463_v3, %v4463_v3  ;;  %8039 = vmatmul.msk.bf16.vlgmr.msra.gmra.mxu0 %vm1730_vm1, %v4164_v43 }
 0x67c   : > { %4466 = vst [vmem:[#allocation1 + $0x2] ss:$9 sm:$0xff] %v4294_v32  ;;  %v4308_v32 = vrot.slane %v10031_v45, 7 }
 0x67d   : > { %4467 = vst [vmem:[#allocation1 + $0x3] ss:$9 sm:$0xff] %v4201_v0  ;;  %v5361_v31 = vsel %vm1730_vm1, %v4602_v7, 0  ;;  %v4306_v0 = vrot.slane %v10031_v45, 5  ;;  %v4310_v7 = vrot.slane %v10001_v5, 2 }
 0x67e   : > { %4468 = vst [vmem:[#allocation1 + $0x4] ss:$9 sm:$0xff] %v4295_v15  ;;  %5370 = vmatpush.bf16.xpose.msrb.mxu3 %v5361_v31  ;;  %v8234_v15 = vpop.permute.xlu1 %8233  ;;  %v4312_v31 = vrot.slane %v10001_v5, 4 }
 0x67f   : > { %4465 = vst [vmem:[#allocation1 + $0x1] ss:$9 sm:$0xff] %v4293_v44  ;;  %v5184_v8 = vpop.f32.mrf.mxu1  ;;  %v8236_v6 = vunpack.i.h.bf16 %v8234_v15 }
 0x680   : > { %v4324_v8 = vrot.slane %v10010_v11, 2 }
 0x686   : > { %v4469_v21 = vld [vmem:[#allocation1] sm:$0xff] }
 0x687   : > { %4470 = vst [vmem:[#allocation1] ss:$9 sm:$0xff] %v4296_v26  ;;  %v4603_v14 = vpack.c.bf16 %v4469_v21, %v4469_v21  ;;  %v8235_v21 = vunpack.i.l.bf16 %v8234_v15  ;;  %v4330_v15 = vrot.slane %v10041_v28, 1 }
 0x688   : > { %4471 = vst [vmem:[#allocation1 + $0x1] ss:$9 sm:$0xff] %v4297_v41 }
 0x689   : > { %4472 = vst [vmem:[#allocation1 + $0x2] ss:$9 sm:$0xff] %v4298_v4  ;;  %v5380_v42 = vsel %vm1730_vm1, %v4603_v14, 0  ;;  %v10069_v44 = vpop.f32.mrf.mxu2  ;;  %v4127_v4 = vrot.slane %v8236_v6, 4  ;;  %v4128_v2 = vrot.slane %v8235_v21, 4 }
 0x68a   : > { %4473 = vst [vmem:[#allocation1 + $0x3] ss:$9 sm:$0xff] %v4299_v23  ;;  %5389 = vmatpush.bf16.xpose.msrb.mxu0 %v5380_v42  ;;  %v5683_v41 = vsel %vm5661_vm6, %v10069_v44, -inf  ;;  %v4169_v23 = vpack.c.bf16 %v8235_v21, %v8235_v21  ;;  %v4323_v42 = vrot.slane %v10010_v11, 1 }
 0x68b   : > { %4474 = vst [vmem:[#allocation1 + $0x4] ss:$9 sm:$0xff] %v4300_v25  ;;  %5684 = vmax.xlane.f32.xlu2 %v5683_v41  ;;  %v4309_v25 = vrot.slane %v10001_v5, 1  ;;  %v4332_v41 = vrot.slane %v10041_v28, 3 }
 0x691   : > { %v5203_v47 = vpop.f32.mrf.mxu2 }
 0x692   : > { %v4475_v1 = vld [vmem:[#allocation1] sm:$0xff] }
 0x693   : > { %4476 = vst [vmem:[#allocation1] ss:$9 sm:$0xff] %v4301_v48  ;;  %v4604_v3 = vpack.c.bf16 %v4475_v1, %v4475_v1  ;;  %v4168_v48 = vpack.c.bf16 %v4127_v4, %v4127_v4  ;;  %v4333_v4 = vrot.slane %v10041_v28, 4 }
 0x694   : > { %4477 = vst [vmem:[#allocation1 + $0x1] ss:$9 sm:$0xff] %v10031_v45  ;;  %v4167_v45 = vpack.c.bf16 %v8236_v6, %v8236_v6  ;;  %v10114_v6 = vpop.permute.xlu2 %4214 }
 0x695   : > { %4478 = vst [vmem:[#allocation1 + $0x2] ss:$9 sm:$0xff] %v4302_v9  ;;  %v5399_v26 = vsel %vm1730_vm1, %v4604_v3, 0  ;;  %v4311_v9 = vrot.slane %v10001_v5, 3  ;;  %8043 = vmatmul.msk.bf16.vlgmr.msrb.gmra.mxu0 %vm1730_vm1, %v4168_v48  ;;  %v4329_v3 = vrot.slane %v10010_v11, 7  ;;  %v10127_v48 = vpop.permute.xlu0 %8248 }
 0x696   : > { %4479 = vst [vmem:[#allocation1 + $0x3] ss:$9 sm:$0xff] %v4303_v63  ;;  %5408 = vmatpush.bf16.xpose.msrb.mxu1 %v5399_v26  ;;  %8042 = vmatmul.msk.bf16.vlgmr.msrb.gmra.mxu3 %vm1730_vm1, %v4167_v45  ;;  %v4314_v63 = vrot.slane %v10001_v5, 6  ;;  %v4331_v26 = vrot.slane %v10041_v28, 2  ;;  %v4334_v45 = vrot.slane %v10041_v28, 5 }
 0x697   : > { %4480 = vst [vmem:[#allocation1 + $0x4] ss:$9 sm:$0xff] %v4304_v49  ;;  %v4316_v49 = vrot.slane %v10039_v33, 1 }
 0x69d   : > { %8044 = vmatmul.msk.bf16.vlgmr.msrb.gmra.mxu1 %vm1730_vm1, %v4169_v23  ;;  %v4335_v23 = vrot.slane %v10041_v28, 6 }
 0x69e   : > { %v4481_v18 = vld [vmem:[#allocation1] sm:$0xff] }
 0x69f   : > { %4482 = vst [vmem:[#allocation1] ss:$9 sm:$0xff] %v4305_v62  ;;  %v4605_v14 = vpack.c.bf16 %v4481_v18, %v4481_v18  ;;  %v4170_v62 = vpack.c.bf16 %v4128_v2, %v4128_v2  ;;  %v4327_v18 = vrot.slane %v10010_v11, 5 }
 0x6a0   : > { %4483 = vst [vmem:[#allocation1 + $0x1] ss:$9 sm:$0xff] %v4306_v0  ;;  %v4326_v0 = vrot.slane %v10010_v11, 4 }
 0x6a1   : > { %4484 = vst [vmem:[#allocation1 + $0x2] ss:$9 sm:$0xff] %v4307_v24  ;;  %v5418_v43 = vsel %vm1730_vm1, %v4605_v14, 0  ;;  %v4328_v24 = vrot.slane %v10010_v11, 6 }
 0x6a2   : > { %4485 = vst [vmem:[#allocation1 + $0x3] ss:$9 sm:$0xff] %v4308_v32  ;;  %5427 = vmatpush.bf16.xpose.msra.mxu2 %v5418_v43  ;;  %v4341_v43 = vrot.slane %v10058_v60, 5 }
 0x6a3   : > { %4486 = vst [vmem:[#allocation1 + $0x4] ss:$9 sm:$0xff] %v10001_v5  ;;  %v4320_v5 = vrot.slane %v10039_v33, 5 }
 0x6a9   : > { %8045 = vmatmul.msk.bf16.vlgmr.msra.gmra.mxu2 %vm1730_vm1, %v4170_v62  ;;  %v4343_v62 = vrot.slane %v10058_v60, 7 }
 0x6aa   : > { %v10078_v1 = vld [vmem:[#allocation1] sm:$0xff] }
 0x6ab   : > { %4488 = vst [vmem:[#allocation1] ss:$9 sm:$0xff] %v4309_v25  ;;  %v4606_v25 = vpack.c.bf16 %v10078_v1, %v10078_v1  ;;  %v4338_v1 = vrot.slane %v10058_v60, 2 }
 0x6ac   : > { %4489 = vst [vmem:[#allocation1 + $0x1] ss:$9 sm:$0xff] %v4310_v7 }
 0x6ad   : > { %4491 = vst [vmem:[#allocation1 + $0x3] ss:$9 sm:$0xff] %v4312_v31  ;;  %v5437_v47 = vsel %vm1730_vm1, %v4606_v25, 0  ;;  %v4336_v31 = vrot.slane %v10041_v28, 7 }
 0x6ae   : > { %4490 = vst [vmem:[#allocation1 + $0x2] ss:$9 sm:$0xff] %v4311_v9  ;;  %5446 = vmatpush.bf16.xpose.msra.mxu3 %v5437_v47  ;;  %v8244_v47 = vpop.permute.xlu1 %8243 }
 0x6af   : > { %4492 = vst [vmem:[#allocation1 + $0x4] ss:$9 sm:$0xff] %v4313_v12 }
 0x6b6   : > { %v10087_v22 = vld [vmem:[#allocation1] sm:$0xff] }
 0x6b7   : > { %4494 = vst [vmem:[#allocation1] ss:$9 sm:$0xff] %v4314_v63  ;;  %v4337_v63 = vrot.slane %v10058_v60, 1 }
 0x6b8   : > { %4495 = vst [vmem:[#allocation1 + $0x1] ss:$9 sm:$0xff] %v4315_v38 }
 0x6b9   : > { %4496 = vst [vmem:[#allocation1 + $0x2] ss:$9 sm:$0xff] %v10039_v33  ;;  %v4325_v33 = vrot.slane %v10010_v11, 3 }
 0x6ba   : > { %4497 = vst [vmem:[#allocation1 + $0x3] ss:$9 sm:$0xff] %v4316_v49  ;;  %v4607_v49 = vpack.c.bf16 %v10087_v22, %v10087_v22 }
 0x6bb   : > { %4498 = vst [vmem:[#allocation1 + $0x4] ss:$9 sm:$0xff] %v4317_v59  ;;  %v4339_v59 = vrot.slane %v10058_v60, 3 }
 0x6c2   : > { %v10094_v13 = vld [vmem:[#allocation1] sm:$0xff] }
 0x6c3   : > { %4500 = vst [vmem:[#allocation1] ss:$9 sm:$0xff] %v4318_v34  ;;  %v4608_v22 = vpack.c.bf16 %v10094_v13, %v10094_v13 }
 0x6c4   : > { %4501 = vst [vmem:[#allocation1 + $0x1] ss:$9 sm:$0xff] %v4319_v40  ;;  %v10142_v40 = vpop.permute.xlu0 %4216 }
 0x6c5   : > { %4502 = vst [vmem:[#allocation1 + $0x2] ss:$9 sm:$0xff] %v4320_v5  ;;  %v5475_v14 = vsel %vm1730_vm1, %v4608_v22, 0 }
 0x6c6   : > { %4503 = vst [vmem:[#allocation1 + $0x3] ss:$9 sm:$0xff] %v4321_v17  ;;  %5484 = vmatpush.bf16.xpose.msra.mxu1 %v5475_v14 }
 0x6c7   : > { %4504 = vst [vmem:[#allocation1 + $0x4] ss:$9 sm:$0xff] %v4322_v16  ;;  %v4340_v16 = vrot.slane %v10058_v60, 4 }
 0x6ce   : > { %v10101_v39 = vld [vmem:[#allocation1] sm:$0xff] }
 0x6cf   : > { %4506 = vst [vmem:[#allocation1] ss:$9 sm:$0xff] %v10010_v11  ;;  %v8239_v11 = vpop.permute.xlu2 %8238 }
 0x6d0   : > { %4507 = vst [vmem:[#allocation1 + $0x1] ss:$9 sm:$0xff] %v4323_v42  ;;  %v8241_v7 = vunpack.i.h.bf16 %v8239_v11  ;;  %v4342_v42 = vrot.slane %v10058_v60, 6 }
 0x6d1   : > { %4508 = vst [vmem:[#allocation1 + $0x2] ss:$9 sm:$0xff] %v4324_v8  ;;  %v8240_v8 = vunpack.i.l.bf16 %v8239_v11  ;;  %v4347_v11 = vrot.slane %v10114_v6, 4 }
 0x6d2   : > { %4510 = vst [vmem:[#allocation1 + $0x4] ss:$9 sm:$0xff] %v4326_v0  ;;  %v4171_v38 = vpack.c.bf16 %v8241_v7, %v8241_v7  ;;  %v4129_v34 = vrot.slane %v8241_v7, 4  ;;  %v10157_v0 = vpop.permute.xlu0 %4627 }
 0x6d3   : > { %4509 = vst [vmem:[#allocation1 + $0x3] ss:$9 sm:$0xff] %v4325_v33  ;;  %v4173_v13 = vpack.c.bf16 %v8240_v8, %v8240_v8  ;;  %v4609_v33 = vpack.c.bf16 %v10101_v39, %v10101_v39 }
 0x6d4   : > { %8046 = vmatmul.msk.bf16.vlgmr.msra.gmra.mxu3 %vm1730_vm1, %v4171_v38  ;;  %v4172_v5 = vpack.c.bf16 %v4129_v34, %v4129_v34 }
 0x6d5   : > { %8048 = vmatmul.msk.bf16.vlgmr.msra.gmra.mxu1 %vm1730_vm1, %v4173_v13  ;;  %v8245_v13 = vunpack.i.l.bf16 %v8244_v47 }
 0x6d7   : > { %v10130_v9 = vpop.permute.xlu2 %4623 }
 0x6da   : > { %v10110_v32 = vld [vmem:[#allocation1] sm:$0xff] }
 0x6db   : > { %4512 = vst [vmem:[#allocation1] ss:$9 sm:$0xff] %v4327_v18  ;;  %v5494_v18 = vsel %vm1730_vm1, %v4609_v33, 0  ;;  %v4610_v39 = vpack.c.bf16 %v10110_v32, %v10110_v32 }
 0x6dc   : > { %4513 = vst [vmem:[#allocation1 + $0x1] ss:$9 sm:$0xff] %v4328_v24  ;;  %5503 = vmatpush.bf16.xpose.msrb.mxu2 %v5494_v18  ;;  %v4353_v18 = vrot.slane %v10142_v40, 3 }
 0x6dd   : > { %4514 = vst [vmem:[#allocation1 + $0x2] ss:$9 sm:$0xff] %v4329_v3  ;;  %v4130_v3 = vrot.slane %v8240_v8, 4  ;;  %v5513_v25 = vsel %vm1730_vm1, %v4610_v39, 0  ;;  %v4355_v39 = vrot.slane %v10142_v40, 5 }
 0x6de   : > { %4515 = vst [vmem:[#allocation1 + $0x3] ss:$9 sm:$0xff] %v10041_v28  ;;  %v5456_v28 = vsel %vm1730_vm1, %v4607_v49, 0  ;;  %5522 = vmatpush.bf16.xpose.msrb.mxu3 %v5513_v25  ;;  %v4357_v25 = vrot.slane %v10142_v40, 7 }
 0x6df   : > { %4516 = vst [vmem:[#allocation1 + $0x4] ss:$9 sm:$0xff] %v4330_v15  ;;  %5465 = vmatpush.bf16.xpose.msra.mxu0 %v5456_v28  ;;  %v10146_v17 = vpop.permute.xlu2 %4635  ;;  %v4345_v15 = vrot.slane %v10114_v6, 2  ;;  %v4350_v28 = vrot.slane %v10114_v6, 7 }
 0x6e6   : > { %v10119_v21 = vld [vmem:[#allocation1] sm:$0xff]  ;;  %8047 = vmatmul.msk.bf16.vlgmr.msra.gmra.mxu0 %vm1730_vm1, %v4172_v5 }
 0x6e7   : > { %4518 = vst [vmem:[#allocation1] ss:$9 sm:$0xff] %v4331_v26  ;;  %v10163_v24 = vpop.permute.xlu2 %4641  ;;  %v4611_v49 = vpack.c.bf16 %v10119_v21, %v10119_v21  ;;  %v4351_v21 = vrot.slane %v10142_v40, 1 }
 0x6e8   : > { %4519 = vst [vmem:[#allocation1 + $0x1] ss:$9 sm:$0xff] %v4332_v41  ;;  %v4346_v41 = vrot.slane %v10114_v6, 3 }
 0x6e9   : > { %4520 = vst [vmem:[#allocation1 + $0x2] ss:$9 sm:$0xff] %v4333_v4  ;;  %v4174_v4 = vpack.c.bf16 %v4130_v3, %v4130_v3 }
 0x6ea   : > { %4521 = vst [vmem:[#allocation1 + $0x3] ss:$9 sm:$0xff] %v4334_v45  ;;  %v4348_v45 = vrot.slane %v10114_v6, 5 }
 0x6eb   : > { %4522 = vst [vmem:[#allocation1 + $0x4] ss:$9 sm:$0xff] %v4335_v23  ;;  %v10174_v23 = vpop.permute.xlu0 %4633  ;;  %8049 = vmatmul.msk.bf16.vlgmr.msrb.gmra.mxu2 %vm1730_vm1, %v4174_v4  ;;  %v10211_v4 = vpop.permute.xlu1 %4625 }
 0x6ef   : > { %v5664_v7 = vpop.xlane.xlu2 %5663 }
 0x6f0   : > { %v5758_v32 = vsub.f32 %v9990_v30, %v5664_v7  ;;  %v10220_v7 = vpop.f32.mrf.mxu1 }
 0x6f2   : > { %v10132_v12 = vld [vmem:[#allocation1] sm:$0xff] }
 0x6f3   : > { %4524 = vst [vmem:[#allocation1] ss:$9 sm:$0xff] %v4336_v31  ;;  %v8246_v31 = vunpack.i.h.bf16 %v8244_v47  ;;  %v10187_v30 = vpop.permute.xlu0 %4643 }
 0x6f4   : > { %4525 = vst [vmem:[#allocation1 + $0x1] ss:$9 sm:$0xff] %v10058_v60  ;;  %v4344_v60 = vrot.slane %v10114_v6, 1 }
 0x6f5   : > { %4526 = vst [vmem:[#allocation1 + $0x2] ss:$9 sm:$0xff] %v4337_v63  ;;  %v5790_v63 = vmul.f32 1.442695, %v5758_v32  ;;  %v4175_v38 = vpack.c.bf16 %v8246_v31, %v8246_v31  ;;  %v4131_v22 = vrot.slane %v8246_v31, 4  ;;  %v4132_v31 = vrot.slane %v8245_v13, 4  ;;  %v10222_v32 = vpop.f32.mrf.mxu0 }
 0x6f6   : > { %4527 = vst [vmem:[#allocation1 + $0x3] ss:$9 sm:$0xff] %v4338_v1  ;;  %v4349_v1 = vrot.slane %v10114_v6, 6 }
 0x6f7   : > { %4528 = vst [vmem:[#allocation1 + $0x4] ss:$9 sm:$0xff] %v4339_v59  ;;  %8394 = vpow2.f32 %v5790_v63  ;;  %8050 = vmatmul.msk.bf16.vlgmr.msrb.gmra.mxu3 %vm1730_vm1, %v4175_v38  ;;  %v5532_v59 = vsel %vm1730_vm1, %v4611_v49, 0  ;;  %v5670_v5 = vpop.xlane.xlu2 %5669  ;;  %v4176_v8 = vpack.c.bf16 %v4131_v22, %v4131_v22  ;;  %v4178_v63 = vpack.c.bf16 %v4132_v31, %v4132_v31  ;;  %v10230_v49 = vpop.permute.xlu1 %4629 }
 0x6f8   : > { %5541 = vmatpush.bf16.xpose.msrb.mxu0 %v5532_v59  ;;  %v5260_v22 = vpop.f32.mrf.mxu1  ;;  %v4659_v31 = vrot.slane %v9968_v37, 7 }
 0x6fb   : > { %v10204_v3 = vpop.permute.xlu0 %4645 }
 0x6fd   : > { %v10191_v14 = vpop.eup %8394 }
 0x6fe   : > { %v10152_v2 = vld [vmem:[#allocation1] sm:$0xff] }
 0x6ff   : > { %4530 = vst [vmem:[#allocation1] ss:$9 sm:$0xff] %v4340_v16  ;;  %v5760_v16 = vsub.f32 %v10005_v58, %v5670_v5  ;;  %v4612_v58 = vpack.c.bf16 %v10132_v12, %v10132_v12  ;;  %8051 = vmatmul.msk.bf16.vlgmr.msrb.gmra.mxu0 %vm1730_vm1, %v4176_v8  ;;  %v4177_v12 = vpack.c.bf16 %v8245_v13, %v8245_v13  ;;  %v4656_v8 = vrot.slane %v9968_v37, 4 }
 0x700   : > { %4531 = vst [vmem:[#allocation1 + $0x1] ss:$9 sm:$0xff] %v4341_v43  ;;  %v4352_v43 = vrot.slane %v10142_v40, 2 }
 0x701   : > { %4532 = vst [vmem:[#allocation1 + $0x2] ss:$9 sm:$0xff] %v4342_v42  ;;  %v5854_v42 = vsel %vm5661_vm6, %v10191_v14, 0.0 }
 0x702   : > { %4533 = vst [vmem:[#allocation1 + $0x3] ss:$9 sm:$0xff] %v4343_v62  ;;  %5855 = vadd.xlane.f32.xlu1 %v5854_v42  ;;  %v5551_v62 = vsel %vm1730_vm1, %v4612_v58, 0 }
 0x703   : > { %4534 = vst [vmem:[#allocation1 + $0x4] ss:$9 sm:$0xff] %v10114_v6  ;;  %v5794_v6 = vmul.f32 1.442695, %v5760_v16  ;;  %5560 = vmatpush.bf16.xpose.msrb.mxu1 %v5551_v62  ;;  %v4654_v16 = vrot.slane %v9968_v37, 2 }
 0x705   : > { %8396 = vpow2.f32 %v5794_v6  ;;  %v5241_v6 = vpop.f32.mrf.mxu0 }
 0x706   : > { %v5682_v6 = vpop.xlane.xlu2 %5681 }
 0x70a   : > { %v10167_v26 = vld [vmem:[#allocation1] sm:$0xff]  ;;  %8052 = vmatmul.msk.bf16.vlgmr.msrb.gmra.mxu1 %vm1730_vm1, %v4177_v12  ;;  %v5689_v12 = vsel %vm5661_vm6, %v10222_v32, -inf }
 0x70b   : > { %4536 = vst [vmem:[#allocation1] ss:$9 sm:$0xff] %v4344_v60  ;;  %v10201_v33 = vpop.eup %8396  ;;  %v4354_v60 = vrot.slane %v10142_v40, 4  ;;  %v4614_v38 = vpack.c.bf16 %v10167_v26, %v10167_v26  ;;  %v8251_v26 = vunpack.i.h.bf16 %v10127_v48 }
 0x70c   : > { %4537 = vst [vmem:[#allocation1 + $0x1] ss:$9 sm:$0xff] %v4345_v15 }
 0x70d   : > { %4538 = vst [vmem:[#allocation1 + $0x2] ss:$9 sm:$0xff] %v4346_v41  ;;  %v5860_v41 = vsel %vm5661_vm6, %v10201_v33, 0.0  ;;  %v4179_v58 = vpack.c.bf16 %v8251_v26, %v8251_v26 }
 0x70e   : > { %4539 = vst [vmem:[#allocation1 + $0x3] ss:$9 sm:$0xff] %v4347_v11  ;;  %5861 = vadd.xlane.f32.xlu0 %v5860_v41  ;;  %v4613_v11 = vpack.c.bf16 %v10152_v2, %v10152_v2  ;;  %v10224_v2 = vpop.permute.xlu0 %4631 }
 0x70f   : > { %4540 = vst [vmem:[#allocation1 + $0x4] ss:$9 sm:$0xff] %v4348_v45  ;;  %v4356_v45 = vrot.slane %v10142_v40, 6 }
 0x710   : > { %v5570_v47 = vsel %vm1730_vm1, %v4613_v11, 0  ;;  %v10253_v11 = vpop.permute.xlu1 %4637 }
 0x711   : > { %5579 = vmatpush.bf16.xpose.msra.mxu2 %v5570_v47 }
 0x716   : > { %v10185_v34 = vld [vmem:[#allocation1] sm:$0xff]  ;;  %v5667_v62 = vpop.xlane.xlu0 %5666 }
 0x717   : > { %4542 = vst [vmem:[#allocation1] ss:$9 sm:$0xff] %v4349_v1  ;;  %v5589_v1 = vsel %vm1730_vm1, %v4614_v38, 0  ;;  %v4615_v13 = vpack.c.bf16 %v10185_v34, %v10185_v34  ;;  %v4657_v34 = vrot.slane %v9968_v37, 5 }
 0x718   : > { %4543 = vst [vmem:[#allocation1 + $0x1] ss:$9 sm:$0xff] %v4350_v28  ;;  %8053 = vmatmul.msk.bf16.vlgmr.msra.gmra.mxu2 %vm1730_vm1, %v4178_v63  ;;  %v4653_v28 = vrot.slane %v9968_v37, 1  ;;  %5598 = vmatpush.bf16.xpose.msra.mxu3 %v5589_v1  ;;  %v4660_v1 = vrot.slane %v9915_v19, 1 }
 0x719   : > { %4544 = vst [vmem:[#allocation1 + $0x2] ss:$9 sm:$0xff] %v10142_v40  ;;  %v10228_v40 = vpop.f32.mrf.mxu3  ;;  %v5608_v41 = vsel %vm1730_vm1, %v4615_v13, 0  ;;  %v4663_v13 = vrot.slane %v9915_v19, 4 }
 0x71a   : > { %4545 = vst [vmem:[#allocation1 + $0x3] ss:$9 sm:$0xff] %v4351_v21  ;;  %v5686_v59 = vsel %vm5661_vm6, %v10228_v40, -inf  ;;  %v10240_v21 = vpop.f32.mrf.mxu2  ;;  %5617 = vmatpush.bf16.xpose.msra.mxu0 %v5608_v41  ;;  %v4665_v41 = vrot.slane %v9915_v19, 6 }
 0x71b   : > { %4546 = vst [vmem:[#allocation1 + $0x4] ss:$9 sm:$0xff] %v4352_v43  ;;  %5687 = vmax.xlane.f32.xlu2 %v5686_v59  ;;  %v4655_v43 = vrot.slane %v9968_v37, 3  ;;  %v5695_v42 = vsel %vm5661_vm6, %v10240_v21, -inf }
 0x71c   : > { %5696 = vmax.xlane.f32.xlu1 %v5695_v42  ;;  %v4661_v42 = vrot.slane %v9915_v19, 2 }
 0x71f   : > { %8054 = vmatmul.msk.bf16.vlgmr.msra.gmra.mxu3 %vm1730_vm1, %v4179_v58 }
 0x722   : > { %v10207_v15 = vld [vmem:[#allocation1] sm:$0xff] }
 0x723   : > { %4548 = vst [vmem:[#allocation1] ss:$9 sm:$0xff] %v4353_v18  ;;  %v5759_v18 = vsub.f32 %v9999_v29, %v5667_v62  ;;  %5690 = vmax.xlane.f32.xlu2 %v5689_v12  ;;  %v4658_v29 = vrot.slane %v9968_v37, 6  ;;  %v4616_v38 = vpack.c.bf16 %v10207_v15, %v10207_v15 }
 0x724   : > { %4549 = vst [vmem:[#allocation1 + $0x1] ss:$9 sm:$0xff] %v4354_v60  ;;  %v5222_v60 = vpop.f32.mrf.mxu3 }
 0x725   : > { %4550 = vst [vmem:[#allocation1 + $0x2] ss:$9 sm:$0xff] %v4355_v39  ;;  %v5792_v39 = vmul.f32 1.442695, %v5759_v18  ;;  %v5627_v59 = vsel %vm1730_vm1, %v4616_v38, 0 }
 0x726   : > { %4551 = vst [vmem:[#allocation1 + $0x3] ss:$9 sm:$0xff] %v4356_v45  ;;  %v4133_v45 = vrot.slane %v8251_v26, 4  ;;  %5636 = vmatpush.bf16.xpose.msra.mxu1 %v5627_v59 }
 0x727   : > { %4552 = vst [vmem:[#allocation1 + $0x4] ss:$9 sm:$0xff] %v4357_v25  ;;  %v5279_v25 = vpop.f32.mrf.mxu2  ;;  %8398 = vpow2.f32 %v5792_v39 }
 0x728   : > { %v4180_v63 = vpack.c.bf16 %v4133_v45, %v4133_v45  ;;  %v8559_v45 = vmov 65535  }
 0x729   : > { %v6051_v25 = vsel %vm2728_vm3, 4294967295, %v8559_v45 }
 0x72a   : > { %8055 = vmatmul.msk.bf16.vlgmr.msra.gmra.mxu0 %vm1730_vm1, %v4180_v63 }
 0x72d   : > { %v10265_v22 = vpop.eup %8398 }
 0x72e   : > { %v4553_v5 = vld [vmem:[#allocation1] sm:$0xff]  ;;  %v5857_v15 = vsel %vm5661_vm6, %v10265_v22, 0.0 }
 0x72f   : > { %4793 = vst [vmem:[#allocation1] ss:$9 sm:$0xff] %v9968_v37  ;;  %v8250_v37 = vunpack.i.l.bf16 %v10127_v48  ;;  %5858 = vadd.xlane.f32.xlu1 %v5857_v15  ;;  %v4662_v48 = vrot.slane %v9915_v19, 3  ;;  %v5676_v15 = vpop.xlane.xlu0 %5675 }
 0x730   : > { %4795 = vst [vmem:[#allocation1 + $0x1] ss:$9 sm:$0xff] %v4653_v28  ;;  %v5692_v28 = vsel %vm5661_vm6, %v10220_v7, -inf }
 0x731   : > { %4797 = vst [vmem:[#allocation1 + $0x2] ss:$9 sm:$0xff] %v4654_v16  ;;  %5693 = vmax.xlane.f32.xlu2 %v5692_v28  ;;  %v10271_v16 = vpop.permute.xlu1 %4639  ;;  %v4181_v26 = vpack.c.bf16 %v8250_v37, %v8250_v37  ;;  %v4134_v18 = vrot.slane %v8250_v37, 4  ;;  %v10292_v28 = vpop.f32.mrf.mxu1  ;;  %v4667_v37 = vrot.slane %v9941_v10, 1 }
 0x732   : > { %4799 = vst [vmem:[#allocation1 + $0x3] ss:$9 sm:$0xff] %v4655_v43  ;;  %v4617_v43 = vpack.c.bf16 %v4553_v5, %v4553_v5  ;;  %v4664_v5 = vrot.slane %v9915_v19, 5 }
 0x733   : > { %4801 = vst [vmem:[#allocation1 + $0x4] ss:$9 sm:$0xff] %v4656_v8  ;;  %v5764_v8 = vsub.f32 %v10049_v20, %v5682_v6  ;;  %8056 = vmatmul.msk.bf16.vlgmr.msra.gmra.mxu1 %vm1730_vm1, %v4181_v26  ;;  %v4182_v12 = vpack.c.bf16 %v4134_v18, %v4134_v18  ;;  %v4668_v6 = vrot.slane %v9941_v10, 2 }
 0x734   : > { %v5646_v58 = vsel %vm1730_vm1, %v4617_v43, 0 }
 0x735   : > { %5655 = vmatpush.bf16.xpose.msrb.mxu2 %v5646_v58  ;;  %v5802_v60 = vmul.f32 1.442695, %v5764_v8 }
 0x737   : > { %8400 = vpow2.f32 %v5802_v60  ;;  %v5679_v45 = vpop.xlane.xlu0 %5678 }
 0x739   : > { %v5673_v20 = vpop.xlane.xlu1 %5672  ;;  %v5336_v60 = vpop.f32.mrf.mxu1 }
 0x73a   : > { %v4802_v47 = vld [vmem:[#allocation1] sm:$0xff] }
 0x73b   : > { %4803 = vst [vmem:[#allocation1] ss:$9 sm:$0xff] %v4657_v34  ;;  %v5021_v39 = vpack.c.bf16 %v4802_v47, %v4802_v47  ;;  %v5761_v34 = vsub.f32 %v10019_v35, %v5673_v20  ;;  %v4666_v47 = vrot.slane %v9915_v19, 7  ;;  %v5685_v35 = vpop.xlane.xlu2 %5684 }
 0x73c   : > { %4804 = vst [vmem:[#allocation1 + $0x1] ss:$9 sm:$0xff] %v4658_v29  ;;  %v10283_v29 = vsel %vm6050_vm7, %v6051_v25, 0  ;;  %8057 = vmatmul.msk.bf16.vlgmr.msrb.gmra.mxu2 %vm1730_vm1, %v4182_v12  ;;  %v5765_v26 = vsub.f32 %v10069_v44, %v5685_v35  ;;  %v5762_v44 = vsub.f32 %v10034_v36, %v5676_v15  ;;  %v4670_v36 = vrot.slane %v9941_v10, 4 }
 0x73d   : > { %4805 = vst [vmem:[#allocation1 + $0x2] ss:$9 sm:$0xff] %v4659_v31  ;;  %v6054_v31 = vand.u32 %v10283_v29, %v5021_v39  ;;  %v10287_v63 = vpop.eup %8400  ;;  %v5796_v38 = vmul.f32 1.442695, %v5761_v34  ;;  %v5763_v35 = vsub.f32 %v10045_v46, %v5679_v45  ;;  %v5704_v15 = vsel %vm5661_vm6, %v10292_v28, -inf }
 0x73e   : > { %4806 = vst [vmem:[#allocation1 + $0x3] ss:$9 sm:$0xff] %v9915_v19  ;;  %v4669_v19 = vrot.slane %v9941_v10, 3  ;;  %v5798_v12 = vmul.f32 1.442695, %v5762_v44  ;;  %vm7489_vm7 = vcmask 523264  }
 0x73f   : > { %4807 = vst [vmem:[#allocation1 + $0x4] ss:$9 sm:$0xff] %v4660_v1  ;;  %6063 = vmatpush.bf16.msrb.mxu3 %v6054_v31  ;;  %v5872_v1 = vsel %vm5661_vm6, %v10287_v63, 0.0  ;;  %8402 = vpow2.f32 %v5796_v38  ;;  %v4671_v31 = vrot.slane %v9941_v10, 5 }
 0x740   : > { %5873 = vadd.xlane.f32.xlu2 %v5872_v1  ;;  %v4672_v1 = vrot.slane %v9941_v10, 6 }
 0x745   : > { %v10309_v18 = vpop.eup %8402 }
 0x746   : > { %v4808_v62 = vld [vmem:[#allocation1] sm:$0xff]  ;;  %v5863_v25 = vsel %vm5661_vm6, %v10309_v18, 0.0 }
 0x747   : > { %4809 = vst [vmem:[#allocation1] ss:$9 sm:$0xff] %v4661_v42  ;;  %v5022_v43 = vpack.c.bf16 %v4808_v62, %v4808_v62  ;;  %v10298_v42 = vpop.f32.mrf.mxu0  ;;  %v10305_v62 = vpop.f32.mrf.mxu3 }
 0x748   : > { %4810 = vst [vmem:[#allocation1 + $0x1] ss:$9 sm:$0xff] %v4662_v48  ;;  %v5701_v8 = vsel %vm5661_vm6, %v10298_v42, -inf  ;;  %v5804_v48 = vmul.f32 1.442695, %v5765_v26  ;;  %v10327_v26 = vpop.f32.mrf.mxu1 }
 0x749   : > { %4811 = vst [vmem:[#allocation1 + $0x2] ss:$9 sm:$0xff] %v4663_v13  ;;  %v6073_v58 = vand.u32 %v10283_v29, %v5022_v43  ;;  %5702 = vmax.xlane.f32.xlu1 %v5701_v8  ;;  %v5698_v13 = vsel %vm5661_vm6, %v10305_v62, -inf  ;;  %v5800_v8 = vmul.f32 1.442695, %v5763_v35 }
 0x74a   : > { %4812 = vst [vmem:[#allocation1 + $0x3] ss:$9 sm:$0xff] %v4664_v5  ;;  %8404 = vpow2.f32 %v5804_v48  ;;  %5699 = vmax.xlane.f32.xlu0 %v5698_v13  ;;  %v10311_v5 = vpop.f32.mrf.mxu2  ;;  %v4675_v13 = vrot.slane %v9928_v27, 2 }
 0x74b   : > { %4813 = vst [vmem:[#allocation1 + $0x4] ss:$9 sm:$0xff] %v4665_v41  ;;  %6082 = vmatpush.bf16.msrb.mxu0 %v6073_v58  ;;  %v5707_v41 = vsel %vm5661_vm6, %v10311_v5, -inf  ;;  %8406 = vpow2.f32 %v5798_v12 }
 0x74c   : > { %5708 = vmax.xlane.f32.xlu2 %v5707_v41  ;;  %8408 = vpow2.f32 %v5800_v8  ;;  %v4674_v41 = vrot.slane %v9928_v27, 1 }
 0x74f   : > { %v5317_v39 = vpop.f32.mrf.mxu0 }
 0x750   : > { %v5412_v12 = vpop.f32.mrf.mxu1  ;;  %v4676_v39 = vrot.slane %v9928_v27, 3 }
 0x751   : > { %5864 = vadd.xlane.f32.xlu1 %v5863_v25  ;;  %v4677_v25 = vrot.slane %v9928_v27, 4 }
 0x752   : > { %v4814_v59 = vld [vmem:[#allocation1] sm:$0xff]  ;;  %5705 = vmax.xlane.f32.xlu0 %v5704_v15  ;;  %v5355_v43 = vpop.f32.mrf.mxu2 }
 0x753   : > { %4815 = vst [vmem:[#allocation1] ss:$9 sm:$0xff] %v4666_v47  ;;  %v5023_v20 = vpack.c.bf16 %v4814_v59, %v4814_v59  ;;  %v10321_v47 = vpop.eup %8404  ;;  %v4673_v59 = vrot.slane %v9941_v10, 7  ;;  %v4679_v43 = vrot.slane %v9928_v27, 6 }
 0x754   : > { %4816 = vst [vmem:[#allocation1 + $0x1] ss:$9 sm:$0xff] %v9941_v10  ;;  %v10335_v48 = vpop.eup %8406 }
 0x755   : > { %4817 = vst [vmem:[#allocation1 + $0x2] ss:$9 sm:$0xff] %v4667_v37  ;;  %v6092_v34 = vand.u32 %v10283_v29, %v5023_v20  ;;  %v5298_v37 = vpop.f32.mrf.mxu3  ;;  %v5866_v60 = vsel %vm5661_vm6, %v10335_v48, 0.0 }
 0x756   : > { %4818 = vst [vmem:[#allocation1 + $0x3] ss:$9 sm:$0xff] %v4668_v6  ;;  %v5875_v6 = vsel %vm5661_vm6, %v10321_v47, 0.0 }
 0x757   : > { %4819 = vst [vmem:[#allocation1 + $0x4] ss:$9 sm:$0xff] %v4669_v19  ;;  %6101 = vmatpush.bf16.msrb.mxu1 %v6092_v34  ;;  %v10332_v58 = vpop.f32.mrf.mxu0  ;;  %5876 = vadd.xlane.f32.xlu2 %v5875_v6  ;;  %v4680_v6 = vrot.slane %v9928_v27, 7 }
 0x75a   : > { %5867 = vadd.xlane.f32.xlu0 %v5866_v60  ;;  %v10351_v35 = vpop.f32.mrf.mxu2 }
 0x75b   : > { %v5719_v15 = vsel %vm5661_vm6, %v10351_v35, -inf }
 0x75d   : > { %v10337_v44 = vpop.f32.mrf.mxu3 }
 0x75e   : > { %v4820_v38 = vld [vmem:[#allocation1] sm:$0xff]  ;;  %v5710_v12 = vsel %vm5661_vm6, %v10337_v44, -inf }
 0x75f   : > { %4821 = vst [vmem:[#allocation1] ss:$9 sm:$0xff] %v4670_v36  ;;  %v5024_v19 = vpack.c.bf16 %v4820_v38, %v4820_v38  ;;  %v5716_v36 = vsel %vm5661_vm6, %v10327_v26, -inf  ;;  %v5393_v34 = vpop.f32.mrf.mxu0 }
 0x760   : > { %4822 = vst [vmem:[#allocation1 + $0x1] ss:$9 sm:$0xff] %v4671_v31  ;;  %5717 = vmax.xlane.f32.xlu2 %v5716_v36  ;;  %v4678_v31 = vrot.slane %v9928_v27, 5  ;;  %v4683_v34 = vrot.slane %v9981_v61, 3 }
 0x761   : > { %4823 = vst [vmem:[#allocation1 + $0x2] ss:$9 sm:$0xff] %v4672_v1  ;;  %v6111_v46 = vand.u32 %v10283_v29, %v5024_v19  ;;  %v10349_v1 = vpop.eup %8408 }
 0x762   : > { %4824 = vst [vmem:[#allocation1 + $0x3] ss:$9 sm:$0xff] %v4673_v59  ;;  %v5869_v37 = vsel %vm5661_vm6, %v10349_v1, 0.0 }
 0x763   : > { %4825 = vst [vmem:[#allocation1 + $0x4] ss:$9 sm:$0xff] %v9928_v27  ;;  %6120 = vmatpush.bf16.msra.mxu2 %v6111_v46  ;;  %5870 = vadd.xlane.f32.xlu0 %v5869_v37  ;;  %v4681_v46 = vrot.slane %v9981_v61, 1 }
 0x765   : > { %v5374_v59 = vpop.f32.mrf.mxu3 }
 0x767   : > { %v10369_v36 = vpop.f32.mrf.mxu0 }
 0x768   : > { %5720 = vmax.xlane.f32.xlu2 %v5719_v15  ;;  %v10377_v15 = vpop.f32.mrf.mxu1 }
 0x76a   : > { %v4826_v20 = vld [vmem:[#allocation1] sm:$0xff] }
 0x76b   : > { %4828 = vst [vmem:[#allocation1 + $0x1] ss:$9 sm:$0xff] %v4675_v13  ;;  %v5025_v45 = vpack.c.bf16 %v4826_v20, %v4826_v20  ;;  %v5431_v13 = vpop.f32.mrf.mxu2  ;;  %5711 = vmax.xlane.f32.xlu0 %v5710_v12 }
 0x76c   : > { %4827 = vst [vmem:[#allocation1] ss:$9 sm:$0xff] %v4674_v41  ;;  %v4682_v41 = vrot.slane %v9981_v61, 2  ;;  %v5728_v13 = vsel %vm5661_vm6, %v10377_v15, -inf }
 0x76d   : > { %4829 = vst [vmem:[#allocation1 + $0x2] ss:$9 sm:$0xff] %v4676_v39  ;;  %v6130_v38 = vand.u32 %v10283_v29, %v5025_v45  ;;  %v10360_v60 = vpop.f32.mrf.mxu3  ;;  %v5725_v45 = vsel %vm5661_vm6, %v10369_v36, -inf }
 0x76e   : > { %4830 = vst [vmem:[#allocation1 + $0x3] ss:$9 sm:$0xff] %v4677_v25  ;;  %v5722_v39 = vsel %vm5661_vm6, %v10360_v60, -inf }
 0x76f   : > { %4831 = vst [vmem:[#allocation1 + $0x4] ss:$9 sm:$0xff] %v4678_v31  ;;  %6139 = vmatpush.bf16.msra.mxu3 %v6130_v38  ;;  %5723 = vmax.xlane.f32.xlu1 %v5722_v39  ;;  %v5713_v31 = vsel %vm5661_vm6, %v10332_v58, -inf  ;;  %v4684_v38 = vrot.slane %v9981_v61, 4  ;;  %v5469_v37 = vpop.f32.mrf.mxu0 }
 0x770   : > { %5726 = vmax.xlane.f32.xlu2 %v5725_v45  ;;  %v4689_v45 = vrot.slane %v10130_v9, 2 }
 0x773   : > { %5714 = vmax.xlane.f32.xlu0 %v5713_v31  ;;  %v10389_v31 = vpop.f32.mrf.mxu2 }
 0x774   : > { %v5731_v37 = vsel %vm5661_vm6, %v10389_v31, -inf }
 0x775   : > { %v5450_v25 = vpop.f32.mrf.mxu3  ;;  %v5856_v39 = vpop.xlane.xlu1 %5855 }
 0x776   : > { %v4832_v19 = vld [vmem:[#allocation1] sm:$0xff]  ;;  %8410 = vrcp.f32 %v5856_v39 }
 0x777   : > { %4833 = vst [vmem:[#allocation1] ss:$9 sm:$0xff] %v4679_v43  ;;  %v5026_v8 = vpack.c.bf16 %v4832_v19, %v4832_v19  ;;  %v4685_v43 = vrot.slane %v9981_v61, 5  ;;  %v4686_v19 = vrot.slane %v9981_v61, 6 }
 0x778   : > { %4834 = vst [vmem:[#allocation1 + $0x1] ss:$9 sm:$0xff] %v4680_v6 }
 0x779   : > { %4835 = vst [vmem:[#allocation1 + $0x2] ss:$9 sm:$0xff] %v9981_v61  ;;  %v6149_v20 = vand.u32 %v10283_v29, %v5026_v8  ;;  %v4687_v8 = vrot.slane %v9981_v61, 7 }
 0x77a   : > { %4836 = vst [vmem:[#allocation1 + $0x3] ss:$9 sm:$0xff] %v4681_v46 }
 0x77b   : > { %4837 = vst [vmem:[#allocation1 + $0x4] ss:$9 sm:$0xff] %v4682_v41  ;;  %6158 = vmatpush.bf16.msra.mxu0 %v6149_v20  ;;  %v5488_v41 = vpop.f32.mrf.mxu1  ;;  %5729 = vmax.xlane.f32.xlu0 %v5728_v13  ;;  %v4688_v20 = vrot.slane %v10130_v9, 1 }
 0x77c   : > { %v4692_v41 = vrot.slane %v10130_v9, 5 }
 0x77d   : > { %v10396_v13 = vpop.f32.mrf.mxu3 }
 0x782   : > { %v4838_v59 = vld [vmem:[#allocation1] sm:$0xff] }
 0x783   : > { %4839 = vst [vmem:[#allocation1] ss:$9 sm:$0xff] %v4683_v34  ;;  %v5027_v6 = vpack.c.bf16 %v4838_v59, %v4838_v59  ;;  %v4690_v34 = vrot.slane %v10130_v9, 3  ;;  %5732 = vmax.xlane.f32.xlu0 %v5731_v37 }
 0x784   : > { %4840 = vst [vmem:[#allocation1 + $0x1] ss:$9 sm:$0xff] %v4684_v38  ;;  %v4691_v38 = vrot.slane %v10130_v9, 4 }
 0x785   : > { %4841 = vst [vmem:[#allocation1 + $0x2] ss:$9 sm:$0xff] %v4685_v43  ;;  %v6168_v46 = vand.u32 %v10283_v29, %v5027_v6  ;;  %v8411_v43 = vpop.eup %8410 }
 0x786   : > { %4842 = vst [vmem:[#allocation1 + $0x3] ss:$9 sm:$0xff] %v4686_v19  ;;  %v5982_v6 = vmul.f32 %v8411_v43, %v10191_v14  ;;  %v5862_v19 = vpop.xlane.xlu0 %5861  ;;  %v4694_v14 = vrot.slane %v10130_v9, 7 }
 0x787   : > { %4843 = vst [vmem:[#allocation1 + $0x4] ss:$9 sm:$0xff] %v4687_v8  ;;  %6177 = vmatpush.bf16.msra.mxu1 %v6168_v46  ;;  %8412 = vrcp.f32 %v5862_v19  ;;  %v5507_v46 = vpop.f32.mrf.mxu2 }
 0x788   : > { %v6014_v8 = vpack.c.bf16 %v5982_v6, %v5982_v6  ;;  %v5526_v6 = vpop.f32.mrf.mxu3  ;;  %v10411_v46 = vpop.f32.mrf.mxu1 }
 0x78a   : > { %8058 = vmatmul.msk.bf16.vlgmr.msrb.gmra.mxu3 %vm6046_vm8, %v6014_v8 }
 0x78e   : > { %v4844_v12 = vld [vmem:[#allocation1] sm:$0xff]  ;;  %v5688_v19 = vpop.xlane.xlu2 %5687 }
 0x78f   : > { %4845 = vst [vmem:[#allocation1] ss:$9 sm:$0xff] %v10130_v9  ;;  %v5028_v25 = vpack.c.bf16 %v4844_v12, %v4844_v12  ;;  %v4693_v12 = vrot.slane %v10130_v9, 6  ;;  %v5766_v9 = vsub.f32 %v10228_v40, %v5688_v19  ;;  %v4699_v40 = vrot.slane %v10211_v4, 5 }
 0x790   : > { %4846 = vst [vmem:[#allocation1 + $0x1] ss:$9 sm:$0xff] %v4688_v20  ;;  %v5734_v20 = vsel %vm5661_vm6, %v10396_v13, -inf }
 0x791   : > { %4847 = vst [vmem:[#allocation1 + $0x2] ss:$9 sm:$0xff] %v4689_v45  ;;  %v6187_v59 = vand.u32 %v10283_v29, %v5028_v25  ;;  %v10402_v45 = vpop.f32.mrf.mxu0  ;;  %5735 = vmax.xlane.f32.xlu1 %v5734_v20  ;;  %v5806_v20 = vmul.f32 1.442695, %v5766_v9 }
 0x792   : > { %4848 = vst [vmem:[#allocation1 + $0x3] ss:$9 sm:$0xff] %v4690_v34  ;;  %v8413_v34 = vpop.eup %8412 }
 0x793   : > { %4849 = vst [vmem:[#allocation1 + $0x4] ss:$9 sm:$0xff] %v4691_v38  ;;  %6196 = vmatpush.bf16.msrb.mxu2 %v6187_v59  ;;  %v4695_v38 = vrot.slane %v10211_v4, 1  ;;  %v5984_v37 = vmul.f32 %v8413_v34, %v10201_v33  ;;  %v4697_v33 = vrot.slane %v10211_v4, 3  ;;  %8414 = vpow2.f32 %v5806_v20 }
 0x795   : > { %v6016_v43 = vpack.c.bf16 %v5984_v37, %v5984_v37  ;;  %v5697_v37 = vpop.xlane.xlu1 %5696 }
 0x796   : > { %v5691_v34 = vpop.xlane.xlu2 %5690 }
 0x797   : > { %8060 = vmatmul.msk.bf16.vlgmr.msrb.gmra.mxu1 %vm6046_vm8, %v6016_v43 }
 0x799   : > { %v5545_v8 = vpop.f32.mrf.mxu0  ;;  %v10422_v43 = vpop.eup %8414 }
 0x79a   : > { %v4850_v39 = vld [vmem:[#allocation1] sm:$0xff]  ;;  %v5878_v19 = vsel %vm5661_vm6, %v10422_v43, 0.0  ;;  %v4701_v8 = vrot.slane %v10211_v4, 7 }
 0x79b   : > { %4851 = vst [vmem:[#allocation1] ss:$9 sm:$0xff] %v4692_v41  ;;  %v5029_v25 = vpack.c.bf16 %v4850_v39, %v4850_v39  ;;  %v5740_v41 = vsel %vm5661_vm6, %v10411_v46, -inf  ;;  %5879 = vadd.xlane.f32.xlu2 %v5878_v19  ;;  %v10426_v9 = vpop.f32.mrf.mxu2 }
 0x79c   : > { %4852 = vst [vmem:[#allocation1 + $0x1] ss:$9 sm:$0xff] %v4693_v12  ;;  %5741 = vmax.xlane.f32.xlu1 %v5740_v41  ;;  %v4696_v12 = vrot.slane %v10211_v4, 2 }
 0x79d   : > { %4853 = vst [vmem:[#allocation1 + $0x2] ss:$9 sm:$0xff] %v4694_v14  ;;  %v6206_v59 = vand.u32 %v10283_v29, %v5029_v25  ;;  %v4698_v14 = vrot.slane %v10211_v4, 4  ;;  %v4700_v25 = vrot.slane %v10211_v4, 6 }
 0x79e   : > { %4854 = vst [vmem:[#allocation1 + $0x3] ss:$9 sm:$0xff] %v10211_v4 }
 0x79f   : > { %4855 = vst [vmem:[#allocation1 + $0x4] ss:$9 sm:$0xff] %v4695_v38  ;;  %6215 = vmatpush.bf16.msrb.mxu3 %v6206_v59  ;;  %v5767_v38 = vsub.f32 %v10222_v32, %v5691_v34  ;;  %v5564_v59 = vpop.f32.mrf.mxu1  ;;  %v4704_v34 = vrot.slane %v10157_v0, 3 }
 0x7a1   : > { %v5808_v6 = vmul.f32 1.442695, %v5767_v38 }
 0x7a2   : > { %v10439_v19 = vpop.f32.mrf.mxu3 }
 0x7a3   : > { %8416 = vpow2.f32 %v5808_v6  ;;  %v5583_v6 = vpop.f32.mrf.mxu2 }
 0x7a4   : > { %v5694_v41 = vpop.xlane.xlu2 %5693 }
 0x7a6   : > { %v4856_v39 = vld [vmem:[#allocation1] sm:$0xff] }
 0x7a7   : > { %4857 = vst [vmem:[#allocation1] ss:$9 sm:$0xff] %v4696_v12  ;;  %v4702_v12 = vrot.slane %v10157_v0, 1 }
 0x7a8   : > { %4858 = vst [vmem:[#allocation1 + $0x1] ss:$9 sm:$0xff] %v4697_v33  ;;  %v5859_v33 = vpop.xlane.xlu1 %5858 }
 0x7a9   : > { %4859 = vst [vmem:[#allocation1 + $0x2] ss:$9 sm:$0xff] %v4698_v14  ;;  %v10430_v14 = vpop.eup %8416  ;;  %8418 = vrcp.f32 %v5859_v33  ;;  %v4706_v33 = vrot.slane %v10157_v0, 5 }
 0x7aa   : > { %4860 = vst [vmem:[#allocation1 + $0x3] ss:$9 sm:$0xff] %v4699_v40  ;;  %v4703_v40 = vrot.slane %v10157_v0, 2  ;;  %v5881_v38 = vsel %vm5661_vm6, %v10430_v14, 0.0 }
 0x7ab   : > { %4861 = vst [vmem:[#allocation1 + $0x4] ss:$9 sm:$0xff] %v4700_v25  ;;  %v5768_v25 = vsub.f32 %v10220_v7, %v5694_v41  ;;  %5882 = vadd.xlane.f32.xlu0 %v5881_v38  ;;  %v5746_v7 = vsel %vm5661_vm6, %v10439_v19, -inf  ;;  %v10443_v41 = vpop.f32.mrf.mxu0 }
 0x7ac   : > { %5747 = vmax.xlane.f32.xlu1 %v5746_v7 }
 0x7ad   : > { %v5810_v59 = vmul.f32 1.442695, %v5768_v25  ;;  %v5737_v25 = vsel %vm5661_vm6, %v10402_v45, -inf }
 0x7af   : > { %8420 = vpow2.f32 %v5810_v59 }
 0x7b0   : > { %v10459_v7 = vpop.f32.mrf.mxu1 }
 0x7b2   : > { %v4862_v20 = vld [vmem:[#allocation1] sm:$0xff] }
 0x7b3   : > { %4863 = vst [vmem:[#allocation1] ss:$9 sm:$0xff] %v4701_v8  ;;  %v5031_v32 = vpack.c.bf16 %v4862_v20, %v4862_v20  ;;  %v8419_v8 = vpop.eup %8418  ;;  %v5030_v20 = vpack.c.bf16 %v4856_v39, %v4856_v39  ;;  %5738 = vmax.xlane.f32.xlu0 %v5737_v25  ;;  %v4707_v39 = vrot.slane %v10157_v0, 6  ;;  %v5621_v6 = vpop.f32.mrf.mxu0 }
 0x7b4   : > { %4864 = vst [vmem:[#allocation1 + $0x1] ss:$9 sm:$0xff] %v10157_v0  ;;  %v4713_v6 = vrot.slane %v10230_v49, 5 }
 0x7b5   : > { %4865 = vst [vmem:[#allocation1 + $0x2] ss:$9 sm:$0xff] %v4702_v12  ;;  %v6244_v4 = vand.u32 %v10283_v29, %v5031_v32  ;;  %v5983_v12 = vmul.f32 %v8419_v8, %v10265_v22  ;;  %v5769_v32 = vsub.f32 %v10240_v21, %v5697_v37  ;;  %v6225_v38 = vand.u32 %v10283_v29, %v5030_v20  ;;  %v5602_v37 = vpop.f32.mrf.mxu3  ;;  %v10457_v59 = vpop.eup %8420 }
 0x7b6   : > { %4866 = vst [vmem:[#allocation1 + $0x3] ss:$9 sm:$0xff] %v4703_v40  ;;  %v4708_v21 = vrot.slane %v10157_v0, 7  ;;  %v5874_v8 = vpop.xlane.xlu2 %5873  ;;  %v5884_v20 = vsel %vm5661_vm6, %v10457_v59, 0.0 }
 0x7b7   : > { %4867 = vst [vmem:[#allocation1 + $0x4] ss:$9 sm:$0xff] %v4704_v34  ;;  %6253 = vmatpush.bf16.msrb.mxu1 %v6244_v4  ;;  %v6015_v40 = vpack.c.bf16 %v5983_v12, %v5983_v12  ;;  %v4705_v34 = vrot.slane %v10157_v0, 4  ;;  %v5812_v22 = vmul.f32 1.442695, %v5769_v32  ;;  %v4709_v0 = vrot.slane %v10230_v49, 1 }
 0x7b8   : > { %v5640_v25 = vpop.f32.mrf.mxu1 }
 0x7b9   : > { %8059 = vmatmul.msk.bf16.vlgmr.msrb.gmra.mxu0 %vm6046_vm8, %v6015_v40  ;;  %8422 = vpow2.f32 %v5812_v22 }
 0x7ba   : > { %6234 = vmatpush.bf16.msrb.mxu0 %v6225_v38  ;;  %8424 = vrcp.f32 %v5874_v8 }
 0x7bb   : > { %5885 = vadd.xlane.f32.xlu0 %v5884_v20 }
 0x7bc   : > { %v5703_v12 = vpop.xlane.xlu1 %5702 }
 0x7bd   : > { %v5771_v40 = vsub.f32 %v10298_v42, %v5703_v12  ;;  %v5700_v8 = vpop.xlane.xlu0 %5699 }
 0x7be   : > { %v10451_v4 = vld [vmem:[#allocation1] sm:$0xff]  ;;  %v5770_v12 = vsub.f32 %v10305_v62, %v5700_v8  ;;  %v4716_v8 = vrot.slane %v10224_v2, 1 }
 0x7bf   : > { %4870 = vst [vmem:[#allocation1 + $0x1] ss:$9 sm:$0xff] %v4706_v33  ;;  %v10465_v32 = vpop.eup %8422  ;;  %v4710_v33 = vrot.slane %v10230_v49, 2  ;;  %v5816_v37 = vmul.f32 1.442695, %v5771_v40  ;;  %v10478_v55 = vpop.f32.mrf.mxu2  ;;  %v4714_v40 = vrot.slane %v10230_v49, 6 }
 0x7c0   : > { %4869 = vst [vmem:[#allocation1] ss:$9 sm:$0xff] %v4705_v34  ;;  %v8425_v38 = vpop.eup %8424  ;;  %v5887_v20 = vsel %vm5661_vm6, %v10465_v32, 0.0  ;;  %v5814_v25 = vmul.f32 1.442695, %v5770_v12 }
 0x7c1   : > { %4871 = vst [vmem:[#allocation1 + $0x2] ss:$9 sm:$0xff] %v4707_v39  ;;  %v4711_v39 = vrot.slane %v10230_v49, 3  ;;  %v5988_v22 = vmul.f32 %v8425_v38, %v10287_v63  ;;  %8426 = vpow2.f32 %v5816_v37 }
 0x7c2   : > { %4872 = vst [vmem:[#allocation1 + $0x3] ss:$9 sm:$0xff] %v4708_v21  ;;  %v4712_v21 = vrot.slane %v10230_v49, 4  ;;  %8428 = vpow2.f32 %v5814_v25  ;;  %v4717_v25 = vrot.slane %v10224_v2, 2 }
 0x7c3   : > { %4873 = vst [vmem:[#allocation1 + $0x4] ss:$9 sm:$0xff] %v10230_v49  ;;  %v6020_v42 = vpack.c.bf16 %v5988_v22, %v5988_v22  ;;  %5888 = vadd.xlane.f32.xlu0 %v5887_v20 }
 0x7c4   : > { %v5865_v63 = vpop.xlane.xlu1 %5864 }
 0x7c5   : > { %8064 = vmatmul.msk.bf16.vlgmr.msra.gmra.mxu1 %vm6046_vm8, %v6020_v42  ;;  %8430 = vrcp.f32 %v5865_v63  ;;  %v5706_v38 = vpop.xlane.xlu0 %5705 }
 0x7c6   : > { %v5772_v37 = vsub.f32 %v10292_v28, %v5706_v38  ;;  %v5032_v28 = vpack.c.bf16 %v10451_v4, %v10451_v4 }
 0x7c7   : > { %v5659_v42 = vpop.f32.mrf.mxu2 }
 0x7c8   : > { %v5818_v20 = vmul.f32 1.442695, %v5772_v37  ;;  %v4718_v37 = vrot.slane %v10224_v2, 3  ;;  %v4719_v42 = vrot.slane %v10224_v2, 4 }
 0x7ca   : > { %v10469_v34 = vld [vmem:[#allocation1] sm:$0xff]  ;;  %8432 = vpow2.f32 %v5818_v20  ;;  %v5749_v20 = vsel %vm5661_vm6, %v10443_v41, -inf }
 0x7cb   : > { %4875 = vst [vmem:[#allocation1] ss:$9 sm:$0xff] %v4709_v0  ;;  %v5709_v0 = vpop.xlane.xlu2 %5708 }
 0x7cc   : > { %4876 = vst [vmem:[#allocation1 + $0x1] ss:$9 sm:$0xff] %v4710_v33  ;;  %v10481_v33 = vpop.eup %8426 }
 0x7cd   : > { %4877 = vst [vmem:[#allocation1 + $0x2] ss:$9 sm:$0xff] %v4711_v39  ;;  %v5893_v62 = vsel %vm5661_vm6, %v10481_v33, 0.0  ;;  %v5743_v39 = vsel %vm5661_vm6, %v10426_v9, -inf }
 0x7ce   : > { %4878 = vst [vmem:[#allocation1 + $0x3] ss:$9 sm:$0xff] %v4712_v21  ;;  %v4715_v21 = vrot.slane %v10230_v49, 7  ;;  %5894 = vadd.xlane.f32.xlu1 %v5893_v62  ;;  %5744 = vmax.xlane.f32.xlu0 %v5743_v39  ;;  %v5868_v62 = vpop.xlane.xlu0 %5867  ;;  %v6263_v39 = vand.u32 %v10283_v29, %v5032_v28 }
 0x7cf   : > { %4879 = vst [vmem:[#allocation1 + $0x4] ss:$9 sm:$0xff] %v4713_v6  ;;  %v10492_v6 = vpop.eup %8428  ;;  %8434 = vrcp.f32 %v5868_v62  ;;  %v4722_v62 = vrot.slane %v10224_v2, 7 }
 0x7d0   : > { %v8431_v12 = vpop.eup %8430  ;;  %v5890_v63 = vsel %vm5661_vm6, %v10492_v6, 0.0 }
 0x7d1   : > { %5891 = vadd.xlane.f32.xlu2 %v5890_v63  ;;  %v10506_v4 = vpop.eup %8432 }
 0x7d3   : > { %v5877_v49 = vpop.xlane.xlu2 %5876 }
 0x7d4   : > { %8436 = vrcp.f32 %v5877_v49 }
 0x7d5   : > { %v8435_v28 = vpop.eup %8434 }
 0x7d6   : > { %v10489_v22 = vld [vmem:[#allocation1] sm:$0xff] }
 0x7d7   : > { %4881 = vst [vmem:[#allocation1] ss:$9 sm:$0xff] %v4714_v40  ;;  %v5985_v40 = vmul.f32 %v8431_v12, %v10309_v18  ;;  %v5773_v18 = vsub.f32 %v10311_v5, %v5709_v0  ;;  %v4721_v5 = vrot.slane %v10224_v2, 6 }
 0x7d8   : > { %4882 = vst [vmem:[#allocation1 + $0x1] ss:$9 sm:$0xff] %v4715_v21  ;;  %v5755_v21 = vsel %vm5661_vm6, %v10478_v55, -inf }
 0x7d9   : > { %4883 = vst [vmem:[#allocation1 + $0x2] ss:$9 sm:$0xff] %v10224_v2  ;;  %v6017_v38 = vpack.c.bf16 %v5985_v40, %v5985_v40  ;;  %5756 = vmax.xlane.f32.xlu0 %v5755_v21  ;;  %5750 = vmax.xlane.f32.xlu2 %v5749_v20  ;;  %v5820_v0 = vmul.f32 1.442695, %v5773_v18  ;;  %v5033_v40 = vpack.c.bf16 %v10469_v34, %v10469_v34 }
 0x7da   : > { %4884 = vst [vmem:[#allocation1 + $0x3] ss:$9 sm:$0xff] %v4716_v8  ;;  %v5896_v8 = vsel %vm5661_vm6, %v10506_v4, 0.0  ;;  %v5986_v21 = vmul.f32 %v8435_v28, %v10335_v48 }
 0x7db   : > { %4885 = vst [vmem:[#allocation1 + $0x4] ss:$9 sm:$0xff] %v4717_v25  ;;  %8061 = vmatmul.msk.bf16.vlgmr.msra.gmra.mxu2 %vm6046_vm8, %v6017_v38  ;;  %5897 = vadd.xlane.f32.xlu1 %v5896_v8  ;;  %v4720_v25 = vrot.slane %v10224_v2, 5  ;;  %v5718_v63 = vpop.xlane.xlu2 %5717  ;;  %v8437_v38 = vpop.eup %8436  ;;  %v6282_v34 = vand.u32 %v10283_v29, %v5033_v40  ;;  %v5752_v2 = vsel %vm5661_vm6, %v10459_v7, -inf  ;;  %v4724_v40 = vrot.slane %v10174_v23, 2 }
 0x7dc   : > { %6272 = vmatpush.bf16.msra.mxu2 %v6263_v39  ;;  %v5871_v8 = vpop.xlane.xlu0 %5870  ;;  %v5989_v18 = vmul.f32 %v8437_v38, %v10321_v47  ;;  %v5776_v20 = vsub.f32 %v10327_v26, %v5718_v63  ;;  %v4723_v63 = vrot.slane %v10174_v23, 1  ;;  %v4725_v38 = vrot.slane %v10174_v23, 3 }
 0x7dd   : > { %8438 = vrcp.f32 %v5871_v8 }
 0x7de   : > { %8440 = vpow2.f32 %v5820_v0 }
 0x7e2   : > { %v4886_v12 = vld [vmem:[#allocation1] sm:$0xff] }
 0x7e3   : > { %v5035_v49 = vpack.c.bf16 %v4886_v12, %v4886_v12  ;;  %4887 = vst [vmem:[#allocation1] ss:$9 sm:$0xff] %v4718_v37  ;;  %v6018_v37 = vpack.c.bf16 %v5986_v21, %v5986_v21  ;;  %5753 = vmax.xlane.f32.xlu1 %v5752_v2  ;;  %v8439_v48 = vpop.eup %8438  ;;  %v5826_v12 = vmul.f32 1.442695, %v5776_v20  ;;  %v5721_v47 = vpop.xlane.xlu2 %5720 }
 0x7e4   : > { %4888 = vst [vmem:[#allocation1 + $0x1] ss:$9 sm:$0xff] %v4719_v42  ;;  %v6021_v42 = vpack.c.bf16 %v5989_v18, %v5989_v18  ;;  %v5712_v28 = vpop.xlane.xlu0 %5711  ;;  %v10531_v26 = vpop.eup %8440 }
 0x7e5   : > { %v6320_v39 = vand.u32 %v10283_v29, %v5035_v49  ;;  %4889 = vst [vmem:[#allocation1 + $0x2] ss:$9 sm:$0xff] %v4720_v25  ;;  %8062 = vmatmul.msk.bf16.vlgmr.msra.gmra.mxu3 %vm6046_vm8, %v6018_v37  ;;  %v5034_v25 = vpack.c.bf16 %v10489_v22, %v10489_v22  ;;  %v5987_v49 = vmul.f32 %v8439_v48, %v10349_v1  ;;  %8442 = vpow2.f32 %v5826_v12  ;;  %v5724_v18 = vpop.xlane.xlu1 %5723 }
 0x7e6   : > { %4890 = vst [vmem:[#allocation1 + $0x3] ss:$9 sm:$0xff] %v4721_v5  ;;  %6291 = vmatpush.bf16.msra.mxu3 %v6282_v34  ;;  %v5774_v5 = vsub.f32 %v10337_v44, %v5712_v28  ;;  %v5777_v1 = vsub.f32 %v10351_v35, %v5721_v47  ;;  %v4726_v44 = vrot.slane %v10174_v23, 4  ;;  %v5899_v37 = vsel %vm5661_vm6, %v10531_v26, 0.0 }
 0x7e7   : > { %6329 = vmatpush.bf16.msra.mxu1 %v6320_v39  ;;  %4891 = vst [vmem:[#allocation1 + $0x4] ss:$9 sm:$0xff] %v4722_v62  ;;  %v6019_v62 = vpack.c.bf16 %v5987_v49, %v5987_v49  ;;  %v6301_v21 = vand.u32 %v10283_v29, %v5034_v25  ;;  %v4727_v25 = vrot.slane %v10174_v23, 5  ;;  %v4728_v47 = vrot.slane %v10174_v23, 6 }
 0x7e8   : > { %v5822_v22 = vmul.f32 1.442695, %v5774_v5  ;;  %v5828_v35 = vmul.f32 1.442695, %v5777_v1  ;;  %v4729_v28 = vrot.slane %v10174_v23, 7  ;;  %v4731_v1 = vrot.slane %v10146_v17, 2 }
 0x7e9   : > { %8063 = vmatmul.msk.bf16.vlgmr.msra.gmra.mxu0 %vm6046_vm8, %v6019_v62 }
 0x7ea   : > { %8444 = vpow2.f32 %v5822_v22  ;;  %6310 = vmatpush.bf16.msra.mxu0 %v6301_v21 }
 0x7eb   : > { %8065 = vmatmul.msk.bf16.vlgmr.msrb.gmra.mxu2 %vm6046_vm8, %v6021_v42  ;;  %5900 = vadd.xlane.f32.xlu1 %v5899_v37  ;;  %v10548_v34 = vpop.eup %8442  ;;  %8446 = vpow2.f32 %v5828_v35  ;;  %v5778_v42 = vsub.f32 %v10360_v60, %v5724_v18  ;;  %v5727_v5 = vpop.xlane.xlu2 %5726  ;;  %v4734_v37 = vrot.slane %v10146_v17, 5  ;;  %v4735_v18 = vrot.slane %v10146_v17, 6 }
 0x7ec   : > { %v5715_v20 = vpop.xlane.xlu0 %5714  ;;  %v5908_v49 = vsel %vm5661_vm6, %v10548_v34, 0.0 }
 0x7ed   : > { %4649 = vrot.lane.b32.xlu0 %v9928_v27, %s11293_s29  ;;  %v5775_v2 = vsub.f32 %v10332_v58, %v5715_v20  ;;  %v5830_v60 = vmul.f32 1.442695, %v5778_v42 }
 0x7ee   : > { %v4892_v0 = vld [vmem:[#allocation1] sm:$0xff] }
 0x7ef   : > { %v5036_v39 = vpack.c.bf16 %v4892_v0, %v4892_v0  ;;  %4893 = vst [vmem:[#allocation1] ss:$9 sm:$0xff] %v10174_v23  ;;  %v5824_v12 = vmul.f32 1.442695, %v5775_v2  ;;  %v5779_v23 = vsub.f32 %v10369_v36, %v5727_v5  ;;  %v4733_v36 = vrot.slane %v10146_v17, 4 }
 0x7f0   : > { %4894 = vst [vmem:[#allocation1 + $0x1] ss:$9 sm:$0xff] %v4723_v63  ;;  %v10551_v48 = vpop.eup %8444  ;;  %v4730_v63 = vrot.slane %v10146_v17, 1 }
 0x7f1   : > { %v6339_v8 = vand.u32 %v10283_v29, %v5036_v39  ;;  %4895 = vst [vmem:[#allocation1 + $0x2] ss:$9 sm:$0xff] %v4724_v40  ;;  %v5902_v27 = vsel %vm5661_vm6, %v10551_v48, 0.0  ;;  %8448 = vpow2.f32 %v5824_v12  ;;  %v10568_v40 = vpop.eup %8446  ;;  %v5832_v39 = vmul.f32 1.442695, %v5779_v23 }
 0x7f2   : > { %4896 = vst [vmem:[#allocation1 + $0x3] ss:$9 sm:$0xff] %v4725_v38  ;;  %5903 = vadd.xlane.f32.xlu2 %v5902_v27  ;;  %8450 = vpow2.f32 %v5830_v60  ;;  %v5911_v62 = vsel %vm5661_vm6, %v10568_v40, 0.0 }
 0x7f3   : > { %6348 = vmatpush.bf16.msrb.mxu2 %v6339_v8  ;;  %4897 = vst [vmem:[#allocation1 + $0x4] ss:$9 sm:$0xff] %v4726_v44  ;;  %5909 = vadd.xlane.f32.xlu1 %v5908_v49  ;;  %v4732_v44 = vrot.slane %v10146_v17, 3  ;;  %8452 = vpow2.f32 %v5832_v39  ;;  %v4736_v49 = vrot.slane %v10146_v17, 7 }
 0x7f4   : > { %v10566_v0 = vpop.xlane.xlu0 %5729 }
 0x7f5   : > { %4651 = vrot.lane.b32.xlu0 %v9981_v61, %s11293_s29 }
 0x7f7   : > { %v10571_v38 = vpop.eup %8448 }
 0x7f8   : > { %v5905_v61 = vsel %vm5661_vm6, %v10571_v38, 0.0  ;;  %v10579_v21 = vpop.eup %8450 }
 0x7f9   : > { %v5914_v20 = vsel %vm5661_vm6, %v10579_v21, 0.0  ;;  %v10590_v12 = vpop.eup %8452 }
 0x7fa   : > { %v10560_v58 = vld [vmem:[#allocation1] sm:$0xff]  ;;  %5906 = vadd.xlane.f32.xlu2 %v5905_v61 }
 0x7fb   : > { %4899 = vst [vmem:[#allocation1] ss:$9 sm:$0xff] %v4727_v25  ;;  %5912 = vadd.xlane.f32.xlu1 %v5911_v62  ;;  %v4740_v62 = vrot.slane %v10253_v11, 4 }
 0x7fc   : > { %4900 = vst [vmem:[#allocation1 + $0x1] ss:$9 sm:$0xff] %v4728_v47  ;;  %v5733_v22 = vpop.xlane.xlu0 %5732  ;;  %v4737_v47 = vrot.slane %v10253_v11, 1 }
 0x7fd   : > { %4901 = vst [vmem:[#allocation1 + $0x2] ss:$9 sm:$0xff] %v4729_v28  ;;  %v5781_v35 = vsub.f32 %v10389_v31, %v5733_v22  ;;  %v5917_v31 = vsel %vm5661_vm6, %v10590_v12, 0.0  ;;  %v4738_v28 = vrot.slane %v10253_v11, 2  ;;  %v4741_v22 = vrot.slane %v10253_v11, 5 }
 0x7fe   : > { %4902 = vst [vmem:[#allocation1 + $0x3] ss:$9 sm:$0xff] %v10146_v17 }
 0x7ff   : > { %4903 = vst [vmem:[#allocation1 + $0x4] ss:$9 sm:$0xff] %v4730_v63  ;;  %v5836_v2 = vmul.f32 1.442695, %v5781_v35  ;;  %v4739_v63 = vrot.slane %v10253_v11, 3 }
 0x801   : > { %8454 = vpow2.f32 %v5836_v2 }
 0x803   : > { %5915 = vadd.xlane.f32.xlu1 %v5914_v20 }
 0x804   : > { %v5736_v42 = vpop.xlane.xlu1 %5735 }
 0x805   : > { %v5782_v25 = vsub.f32 %v10396_v13, %v5736_v42 }
 0x806   : > { %v10582_v8 = vld [vmem:[#allocation1] sm:$0xff] }
 0x807   : > { %4905 = vst [vmem:[#allocation1] ss:$9 sm:$0xff] %v4731_v1  ;;  %v5838_v60 = vmul.f32 1.442695, %v5782_v25  ;;  %v10602_v13 = vpop.eup %8454  ;;  %v5037_v25 = vpack.c.bf16 %v10560_v58, %v10560_v58  ;;  %v4748_v58 = vrot.slane %v10271_v16, 5 }
 0x808   : > { %4906 = vst [vmem:[#allocation1 + $0x1] ss:$9 sm:$0xff] %v4732_v44  ;;  %v5923_v23 = vsel %vm5661_vm6, %v10602_v13, 0.0 }
 0x809   : > { %4907 = vst [vmem:[#allocation1 + $0x2] ss:$9 sm:$0xff] %v4733_v36  ;;  %8456 = vpow2.f32 %v5838_v60 }
 0x80a   : > { %4908 = vst [vmem:[#allocation1 + $0x3] ss:$9 sm:$0xff] %v4734_v37  ;;  %v4743_v37 = vrot.slane %v10253_v11, 7 }
 0x80b   : > { %4909 = vst [vmem:[#allocation1 + $0x4] ss:$9 sm:$0xff] %v4735_v18  ;;  %5918 = vadd.xlane.f32.xlu1 %v5917_v31 }
 0x80d   : > { %v10610_v39 = vpop.f32.mrf.mxu3 }
 0x80f   : > { %v5742_v17 = vpop.xlane.xlu1 %5741  ;;  %v10612_v1 = vpop.eup %8456 }
 0x810   : > { %v5784_v5 = vsub.f32 %v10411_v46, %v5742_v17  ;;  %v4742_v46 = vrot.slane %v10253_v11, 6  ;;  %v5926_v35 = vsel %vm5661_vm6, %v10612_v1, 0.0 }
 0x812   : > { %v10596_v27 = vld [vmem:[#allocation1] sm:$0xff]  ;;  %v5842_v61 = vmul.f32 1.442695, %v5784_v5  ;;  %4647 = vrot.lane.b32.xlu2 %v9941_v10, %s11293_s29  ;;  %v5880_v10 = vpop.xlane.xlu2 %5879  ;;  %v4747_v5 = vrot.slane %v10271_v16, 4  ;;  %s11179_s29 = scalar_lea.vmem %s11252_s26, %s11295_s10 }
 0x813   : > { %4911 = vst [vmem:[#allocation1] ss:$9 sm:$0xff] %v4736_v49  ;;  %5924 = vadd.xlane.f32.xlu1 %v5923_v23  ;;  %v4744_v49 = vrot.slane %v10271_v16, 1  ;;  %v6358_v23 = vand.u32 %v10283_v29, %v5037_v25 }
 0x814   : > { %4912 = vst [vmem:[#allocation1 + $0x1] ss:$9 sm:$0xff] %v10253_v11  ;;  %8458 = vpow2.f32 %v5842_v61  ;;  %v10618_v36 = vpop.f32.mrf.mxu1  ;;  %v5038_v61 = vpack.c.bf16 %v10582_v8, %v10582_v8 }
 0x815   : > { %4913 = vst [vmem:[#allocation1 + $0x2] ss:$9 sm:$0xff] %v4737_v47  ;;  %8460 = vrcp.f32 %v5880_v10  ;;  %v6067_v2 = vpop.f32.mrf.mxu3 }
 0x816   : > { %4914 = vst [vmem:[#allocation1 + $0x3] ss:$9 sm:$0xff] %v4738_v28  ;;  %v4745_v28 = vrot.slane %v10271_v16, 2  ;;  %v4749_v2 = vrot.slane %v10271_v16, 6 }
 0x817   : > { %4915 = vst [vmem:[#allocation1 + $0x4] ss:$9 sm:$0xff] %v4739_v63  ;;  %v4746_v63 = vrot.slane %v10271_v16, 3 }
 0x81a   : > { %v10623_v18 = vpop.eup %8458 }
 0x81b   : > { %5927 = vadd.xlane.f32.xlu1 %v5926_v35  ;;  %v5932_v20 = vsel %vm5661_vm6, %v10623_v18, 0.0  ;;  %v8461_v11 = vpop.eup %8460 }
 0x81c   : > { %v6105_v42 = vpop.f32.mrf.mxu1  ;;  %v5990_v31 = vmul.f32 %v8461_v11, %v10422_v43  ;;  %v4750_v11 = vrot.slane %v10271_v16, 7 }
 0x81e   : > { %v10615_v44 = vld [vmem:[#allocation1] sm:$0xff]  ;;  %v5883_v47 = vpop.xlane.xlu0 %5882  ;;  %v6022_v17 = vpack.c.bf16 %v5990_v31, %v5990_v31 }
 0x81f   : > { %4917 = vst [vmem:[#allocation1] ss:$9 sm:$0xff] %v4740_v62  ;;  %5933 = vadd.xlane.f32.xlu0 %v5932_v20  ;;  %8462 = vrcp.f32 %v5883_v47  ;;  %v5780_v62 = vsub.f32 %v10377_v15, %v10566_v0  ;;  %v6377_v20 = vand.u32 %v10283_v29, %v5038_v61  ;;  %v4751_v15 = vrot.slane %v10163_v24, 1 }
 0x820   : > { %4918 = vst [vmem:[#allocation1 + $0x1] ss:$9 sm:$0xff] %v4741_v22  ;;  %8066 = vmatmul.msk.bf16.vlgmr.msrb.gmra.mxu3 %vm6046_vm8, %v6022_v17  ;;  %v5039_v47 = vpack.c.bf16 %v10596_v27, %v10596_v27  ;;  %v4755_v61 = vrot.slane %v10163_v24, 5  ;;  %v4756_v27 = vrot.slane %v10163_v24, 6 }
 0x821   : > { %4919 = vst [vmem:[#allocation1 + $0x2] ss:$9 sm:$0xff] %v4742_v46  ;;  %6367 = vmatpush.bf16.msrb.mxu3 %v6358_v23  ;;  %v5834_v42 = vmul.f32 1.442695, %v5780_v62  ;;  %v4754_v23 = vrot.slane %v10163_v24, 4 }
 0x822   : > { %4920 = vst [vmem:[#allocation1 + $0x3] ss:$9 sm:$0xff] %v4743_v37 }
 0x823   : > { %4921 = vst [vmem:[#allocation1 + $0x4] ss:$9 sm:$0xff] %v10271_v16 }
 0x825   : > { %v8463_v43 = vpop.eup %8462 }
 0x826   : > { %v5991_v22 = vmul.f32 %v8463_v43, %v10430_v14  ;;  %v5739_v46 = vpop.xlane.xlu0 %5738 }
 0x827   : > { %v5783_v37 = vsub.f32 %v10402_v45, %v5739_v46  ;;  %v4752_v45 = vrot.slane %v10163_v24, 2  ;;  %v6396_v46 = vand.u32 %v10283_v29, %v5039_v47 }
 0x828   : > { %v6023_v10 = vpack.c.bf16 %v5991_v22, %v5991_v22 }
 0x829   : > { %v5840_v35 = vmul.f32 1.442695, %v5783_v37 }
 0x82a   : > { %v10633_v60 = vld [vmem:[#allocation1] sm:$0xff]  ;;  %8067 = vmatmul.msk.bf16.vlgmr.msrb.gmra.mxu0 %vm6046_vm8, %v6023_v10  ;;  %v5040_v10 = vpack.c.bf16 %v10615_v44, %v10615_v44  ;;  %v4758_v44 = vrot.slane %v10187_v30, 1 }
 0x82b   : > { %4923 = vst [vmem:[#allocation1] ss:$9 sm:$0xff] %v4744_v49  ;;  %8464 = vpow2.f32 %v5840_v35  ;;  %6386 = vmatpush.bf16.msrb.mxu0 %v6377_v20 }
 0x82c   : > { %4924 = vst [vmem:[#allocation1 + $0x1] ss:$9 sm:$0xff] %v4745_v28  ;;  %8466 = vpow2.f32 %v5834_v42  ;;  %v4753_v28 = vrot.slane %v10163_v24, 3 }
 0x82d   : > { %4925 = vst [vmem:[#allocation1 + $0x2] ss:$9 sm:$0xff] %v4746_v63  ;;  %v5748_v63 = vpop.xlane.xlu1 %5747 }
 0x82e   : > { %4926 = vst [vmem:[#allocation1 + $0x3] ss:$9 sm:$0xff] %v4747_v5  ;;  %v5886_v14 = vpop.xlane.xlu0 %5885 }
 0x82f   : > { %4927 = vst [vmem:[#allocation1 + $0x4] ss:$9 sm:$0xff] %v4748_v58  ;;  %8468 = vrcp.f32 %v5886_v14 }
 0x831   : > { %v10655_v0 = vpop.eup %8464 }
 0x832   : > { %v5929_v25 = vsel %vm5661_vm6, %v10655_v0, 0.0  ;;  %v10661_v49 = vpop.eup %8466 }
 0x833   : > { %5930 = vadd.xlane.f32.xlu1 %v5929_v25  ;;  %v5920_v58 = vsel %vm5661_vm6, %v10661_v49, 0.0 }
 0x835   : > { %v8469_v31 = vpop.eup %8468 }
 0x836   : > { %v10650_v8 = vld [vmem:[#allocation1] sm:$0xff]  ;;  %v10657_v16 = vpop.f32.mrf.mxu0  ;;  %v5992_v17 = vmul.f32 %v8469_v31, %v10457_v59  ;;  %v5889_v5 = vpop.xlane.xlu0 %5888  ;;  %v4757_v59 = vrot.slane %v10163_v24, 7  ;;  %v4759_v31 = vrot.slane %v10187_v30, 2 }
 0x837   : > { %4929 = vst [vmem:[#allocation1] ss:$9 sm:$0xff] %v4749_v2  ;;  %8470 = vrcp.f32 %v5889_v5 }
 0x838   : > { %4930 = vst [vmem:[#allocation1 + $0x1] ss:$9 sm:$0xff] %v4750_v11  ;;  %v6024_v62 = vpack.c.bf16 %v5992_v17, %v5992_v17 }
 0x839   : > { %4931 = vst [vmem:[#allocation1 + $0x2] ss:$9 sm:$0xff] %v10163_v24  ;;  %v5786_v24 = vsub.f32 %v10439_v19, %v5748_v63  ;;  %v4760_v19 = vrot.slane %v10187_v30, 3  ;;  %v4761_v63 = vrot.slane %v10187_v30, 4 }
 0x83a   : > { %4932 = vst [vmem:[#allocation1 + $0x3] ss:$9 sm:$0xff] %v4751_v15  ;;  %8068 = vmatmul.msk.bf16.vlgmr.msrb.gmra.mxu1 %vm6046_vm8, %v6024_v62 }
 0x83b   : > { %4933 = vst [vmem:[#allocation1 + $0x4] ss:$9 sm:$0xff] %v4752_v45  ;;  %5921 = vadd.xlane.f32.xlu2 %v5920_v58  ;;  %6405 = vmatpush.bf16.msrb.mxu1 %v6396_v46  ;;  %v6415_v45 = vand.u32 %v10283_v29, %v5040_v10  ;;  %v5846_v47 = vmul.f32 1.442695, %v5786_v24  ;;  %v5041_v46 = vpack.c.bf16 %v10633_v60, %v10633_v60  ;;  %v4763_v24 = vrot.slane %v10187_v30, 6 }
 0x83c   : > { %v4764_v60 = vrot.slane %v10187_v30, 7 }
 0x83d   : > { %v8471_v37 = vpop.eup %8470 }
 0x83e   : > { %v6086_v22 = vpop.f32.mrf.mxu0  ;;  %v5993_v35 = vmul.f32 %v8471_v37, %v10465_v32 }
 0x840   : > { %v6025_v11 = vpack.c.bf16 %v5993_v35, %v5993_v35 }
 0x841   : > { %v5895_v20 = vpop.xlane.xlu1 %5894  ;;  %v5745_v2 = vpop.xlane.xlu0 %5744 }
 0x842   : > { %v10670_v43 = vld [vmem:[#allocation1] sm:$0xff]  ;;  %8472 = vrcp.f32 %v5895_v20  ;;  %v5785_v42 = vsub.f32 %v10426_v9, %v5745_v2  ;;  %v10683_v14 = vpop.f32.mrf.mxu1  ;;  %8069 = vmatmul.msk.bf16.vlgmr.msra.gmra.mxu2 %vm6046_vm8, %v6025_v11  ;;  %v4762_v20 = vrot.slane %v10187_v30, 5 }
 0x843   : > { %4935 = vst [vmem:[#allocation1] ss:$9 sm:$0xff] %v4753_v28  ;;  %6424 = vmatpush.bf16.msra.mxu2 %v6415_v45  ;;  %v5042_v28 = vpack.c.bf16 %v10650_v8, %v10650_v8 }
 0x844   : > { %4936 = vst [vmem:[#allocation1 + $0x1] ss:$9 sm:$0xff] %v4754_v23  ;;  %v5844_v15 = vmul.f32 1.442695, %v5785_v42  ;;  %v5892_v25 = vpop.xlane.xlu2 %5891  ;;  %v6434_v42 = vand.u32 %v10283_v29, %v5041_v46 }
 0x845   : > { %4937 = vst [vmem:[#allocation1 + $0x2] ss:$9 sm:$0xff] %v4755_v61  ;;  %v6453_v62 = vand.u32 %v10283_v29, %v5042_v28 }
 0x846   : > { %4938 = vst [vmem:[#allocation1 + $0x3] ss:$9 sm:$0xff] %v4756_v27  ;;  %8474 = vpow2.f32 %v5844_v15  ;;  %v4765_v15 = vrot.slane %v10204_v3, 1 }
 0x847   : > { %4939 = vst [vmem:[#allocation1 + $0x4] ss:$9 sm:$0xff] %v4757_v59  ;;  %8476 = vrcp.f32 %v5892_v25 }
 0x848   : > { %v8473_v9 = vpop.eup %8472  ;;  %8478 = vpow2.f32 %v5846_v47 }
 0x849   : > { %v5995_v17 = vmul.f32 %v8473_v9, %v10481_v33 }
 0x84a   : > { %v6181_v22 = vpop.f32.mrf.mxu1 }
 0x84b   : > { %v6027_v23 = vpack.c.bf16 %v5995_v17, %v5995_v17  ;;  %v4770_v22 = vrot.slane %v10204_v3, 6 }
 0x84c   : > { %v5757_v5 = vpop.xlane.xlu0 %5756  ;;  %v10696_v58 = vpop.eup %8474 }
 0x84d   : > { %v5789_v61 = vsub.f32 %v10478_v55, %v5757_v5  ;;  %v8477_v27 = vpop.eup %8476  ;;  %8071 = vmatmul.msk.bf16.vlgmr.msra.gmra.mxu0 %vm6046_vm8, %v6027_v23  ;;  %v5935_v33 = vsel %vm5661_vm6, %v10696_v58, 0.0  ;;  %v5751_v37 = vpop.xlane.xlu2 %5750  ;;  %v4767_v23 = vrot.slane %v10204_v3, 3 }
 0x84e   : > { %v10687_v32 = vld [vmem:[#allocation1] sm:$0xff]  ;;  %v5898_v8 = vpop.xlane.xlu1 %5897  ;;  %v5994_v59 = vmul.f32 %v8477_v27, %v10492_v6  ;;  %6462 = vmatpush.bf16.msra.mxu0 %v6453_v62  ;;  %5936 = vadd.xlane.f32.xlu1 %v5935_v33  ;;  %v5787_v55 = vsub.f32 %v10443_v41, %v5751_v37  ;;  %v10709_v11 = vpop.eup %8478  ;;  %v4768_v62 = vrot.slane %v10204_v3, 4  ;;  %v4769_v27 = vrot.slane %v10204_v3, 5 }
 0x84f   : > { %4941 = vst [vmem:[#allocation1] ss:$9 sm:$0xff] %v10187_v30  ;;  %8480 = vrcp.f32 %v5898_v8  ;;  %v5852_v35 = vmul.f32 1.442695, %v5789_v61  ;;  %v5938_v25 = vsel %vm5661_vm6, %v10709_v11, 0.0 }
 0x850   : > { %4942 = vst [vmem:[#allocation1 + $0x1] ss:$9 sm:$0xff] %v4758_v44  ;;  %v6026_v10 = vpack.c.bf16 %v5994_v59, %v5994_v59  ;;  %v5848_v2 = vmul.f32 1.442695, %v5787_v55  ;;  %v5043_v44 = vpack.c.bf16 %v10670_v43, %v10670_v43 }
 0x851   : > { %4943 = vst [vmem:[#allocation1 + $0x2] ss:$9 sm:$0xff] %v4759_v31 }
 0x852   : > { %4944 = vst [vmem:[#allocation1 + $0x3] ss:$9 sm:$0xff] %v4760_v19  ;;  %8070 = vmatmul.msk.bf16.vlgmr.msra.gmra.mxu3 %vm6046_vm8, %v6026_v10  ;;  %8482 = vpow2.f32 %v5848_v2  ;;  %v5044_v10 = vpack.c.bf16 %v10687_v32, %v10687_v32 }
 0x853   : > { %4945 = vst [vmem:[#allocation1 + $0x4] ss:$9 sm:$0xff] %v4761_v63  ;;  %6443 = vmatpush.bf16.msra.mxu3 %v6434_v42  ;;  %8484 = vpow2.f32 %v5852_v35  ;;  %v6472_v63 = vand.u32 %v10283_v29, %v5043_v44 }
 0x855   : > { %v8481_v41 = vpop.eup %8480 }
 0x856   : > { %v5754_v45 = vpop.xlane.xlu1 %5753  ;;  %v5996_v31 = vmul.f32 %v8481_v41, %v10506_v4  ;;  %5939 = vadd.xlane.f32.xlu1 %v5938_v25  ;;  %v6491_v41 = vand.u32 %v10283_v29, %v5044_v10 }
 0x857   : > { %v5788_v30 = vsub.f32 %v10459_v7, %v5754_v45  ;;  %v4766_v7 = vrot.slane %v10204_v3, 2 }
 0x858   : > { %v6028_v9 = vpack.c.bf16 %v5996_v31, %v5996_v31  ;;  %v10724_v47 = vpop.eup %8482 }
 0x859   : > { %v5850_v19 = vmul.f32 1.442695, %v5788_v30  ;;  %v10729_v17 = vpop.eup %8484  ;;  %v5941_v4 = vsel %vm5661_vm6, %v10724_v47, 0.0 }
 0x85a   : > { %v10713_v6 = vld [vmem:[#allocation1] sm:$0xff]  ;;  %8072 = vmatmul.msk.bf16.vlgmr.msra.gmra.mxu1 %vm6046_vm8, %v6028_v9  ;;  %5942 = vadd.xlane.f32.xlu2 %v5941_v4  ;;  %v5947_v5 = vsel %vm5661_vm6, %v10729_v17, 0.0 }
 0x85b   : > { %4947 = vst [vmem:[#allocation1] ss:$9 sm:$0xff] %v4762_v20  ;;  %6481 = vmatpush.bf16.msra.mxu1 %v6472_v63  ;;  %8486 = vpow2.f32 %v5850_v19  ;;  %v5045_v9 = vpack.c.bf16 %v10713_v6, %v10713_v6 }
 0x85c   : > { %4948 = vst [vmem:[#allocation1 + $0x1] ss:$9 sm:$0xff] %v4763_v24  ;;  %v4771_v24 = vrot.slane %v10204_v3, 7 }
 0x85d   : > { %4949 = vst [vmem:[#allocation1 + $0x2] ss:$9 sm:$0xff] %v4764_v60 }
 0x85e   : > { %4950 = vst [vmem:[#allocation1 + $0x3] ss:$9 sm:$0xff] %v10204_v3  ;;  %v10726_v28 = vpop.f32.mrf.mxu2  ;;  %v5901_v43 = vpop.xlane.xlu1 %5900  ;;  %5948 = vadd.xlane.f32.xlu1 %v5947_v5  ;;  %v6510_v5 = vand.u32 %v10283_v29, %v5045_v9 }
 0x85f   : > { %4951 = vst [vmem:[#allocation1 + $0x4] ss:$9 sm:$0xff] %v4765_v15  ;;  %8488 = vrcp.f32 %v5901_v43 }
 0x861   : > { %v10743_v33 = vpop.eup %8486 }
 0x862   : > { %v5944_v55 = vsel %vm5661_vm6, %v10743_v33, 0.0 }
 0x865   : > { %v8489_v59 = vpop.eup %8488  ;;  %v5904_v20 = vpop.xlane.xlu2 %5903 }
 0x866   : > { %v10738_v61 = vld [vmem:[#allocation1] sm:$0xff]  ;;  %v6124_v8 = vpop.f32.mrf.mxu2  ;;  %v5910_v37 = vpop.xlane.xlu1 %5909  ;;  %v5997_v35 = vmul.f32 %v8489_v59, %v10531_v26  ;;  %5945 = vadd.xlane.f32.xlu1 %v5944_v55 }
 0x867   : > { %4953 = vst [vmem:[#allocation1] ss:$9 sm:$0xff] %v4766_v7  ;;  %v10752_v2 = vpop.f32.mrf.mxu0  ;;  %8490 = vrcp.f32 %v5910_v37 }
 0x868   : > { %4954 = vst [vmem:[#allocation1 + $0x1] ss:$9 sm:$0xff] %v4767_v23  ;;  %v10745_v46 = vpop.f32.mrf.mxu3  ;;  %v6029_v42 = vpack.c.bf16 %v5997_v35, %v5997_v35  ;;  %8492 = vrcp.f32 %v5904_v20 }
 0x869   : > { %4955 = vst [vmem:[#allocation1 + $0x2] ss:$9 sm:$0xff] %v4768_v62 }
 0x86a   : > { %4956 = vst [vmem:[#allocation1 + $0x3] ss:$9 sm:$0xff] %v4769_v27  ;;  %8073 = vmatmul.msk.bf16.vlgmr.msrb.gmra.mxu2 %vm6046_vm8, %v6029_v42 }
 0x86b   : > { %4957 = vst [vmem:[#allocation1 + $0x4] ss:$9 sm:$0xff] %v4770_v22  ;;  %6500 = vmatpush.bf16.msrb.mxu2 %v6491_v41 }
 0x86d   : > { %v8491_v45 = vpop.eup %8490  ;;  %v5907_v25 = vpop.xlane.xlu2 %5906 }
 0x86e   : > { %v10755_v60 = vpop.f32.mrf.mxu2  ;;  %v5913_v26 = vpop.xlane.xlu1 %5912  ;;  %v6000_v3 = vmul.f32 %v8491_v45, %v10548_v34 }
 0x86f   : > { %8494 = vrcp.f32 %v5913_v26  ;;  %v6162_v44 = vpop.f32.mrf.mxu0  ;;  %v8493_v30 = vpop.eup %8492 }
 0x870   : > { %v6143_v32 = vpop.f32.mrf.mxu3  ;;  %8496 = vrcp.f32 %v5907_v25  ;;  %v5998_v19 = vmul.f32 %v8493_v30, %v10551_v48  ;;  %v6032_v63 = vpack.c.bf16 %v6000_v3, %v6000_v3  ;;  %v5046_v48 = vpack.c.bf16 %v10738_v61, %v10738_v61 }
 0x872   : > { %v4958_v15 = vld [vmem:[#allocation1] sm:$0xff]  ;;  %v6030_v7 = vpack.c.bf16 %v5998_v19, %v5998_v19  ;;  %8076 = vmatmul.msk.bf16.vlgmr.msrb.gmra.mxu1 %vm6046_vm8, %v6032_v63  ;;  %v6529_v35 = vand.u32 %v10283_v29, %v5046_v48 }
 0x873   : > { %4959 = vst [vmem:[#allocation1] ss:$9 sm:$0xff] %v4771_v24  ;;  %v5047_v31 = vpack.c.bf16 %v4958_v15, %v4958_v15 }
 0x874   : > { %8074 = vmatmul.msk.bf16.vlgmr.msrb.gmra.mxu3 %vm6046_vm8, %v6030_v7 }
 0x875   : > { %v6548_v43 = vand.u32 %v10283_v29, %v5047_v31  ;;  %v8495_v23 = vpop.eup %8494  ;;  %6519 = vmatpush.bf16.msrb.mxu3 %v6510_v5  ;;  %v4648_v22 = vpop.permute.xlu2 %4647 }
 0x876   : > { %v6200_v4 = vpop.f32.mrf.mxu2  ;;  %v8497_v34 = vpop.eup %8496  ;;  %v6001_v62 = vmul.f32 %v8495_v23, %v10568_v40  ;;  %v4772_v59 = vrot.slane %v4648_v22, 1  ;;  %v4773_v37 = vrot.slane %v4648_v22, 2  ;;  %v4774_v55 = vrot.slane %v4648_v22, 3  ;;  %4960 = vst [vmem:[#allocation1 + $0x1] ss:$9 sm:$0xff] %v4648_v22 }
 0x877   : > { %6557 = vmatpush.bf16.msrb.mxu1 %v6548_v43  ;;  %v5916_v6 = vpop.xlane.xlu1 %5915  ;;  %v5999_v27 = vmul.f32 %v8497_v34, %v10571_v38  ;;  %v4775_v42 = vrot.slane %v4648_v22, 4  ;;  %v4776_v24 = vrot.slane %v4648_v22, 5  ;;  %v4777_v15 = vrot.slane %v4648_v22, 6  ;;  %v4650_v31 = vpop.permute.xlu0 %4649 }
 0x878   : > { %8498 = vrcp.f32 %v5916_v6  ;;  %v6033_v8 = vpack.c.bf16 %v6001_v62, %v6001_v62  ;;  %4961 = vst [vmem:[#allocation1 + $0x2] ss:$9 sm:$0xff] %v4772_v59  ;;  %v4778_v45 = vrot.slane %v4648_v22, 7  ;;  %v4779_v9 = vrot.slane %v4650_v31, 1 }
 0x879   : > { %v6031_v10 = vpack.c.bf16 %v5999_v27, %v5999_v27  ;;  %4962 = vst [vmem:[#allocation1 + $0x3] ss:$9 sm:$0xff] %v4773_v37  ;;  %v4780_v4 = vrot.slane %v4650_v31, 2  ;;  %v4782_v23 = vrot.slane %v4650_v31, 4  ;;  %v4783_v34 = vrot.slane %v4650_v31, 5 }
 0x87a   : > { %8077 = vmatmul.msk.bf16.vlgmr.msra.gmra.mxu2 %vm6046_vm8, %v6033_v8  ;;  %4963 = vst [vmem:[#allocation1 + $0x4] ss:$9 sm:$0xff] %v4774_v55  ;;  %v4784_v27 = vrot.slane %v4650_v31, 6  ;;  %v4785_v8 = vrot.slane %v4650_v31, 7 }
 0x87b   : > { %8075 = vmatmul.msk.bf16.vlgmr.msrb.gmra.mxu0 %vm6046_vm8, %v6031_v10 }
 0x87c   : > { %6538 = vmatpush.bf16.msrb.mxu0 %v6529_v35 }
 0x87e   : > { %v8499_v40 = vpop.eup %8498 }
 0x87f   : > { %v6002_v38 = vmul.f32 %v8499_v40, %v10579_v21  ;;  %v5919_v61 = vpop.xlane.xlu1 %5918  ;;  %v4652_v22 = vpop.permute.xlu0 %4651 }
 0x880   : > { %8500 = vrcp.f32 %v5919_v61  ;;  %v4786_v55 = vrot.slane %v4652_v22, 1  ;;  %v4787_v10 = vrot.slane %v4652_v22, 2  ;;  %v4788_v40 = vrot.slane %v4652_v22, 3 }
 0x881   : > { %v6034_v20 = vpack.c.bf16 %v6002_v38, %v6002_v38  ;;  %v4964_v41 = vld [vmem:[#allocation1] sm:$0xff]  ;;  %v4790_v61 = vrot.slane %v4652_v22, 5 }
 0x882   : > { %v5048_v32 = vpack.c.bf16 %v4964_v41, %v4964_v41  ;;  %4965 = vst [vmem:[#allocation1] ss:$9 sm:$0xff] %v4775_v42 }
 0x883   : > { %4966 = vst [vmem:[#allocation1 + $0x1] ss:$9 sm:$0xff] %v4776_v24  ;;  %v4792_v24 = vrot.slane %v4652_v22, 7 }
 0x884   : > { %8078 = vmatmul.msk.bf16.vlgmr.msra.gmra.mxu3 %vm6046_vm8, %v6034_v20  ;;  %v6567_v44 = vand.u32 %v10283_v29, %v5048_v32  ;;  %4967 = vst [vmem:[#allocation1 + $0x2] ss:$9 sm:$0xff] %v4777_v15  ;;  %v4791_v20 = vrot.slane %v4652_v22, 6 }
 0x885   : > { %4968 = vst [vmem:[#allocation1 + $0x3] ss:$9 sm:$0xff] %v4778_v45 }
 0x886   : > { %v8501_v26 = vpop.eup %8500  ;;  %6576 = vmatpush.bf16.msra.mxu2 %v6567_v44  ;;  %4969 = vst [vmem:[#allocation1 + $0x4] ss:$9 sm:$0xff] %v4650_v31 }
 0x887   : > { %v6003_v25 = vmul.f32 %v8501_v26, %v10590_v12  ;;  %v5925_v21 = vpop.xlane.xlu1 %5924  ;;  %v4781_v12 = vrot.slane %v4650_v31, 3 }
 0x888   : > { %8502 = vrcp.f32 %v5925_v21 }
 0x889   : > { %v6035_v30 = vpack.c.bf16 %v6003_v25, %v6003_v25 }
 0x88b   : > { %8079 = vmatmul.msk.bf16.vlgmr.msra.gmra.mxu0 %vm6046_vm8, %v6035_v30 }
 0x88d   : > { %v4970_v7 = vld [vmem:[#allocation1] sm:$0xff] }
 0x88e   : > { %v8503_v3 = vpop.eup %8502  ;;  %v5049_v5 = vpack.c.bf16 %v4970_v7, %v4970_v7  ;;  %4971 = vst [vmem:[#allocation1] ss:$9 sm:$0xff] %v4779_v9  ;;  %v3953_v7 = vld [vmem:[%s11242_s16 + $0x4] sm:$0xf] }
 0x88f   : > { %v6005_v19 = vmul.f32 %v8503_v3, %v10602_v13  ;;  %v5928_v63 = vpop.xlane.xlu1 %5927  ;;  %4972 = vst [vmem:[#allocation1 + $0x1] ss:$9 sm:$0xff] %v4780_v4 }
 0x890   : > { %8504 = vrcp.f32 %v5928_v63  ;;  %v6586_v62 = vand.u32 %v10283_v29, %v5049_v5  ;;  %4973 = vst [vmem:[#allocation1 + $0x2] ss:$9 sm:$0xff] %v4781_v12  ;;  %v6839_v12 = vsel %vm3743_vm5, %v3953_v7, 0 }
 0x891   : > { %v6037_v43 = vpack.c.bf16 %v6005_v19, %v6005_v19  ;;  %4974 = vst [vmem:[#allocation1 + $0x3] ss:$9 sm:$0xff] %v4782_v23 }
 0x892   : > { %6595 = vmatpush.bf16.msra.mxu3 %v6586_v62  ;;  %4975 = vst [vmem:[#allocation1 + $0x4] ss:$9 sm:$0xff] %v4783_v34 }
 0x893   : > { %8081 = vmatmul.msk.bf16.vlgmr.msrb.gmra.mxu2 %vm6046_vm8, %v6037_v43 }
 0x896   : > { %v8505_v13 = vpop.eup %8504 }
 0x897   : > { %v6006_v6 = vmul.f32 %v8505_v13, %v10612_v1  ;;  %v4789_v1 = vrot.slane %v4652_v22, 4 }
 0x899   : > { %v6038_v48 = vpack.c.bf16 %v6006_v6, %v6006_v6  ;;  %v4976_v59 = vld [vmem:[#allocation1] sm:$0xff] }
 0x89a   : > { %v5050_v37 = vpack.c.bf16 %v4976_v59, %v4976_v59  ;;  %4977 = vst [vmem:[#allocation1] ss:$9 sm:$0xff] %v4784_v27 }
 0x89b   : > { %8082 = vmatmul.msk.bf16.vlgmr.msrb.gmra.mxu3 %vm6046_vm8, %v6038_v48  ;;  %4978 = vst [vmem:[#allocation1 + $0x1] ss:$9 sm:$0xff] %v4785_v8 }
 0x89c   : > { %v6605_v35 = vand.u32 %v10283_v29, %v5050_v37  ;;  %4979 = vst [vmem:[#allocation1 + $0x2] ss:$9 sm:$0xff] %v4652_v22 }
 0x89d   : > { %4980 = vst [vmem:[#allocation1 + $0x3] ss:$9 sm:$0xff] %v4786_v55 }
 0x89e   : > { %6614 = vmatpush.bf16.msra.mxu0 %v6605_v35  ;;  %4981 = vst [vmem:[#allocation1 + $0x4] ss:$9 sm:$0xff] %v4787_v10 }
 0x8a3   : > { %v6217_v42 = vpop.f32.mrf.mxu3 }
 0x8a5   : > { %v4982_v38 = vld [vmem:[#allocation1] sm:$0xff] }
 0x8a6   : > { %4983 = vst [vmem:[#allocation1] ss:$9 sm:$0xff] %v4788_v40  ;;  %v5931_v41 = vpop.xlane.xlu1 %5930 }
 0x8a7   : > { %4984 = vst [vmem:[#allocation1 + $0x1] ss:$9 sm:$0xff] %v4789_v1  ;;  %8506 = vrcp.f32 %v5931_v41  ;;  %v6236_v15 = vpop.f32.mrf.mxu0 }
 0x8a8   : > { %4985 = vst [vmem:[#allocation1 + $0x2] ss:$9 sm:$0xff] %v4790_v61 }
 0x8a9   : > { %4986 = vst [vmem:[#allocation1 + $0x3] ss:$9 sm:$0xff] %v4791_v20 }
 0x8aa   : > { %4987 = vst [vmem:[#allocation1 + $0x4] ss:$9 sm:$0xff] %v4792_v24 }
 0x8ab   : > { %6694 = vst [vmem:[#allocation1 + $0x10] ss:$2 sm:$0xff] %v10618_v36  ;;  %v6219_v45 = vpop.f32.mrf.mxu3 }
 0x8ac   : > { %6696 = vst [vmem:[#allocation1 + $0x11] ss:$2 sm:$0xff] %v10726_v28 }
 0x8ad   : > { %6698 = vst [vmem:[#allocation1 + $0x20] ss:$2 sm:$0xff] %v10745_v46  ;;  %v8507_v26 = vpop.eup %8506 }
 0x8ae   : > { %v5922_v32 = vpop.xlane.xlu2 %5921  ;;  %6700 = vst [vmem:[#allocation1 + $0x21] ss:$2 sm:$0xff] %v10752_v2  ;;  %v6007_v25 = vmul.f32 %v8507_v26, %v10655_v0  ;;  %v5051_v2 = vpack.c.bf16 %v4982_v38, %v4982_v38 }
 0x8af   : > { %8508 = vrcp.f32 %v5922_v32  ;;  %6702 = vst [vmem:[#allocation1 + $0x30] ss:$2 sm:$0xff] %v10683_v14  ;;  %v6238_v21 = vpop.f32.mrf.mxu0 }
 0x8b0   : > { %6704 = vst [vmem:[#allocation1 + $0x31] ss:$2 sm:$0xff] %v10755_v60  ;;  %v6039_v36 = vpack.c.bf16 %v6007_v25, %v6007_v25  ;;  %v5934_v60 = vpop.xlane.xlu0 %5933  ;;  %v6624_v0 = vand.u32 %v10283_v29, %v5051_v2 }
 0x8b1   : > { %v4988_v44 = vld [vmem:[#allocation1] sm:$0xff]  ;;  %8510 = vrcp.f32 %v5934_v60 }
 0x8b2   : > { %v5052_v31 = vpack.c.bf16 %v4988_v44, %v4988_v44  ;;  %6690 = vst [vmem:[#allocation1] ss:$2 sm:$0xff] %v10610_v39  ;;  %8083 = vmatmul.msk.bf16.vlgmr.msrb.gmra.mxu0 %vm6046_vm8, %v6039_v36 }
 0x8b3   : > { %6692 = vst [vmem:[#allocation1 + $0x1] ss:$2 sm:$0xff] %v10657_v16  ;;  %v10798_v9 = vld.sshfl [vmem:[#allocation1 + $0x10] sm:$0xff pattern:$0x75316420]  ;;  %6848 = vmatpush.bf16.msrb.mxu0 %v6839_v12 }
 0x8b4   : > { %v6643_v46 = vand.u32 %v10283_v29, %v5052_v31 }
 0x8b5   : > { %v8509_v28 = vpop.eup %8508  ;;  %v6707_v13 = vld.sshfl [vmem:[#allocation1 + $0x20] sm:$0xff pattern:$0x75316420] }
 0x8b6   : > { %v6004_v14 = vmul.f32 %v8509_v28, %v10661_v49  ;;  %6652 = vmatpush.bf16.msrb.mxu2 %v6643_v46  ;;  %v3952_v49 = vld [vmem:[%s11242_s16] sm:$0xf]  ;;  %v6763_v60 = vpack.c.bf16 %v6707_v13, %v6707_v13 }
 0x8b7   : > { %v6255_v3 = vpop.f32.mrf.mxu1  ;;  %v8511_v39 = vpop.eup %8510  ;;  %v6794_v29 = vsel %vm3743_vm5, %v3952_v49, 0  ;;  %v6708_v1 = vld.sshfl [vmem:[#allocation1 + $0x30] sm:$0xff pattern:$0x75316420] }
 0x8b8   : > { %v6036_v30 = vpack.c.bf16 %v6004_v14, %v6004_v14  ;;  %6711 = vst [vmem:[#allocation1 + $0x10] ss:$2 sm:$0xff] %v6255_v3  ;;  %v6008_v63 = vmul.f32 %v8511_v39, %v10623_v18  ;;  %6803 = vmatpush.bf16.msrb.mxu3 %v6794_v29  ;;  %v6783_v3 = vunpack.c.l.b16 %v6763_v60  ;;  %v3954_v39 = vld [vmem:[%s11242_s16 + $0x8] sm:$0xf] }
 0x8ba   : > { %8080 = vmatmul.msk.bf16.vlgmr.msra.gmra.mxu1 %vm6046_vm8, %v6036_v30  ;;  %v6705_v4 = vld.sshfl [vmem:[#allocation1] sm:$0xff pattern:$0x75316420]  ;;  %v6040_v5 = vpack.c.bf16 %v6008_v63, %v6008_v63  ;;  %v6764_v30 = vpack.c.bf16 %v6708_v1, %v6708_v1 }
 0x8bb   : > { %6633 = vmatpush.bf16.msra.mxu1 %v6624_v0  ;;  %6709 = vst [vmem:[#allocation1] ss:$2 sm:$0xff] %v6217_v42  ;;  %v6761_v24 = vpack.c.bf16 %v6705_v4, %v6705_v4 }
 0x8bc   : > { %6710 = vst [vmem:[#allocation1 + $0x1] ss:$2 sm:$0xff] %v6236_v15 }
 0x8bd   : > { %v6781_v26 = vunpack.c.l.b16 %v6761_v24 }
 0x8bf   : > { %v6257_v19 = vpop.f32.mrf.mxu1 }
 0x8c0   : > { %v6881_v19 = vsel %vm3743_vm5, %v3954_v39, 0 }
 0x8c1   : > { %v5937_v16 = vpop.xlane.xlu1 %5936 }
 0x8c2   : > { %8512 = vrcp.f32 %v5937_v16 }
 0x8c3   : > { %v6717_v45 = vld.sshfl [vmem:[#allocation1] sm:$0xff pattern:$0x75316420] }
 0x8c4   : > { %v6765_v31 = vpack.c.bf16 %v6717_v45, %v6717_v45 }
 0x8c5   : > { %v6274_v23 = vpop.f32.mrf.mxu2 }
 0x8c6   : > { %6712 = vst [vmem:[#allocation1 + $0x11] ss:$2 sm:$0xff] %v6274_v23  ;;  %v6826_v2 = vunpack.c.l.b16 %v6765_v31 }
 0x8c8   : > { %v8513_v43 = vpop.eup %8512 }
 0x8c9   : > { %v6009_v34 = vmul.f32 %v8513_v43, %v10696_v58  ;;  %v5940_v18 = vpop.xlane.xlu1 %5939 }
 0x8ca   : > { %8514 = vrcp.f32 %v5940_v18  ;;  %v6312_v62 = vpop.f32.mrf.mxu0  ;;  %8084 = vmatmul.msk.bf16.vlgmr.msrb.gmra.mxu1 %vm6046_vm8, %v6040_v5 }
 0x8cb   : > { %v6041_v6 = vpack.c.bf16 %v6009_v34, %v6009_v34  ;;  %6714 = vst [vmem:[#allocation1 + $0x21] ss:$2 sm:$0xff] %v6312_v62  ;;  %6890 = vmatpush.bf16.msrb.mxu1 %v6881_v19 }
 0x8cd   : > { %8085 = vmatmul.msk.bf16.vlgmr.msra.gmra.mxu2 %vm6046_vm8, %v6041_v6  ;;  %v5943_v48 = vpop.xlane.xlu2 %5942  ;;  %v6276_v22 = vpop.f32.mrf.mxu2  ;;  %v6718_v41 = vld.sshfl [vmem:[#allocation1 + $0x10] sm:$0xff pattern:$0x75316420] }
 0x8ce   : > { %8516 = vrcp.f32 %v5943_v48  ;;  %v6766_v44 = vpack.c.bf16 %v6718_v41, %v6718_v41  ;;  %v3955_v41 = vld [vmem:[%s11242_s16 + $0xc] sm:$0xf] }
 0x8d0   : > { %v8515_v27 = vpop.eup %8514  ;;  %v6827_v46 = vunpack.c.l.b16 %v6766_v44 }
 0x8d1   : > { %v6010_v8 = vmul.f32 %v8515_v27, %v10709_v11  ;;  %v5949_v59 = vpop.xlane.xlu1 %5948 }
 0x8d2   : > { %8518 = vrcp.f32 %v5949_v59  ;;  %v6314_v58 = vpop.f32.mrf.mxu0  ;;  %v6830_v14 = vpack.c.b16 %v6827_v46, %v6826_v2 }
 0x8d3   : > { %v6042_v37 = vpack.c.bf16 %v6010_v8, %v6010_v8 }
 0x8d4   : > { %v8517_v55 = vpop.eup %8516 }
 0x8d5   : > { %v6293_v10 = vpop.f32.mrf.mxu3  ;;  %8086 = vmatmul.msk.bf16.vlgmr.msra.gmra.mxu3 %vm6046_vm8, %v6042_v37  ;;  %v6011_v35 = vmul.f32 %v8517_v55, %v10724_v47  ;;  %v6762_v47 = vpack.c.bf16 %v10798_v9, %v10798_v9  ;;  %v6784_v9 = vunpack.c.l.b16 %v6764_v30 }
 0x8d6   : > { %6713 = vst [vmem:[#allocation1 + $0x20] ss:$2 sm:$0xff] %v6293_v10 }
 0x8d7   : > { %v6331_v40 = vpop.f32.mrf.mxu1  ;;  %v6043_v61 = vpack.c.bf16 %v6011_v35, %v6011_v35  ;;  %v6782_v21 = vunpack.c.l.b16 %v6762_v47  ;;  %v6786_v49 = vpack.c.b16 %v6784_v9, %v6783_v3  ;;  %v6923_v47 = vsel %vm3743_vm5, %v3955_v41, 0 }
 0x8d8   : > { %v8519_v38 = vpop.eup %8518  ;;  %6715 = vst [vmem:[#allocation1 + $0x30] ss:$2 sm:$0xff] %v6331_v40  ;;  %6932 = vmatpush.bf16.msra.mxu2 %v6923_v47 }
 0x8d9   : > { %v6013_v20 = vmul.f32 %v8519_v38, %v10729_v17  ;;  %v5946_v42 = vpop.xlane.xlu1 %5945  ;;  %8087 = vmatmul.msk.bf16.vlgmr.msra.gmra.mxu0 %vm6046_vm8, %v6043_v61  ;;  %v6785_v28 = vpack.c.b16 %v6782_v21, %v6781_v26 }
 0x8da   : > { %8520 = vrcp.f32 %v5946_v42 }
 0x8db   : > { %v6045_v11 = vpack.c.bf16 %v6013_v20, %v6013_v20 }
 0x8dd   : > { %v6295_v15 = vpop.f32.mrf.mxu3  ;;  %8089 = vmatmul.msk.bf16.vlgmr.msrb.gmra.mxu2 %vm6046_vm8, %v6045_v11  ;;  %v6719_v16 = vld.sshfl [vmem:[#allocation1 + $0x20] sm:$0xff pattern:$0x75316420] }
 0x8de   : > { %v6767_v63 = vpack.c.bf16 %v6719_v16, %v6719_v16 }
 0x8df   : > { %v6333_v32 = vpop.f32.mrf.mxu1 }
 0x8e0   : > { %v8521_v25 = vpop.eup %8520  ;;  %v6828_v23 = vunpack.c.l.b16 %v6767_v63 }
 0x8e1   : > { %v6012_v17 = vmul.f32 %v8521_v25, %v10743_v33 }
 0x8e3   : > { %v6044_v36 = vpack.c.bf16 %v6012_v17, %v6012_v17 }
 0x8e5   : > { %8088 = vmatmul.msk.bf16.vlgmr.msra.gmra.mxu1 %vm6046_vm8, %v6044_v36  ;;  %8090 = vmatmul.msk.bf16.vlgmr.msrb.gmra.mxu3 %vm1730_vm1, %v6785_v28 }
 0x8e9   : > { %8092 = vmatmul.msk.bf16.vlgmr.msrb.gmra.mxu0 %vm1730_vm1, %v6830_v14 }
 0x8ed   : > { %v6350_v0 = vpop.f32.mrf.mxu2 }
 0x8ee   : > { %6716 = vst [vmem:[#allocation1 + $0x31] ss:$2 sm:$0xff] %v6350_v0 }
 0x8ef   : > { %v6407_v33 = vpop.f32.mrf.mxu1 }
 0x8f0   : > { %6723 = vst [vmem:[#allocation1 + $0x10] ss:$2 sm:$0xff] %v6407_v33 }
 0x8f5   : > { %v6720_v29 = vld.sshfl [vmem:[#allocation1 + $0x30] sm:$0xff pattern:$0x75316420]  ;;  %v6352_v4 = vpop.f32.mrf.mxu2  ;;  %8091 = vmatmul.msk.bf16.gmra.mxu3 %vm1730_vm1, %v6786_v49 }
 0x8f6   : > { %v6768_v7 = vpack.c.bf16 %v6720_v29, %v6720_v29 }
 0x8f7   : > { %v6369_v12 = vpop.f32.mrf.mxu3  ;;  %v6409_v5 = vpop.f32.mrf.mxu1 }
 0x8f8   : > { %v6388_v43 = vpop.f32.mrf.mxu0  ;;  %6721 = vst [vmem:[#allocation1] ss:$2 sm:$0xff] %v6369_v12  ;;  %v6829_v34 = vunpack.c.l.b16 %v6768_v7 }
 0x8f9   : > { %6722 = vst [vmem:[#allocation1 + $0x1] ss:$2 sm:$0xff] %v6388_v43 }
 0x8fa   : > { %v6831_v18 = vpack.c.b16 %v6829_v34, %v6828_v23 }
 0x8fc   : > { %8093 = vmatmul.msk.bf16.gmra.mxu0 %vm1730_vm1, %v6831_v18 }
 0x8fd   : > { %v6426_v62 = vpop.f32.mrf.mxu2 }
 0x8fe   : > { %6724 = vst [vmem:[#allocation1 + $0x11] ss:$2 sm:$0xff] %v6426_v62 }
 0x8ff   : > { %v6371_v13 = vpop.f32.mrf.mxu3 }
 0x900   : > { %v6390_v6 = vpop.f32.mrf.mxu0  ;;  %v6729_v48 = vld.sshfl [vmem:[#allocation1] sm:$0xff pattern:$0x75316420] }
 0x901   : > { %v6769_v27 = vpack.c.bf16 %v6729_v48, %v6729_v48  ;;  %v8259_v6 = vld [vmem:[%s11243_s17] ss:$0 sm:$0xff] }
 0x903   : > { %v6868_v55 = vunpack.c.l.b16 %v6769_v27 }
 0x905   : > { %v6730_v22 = vld.sshfl [vmem:[#allocation1 + $0x10] sm:$0xff pattern:$0x75316420]  ;;  %v6428_v8 = vpop.f32.mrf.mxu2 }
 0x906   : > { %v6770_v59 = vpack.c.bf16 %v6730_v22, %v6730_v22 }
 0x907   : > { %v6445_v58 = vpop.f32.mrf.mxu3 }
 0x908   : > { %v6464_v37 = vpop.f32.mrf.mxu0  ;;  %6725 = vst [vmem:[#allocation1 + $0x20] ss:$2 sm:$0xff] %v6445_v58  ;;  %v6869_v10 = vunpack.c.l.b16 %v6770_v59 }
 0x909   : > { %6726 = vst [vmem:[#allocation1 + $0x21] ss:$2 sm:$0xff] %v6464_v37 }
 0x90a   : > { %v6872_v35 = vpack.c.b16 %v6869_v10, %v6868_v55 }
 0x90c   : > { %8094 = vmatmul.msk.bf16.vlgmr.msrb.gmra.mxu1 %vm1730_vm1, %v6872_v35 }
 0x90f   : > { %v6447_v40 = vpop.f32.mrf.mxu3 }
 0x910   : > { %v6466_v1 = vpop.f32.mrf.mxu0  ;;  %v6731_v32 = vld.sshfl [vmem:[#allocation1 + $0x20] sm:$0xff pattern:$0x75316420] }
 0x911   : > { %v6771_v26 = vpack.c.bf16 %v6731_v32, %v6731_v32 }
 0x913   : > { %v6870_v17 = vunpack.c.l.b16 %v6771_v26 }
 0x916   : > { %v6502_v38 = vpop.f32.mrf.mxu2 }
 0x917   : > { %6728 = vst [vmem:[#allocation1 + $0x31] ss:$2 sm:$0xff] %v6502_v38 }
 0x91e   : > { %v6504_v61 = vpop.f32.mrf.mxu2  ;;  %v6521_v20 = vpop.f32.mrf.mxu3 }
 0x91f   : > { %6733 = vst [vmem:[#allocation1] ss:$2 sm:$0xff] %v6521_v20 }
 0x926   : > { %v6523_v42 = vpop.f32.mrf.mxu3 }
 0x92f   : > { %v6540_v11 = vpop.f32.mrf.mxu0 }
 0x930   : > { %6734 = vst [vmem:[#allocation1 + $0x1] ss:$2 sm:$0xff] %v6540_v11 }
 0x937   : > { %v6483_v24 = vpop.f32.mrf.mxu1  ;;  %v6542_v15 = vpop.f32.mrf.mxu0  ;;  %v6741_v2 = vld.sshfl [vmem:[#allocation1] sm:$0xff pattern:$0x75316420] }
 0x938   : > { %6727 = vst [vmem:[#allocation1 + $0x30] ss:$2 sm:$0xff] %v6483_v24  ;;  %v6773_v60 = vpack.c.bf16 %v6741_v2, %v6741_v2 }
 0x93a   : > { %v6910_v33 = vunpack.c.l.b16 %v6773_v60 }
 0x93f   : > { %v6732_v45 = vld.sshfl [vmem:[#allocation1 + $0x30] sm:$0xff pattern:$0x75316420]  ;;  %v6485_v25 = vpop.f32.mrf.mxu1 }
 0x940   : > { %v6772_v44 = vpack.c.bf16 %v6732_v45, %v6732_v45 }
 0x942   : > { %v6871_v21 = vunpack.c.l.b16 %v6772_v44 }
 0x944   : > { %v6873_v31 = vpack.c.b16 %v6871_v21, %v6870_v17 }
 0x946   : > { %8095 = vmatmul.msk.bf16.gmra.mxu1 %vm1730_vm1, %v6873_v31 }
 0x947   : > { %v6559_v36 = vpop.f32.mrf.mxu1 }
 0x948   : > { %6735 = vst [vmem:[#allocation1 + $0x10] ss:$2 sm:$0xff] %v6559_v36 }
 0x94f   : > { %v6561_v28 = vpop.f32.mrf.mxu1 }
 0x950   : > { %v6578_v46 = vpop.f32.mrf.mxu2 }
 0x951   : > { %6736 = vst [vmem:[#allocation1 + $0x11] ss:$2 sm:$0xff] %v6578_v46 }
 0x956   : > { %v6616_v14 = vpop.f32.mrf.mxu0 }
 0x957   : > { %6738 = vst [vmem:[#allocation1 + $0x21] ss:$2 sm:$0xff] %v6616_v14 }
 0x958   : > { %v6742_v30 = vld.sshfl [vmem:[#allocation1 + $0x10] sm:$0xff pattern:$0x75316420]  ;;  %v6580_v0 = vpop.f32.mrf.mxu2  ;;  %v6597_v3 = vpop.f32.mrf.mxu3 }
 0x959   : > { %6737 = vst [vmem:[#allocation1 + $0x20] ss:$2 sm:$0xff] %v6597_v3  ;;  %v6774_v9 = vpack.c.bf16 %v6742_v30, %v6742_v30 }
 0x95b   : > { %v6911_v39 = vunpack.c.l.b16 %v6774_v9 }
 0x95d   : > { %v6914_v16 = vpack.c.b16 %v6911_v39, %v6910_v33 }
 0x95e   : > { %v6618_v19 = vpop.f32.mrf.mxu0 }
 0x95f   : > { %8096 = vmatmul.msk.bf16.vlgmr.msra.gmra.mxu2 %vm1730_vm1, %v6914_v16 }
 0x960   : > { %v6599_v49 = vpop.f32.mrf.mxu3  ;;  %v6654_v63 = vpop.f32.mrf.mxu2  ;;  %v6743_v4 = vld.sshfl [vmem:[#allocation1 + $0x20] sm:$0xff pattern:$0x75316420] }
 0x961   : > { %6740 = vst [vmem:[#allocation1 + $0x31] ss:$2 sm:$0xff] %v6654_v63  ;;  %v6775_v12 = vpack.c.bf16 %v6743_v4, %v6743_v4  ;;  %v8560_v4 = vmov 32.0  }
 0x962   : > { %v6635_v29 = vpop.f32.mrf.mxu1  ;;  %8522 = vrcp.f32 %v8560_v4 }
 0x963   : > { %6739 = vst [vmem:[#allocation1 + $0x30] ss:$2 sm:$0xff] %v6635_v29  ;;  %v6912_v34 = vunpack.c.l.b16 %v6775_v12 }
 0x966   : > { %v6850_v27 = vpop.f32.mrf.mxu0 }
 0x968   : > { %v6656_v7 = vpop.f32.mrf.mxu2  ;;  %v6805_v13 = vpop.f32.mrf.mxu3 }
 0x969   : > { %v6818_v48 = vadd.f32 %v8259_v6, %v6805_v13  ;;  %v8523_v7 = vpop.eup %8522 }
 0x96a   : > { %v6637_v43 = vpop.f32.mrf.mxu1  ;;  %v6744_v5 = vld.sshfl [vmem:[#allocation1 + $0x30] sm:$0xff pattern:$0x75316420]  ;;  %vm7018_vm9 = vweird.f32 %v8523_v7 }
 0x96b   : > { %v6776_v23 = vpack.c.bf16 %v6744_v5, %v6744_v5  ;;  %v6860_v59 = vadd.f32 %v6850_v27, %v6818_v48 }
 0x96d   : > { %v6913_v18 = vunpack.c.l.b16 %v6776_v23  ;;  %v8561_v23 = vmov 839922192  }
 0x96e   : > { %v6852_v1 = vpop.f32.mrf.mxu0 }
 0x96f   : > { %v6915_v62 = vpack.c.b16 %v6913_v18, %v6912_v34  ;;  %v7029_v34 = vunpack.c.l.s4 %v8561_v23  ;;  %v8562_v18 = vmov 1985246804   ;;  %v10947_v23 = vld [vmem:[%s11245_s19] ss:$0 sm:$0xff] }
 0x970   : > { %v6807_v8 = vpop.f32.mrf.mxu3 }
 0x971   : > { %8097 = vmatmul.msk.bf16.gmra.mxu2 %vm1730_vm1, %v6915_v62  ;;  %v6819_v55 = vadd.f32 %v8259_v6, %v6807_v8  ;;  %v7033_v62 = vunpack.c.l.s4 %v8562_v18 }
 0x973   : > { %v6861_v61 = vadd.f32 %v6852_v1, %v6819_v55  ;;  %v10879_v48 = vunpack.c.0.s8 %v7033_v62 }
 0x978   : > { %v6810_v42 = vpop.f32.mrf.mxu3 }
 0x979   : > { %v6820_v15 = vadd.f32 %v8259_v6, %v6810_v42 }
 0x980   : > { %v6812_v17 = vpop.f32.mrf.mxu3 }
 0x981   : > { %v6821_v36 = vadd.f32 %v8259_v6, %v6812_v17  ;;  %v10877_v6 = vunpack.c.0.s8 %v7029_v34 }
 0x989   : > { %v6892_v22 = vpop.f32.mrf.mxu1 }
 0x98a   : > { %v6902_v58 = vadd.f32 %v6892_v22, %v6860_v59 }
 0x991   : > { %v6894_v38 = vpop.f32.mrf.mxu1 }
 0x992   : > { %v6903_v11 = vadd.f32 %v6894_v38, %v6861_v61 }
 0x9c3   : > { %v6897_v26 = vpop.f32.mrf.mxu1 }
 0x9cb   : > { %v6899_v2 = vpop.f32.mrf.mxu1 }
 0x9e2   : > { %v6934_v37 = vpop.f32.mrf.mxu2 }
 0x9e3   : > { %v6944_v10 = vadd.f32 %v6934_v37, %v6902_v58 }
 0x9e5   : > { %v6952_v35 = vrot.slane %v6944_v10, 4  ;;  %v10843_v40 = vadd.f32 %v6944_v10, %v8770_v56  ;;  %v6855_v56 = vpop.f32.mrf.mxu0 }
 0x9e6   : > { %v6862_v25 = vadd.f32 %v6855_v56, %v6820_v15 }
 0x9e7   : > { %v10846_v20 = vadd.f32 %v6952_v35, %v8773_v57  ;;  %6978 = vst [vmem:[#allocation1] ss:$2 sm:$0xff] %v10843_v40 }
 0x9e8   : > { %v6904_v21 = vadd.f32 %v6897_v26, %v6862_v25 }
 0x9e9   : > { %6980 = vst [vmem:[#allocation1 + $0x1] ss:$2 sm:$0xff] %v10846_v20 }
 0x9ea   : > { %v6936_v24 = vpop.f32.mrf.mxu2 }
 0x9eb   : > { %v6945_v41 = vadd.f32 %v6936_v24, %v6903_v11 }
 0x9ed   : > { %v6953_v47 = vrot.slane %v6945_v41, 4  ;;  %v10851_v32 = vadd.f32 %v6945_v41, %v8754_v50 }
 0x9ef   : > { %v10854_v45 = vadd.f32 %v6953_v47, %v8756_v51  ;;  %6982 = vst [vmem:[#allocation1 + $0x10] ss:$2 sm:$0xff] %v10851_v32  ;;  %v6857_v51 = vpop.f32.mrf.mxu0 }
 0x9f0   : > { %v6993_v57 = vld.sshfl [vmem:[#allocation1] sm:$0xff pattern:$0x75316420]  ;;  %v6863_v60 = vadd.f32 %v6857_v51, %v6821_v36 }
 0x9f1   : > { %6984 = vst [vmem:[#allocation1 + $0x11] ss:$2 sm:$0xff] %v10854_v45  ;;  %v7001_v44 = vsel %vm947_vm0, %v6993_v57, 0.0 }
 0x9f2   : > { %7002 = vadd.xlane.f32.xlu2 %v7001_v44  ;;  %v6905_v3 = vadd.f32 %v6899_v2, %v6863_v60 }
 0x9f4   : > { %v6939_v31 = vpop.f32.mrf.mxu2 }
 0x9f5   : > { %v6946_v50 = vadd.f32 %v6939_v31, %v6904_v21 }
 0x9f7   : > { %v6954_v28 = vrot.slane %v6946_v50, 4  ;;  %v10860_v46 = vadd.f32 %v6946_v50, %v8758_v52  ;;  %v11294_v52 = vld [vmem:[#allocation2_spill] sm:$0xff] }
 0x9f8   : > { %v6994_v14 = vld.sshfl [vmem:[#allocation1 + $0x10] sm:$0xff pattern:$0x75316420] }
 0x9f9   : > { %v6965_v30 = vadd.f32 %v6954_v28, %v8761_v53  ;;  %6986 = vst [vmem:[#allocation1 + $0x20] ss:$2 sm:$0xff] %v10860_v46  ;;  %v7004_v0 = vsel %vm947_vm0, %v6994_v14, 0.0 }
 0x9fa   : > { %7005 = vadd.xlane.f32.xlu1 %v7004_v0 }
 0x9fb   : > { %6988 = vst [vmem:[#allocation1 + $0x21] ss:$2 sm:$0xff] %v6965_v30 }
 0x9fc   : > { %v6941_v9 = vpop.f32.mrf.mxu2 }
 0x9fd   : > { %v6947_v33 = vadd.f32 %v6941_v9, %v6905_v3 }
 0x9ff   : > { %v6955_v39 = vrot.slane %v6947_v33, 4  ;;  %v10866_v16 = vadd.f32 %v6947_v33, %v8764_v54  ;;  %v7014_v54 = vmul.f32 32.0, %v8523_v7 }
 0xa01   : > { %v10869_v19 = vadd.f32 %v6955_v39, %v11294_v52  ;;  %6990 = vst [vmem:[#allocation1 + $0x30] ss:$2 sm:$0xff] %v10866_v16  ;;  %v7015_v12 = vsub.f32 1.0, %v7014_v54  ;;  %v10941_v54 = vld [vmem:[%s11244_s18] ss:$0 sm:$0xff] }
 0xa02   : > { %v6995_v49 = vld.sshfl [vmem:[#allocation1 + $0x20] sm:$0xff pattern:$0x75316420] }
 0xa03   : > { %6992 = vst [vmem:[#allocation1 + $0x31] ss:$2 sm:$0xff] %v10869_v19  ;;  %v7007_v53 = vsel %vm947_vm0, %v6995_v49, 0.0  ;;  %v7016_v43 = vmul.f32 %v8523_v7, %v7015_v12 }
 0xa04   : > { %7008 = vadd.xlane.f32.xlu2 %v7007_v53 }
 0xa05   : > { %v7017_v5 = vadd.f32 %v8523_v7, %v7016_v43 }
 0xa07   : > { %v10875_v13 = vsel %vm7018_vm9, %v8523_v7, %v7017_v5 }
 0xa0a   : > { %v6996_v63 = vld.sshfl [vmem:[#allocation1 + $0x30] sm:$0xff pattern:$0x75316420] }
 0xa0b   : > { %v7010_v29 = vsel %vm947_vm0, %v6996_v63, 0.0 }
 0xa0c   : > { %7011 = vadd.xlane.f32.xlu1 %v7010_v29 }
 0xa65   : > { %v7003_v27 = vpop.xlane.xlu2 %7002 }
 0xa66   : > { %v7020_v22 = vmul.f32 %v10875_v13, %v7003_v27  ;;  %v10950_v27 = vrot.slane %v10941_v54, 4 }
 0xa68   : > { %v7031_v8 = vperm.slane %v7020_v22, %v10877_v6  ;;  %v7035_v59 = vperm.slane %v7020_v22, %v10879_v48 }
 0xa6a   : > { %v10885_v58 = vsub.f32 %v10843_v40, %v7031_v8  ;;  %v10888_v37 = vsub.f32 %v10846_v20, %v7035_v59 }
 0xa6c   : > { %v7076_v55 = vmul.f32 %v10885_v58, %v10885_v58  ;;  %v7077_v10 = vmul.f32 %v10888_v37, %v10888_v37 }
 0xa6d   : > { %v7006_v35 = vpop.xlane.xlu1 %7005 }
 0xa6e   : > { %7092 = vst [vmem:[#allocation1] ss:$2 sm:$0xff] %v7076_v55  ;;  %v7021_v1 = vmul.f32 %v10875_v13, %v7006_v35  ;;  %v10955_v55 = vrot.slane %v10947_v23, 4 }
 0xa6f   : > { %7094 = vst [vmem:[#allocation1 + $0x1] ss:$2 sm:$0xff] %v7077_v10 }
 0xa70   : > { %v7039_v38 = vperm.slane %v7021_v1, %v10877_v6  ;;  %v7043_v61 = vperm.slane %v7021_v1, %v10879_v48 }
 0xa72   : > { %v10898_v40 = vsub.f32 %v10851_v32, %v7039_v38  ;;  %v10901_v20 = vsub.f32 %v10854_v45, %v7043_v61  ;;  %v8145_v61 = vld [vmem:[%s11246_s20 + $0x8] sm:$0xff] }
 0xa73   : > { %7318 = vmatpush.bf16.msra.mxu3 %v8145_v61 }
 0xa74   : > { %v7078_v42 = vmul.f32 %v10898_v40, %v10898_v40  ;;  %v7079_v11 = vmul.f32 %v10901_v20, %v10901_v20 }
 0xa76   : > { %7096 = vst [vmem:[#allocation1 + $0x10] ss:$2 sm:$0xff] %v7078_v42  ;;  %v7107_v24 = vld.sshfl [vmem:[#allocation1] sm:$0xff pattern:$0x75316420] }
 0xa77   : > { %7098 = vst [vmem:[#allocation1 + $0x11] ss:$2 sm:$0xff] %v7079_v11  ;;  %v7115_v41 = vsel %vm947_vm0, %v7107_v24, 0.0  ;;  %v7009_v15 = vpop.xlane.xlu2 %7008 }
 0xa78   : > { %7116 = vadd.xlane.f32.xlu0 %v7115_v41  ;;  %v7022_v47 = vmul.f32 %v10875_v13, %v7009_v15 }
 0xa7a   : > { %v7047_v32 = vperm.slane %v7022_v47, %v10877_v6  ;;  %v7051_v56 = vperm.slane %v7022_v47, %v10879_v48 }
 0xa7c   : > { %v10912_v26 = vsub.f32 %v10860_v46, %v7047_v32  ;;  %v10914_v45 = vsub.f32 %v6965_v30, %v7051_v56 }
 0xa7e   : > { %v7080_v57 = vmul.f32 %v10912_v26, %v10912_v26  ;;  %v7081_v25 = vmul.f32 %v10914_v45, %v10914_v45  ;;  %v7108_v44 = vld.sshfl [vmem:[#allocation1 + $0x10] sm:$0xff pattern:$0x75316420] }
 0xa7f   : > { %v7118_v17 = vsel %vm947_vm0, %v7108_v44, 0.0  ;;  %v7012_v21 = vpop.xlane.xlu1 %7011 }
 0xa80   : > { %7100 = vst [vmem:[#allocation1 + $0x20] ss:$2 sm:$0xff] %v7080_v57  ;;  %7119 = vadd.xlane.f32.xlu2 %v7118_v17  ;;  %v7023_v31 = vmul.f32 %v10875_v13, %v7012_v21 }
 0xa81   : > { %7102 = vst [vmem:[#allocation1 + $0x21] ss:$2 sm:$0xff] %v7081_v25 }
 0xa82   : > { %v7055_v36 = vperm.slane %v7023_v31, %v10877_v6  ;;  %v7059_v50 = vperm.slane %v7023_v31, %v10879_v48 }
 0xa84   : > { %v10925_v28 = vsub.f32 %v10866_v16, %v7055_v36  ;;  %v10928_v46 = vsub.f32 %v10869_v19, %v7059_v50 }
 0xa86   : > { %v7082_v51 = vmul.f32 %v10925_v28, %v10925_v28  ;;  %v7083_v2 = vmul.f32 %v10928_v46, %v10928_v46 }
 0xa88   : > { %7104 = vst [vmem:[#allocation1 + $0x30] ss:$2 sm:$0xff] %v7082_v51  ;;  %v7109_v14 = vld.sshfl [vmem:[#allocation1 + $0x20] sm:$0xff pattern:$0x75316420] }
 0xa89   : > { %7106 = vst [vmem:[#allocation1 + $0x31] ss:$2 sm:$0xff] %v7083_v2  ;;  %v7121_v60 = vsel %vm947_vm0, %v7109_v14, 0.0 }
 0xa8a   : > { %7122 = vadd.xlane.f32.xlu1 %v7121_v60 }
 0xa90   : > { %v7110_v30 = vld.sshfl [vmem:[#allocation1 + $0x30] sm:$0xff pattern:$0x75316420] }
 0xa91   : > { %v7124_v0 = vsel %vm947_vm0, %v7110_v30, 0.0 }
 0xa92   : > { %7125 = vadd.xlane.f32.xlu0 %v7124_v0 }
 0xaeb   : > { %v7117_v3 = vpop.xlane.xlu0 %7116 }
 0xaec   : > { %v7127_v9 = vmul.f32 %v7117_v3, %v10875_v13 }
 0xaee   : > { %v7131_v33 = vadd.f32 1e-05, %v7127_v9 }
 0xaf0   : > { %8524 = vrsqrt.f32 %v7131_v33  ;;  %vm7141_vm11 = vweird.f32 %v7131_v33 }
 0xaf3   : > { %v7120_v39 = vpop.xlane.xlu2 %7119 }
 0xaf4   : > { %v7128_v16 = vmul.f32 %v7120_v39, %v10875_v13 }
 0xaf6   : > { %v8525_v52 = vpop.eup %8524  ;;  %v7132_v19 = vadd.f32 1e-05, %v7128_v16 }
 0xaf7   : > { %v7136_v49 = vmul.f32 %v8525_v52, %v7131_v33  ;;  %vm7142_vm10 = vweird.f32 %v8525_v52 }
 0xaf8   : > { %8526 = vrsqrt.f32 %v7132_v19  ;;  %vm7143_vm12 = vmor %vm7141_vm11, %vm7142_vm10  ;;  %vm7151_vm14 = vweird.f32 %v7132_v19  ;;  %vm7813_vm11 = vcmask 257024  }
 0xaf9   : > { %v7137_v53 = vmul.f32 %v8525_v52, %v7136_v49 }
 0xafb   : > { %v7138_v63 = vmul.f32 0.5, %v7137_v53 }
 0xafd   : > { %v7139_v29 = vsub.f32 1.5, %v7138_v63  ;;  %v7123_v4 = vpop.xlane.xlu1 %7122 }
 0xafe   : > { %v8527_v7 = vpop.eup %8526  ;;  %v7129_v12 = vmul.f32 %v7123_v4, %v10875_v13 }
 0xaff   : > { %v7140_v43 = vmul.f32 %v8525_v52, %v7139_v29  ;;  %v7146_v5 = vmul.f32 %v8527_v7, %v7132_v19  ;;  %vm7152_vm13 = vweird.f32 %v8527_v7 }
 0xb00   : > { %v7133_v34 = vadd.f32 1e-05, %v7129_v12  ;;  %vm7153_vm15 = vmor %vm7151_vm14, %vm7152_vm13 }
 0xb01   : > { %v7144_v18 = vsel %vm7143_vm12, %v8525_v52, %v7140_v43  ;;  %v7147_v62 = vmul.f32 %v8527_v7, %v7146_v5 }
 0xb02   : > { %v7182_v22 = vperm.slane %v7144_v18, %v10877_v6  ;;  %v7186_v8 = vperm.slane %v7144_v18, %v10879_v48  ;;  %8528 = vrsqrt.f32 %v7133_v34  ;;  %vm7161_vm2 = vweird.f32 %v7133_v34 }
 0xb03   : > { %v7148_v59 = vmul.f32 0.5, %v7147_v62 }
 0xb04   : > { %v7219_v10 = vmul.f32 %v7182_v22, %v10885_v58  ;;  %v7220_v35 = vmul.f32 %v7186_v8, %v10888_v37  ;;  %v8144_v58 = vld [vmem:[%s11246_s20] sm:$0xff] }
 0xb05   : > { %v7149_v1 = vsub.f32 1.5, %v7148_v59  ;;  %v7126_v38 = vpop.xlane.xlu0 %7125  ;;  %7319 = vmatpush.bf16.msra.mxu3 %v8144_v58 }
 0xb06   : > { %v7232_v42 = vmul.f32 %v10941_v54, %v7219_v10  ;;  %v7233_v11 = vmul.f32 %v10950_v27, %v7220_v35  ;;  %v7130_v24 = vmul.f32 %v7126_v38, %v10875_v13 }
 0xb07   : > { %v7150_v41 = vmul.f32 %v8527_v7, %v7149_v1 }
 0xb08   : > { %v8529_v37 = vpop.eup %8528  ;;  %v10969_v15 = vadd.f32 %v10947_v23, %v7232_v42  ;;  %v10972_v47 = vadd.f32 %v10955_v55, %v7233_v11  ;;  %v7134_v32 = vadd.f32 1e-05, %v7130_v24 }
 0xb09   : > { %v7154_v56 = vsel %vm7153_vm15, %v8527_v7, %v7150_v41  ;;  %v7156_v57 = vmul.f32 %v8529_v37, %v7133_v34  ;;  %vm7162_vm1 = vweird.f32 %v8529_v37 }
 0xb0a   : > { %7261 = vst [vmem:[#allocation1] ss:$2 sm:$0xff] %v10969_v15  ;;  %v7190_v25 = vperm.slane %v7154_v56, %v10877_v6  ;;  %v7194_v44 = vperm.slane %v7154_v56, %v10879_v48  ;;  %8530 = vrsqrt.f32 %v7134_v32  ;;  %vm7163_vm3 = vmor %vm7161_vm2, %vm7162_vm1  ;;  %vm7171_vm5 = vweird.f32 %v7134_v32 }
 0xb0b   : > { %7263 = vst [vmem:[#allocation1 + $0x1] ss:$2 sm:$0xff] %v10972_v47  ;;  %v7157_v17 = vmul.f32 %v8529_v37, %v7156_v57 }
 0xb0c   : > { %v7221_v21 = vmul.f32 %v7190_v25, %v10898_v40  ;;  %v7222_v31 = vmul.f32 %v7194_v44, %v10901_v20 }
 0xb0d   : > { %v7158_v36 = vmul.f32 0.5, %v7157_v17 }
 0xb0e   : > { %v7234_v50 = vmul.f32 %v10941_v54, %v7221_v21  ;;  %v7235_v51 = vmul.f32 %v10950_v27, %v7222_v31 }
 0xb0f   : > { %v7159_v2 = vsub.f32 1.5, %v7158_v36 }
 0xb10   : > { %v8531_v14 = vpop.eup %8530  ;;  %v10983_v60 = vadd.f32 %v10947_v23, %v7234_v50  ;;  %v10986_v30 = vadd.f32 %v10955_v55, %v7235_v51 }
 0xb11   : > { %v7160_v0 = vmul.f32 %v8529_v37, %v7159_v2  ;;  %v7166_v3 = vmul.f32 %v8531_v14, %v7134_v32  ;;  %vm7172_vm4 = vweird.f32 %v8531_v14 }
 0xb12   : > { %7265 = vst [vmem:[#allocation1 + $0x10] ss:$2 sm:$0xff] %v10983_v60  ;;  %vm7173_vm6 = vmor %vm7171_vm5, %vm7172_vm4  ;;  %v7276_v7 = vld.sshfl [vmem:[#allocation1] sm:$0xff pattern:$0x75316420] }
 0xb13   : > { %7267 = vst [vmem:[#allocation1 + $0x11] ss:$2 sm:$0xff] %v10986_v30  ;;  %v7164_v40 = vsel %vm7163_vm3, %v8529_v37, %v7160_v0  ;;  %v7167_v20 = vmul.f32 %v8531_v14, %v7166_v3 }
 0xb14   : > { %v7198_v9 = vperm.slane %v7164_v40, %v10877_v6  ;;  %v7202_v33 = vperm.slane %v7164_v40, %v10879_v48 }
 0xb15   : > { %v7168_v39 = vmul.f32 0.5, %v7167_v20 }
 0xb16   : > { %v7223_v16 = vmul.f32 %v7198_v9, %v10912_v26  ;;  %v7224_v52 = vmul.f32 %v7202_v33, %v10914_v45 }
 0xb17   : > { %v7169_v19 = vsub.f32 1.5, %v7168_v39 }
 0xb18   : > { %v7236_v49 = vmul.f32 %v10941_v54, %v7223_v16  ;;  %v7237_v53 = vmul.f32 %v10950_v27, %v7224_v52 }
 0xb19   : > { %v7170_v63 = vmul.f32 %v8531_v14, %v7169_v19 }
 0xb1a   : > { %v10997_v29 = vadd.f32 %v10947_v23, %v7236_v49  ;;  %v11000_v4 = vadd.f32 %v10955_v55, %v7237_v53  ;;  %v7277_v12 = vld.sshfl [vmem:[#allocation1 + $0x10] sm:$0xff pattern:$0x75316420] }
 0xb1b   : > { %v7174_v26 = vsel %vm7173_vm6, %v8531_v14, %v7170_v63  ;;  %v7284_v43 = vpack.c.bf16 %v7277_v12, %v7276_v7 }
 0xb1c   : > { %7269 = vst [vmem:[#allocation1 + $0x20] ss:$2 sm:$0xff] %v10997_v29  ;;  %v7206_v45 = vperm.slane %v7174_v26, %v10877_v6  ;;  %v7210_v5 = vperm.slane %v7174_v26, %v10879_v48 }
 0xb1d   : > { %7271 = vst [vmem:[#allocation1 + $0x21] ss:$2 sm:$0xff] %v11000_v4  ;;  %8106 = vmatmul.msk.bf16.vlgmr.msra.gmra.mxu3 %vm947_vm0, %v7284_v43 }
 0xb1e   : > { %v7225_v34 = vmul.f32 %v7206_v45, %v10925_v28  ;;  %v7226_v18 = vmul.f32 %v7210_v5, %v10928_v46  ;;  %v8262_v28 = vld [vmem:[%s11247_s21] ss:$0 sm:$0xff] }
 0xb20   : > { %v7238_v62 = vmul.f32 %v10941_v54, %v7225_v34  ;;  %v7239_v22 = vmul.f32 %v10950_v27, %v7226_v18 }
 0xb22   : > { %v11012_v8 = vadd.f32 %v10947_v23, %v7238_v62  ;;  %v11015_v59 = vadd.f32 %v10955_v55, %v7239_v22 }
 0xb24   : > { %7273 = vst [vmem:[#allocation1 + $0x30] ss:$2 sm:$0xff] %v11012_v8  ;;  %v7278_v10 = vld.sshfl [vmem:[#allocation1 + $0x20] sm:$0xff pattern:$0x75316420] }
 0xb25   : > { %7275 = vst [vmem:[#allocation1 + $0x31] ss:$2 sm:$0xff] %v11015_v59 }
 0xb2c   : > { %v7279_v35 = vld.sshfl [vmem:[#allocation1 + $0x30] sm:$0xff pattern:$0x75316420] }
 0xb2d   : > { %v7285_v1 = vpack.c.bf16 %v7279_v35, %v7278_v10 }
 0xb2f   : > { %8107 = vmatmul.msk.bf16.gmra.mxu3 %vm947_vm0, %v7285_v1 }
 0xba0   : > { %v7321_v46 = vpop.f32.mrf.mxu3 }
 0xba1   : > { %v11023_v54 = vadd.f32 %v8262_v28, %v7321_v46 }
 0xba3   : > { %v7335_v23 = vmul.f32 0.70710677, %v11023_v54 }
 0xba5   : > { %v11026_v27 = vclamps-f32 %v7335_v23, 4.0 }
 0xba7   : > { %v7347_v55 = vmul.f32 %v11026_v27, %v11026_v27 }
 0xba8   : > { %v7323_v38 = vpop.f32.mrf.mxu3 }
 0xba9   : > { %v7351_v61 = vmul.f32 -2.7261424e-10, %v7347_v55  ;;  %v7399_v42 = vmul.f32 -1.45660715e-05, %v7347_v55  ;;  %v11030_v11 = vadd.f32 %v8262_v28, %v7323_v38 }
 0xbab   : > { %v7355_v24 = vadd.f32 2.7706815e-08, %v7351_v61  ;;  %v7403_v41 = vadd.f32 -0.00021337405, %v7399_v42  ;;  %v7336_v58 = vmul.f32 0.70710677, %v11030_v11 }
 0xbad   : > { %v7359_v37 = vmul.f32 %v7355_v24, %v7347_v55  ;;  %v7407_v32 = vmul.f32 %v7403_v41, %v7347_v55  ;;  %v11033_v56 = vclamps-f32 %v7336_v58, 4.0 }
 0xbaf   : > { %v7363_v57 = vadd.f32 -2.101024e-06, %v7359_v37  ;;  %v7411_v25 = vadd.f32 -0.001682827, %v7407_v32  ;;  %v7348_v44 = vmul.f32 %v11033_v56, %v11033_v56 }
 0xbb1   : > { %v7367_v17 = vmul.f32 %v7363_v57, %v7347_v55  ;;  %v7415_v21 = vmul.f32 %v7411_v25, %v7347_v55  ;;  %v7352_v31 = vmul.f32 -2.7261424e-10, %v7348_v44  ;;  %v7400_v36 = vmul.f32 -1.45660715e-05, %v7348_v44 }
 0xbb2   : > { %v7326_v50 = vpop.f32.mrf.mxu3 }
 0xbb3   : > { %v7371_v51 = vadd.f32 -5.6925062e-05, %v7367_v17  ;;  %v11037_v2 = vadd.f32 %v8262_v28, %v7326_v50  ;;  %v7356_v14 = vadd.f32 2.7706815e-08, %v7352_v31  ;;  %v7404_v0 = vadd.f32 -0.00021337405, %v7400_v36 }
 0xbb4   : > { %v7419_v40 = vadd.f32 -0.0073733293, %v7415_v21 }
 0xbb5   : > { %v7375_v3 = vmul.f32 %v7371_v51, %v7347_v55  ;;  %v7337_v20 = vmul.f32 0.70710677, %v11037_v2  ;;  %v7360_v9 = vmul.f32 %v7356_v14, %v7348_v44  ;;  %v7408_v33 = vmul.f32 %v7404_v0, %v7348_v44  ;;  %v8149_v14 = vld [vmem:[%s11248_s22 + $0x18] sm:$0xff] }
 0xbb6   : > { %v7423_v53 = vmul.f32 %v7419_v40, %v7347_v55  ;;  %7500 = vmatpush.bf16.msra.mxu0 %v8149_v14 }
 0xbb7   : > { %v7379_v39 = vadd.f32 -0.00073499064, %v7375_v3  ;;  %v11040_v16 = vclamps-f32 %v7337_v20, 4.0  ;;  %v7364_v52 = vadd.f32 -2.101024e-06, %v7360_v9 }
 0xbb8   : > { %v7412_v19 = vadd.f32 -0.001682827, %v7408_v33  ;;  %v7427_v10 = vadd.f32 -0.014264739, %v7423_v53 }
 0xbb9   : > { %v7383_v49 = vmul.f32 %v7379_v39, %v7347_v55  ;;  %v11044_v63 = vmul.f32 %v11040_v16, %v11040_v16  ;;  %v7368_v7 = vmul.f32 %v7364_v52, %v7348_v44 }
 0xbba   : > { %v7416_v12 = vmul.f32 %v7412_v19, %v7348_v44  ;;  %v7328_v26 = vpop.f32.mrf.mxu3  ;;  %8532 = vrcp.f32 %v7427_v10 }
 0xbbb   : > { %v7387_v43 = vadd.f32 -0.0029546001, %v7383_v49  ;;  %v7353_v45 = vmul.f32 -2.7261424e-10, %v11044_v63  ;;  %v7401_v5 = vmul.f32 -1.45660715e-05, %v11044_v63  ;;  %v11048_v34 = vadd.f32 %v8262_v28, %v7328_v26 }
 0xbbc   : > { %v7372_v18 = vadd.f32 -5.6925062e-05, %v7368_v7  ;;  %v7420_v62 = vadd.f32 -0.0073733293, %v7416_v12 }
 0xbbd   : > { %v7391_v22 = vmul.f32 %v7387_v43, %v7347_v55  ;;  %v7357_v35 = vadd.f32 2.7706815e-08, %v7353_v45  ;;  %v7405_v1 = vadd.f32 -0.00021337405, %v7401_v5  ;;  %v7338_v38 = vmul.f32 0.70710677, %v11048_v34 }
 0xbbe   : > { %v7376_v46 = vmul.f32 %v7372_v18, %v7348_v44  ;;  %v7424_v23 = vmul.f32 %v7420_v62, %v7348_v44  ;;  %v8147_v5 = vld [vmem:[%s11248_s22 + $0x8] sm:$0xff] }
 0xbbf   : > { %v7361_v61 = vmul.f32 %v7357_v35, %v11044_v63  ;;  %v7409_v42 = vmul.f32 %v7405_v1, %v11044_v63  ;;  %v7395_v24 = vadd.f32 -0.016096033, %v7391_v22  ;;  %v11053_v58 = vclamps-f32 %v7338_v38, 4.0 }
 0xbc0   : > { %v7380_v41 = vadd.f32 -0.00073499064, %v7376_v46  ;;  %v7428_v28 = vadd.f32 -0.014264739, %v7424_v23  ;;  %v8533_v20 = vpop.eup %8532  ;;  %v7331_v35 = vmul.f32 0.5, %v11023_v54 }
 0xbc1   : > { %v7365_v37 = vadd.f32 -2.101024e-06, %v7361_v61  ;;  %v7413_v32 = vadd.f32 -0.001682827, %v7409_v42  ;;  %v7350_v57 = vmul.f32 %v11053_v58, %v11053_v58  ;;  %v7431_v21 = vmul.f32 %v11026_v27, %v7395_v24  ;;  %v8148_v27 = vld [vmem:[%s11248_s22 + $0x10] sm:$0xff]  ;;  %v8146_v24 = vld [vmem:[%s11248_s22] sm:$0xff] }
 0xbc2   : > { %v7384_v55 = vmul.f32 %v7380_v41, %v7348_v44  ;;  %8534 = vrcp.f32 %v7428_v28  ;;  %7501 = vmatpush.bf16.msra.mxu0 %v8148_v27 }
 0xbc3   : > { %v7369_v25 = vmul.f32 %v7365_v37, %v11044_v63  ;;  %v7417_v17 = vmul.f32 %v7413_v32, %v11044_v63  ;;  %v7354_v36 = vmul.f32 -2.7261424e-10, %v7350_v57  ;;  %v7402_v50 = vmul.f32 -1.45660715e-05, %v7350_v57 }
 0xbc4   : > { %v7388_v31 = vadd.f32 -0.0029546001, %v7384_v55  ;;  %v7439_v39 = vmul.f32 %v8533_v20, %v7431_v21  ;;  %v7333_v20 = vmul.f32 0.5, %v11037_v2 }
 0xbc5   : > { %v7373_v51 = vadd.f32 -5.6925062e-05, %v7369_v25  ;;  %v7358_v3 = vadd.f32 2.7706815e-08, %v7354_v36  ;;  %v7406_v40 = vadd.f32 -0.00021337405, %v7402_v50 }
 0xbc6   : > { %v7392_v0 = vmul.f32 %v7388_v31, %v7348_v44  ;;  %v7421_v33 = vadd.f32 -0.0073733293, %v7417_v17  ;;  %v7443_v18 = vadd.f32 1.0, %v7439_v39  ;;  %7502 = vmatpush.bf16.msra.mxu0 %v8147_v5 }
 0xbc7   : > { %v7377_v9 = vmul.f32 %v7373_v51, %v11044_v63  ;;  %v7362_v19 = vmul.f32 %v7358_v3, %v7350_v57  ;;  %v7410_v49 = vmul.f32 %v7406_v40, %v7350_v57 }
 0xbc8   : > { %v7396_v52 = vadd.f32 -0.016096033, %v7392_v0  ;;  %v8535_v26 = vpop.eup %8534  ;;  %v7425_v45 = vmul.f32 %v7421_v33, %v11044_v63  ;;  %v7447_v41 = vmul.f32 %v7443_v18, %v7331_v35 }
 0xbc9   : > { %v7381_v53 = vadd.f32 -0.00073499064, %v7377_v9  ;;  %v7366_v12 = vadd.f32 -2.101024e-06, %v7362_v19  ;;  %v7414_v44 = vadd.f32 -0.001682827, %v7410_v49 }
 0xbca   : > { %v7432_v7 = vmul.f32 %v11033_v56, %v7396_v52  ;;  %v7332_v56 = vmul.f32 0.5, %v11030_v11  ;;  %v7429_v42 = vadd.f32 -0.014264739, %v7425_v45  ;;  %7503 = vmatpush.bf16.msra.mxu0 %v8146_v24  ;;  %v7334_v9 = vmul.f32 0.5, %v11048_v34 }
 0xbcb   : > { %v7385_v43 = vmul.f32 %v7381_v53, %v11044_v63  ;;  %v7370_v22 = vmul.f32 %v7366_v12, %v7350_v57  ;;  %v7418_v10 = vmul.f32 %v7414_v44, %v7350_v57 }
 0xbcc   : > { %v7440_v62 = vmul.f32 %v8535_v26, %v7432_v7  ;;  %8536 = vrcp.f32 %v7429_v42 }
 0xbcd   : > { %v7389_v1 = vadd.f32 -0.0029546001, %v7385_v43  ;;  %v7374_v23 = vadd.f32 -5.6925062e-05, %v7370_v22  ;;  %v7422_v38 = vadd.f32 -0.0073733293, %v7418_v10 }
 0xbce   : > { %v7444_v46 = vadd.f32 1.0, %v7440_v62 }
 0xbcf   : > { %v7393_v61 = vmul.f32 %v7389_v1, %v11044_v63  ;;  %v7378_v37 = vmul.f32 %v7374_v23, %v7350_v57  ;;  %v7426_v32 = vmul.f32 %v7422_v38, %v7350_v57 }
 0xbd0   : > { %v7448_v28 = vmul.f32 %v7444_v46, %v7332_v56 }
 0xbd1   : > { %v7397_v54 = vadd.f32 -0.016096033, %v7393_v61  ;;  %v7382_v25 = vadd.f32 -0.00073499064, %v7378_v37  ;;  %v7430_v11 = vadd.f32 -0.014264739, %v7426_v32 }
 0xbd2   : > { %v7451_v55 = vpack.c.bf16 %v7448_v28, %v7447_v41  ;;  %v8537_v36 = vpop.eup %8536 }
 0xbd3   : > { %v7386_v17 = vmul.f32 %v7382_v25, %v7350_v57  ;;  %v7433_v63 = vmul.f32 %v11040_v16, %v7397_v54  ;;  %8538 = vrcp.f32 %v7430_v11 }
 0xbd4   : > { %8128 = vmatmul.msk.bf16.vlgmr.msra.gmra.mxu0 %vm7489_vm7, %v7451_v55 }
 0xbd5   : > { %v7390_v21 = vadd.f32 -0.0029546001, %v7386_v17  ;;  %v7441_v50 = vmul.f32 %v8537_v36, %v7433_v63 }
 0xbd7   : > { %v7394_v31 = vmul.f32 %v7390_v21, %v7350_v57  ;;  %v7445_v3 = vadd.f32 1.0, %v7441_v50  ;;  %v8263_v57 = vld [vmem:[%s11249_s23] ss:$0 sm:$0xff] }
 0xbd9   : > { %v7398_v51 = vadd.f32 -0.016096033, %v7394_v31  ;;  %v8539_v0 = vpop.eup %8538  ;;  %v7449_v27 = vmul.f32 %v7445_v3, %v7333_v20 }
 0xbdb   : > { %v7434_v14 = vmul.f32 %v11053_v58, %v7398_v51 }
 0xbdd   : > { %v7442_v40 = vmul.f32 %v8539_v0, %v7434_v14 }
 0xbdf   : > { %v7446_v33 = vadd.f32 1.0, %v7442_v40 }
 0xbe1   : > { %v7450_v16 = vmul.f32 %v7446_v33, %v7334_v9 }
 0xbe3   : > { %v7452_v39 = vpack.c.bf16 %v7450_v16, %v7449_v27 }
 0xbe5   : > { %8129 = vmatmul.msk.bf16.gmra.mxu0 %vm7489_vm7, %v7452_v39 }
 0xc51   : > { %v7505_v52 = vpop.f32.mrf.mxu0 }
 0xc52   : > { %v7506_v19 = vadd.f32 %v8263_v57, %v7505_v52 }
 0xc54   : > { %v7519_v58 = vrot.slane %v7506_v19, 4  ;;  %v7527_v49 = vadd.f32 %v7506_v19, %v10969_v15 }
 0xc56   : > { %v7528_v53 = vadd.f32 %v7519_v58, %v10972_v47  ;;  %7545 = vst [vmem:[#allocation1] ss:$2 sm:$0xff] %v7527_v49 }
 0xc58   : > { %7547 = vst [vmem:[#allocation1 + $0x1] ss:$2 sm:$0xff] %v7528_v53 }
 0xc59   : > { %v7507_v2 = vpop.f32.mrf.mxu0 }
 0xc5a   : > { %v7508_v34 = vadd.f32 %v8263_v57, %v7507_v2 }
 0xc5c   : > { %v7520_v7 = vrot.slane %v7508_v34, 4  ;;  %v7529_v12 = vadd.f32 %v7508_v34, %v10983_v60 }
 0xc5e   : > { %v7530_v44 = vadd.f32 %v7520_v7, %v10986_v30  ;;  %7549 = vst [vmem:[#allocation1 + $0x10] ss:$2 sm:$0xff] %v7529_v12 }
 0xc5f   : > { %v7560_v26 = vld.sshfl [vmem:[#allocation1] sm:$0xff pattern:$0x75316420] }
 0xc60   : > { %7551 = vst [vmem:[#allocation1 + $0x11] ss:$2 sm:$0xff] %v7530_v44  ;;  %v7568_v43 = vsel %vm947_vm0, %v7560_v26, 0.0 }
 0xc61   : > { %7569 = vadd.xlane.f32.xlu2 %v7568_v43 }
 0xc62   : > { %v7510_v45 = vpop.f32.mrf.mxu0 }
 0xc63   : > { %v7511_v5 = vadd.f32 %v8263_v57, %v7510_v45 }
 0xc65   : > { %v7521_v15 = vrot.slane %v7511_v5, 4  ;;  %v7531_v47 = vadd.f32 %v7511_v5, %v10997_v29 }
 0xc67   : > { %v7532_v18 = vadd.f32 %v7521_v15, %v11000_v4  ;;  %7553 = vst [vmem:[#allocation1 + $0x20] ss:$2 sm:$0xff] %v7531_v47  ;;  %v7561_v62 = vld.sshfl [vmem:[#allocation1 + $0x10] sm:$0xff pattern:$0x75316420] }
 0xc68   : > { %v7571_v60 = vsel %vm947_vm0, %v7561_v62, 0.0 }
 0xc69   : > { %7555 = vst [vmem:[#allocation1 + $0x21] ss:$2 sm:$0xff] %v7532_v18  ;;  %7572 = vadd.xlane.f32.xlu1 %v7571_v60 }
 0xc6a   : > { %v7512_v30 = vpop.f32.mrf.mxu0 }
 0xc6b   : > { %v7513_v22 = vadd.f32 %v8263_v57, %v7512_v30 }
 0xc6d   : > { %v7522_v10 = vrot.slane %v7513_v22, 4  ;;  %v7533_v35 = vadd.f32 %v7513_v22, %v11012_v8 }
 0xc6f   : > { %v7534_v1 = vadd.f32 %v7522_v10, %v11015_v59  ;;  %7557 = vst [vmem:[#allocation1 + $0x30] ss:$2 sm:$0xff] %v7533_v35  ;;  %v11154_v10 = vld [vmem:[%s11250_s24] ss:$0 sm:$0xff] }
 0xc70   : > { %v7562_v56 = vld.sshfl [vmem:[#allocation1 + $0x20] sm:$0xff pattern:$0x75316420] }
 0xc71   : > { %7559 = vst [vmem:[#allocation1 + $0x31] ss:$2 sm:$0xff] %v7534_v1  ;;  %v7574_v29 = vsel %vm947_vm0, %v7562_v56, 0.0 }
 0xc72   : > { %7575 = vadd.xlane.f32.xlu0 %v7574_v29  ;;  %v11159_v29 = vld [vmem:[%s11251_s25] ss:$0 sm:$0xff] }
 0xc78   : > { %v7563_v4 = vld.sshfl [vmem:[#allocation1 + $0x30] sm:$0xff pattern:$0x75316420] }
 0xc79   : > { %v7577_v46 = vsel %vm947_vm0, %v7563_v4, 0.0 }
 0xc7a   : > { %7578 = vadd.xlane.f32.xlu2 %v7577_v46 }
 0xcd4   : > { %v7570_v23 = vpop.xlane.xlu2 %7569 }
 0xcd5   : > { %v7580_v38 = vmul.f32 %v7570_v23, %v10875_v13  ;;  %v11162_v23 = vrot.slane %v11154_v10, 4 }
 0xcd7   : > { %v7591_v61 = vperm.slane %v7580_v38, %v10877_v6  ;;  %v7595_v42 = vperm.slane %v7580_v38, %v10879_v48 }
 0xcd9   : > { %v11103_v8 = vsub.f32 %v7527_v49, %v7591_v61  ;;  %v11105_v59 = vsub.f32 %v7528_v53, %v7595_v42 }
 0xcdb   : > { %v7636_v24 = vmul.f32 %v11103_v8, %v11103_v8  ;;  %v7637_v41 = vmul.f32 %v11105_v59, %v11105_v59 }
 0xcdc   : > { %v7573_v28 = vpop.xlane.xlu1 %7572 }
 0xcdd   : > { %7652 = vst [vmem:[#allocation1] ss:$2 sm:$0xff] %v7636_v24  ;;  %v7581_v37 = vmul.f32 %v7573_v28, %v10875_v13 }
 0xcde   : > { %7654 = vst [vmem:[#allocation1 + $0x1] ss:$2 sm:$0xff] %v7637_v41  ;;  %v11167_v41 = vrot.slane %v11159_v29, 4 }
 0xcdf   : > { %v7599_v32 = vperm.slane %v7581_v37, %v10877_v6  ;;  %v7603_v55 = vperm.slane %v7581_v37, %v10879_v48 }
 0xce1   : > { %v11114_v54 = vsub.f32 %v7529_v12, %v7599_v32  ;;  %v11116_v25 = vsub.f32 %v7530_v44, %v7603_v55 }
 0xce3   : > { %v7638_v11 = vmul.f32 %v11114_v54, %v11114_v54  ;;  %v7639_v17 = vmul.f32 %v11116_v25, %v11116_v25 }
 0xce5   : > { %v7576_v63 = vpop.xlane.xlu0 %7575  ;;  %7656 = vst [vmem:[#allocation1 + $0x10] ss:$2 sm:$0xff] %v7638_v11  ;;  %v7667_v21 = vld.sshfl [vmem:[#allocation1] sm:$0xff pattern:$0x75316420] }
 0xce6   : > { %v7582_v31 = vmul.f32 %v7576_v63, %v10875_v13  ;;  %7658 = vst [vmem:[#allocation1 + $0x11] ss:$2 sm:$0xff] %v7639_v17  ;;  %v7675_v36 = vsel %vm947_vm0, %v7667_v21, 0.0 }
 0xce7   : > { %7676 = vadd.xlane.f32.xlu1 %v7675_v36 }
 0xce8   : > { %v7607_v50 = vperm.slane %v7582_v31, %v10877_v6  ;;  %v7611_v51 = vperm.slane %v7582_v31, %v10879_v48 }
 0xcea   : > { %v11126_v14 = vsub.f32 %v7531_v47, %v7607_v50  ;;  %v11128_v0 = vsub.f32 %v7532_v18, %v7611_v51 }
 0xcec   : > { %v7640_v3 = vmul.f32 %v11126_v14, %v11126_v14  ;;  %v7641_v40 = vmul.f32 %v11128_v0, %v11128_v0 }
 0xced   : > { %v7579_v20 = vpop.xlane.xlu2 %7578  ;;  %v7668_v33 = vld.sshfl [vmem:[#allocation1 + $0x10] sm:$0xff pattern:$0x75316420] }
 0xcee   : > { %7660 = vst [vmem:[#allocation1 + $0x20] ss:$2 sm:$0xff] %v7640_v3  ;;  %v7583_v9 = vmul.f32 %v7579_v20, %v10875_v13  ;;  %v7678_v27 = vsel %vm947_vm0, %v7668_v33, 0.0 }
 0xcef   : > { %7662 = vst [vmem:[#allocation1 + $0x21] ss:$2 sm:$0xff] %v7641_v40  ;;  %7679 = vadd.xlane.f32.xlu0 %v7678_v27 }
 0xcf0   : > { %v7615_v16 = vperm.slane %v7583_v9, %v10877_v6  ;;  %v7619_v39 = vperm.slane %v7583_v9, %v10879_v48 }
 0xcf2   : > { %v11138_v57 = vsub.f32 %v7533_v35, %v7615_v16  ;;  %v11140_v52 = vsub.f32 %v7534_v1, %v7619_v39 }
 0xcf4   : > { %v7642_v19 = vmul.f32 %v11138_v57, %v11138_v57  ;;  %v7643_v58 = vmul.f32 %v11140_v52, %v11140_v52 }
 0xcf6   : > { %7664 = vst [vmem:[#allocation1 + $0x30] ss:$2 sm:$0xff] %v7642_v19  ;;  %v7669_v49 = vld.sshfl [vmem:[#allocation1 + $0x20] sm:$0xff pattern:$0x75316420] }
 0xcf7   : > { %7666 = vst [vmem:[#allocation1 + $0x31] ss:$2 sm:$0xff] %v7643_v58  ;;  %v7681_v53 = vsel %vm947_vm0, %v7669_v49, 0.0 }
 0xcf8   : > { %7682 = vadd.xlane.f32.xlu2 %v7681_v53 }
 0xcfe   : > { %v7670_v2 = vld.sshfl [vmem:[#allocation1 + $0x30] sm:$0xff pattern:$0x75316420] }
 0xcff   : > { %v7684_v34 = vsel %vm947_vm0, %v7670_v2, 0.0 }
 0xd00   : > { %7685 = vadd.xlane.f32.xlu1 %v7684_v34 }
 0xd5a   : > { %v7677_v7 = vpop.xlane.xlu1 %7676 }
 0xd5b   : > { %v7687_v12 = vmul.f32 %v7677_v7, %v10875_v13 }
 0xd5d   : > { %v7691_v44 = vadd.f32 1e-05, %v7687_v12 }
 0xd5f   : > { %8540 = vrsqrt.f32 %v7691_v44  ;;  %vm7701_vm8 = vweird.f32 %v7691_v44 }
 0xd62   : > { %v7680_v26 = vpop.xlane.xlu0 %7679 }
 0xd63   : > { %v7688_v43 = vmul.f32 %v7680_v26, %v10875_v13 }
 0xd65   : > { %v8541_v45 = vpop.eup %8540  ;;  %v7692_v5 = vadd.f32 1e-05, %v7688_v43 }
 0xd66   : > { %v7696_v15 = vmul.f32 %v8541_v45, %v7691_v44  ;;  %vm7702_vm0 = vweird.f32 %v8541_v45 }
 0xd67   : > { %8542 = vrsqrt.f32 %v7692_v5  ;;  %vm7703_vm9 = vmor %vm7701_vm8, %vm7702_vm0  ;;  %vm7711_vm12 = vweird.f32 %v7692_v5 }
 0xd68   : > { %v7697_v47 = vmul.f32 %v8541_v45, %v7696_v15 }
 0xd6a   : > { %v7698_v18 = vmul.f32 0.5, %v7697_v47 }
 0xd6b   : > { %v7683_v62 = vpop.xlane.xlu2 %7682 }
 0xd6c   : > { %v7689_v60 = vmul.f32 %v7683_v62, %v10875_v13  ;;  %v7699_v30 = vsub.f32 1.5, %v7698_v18 }
 0xd6d   : > { %v8543_v22 = vpop.eup %8542 }
 0xd6e   : > { %v7693_v35 = vadd.f32 1e-05, %v7689_v60  ;;  %v7700_v1 = vmul.f32 %v8541_v45, %v7699_v30  ;;  %v7706_v56 = vmul.f32 %v8543_v22, %v7692_v5  ;;  %vm7712_vm10 = vweird.f32 %v8543_v22 }
 0xd6f   : > { %vm7713_vm13 = vmor %vm7711_vm12, %vm7712_vm10 }
 0xd70   : > { %8544 = vrsqrt.f32 %v7693_v35  ;;  %v7704_v4 = vsel %vm7703_vm9, %v8541_v45, %v7700_v1  ;;  %v7707_v46 = vmul.f32 %v8543_v22, %v7706_v56  ;;  %vm7721_vm15 = vweird.f32 %v7693_v35 }
 0xd71   : > { %v7742_v38 = vperm.slane %v7704_v4, %v10877_v6  ;;  %v7746_v61 = vperm.slane %v7704_v4, %v10879_v48 }
 0xd72   : > { %v7708_v42 = vmul.f32 0.5, %v7707_v46 }
 0xd73   : > { %v7686_v24 = vpop.xlane.xlu1 %7685  ;;  %v7779_v28 = vmul.f32 %v7742_v38, %v11103_v8  ;;  %v7780_v37 = vmul.f32 %v7746_v61, %v11105_v59 }
 0xd74   : > { %v7690_v32 = vmul.f32 %v7686_v24, %v10875_v13  ;;  %v7709_v55 = vsub.f32 1.5, %v7708_v42 }
 0xd75   : > { %v7792_v17 = vmul.f32 %v11154_v10, %v7779_v28  ;;  %v7793_v63 = vmul.f32 %v11162_v23, %v7780_v37 }
 0xd76   : > { %v8545_v11 = vpop.eup %8544  ;;  %v7694_v21 = vadd.f32 1e-05, %v7690_v32  ;;  %v7710_v8 = vmul.f32 %v8543_v22, %v7709_v55 }
 0xd77   : > { %v7716_v13 = vmul.f32 %v8545_v11, %v7693_v35  ;;  %v7805_v59 = vadd.f32 %v11159_v29, %v7792_v17  ;;  %v7806_v31 = vadd.f32 %v11167_v41, %v7793_v63  ;;  %vm7722_vm14 = vweird.f32 %v8545_v11 }
 0xd78   : > { %8546 = vrsqrt.f32 %v7694_v21  ;;  %v7714_v36 = vsel %vm7713_vm13, %v8543_v22, %v7710_v8  ;;  %vm7723_vm1 = vmor %vm7721_vm15, %vm7722_vm14  ;;  %vm7731_vm3 = vweird.f32 %v7694_v21 }
 0xd79   : > { %v7717_v50 = vmul.f32 %v8545_v11, %v7716_v13  ;;  %7814 = vst.msk [vmem:[%s11179_s29] sm:$0xf] %vm7813_vm11, %v7805_v59  ;;  %v7750_v51 = vperm.slane %v7714_v36, %v10877_v6  ;;  %v7754_v3 = vperm.slane %v7714_v36, %v10879_v48 }
 0xd7a   : > { %7815 = vst.msk [vmem:[%s11179_s29 + $0x4] sm:$0xf] %vm7813_vm11, %v7806_v31 }
 0xd7b   : > { %v7718_v40 = vmul.f32 0.5, %v7717_v50  ;;  %v7781_v20 = vmul.f32 %v7750_v51, %v11114_v54  ;;  %v7782_v9 = vmul.f32 %v7754_v3, %v11116_v25 }
 0xd7d   : > { %v7719_v33 = vsub.f32 1.5, %v7718_v40  ;;  %v7794_v16 = vmul.f32 %v11154_v10, %v7781_v20  ;;  %v7795_v39 = vmul.f32 %v11162_v23, %v7782_v9 }
 0xd7e   : > { %v8547_v27 = vpop.eup %8546 }
 0xd7f   : > { %v7720_v19 = vmul.f32 %v8545_v11, %v7719_v33  ;;  %v7726_v58 = vmul.f32 %v8547_v27, %v7694_v21  ;;  %v7807_v49 = vadd.f32 %v11159_v29, %v7794_v16  ;;  %v7808_v53 = vadd.f32 %v11167_v41, %v7795_v39 }
 0xd80   : > { %vm7732_vm2 = vweird.f32 %v8547_v27 }
 0xd81   : > { %v7724_v2 = vsel %vm7723_vm1, %v8545_v11, %v7720_v19  ;;  %v7727_v54 = vmul.f32 %v8547_v27, %v7726_v58  ;;  %7816 = vst.msk [vmem:[%s11179_s29 + $0x8] sm:$0xf] %vm7813_vm11, %v7807_v49  ;;  %vm7733_vm4 = vmor %vm7731_vm3, %vm7732_vm2 }
 0xd82   : > { %v7758_v25 = vperm.slane %v7724_v2, %v10877_v6  ;;  %v7762_v34 = vperm.slane %v7724_v2, %v10879_v48  ;;  %7817 = vst.msk [vmem:[%s11179_s29 + $0xc] sm:$0xf] %vm7813_vm11, %v7808_v53 }
 0xd83   : > { %v7728_v7 = vmul.f32 0.5, %v7727_v54 }
 0xd84   : > { %v7783_v12 = vmul.f32 %v7758_v25, %v11126_v14  ;;  %v7784_v44 = vmul.f32 %v7762_v34, %v11128_v0 }
 0xd85   : > { %v7729_v26 = vsub.f32 1.5, %v7728_v7 }
 0xd86   : > { %v7796_v43 = vmul.f32 %v11154_v10, %v7783_v12  ;;  %v7797_v45 = vmul.f32 %v11162_v23, %v7784_v44 }
 0xd87   : > { %v7730_v5 = vmul.f32 %v8547_v27, %v7729_v26 }
 0xd88   : > { %v7809_v15 = vadd.f32 %v11159_v29, %v7796_v43  ;;  %v7810_v47 = vadd.f32 %v11167_v41, %v7797_v45 }
 0xd89   : > { %v7734_v18 = vsel %vm7733_vm4, %v8547_v27, %v7730_v5 }
 0xd8a   : > { %7818 = vst.msk [vmem:[%s11179_s29 + $0x10] sm:$0xf] %vm7813_vm11, %v7809_v15  ;;  %v7766_v14 = vperm.slane %v7734_v18, %v10877_v6  ;;  %v7770_v0 = vperm.slane %v7734_v18, %v10879_v48 }
 0xd8b   : > { %7819 = vst.msk [vmem:[%s11179_s29 + $0x14] sm:$0xf] %vm7813_vm11, %v7810_v47 }
 0xd8c   : > { %v7785_v62 = vmul.f32 %v7766_v14, %v11138_v57  ;;  %v7786_v60 = vmul.f32 %v7770_v0, %v11140_v52 }
 0xd8e   : > { %v7798_v30 = vmul.f32 %v11154_v10, %v7785_v62  ;;  %v7799_v22 = vmul.f32 %v11162_v23, %v7786_v60 }
 0xd90   : > { %v7811_v35 = vadd.f32 %v11159_v29, %v7798_v30  ;;  %v7812_v1 = vadd.f32 %v11167_v41, %v7799_v22 }
 0xd92   : > { %7820 = vst.msk [vmem:[%s11179_s29 + $0x18] sm:$0xf] %vm7813_vm11, %v7811_v35 }
 0xd93   : > { %7821 = vst.msk [vmem:[%s11179_s29 + $0x1c] sm:$0xf] %vm7813_vm11, %v7812_v1 }
 0xd94 PF: > { %s36_s27 = sadd.s32 1, %s8554_s27  }
 0xd95   : > { %p33_p4 = scmp.ge.s32.totalorder %s36_s27, 4  }
 0xd97   :  { %35 = sbr.rel (!%p33_p4) target bundleno = 12 (0xc), region = 229 }

</bundles_post_ra>
